<compile_context>
chip_gen: v6e
topology: v6e:2x2x1
jax: 0.10.0
libtpu: 0.0.40
codegen_flags: <defaults>
</compile_context>

<pallas_src>
import numpy as np
import jax
import jax.numpy as jnp
from jax.experimental import pallas as pl
from jax.experimental.pallas import tpu as pltpu

BN_EPS = 1e-5

# ----------------------------- static geometry ------------------------------
C1, C2 = 32, 64        # conv channel counts
WP1 = 32               # row width of the flat padded 28x28 image (30x32 pad)
S1 = 28 * WP1          # 896 over-wide conv1 output positions per image
P1 = 256               # lane-padded width of the pooled-1 activation (>=198)
WP2 = 14               # row width of the pooled-1 / conv2 flat layout
S2 = 12 * WP2          # 168 over-wide conv2 output positions
NPOOL2 = 36            # 6*6 pooled-2 positions
K1 = S1 - 1 - WP1      # 863: rows of the pool-1 selection matmul
K2 = S2 - 1 - WP2      # 153: rows of the pool-2 selection matmul
NCLS = 10
NPAD = 128             # FC output lanes padded to a full lane tile
XFLAT = 1024           # flat padded image length (30*32 = 960, padded to 1024)


def _pool_selector(n_rows, row_w, pooled_hw, n_cols):
    """0/1 matrix S so that (pairwise-maxed rows) @ S gathers the 2x2-pooled
    grid: column q = io*pooled_hw + jo picks row r = 2*io*row_w + 2*jo."""
    s = np.zeros((n_rows, n_cols), np.float32)
    for q in range(pooled_hw * pooled_hw):
        io, jo = divmod(q, pooled_hw)
        s[2 * io * row_w + 2 * jo, q] = 1.0
    return s


# ------------------------------ Pallas kernels -------------------------------

def conv_stack_kernel(x_ref, w1_ref, s1_ref, t1_ref, sel1_ref,
                      w2_ref, s2_ref, t2_ref, sel2_ref, o_ref):
    """Per-image: conv1+BN+ReLU+pool -> conv2+BN+ReLU+pool, all in VMEM."""
    x = x_ref[0]                                   # [1, XFLAT] flat padded img
    w1 = w1_ref[...]                               # [C1, 9]

    # conv1 (1->32, 3x3, pad=1): 9 shifted VPU multiply-adds (no im2col/MXU).
    acc1 = jnp.zeros((C1, S1), jnp.float32)
    for t in range(9):
        off = (t // 3) * WP1 + (t % 3)
        acc1 = acc1 + w1[:, t:t + 1] * x[:, off:off + S1]
    a1 = jnp.maximum(acc1 * s1_ref[...] + t1_ref[...], 0.0)          # BN+ReLU

    # fused 2x2 max-pool: pairwise max of shifted slices + selection matmul.
    mw = jnp.maximum(a1[:, :-1], a1[:, 1:])
    mhw = jnp.maximum(mw[:, :-WP1], mw[:, WP1:])                     # [C1, K1]
    p1 = jnp.dot(mhw, sel1_ref[...],
                 preferred_element_type=jnp.float32)                 # [C1, P1]

    # conv2 (32->64, 3x3, valid): in-register im2col (9 shifted slices stacked
    # along sublanes -> [9*C1, S2]) feeding ONE K=288 MXU matmul.
    taps = [(t // 3) * WP2 + (t % 3) for t in range(9)]
    cols = jnp.concatenate([p1[:, o:o + S2] for o in taps], axis=0)  # [288,S2]
    acc2 = jnp.dot(w2_ref[...], cols,
                   preferred_element_type=jnp.float32)               # [C2, S2]
    a2 = jnp.maximum(acc2 * s2_ref[...] + t2_ref[...], 0.0)          # BN+ReLU

    # fused 2x2 max-pool.
    mw2 = jnp.maximum(a2[:, :-1], a2[:, 1:])
    mhw2 = jnp.maximum(mw2[:, :-WP2], mw2[:, WP2:])                  # [C2, K2]
    o_ref[0] = jnp.dot(mhw2, sel2_ref[...],
                       preferred_element_type=jnp.float32)           # [C2, 36]


def fc_logsoftmax_kernel(x_ref, w_ref, b_ref, o_ref):
    # lane-dense [TB, 2304] @ [2304, 128] matmul; softmax over the 10 real cols
    logits = jnp.dot(x_ref[...], w_ref[...],
                     preferred_element_type=jnp.float32) + b_ref[...]
    l = logits[:, :NCLS]
    m = jnp.max(l, axis=-1, keepdims=True)
    z = l - m
    lse = jnp.log(jnp.sum(jnp.exp(z), axis=-1, keepdims=True))
    o_ref[...] = z - lse


# -------------------------------- wrappers -----------------------------------

def conv_stack(xflat, kp):
    B = xflat.shape[0]
    c2 = lambda b: (0, 0)
    return pl.pallas_call(
        conv_stack_kernel,
        out_shape=jax.ShapeDtypeStruct((B, C2, NPOOL2), jnp.float32),
        grid=(B,),
        in_specs=[
            pl.BlockSpec((1, 1, XFLAT), lambda b: (b, 0, 0)),   # image
            pl.BlockSpec((C1, 9), c2),                          # conv1 weight
            pl.BlockSpec((C1, 1), c2),                          # bn1 scale
            pl.BlockSpec((C1, 1), c2),                          # bn1 shift
            pl.BlockSpec((K1, P1), c2),                         # pool1 selector
            pl.BlockSpec((C2, 9 * C1), c2),                     # conv2 weight
            pl.BlockSpec((C2, 1), c2),                          # bn2 scale
            pl.BlockSpec((C2, 1), c2),                          # bn2 shift
            pl.BlockSpec((K2, NPOOL2), c2),                     # pool2 selector
        ],
        out_specs=pl.BlockSpec((1, C2, NPOOL2), lambda b: (b, 0, 0)),
        compiler_params=pltpu.CompilerParams(
            dimension_semantics=("parallel",)),
    )(xflat, kp["w1"], kp["s1"], kp["t1"], kp["sel1"],
      kp["w2"], kp["s2"], kp["t2"], kp["sel2"])


def fc_logsoftmax(flat, wf, bf):
    B, K = flat.shape
    TB = min(B, 128)
    return pl.pallas_call(
        fc_logsoftmax_kernel,
        out_shape=jax.ShapeDtypeStruct((B, NCLS), jnp.float32),
        grid=(pl.cdiv(B, TB),),
        in_specs=[
            pl.BlockSpec((TB, K), lambda i: (i, 0)),
            pl.BlockSpec((K, NPAD), lambda i: (0, 0)),
            pl.BlockSpec((1, NPAD), lambda i: (0, 0)),
        ],
        out_specs=pl.BlockSpec((TB, NCLS), lambda i: (i, 0)),
        compiler_params=pltpu.CompilerParams(
            dimension_semantics=("parallel",)),
    )(flat, wf, bf)


@jax.jit
def cnn_forward(x_nchw, kp):
    B = x_nchw.shape[0]
    x = x_nchw.reshape(B, 28, 28)                       # Cin == 1
    xp = jnp.pad(x, ((0, 0), (1, 1), (1, 3)))           # [B, 30, 32]
    xflat = jnp.pad(xp.reshape(B, 1, 30 * 32),
                    ((0, 0), (0, 0), (0, XFLAT - 30 * 32)))   # [B, 1, 1024]
    y2 = conv_stack(xflat, kp)                          # [B, 64, 36] (NCHW-ish)
    flat = y2.reshape(B, C2 * NPOOL2)                   # == torch view(-1,2304)
    return fc_logsoftmax(flat, kp["wf"], kp["bf"])      # [B, 10]


# ------------------------------- parameters ----------------------------------

def fold_bn(bias, gamma, beta, mean, var):
    """Eval-mode BatchNorm(conv + bias) folded into per-channel scale/shift."""
    scale = gamma / jnp.sqrt(var + BN_EPS)
    shift = beta + scale * (bias - mean)
    return scale.reshape(-1, 1), shift.reshape(-1, 1)


def make_params():
    """Random parameters in PyTorch layouts (w: [Cout,Cin,kh,kw], fc: [out,in])."""
    ks = jax.random.split(jax.random.PRNGKey(42), 14)
    p = {}
    p["w1"] = jax.random.normal(ks[0], (C1, 1, 3, 3), jnp.float32) * 0.2
    p["b1"] = jax.random.normal(ks[1], (C1,), jnp.float32) * 0.05
    p["g1"] = 0.5 + jax.random.uniform(ks[2], (C1,), jnp.float32)
    p["be1"] = jax.random.normal(ks[3], (C1,), jnp.float32) * 0.05
    p["m1"] = jax.random.normal(ks[4], (C1,), jnp.float32) * 0.05
    p["v1"] = 0.5 + jax.random.uniform(ks[5], (C1,), jnp.float32)
    p["w2"] = jax.random.normal(ks[6], (C2, C1, 3, 3), jnp.float32) * 0.05
    p["b2"] = jax.random.normal(ks[7], (C2,), jnp.float32) * 0.05
    p["g2"] = 0.5 + jax.random.uniform(ks[8], (C2,), jnp.float32)
    p["be2"] = jax.random.normal(ks[9], (C2,), jnp.float32) * 0.05
    p["m2"] = jax.random.normal(ks[10], (C2,), jnp.float32) * 0.05
    p["v2"] = 0.5 + jax.random.uniform(ks[11], (C2,), jnp.float32)
    p["wf"] = jax.random.normal(ks[12], (NCLS, C2 * NPOOL2), jnp.float32) * 0.02
    p["bf"] = jax.random.normal(ks[13], (NCLS,), jnp.float32) * 0.02
    return p


def prepare_params(p):
    """Rearrange PyTorch-layout params into the kernel layouts (done once)."""
    kp = {}
    kp["w1"] = p["w1"].reshape(C1, 9)                              # [Cout, tap]
    kp["s1"], kp["t1"] = fold_bn(p["b1"], p["g1"], p["be1"], p["m1"], p["v1"])
    # conv2 weight as [Cout, tap*Cin] matching the kernel's im2col row order
    # (rows stacked tap-major, Cin-minor): w2m[co, t*C1 + ci] = w2[co, ci, di, dj].
    kp["w2"] = jnp.transpose(p["w2"], (0, 2, 3, 1)).reshape(C2, 9 * C1)
    kp["s2"], kp["t2"] = fold_bn(p["b2"], p["g2"], p["be2"], p["m2"], p["v2"])
    # [C, H*W] kernel layout flattens exactly in NCHW order -> plain transpose,
    # zero-padded to 128 output lanes (softmax only uses the first 10).
    kp["wf"] = jnp.pad(p["wf"].T, ((0, 0), (0, NPAD - NCLS)))      # [2304, 128]
    kp["bf"] = jnp.pad(p["bf"], (0, NPAD - NCLS)).reshape(1, NPAD)
    kp["sel1"] = jnp.asarray(_pool_selector(K1, WP1, 14, P1))      # [863, 256]
    kp["sel2"] = jnp.asarray(_pool_selector(K2, WP2, 6, NPOOL2))   # [153, 36]
    return kp


# ------------------------- pure-JAX reference (check) -------------------------

@jax.jit
def reference_forward(x_nchw, p):
    hi = jax.lax.Precision.HIGHEST
    x = jnp.transpose(x_nchw, (0, 2, 3, 1))

    def conv(y, w, pad):
        return jax.lax.conv_general_dilated(
            y, jnp.transpose(w, (2, 3, 1, 0)), (1, 1),
            [(pad, pad), (pad, pad)],
            dimension_numbers=("NHWC", "HWIO", "NHWC"), precision=hi)

    def bn_relu(y, b, g, be, m, v):
        s = g / jnp.sqrt(v + BN_EPS)
        return jnp.maximum((y + b - m) * s + be, 0.0)

    def pool(y):
        return jax.lax.reduce_window(y, -jnp.inf, jax.lax.max,
                                     (1, 2, 2, 1), (1, 2, 2, 1), "VALID")

    y = pool(bn_relu(conv(x, p["w1"], 1),
                     p["b1"], p["g1"], p["be1"], p["m1"], p["v1"]))
    y = pool(bn_relu(conv(y, p["w2"], 0),
                     p["b2"], p["g2"], p["be2"], p["m2"], p["v2"]))
    flat = jnp.transpose(y, (0, 3, 1, 2)).reshape(x.shape[0], -1)
    logits = jnp.dot(flat, p["wf"].T, precision=hi) + p["bf"]
    return jax.nn.log_softmax(logits, axis=-1)


# ----------------------------------- main -------------------------------------

if __name__ == "__main__":
    torch_params = make_params()
    kparams = prepare_params(torch_params)

    x = jax.random.normal(jax.random.PRNGKey(0), (2, 1, 28, 28), jnp.float32)
    out = jax.block_until_ready(cnn_forward(x, kparams))

    assert out.shape == (2, NCLS)
    assert bool(jnp.all(jnp.isfinite(out)))
    prob_sum = jnp.sum(jnp.exp(out), axis=-1)
    assert bool(jnp.all(jnp.abs(prob_sum - 1.0) < 1e-4))

    ref = reference_forward(x, torch_params)
    err = float(jnp.max(jnp.abs(out - ref)))
    assert err < 2e-2, f"mismatch vs pure-JAX reference: {err}"

    print("KERNEL_OK")
</pallas_src>

<mosaic_0001>
module attributes {stable_mosaic.version = 11 : i64} {
  func.func @fc_logsoftmax_kernel(%arg0: i32, %arg1: memref<2x2304xf32, #tpu.memory_space<vmem>>, %arg2: memref<2304x128xf32, #tpu.memory_space<vmem>>, %arg3: memref<1x128xf32, #tpu.memory_space<vmem>>, %arg4: memref<2x10xf32, #tpu.memory_space<vmem>>) attributes {dimension_semantics = [#tpu.dimension_semantics<parallel>], iteration_bounds = array<i64: 1>, scalar_prefetch = 0 : i64, scratch_operands = 0 : i64, tpu.core_type = #tpu.core_type<tc>, window_params = [{transform_indices = @transform_0, window_bounds = array<i64: 2, 2304>}, {pipeline_mode = #tpu.pipeline_mode<synchronous>, transform_indices = @transform_1, window_bounds = array<i64: 2304, 128>}, {pipeline_mode = #tpu.pipeline_mode<synchronous>, transform_indices = @transform_2, window_bounds = array<i64: 1, 128>}, {transform_indices = @transform_3, window_bounds = array<i64: 2, 10>}]} {
    %c0 = arith.constant 0 : index
    %c0_0 = arith.constant 0 : index
    %0 = vector.load %arg1[%c0, %c0_0] : memref<2x2304xf32, #tpu.memory_space<vmem>>, vector<2x2304xf32>
    %c0_1 = arith.constant 0 : index
    %c0_2 = arith.constant 0 : index
    %1 = vector.load %arg2[%c0_1, %c0_2] : memref<2304x128xf32, #tpu.memory_space<vmem>>, vector<2304x128xf32>
    %cst = arith.constant dense<0.000000e+00> : vector<2x128xf32>
    %2 = tpu.matmul %0, %1, %cst {dimension_numbers = #tpu.dot_dimension_numbers<[1], [0], [0], [1], [0, 0, 1, 1], [], []>} : vector<2x2304xf32>, vector<2304x128xf32>, vector<2x128xf32> -> vector<2x128xf32>
    %c0_3 = arith.constant 0 : index
    %c0_4 = arith.constant 0 : index
    %3 = vector.load %arg3[%c0_3, %c0_4] : memref<1x128xf32, #tpu.memory_space<vmem>>, vector<1x128xf32>
    %4 = vector.broadcast %3 : vector<1x128xf32> to vector<2x128xf32>
    %5 = arith.addf %2, %4 : vector<2x128xf32>
    %6 = vector.extract_strided_slice %5 {offsets = [0, 0], sizes = [2, 10], strides = [1, 1]} : vector<2x128xf32> to vector<2x10xf32>
    %cst_5 = arith.constant dense<0xFF800000> : vector<2xf32>
    %7 = vector.multi_reduction <maximumf>, %6, %cst_5 [1] : vector<2x10xf32> to vector<2xf32>
    %8 = vector.shape_cast %7 : vector<2xf32> to vector<2x1xf32>
    %9 = vector.broadcast %8 : vector<2x1xf32> to vector<2x10xf32>
    %10 = arith.subf %6, %9 : vector<2x10xf32>
    %11 = math.exp %10 : vector<2x10xf32>
    %cst_6 = arith.constant dense<0.000000e+00> : vector<2xf32>
    %12 = vector.multi_reduction <add>, %11, %cst_6 [1] : vector<2x10xf32> to vector<2xf32>
    %13 = vector.shape_cast %12 : vector<2xf32> to vector<2x1xf32>
    %14 = math.log %13 : vector<2x1xf32>
    %15 = vector.broadcast %14 : vector<2x1xf32> to vector<2x10xf32>
    %16 = arith.subf %10, %15 : vector<2x10xf32>
    %c0_7 = arith.constant 0 : index
    %c0_8 = arith.constant 0 : index
    %17 = vector.load %arg4[%c0_7, %c0_8] : memref<2x10xf32, #tpu.memory_space<vmem>>, vector<2x10xf32>
    tpu.vector_store %arg4[%c0_7, %c0_8], %16 {strides = array<i32>} : memref<2x10xf32, #tpu.memory_space<vmem>>, vector<2x10xf32>,
    return
  }
  func.func @transform_0(%arg0: i32) -> (i32, i32) {
    %c0_i32 = arith.constant 0 : i32
    %c0_i32_0 = arith.constant 0 : i32
    return %arg0, %c0_i32 : i32, i32
  }
  func.func @transform_1(%arg0: i32) -> (i32, i32) {
    %c0_i32 = arith.constant 0 : i32
    %c0_i32_0 = arith.constant 0 : i32
    %c0_i32_1 = arith.constant 0 : i32
    return %c0_i32, %c0_i32_0 : i32, i32
  }
  func.func @transform_2(%arg0: i32) -> (i32, i32) {
    %c0_i32 = arith.constant 0 : i32
    %c0_i32_0 = arith.constant 0 : i32
    %c0_i32_1 = arith.constant 0 : i32
    return %c0_i32, %c0_i32_0 : i32, i32
  }
  func.func @transform_3(%arg0: i32) -> (i32, i32) {
    %c0_i32 = arith.constant 0 : i32
    %c0_i32_0 = arith.constant 0 : i32
    return %arg0, %c0_i32 : i32, i32
  }
}

module attributes {stable_mosaic.version = 11 : i64} {
  func.func @conv_stack_kernel(%arg0: i32, %arg1: memref<1x1x1024xf32, #tpu.memory_space<vmem>>, %arg2: memref<32x9xf32, #tpu.memory_space<vmem>>, %arg3: memref<32x1xf32, #tpu.memory_space<vmem>>, %arg4: memref<32x1xf32, #tpu.memory_space<vmem>>, %arg5: memref<863x256xf32, #tpu.memory_space<vmem>>, %arg6: memref<64x288xf32, #tpu.memory_space<vmem>>, %arg7: memref<64x1xf32, #tpu.memory_space<vmem>>, %arg8: memref<64x1xf32, #tpu.memory_space<vmem>>, %arg9: memref<153x36xf32, #tpu.memory_space<vmem>>, %arg10: memref<1x64x36xf32, #tpu.memory_space<vmem>>) attributes {dimension_semantics = [#tpu.dimension_semantics<parallel>], iteration_bounds = array<i64: 2>, scalar_prefetch = 0 : i64, scratch_operands = 0 : i64, tpu.core_type = #tpu.core_type<tc>, window_params = [{transform_indices = @transform_0, window_bounds = array<i64: 1, 1, 1024>}, {pipeline_mode = #tpu.pipeline_mode<synchronous>, transform_indices = @transform_1, window_bounds = array<i64: 32, 9>}, {pipeline_mode = #tpu.pipeline_mode<synchronous>, transform_indices = @transform_2, window_bounds = array<i64: 32, 1>}, {pipeline_mode = #tpu.pipeline_mode<synchronous>, transform_indices = @transform_3, window_bounds = array<i64: 32, 1>}, {pipeline_mode = #tpu.pipeline_mode<synchronous>, transform_indices = @transform_4, window_bounds = array<i64: 863, 256>}, {pipeline_mode = #tpu.pipeline_mode<synchronous>, transform_indices = @transform_5, window_bounds = array<i64: 64, 288>}, {pipeline_mode = #tpu.pipeline_mode<synchronous>, transform_indices = @transform_6, window_bounds = array<i64: 64, 1>}, {pipeline_mode = #tpu.pipeline_mode<synchronous>, transform_indices = @transform_7, window_bounds = array<i64: 64, 1>}, {pipeline_mode = #tpu.pipeline_mode<synchronous>, transform_indices = @transform_8, window_bounds = array<i64: 153, 36>}, {transform_indices = @transform_9, window_bounds = array<i64: 1, 64, 36>}]} {
    %c0 = arith.constant 0 : index
    %c0_0 = arith.constant 0 : index
    %c0_1 = arith.constant 0 : index
    %0 = vector.load %arg1[%c0, %c0_0, %c0_1] : memref<1x1x1024xf32, #tpu.memory_space<vmem>>, vector<1x1x1024xf32>
    %1 = vector.shape_cast %0 : vector<1x1x1024xf32> to vector<1x1024xf32>
    %c0_2 = arith.constant 0 : index
    %c0_3 = arith.constant 0 : index
    %2 = vector.load %arg2[%c0_2, %c0_3] : memref<32x9xf32, #tpu.memory_space<vmem>>, vector<32x9xf32>
    %cst = arith.constant 0.000000e+00 : f32
    %3 = vector.broadcast %cst : f32 to vector<32x896xf32>
    %4 = vector.extract_strided_slice %2 {offsets = [0, 0], sizes = [32, 1], strides = [1, 1]} : vector<32x9xf32> to vector<32x1xf32>
    %5 = vector.extract_strided_slice %1 {offsets = [0, 0], sizes = [1, 896], strides = [1, 1]} : vector<1x1024xf32> to vector<1x896xf32>
    %6 = vector.broadcast %4 : vector<32x1xf32> to vector<32x896xf32>
    %7 = vector.broadcast %5 : vector<1x896xf32> to vector<32x896xf32>
    %8 = arith.mulf %6, %7 : vector<32x896xf32>
    %9 = arith.addf %3, %8 : vector<32x896xf32>
    %10 = vector.extract_strided_slice %2 {offsets = [0, 1], sizes = [32, 1], strides = [1, 1]} : vector<32x9xf32> to vector<32x1xf32>
    %11 = vector.extract_strided_slice %1 {offsets = [0, 1], sizes = [1, 896], strides = [1, 1]} : vector<1x1024xf32> to vector<1x896xf32>
    %12 = vector.broadcast %10 : vector<32x1xf32> to vector<32x896xf32>
    %13 = vector.broadcast %11 : vector<1x896xf32> to vector<32x896xf32>
    %14 = arith.mulf %12, %13 : vector<32x896xf32>
    %15 = arith.addf %9, %14 : vector<32x896xf32>
    %16 = vector.extract_strided_slice %2 {offsets = [0, 2], sizes = [32, 1], strides = [1, 1]} : vector<32x9xf32> to vector<32x1xf32>
    %17 = vector.extract_strided_slice %1 {offsets = [0, 2], sizes = [1, 896], strides = [1, 1]} : vector<1x1024xf32> to vector<1x896xf32>
    %18 = vector.broadcast %16 : vector<32x1xf32> to vector<32x896xf32>
    %19 = vector.broadcast %17 : vector<1x896xf32> to vector<32x896xf32>
    %20 = arith.mulf %18, %19 : vector<32x896xf32>
    %21 = arith.addf %15, %20 : vector<32x896xf32>
    %22 = vector.extract_strided_slice %2 {offsets = [0, 3], sizes = [32, 1], strides = [1, 1]} : vector<32x9xf32> to vector<32x1xf32>
    %23 = vector.extract_strided_slice %1 {offsets = [0, 32], sizes = [1, 896], strides = [1, 1]} : vector<1x1024xf32> to vector<1x896xf32>
    %24 = vector.broadcast %22 : vector<32x1xf32> to vector<32x896xf32>
    %25 = vector.broadcast %23 : vector<1x896xf32> to vector<32x896xf32>
    %26 = arith.mulf %24, %25 : vector<32x896xf32>
    %27 = arith.addf %21, %26 : vector<32x896xf32>
    %28 = vector.extract_strided_slice %2 {offsets = [0, 4], sizes = [32, 1], strides = [1, 1]} : vector<32x9xf32> to vector<32x1xf32>
    %29 = vector.extract_strided_slice %1 {offsets = [0, 33], sizes = [1, 896], strides = [1, 1]} : vector<1x1024xf32> to vector<1x896xf32>
    %30 = vector.broadcast %28 : vector<32x1xf32> to vector<32x896xf32>
    %31 = vector.broadcast %29 : vector<1x896xf32> to vector<32x896xf32>
    %32 = arith.mulf %30, %31 : vector<32x896xf32>
    %33 = arith.addf %27, %32 : vector<32x896xf32>
    %34 = vector.extract_strided_slice %2 {offsets = [0, 5], sizes = [32, 1], strides = [1, 1]} : vector<32x9xf32> to vector<32x1xf32>
    %35 = vector.extract_strided_slice %1 {offsets = [0, 34], sizes = [1, 896], strides = [1, 1]} : vector<1x1024xf32> to vector<1x896xf32>
    %36 = vector.broadcast %34 : vector<32x1xf32> to vector<32x896xf32>
    %37 = vector.broadcast %35 : vector<1x896xf32> to vector<32x896xf32>
    %38 = arith.mulf %36, %37 : vector<32x896xf32>
    %39 = arith.addf %33, %38 : vector<32x896xf32>
    %40 = vector.extract_strided_slice %2 {offsets = [0, 6], sizes = [32, 1], strides = [1, 1]} : vector<32x9xf32> to vector<32x1xf32>
    %41 = vector.extract_strided_slice %1 {offsets = [0, 64], sizes = [1, 896], strides = [1, 1]} : vector<1x1024xf32> to vector<1x896xf32>
    %42 = vector.broadcast %40 : vector<32x1xf32> to vector<32x896xf32>
    %43 = vector.broadcast %41 : vector<1x896xf32> to vector<32x896xf32>
    %44 = arith.mulf %42, %43 : vector<32x896xf32>
    %45 = arith.addf %39, %44 : vector<32x896xf32>
    %46 = vector.extract_strided_slice %2 {offsets = [0, 7], sizes = [32, 1], strides = [1, 1]} : vector<32x9xf32> to vector<32x1xf32>
    %47 = vector.extract_strided_slice %1 {offsets = [0, 65], sizes = [1, 896], strides = [1, 1]} : vector<1x1024xf32> to vector<1x896xf32>
    %48 = vector.broadcast %46 : vector<32x1xf32> to vector<32x896xf32>
    %49 = vector.broadcast %47 : vector<1x896xf32> to vector<32x896xf32>
    %50 = arith.mulf %48, %49 : vector<32x896xf32>
    %51 = arith.addf %45, %50 : vector<32x896xf32>
    %52 = vector.extract_strided_slice %2 {offsets = [0, 8], sizes = [32, 1], strides = [1, 1]} : vector<32x9xf32> to vector<32x1xf32>
    %53 = vector.extract_strided_slice %1 {offsets = [0, 66], sizes = [1, 896], strides = [1, 1]} : vector<1x1024xf32> to vector<1x896xf32>
    %54 = vector.broadcast %52 : vector<32x1xf32> to vector<32x896xf32>
    %55 = vector.broadcast %53 : vector<1x896xf32> to vector<32x896xf32>
    %56 = arith.mulf %54, %55 : vector<32x896xf32>
    %57 = arith.addf %51, %56 : vector<32x896xf32>
    %c0_4 = arith.constant 0 : index
    %c0_5 = arith.constant 0 : index
    %58 = vector.load %arg3[%c0_4, %c0_5] : memref<32x1xf32, #tpu.memory_space<vmem>>, vector<32x1xf32>
    %59 = vector.broadcast %58 : vector<32x1xf32> to vector<32x896xf32>
    %60 = arith.mulf %57, %59 : vector<32x896xf32>
    %c0_6 = arith.constant 0 : index
    %c0_7 = arith.constant 0 : index
    %61 = vector.load %arg4[%c0_6, %c0_7] : memref<32x1xf32, #tpu.memory_space<vmem>>, vector<32x1xf32>
    %62 = vector.broadcast %61 : vector<32x1xf32> to vector<32x896xf32>
    %63 = arith.addf %60, %62 : vector<32x896xf32>
    %cst_8 = arith.constant 0.000000e+00 : f32
    %64 = vector.broadcast %cst_8 : f32 to vector<32x896xf32>
    %65 = arith.maximumf %63, %64 : vector<32x896xf32>
    %66 = vector.extract_strided_slice %65 {offsets = [0, 0], sizes = [32, 895], strides = [1, 1]} : vector<32x896xf32> to vector<32x895xf32>
    %67 = vector.extract_strided_slice %65 {offsets = [0, 1], sizes = [32, 895], strides = [1, 1]} : vector<32x896xf32> to vector<32x895xf32>
    %68 = arith.maximumf %66, %67 : vector<32x895xf32>
    %69 = vector.extract_strided_slice %68 {offsets = [0, 0], sizes = [32, 863], strides = [1, 1]} : vector<32x895xf32> to vector<32x863xf32>
    %70 = vector.extract_strided_slice %68 {offsets = [0, 32], sizes = [32, 863], strides = [1, 1]} : vector<32x895xf32> to vector<32x863xf32>
    %71 = arith.maximumf %69, %70 : vector<32x863xf32>
    %c0_9 = arith.constant 0 : index
    %c0_10 = arith.constant 0 : index
    %72 = vector.load %arg5[%c0_9, %c0_10] : memref<863x256xf32, #tpu.memory_space<vmem>>, vector<863x256xf32>
    %cst_11 = arith.constant dense<0.000000e+00> : vector<32x256xf32>
    %73 = tpu.matmul %71, %72, %cst_11 {dimension_numbers = #tpu.dot_dimension_numbers<[1], [0], [0], [1], [0, 0, 1, 1], [], []>} : vector<32x863xf32>, vector<863x256xf32>, vector<32x256xf32> -> vector<32x256xf32>
    %74 = vector.extract_strided_slice %73 {offsets = [0, 0], sizes = [32, 168], strides = [1, 1]} : vector<32x256xf32> to vector<32x168xf32>
    %75 = vector.extract_strided_slice %73 {offsets = [0, 1], sizes = [32, 168], strides = [1, 1]} : vector<32x256xf32> to vector<32x168xf32>
    %76 = vector.extract_strided_slice %73 {offsets = [0, 2], sizes = [32, 168], strides = [1, 1]} : vector<32x256xf32> to vector<32x168xf32>
    %77 = vector.extract_strided_slice %73 {offsets = [0, 14], sizes = [32, 168], strides = [1, 1]} : vector<32x256xf32> to vector<32x168xf32>
    %78 = vector.extract_strided_slice %73 {offsets = [0, 15], sizes = [32, 168], strides = [1, 1]} : vector<32x256xf32> to vector<32x168xf32>
    %79 = vector.extract_strided_slice %73 {offsets = [0, 16], sizes = [32, 168], strides = [1, 1]} : vector<32x256xf32> to vector<32x168xf32>
    %80 = vector.extract_strided_slice %73 {offsets = [0, 28], sizes = [32, 168], strides = [1, 1]} : vector<32x256xf32> to vector<32x168xf32>
    %81 = vector.extract_strided_slice %73 {offsets = [0, 29], sizes = [32, 168], strides = [1, 1]} : vector<32x256xf32> to vector<32x168xf32>
    %82 = vector.extract_strided_slice %73 {offsets = [0, 30], sizes = [32, 168], strides = [1, 1]} : vector<32x256xf32> to vector<32x168xf32>
    %83 = tpu.concatenate %74, %75, %76, %77, %78, %79, %80, %81, %82 in 0 : vector<32x168xf32>, vector<32x168xf32>, vector<32x168xf32>, vector<32x168xf32>, vector<32x168xf32>, vector<32x168xf32>, vector<32x168xf32>, vector<32x168xf32>, vector<32x168xf32> -> vector<288x168xf32>
    %c0_12 = arith.constant 0 : index
    %c0_13 = arith.constant 0 : index
    %84 = vector.load %arg6[%c0_12, %c0_13] : memref<64x288xf32, #tpu.memory_space<vmem>>, vector<64x288xf32>
    %cst_14 = arith.constant dense<0.000000e+00> : vector<64x168xf32>
    %85 = tpu.matmul %84, %83, %cst_14 {dimension_numbers = #tpu.dot_dimension_numbers<[1], [0], [0], [1], [0, 0, 1, 1], [], []>} : vector<64x288xf32>, vector<288x168xf32>, vector<64x168xf32> -> vector<64x168xf32>
    %c0_15 = arith.constant 0 : index
    %c0_16 = arith.constant 0 : index
    %86 = vector.load %arg7[%c0_15, %c0_16] : memref<64x1xf32, #tpu.memory_space<vmem>>, vector<64x1xf32>
    %87 = vector.broadcast %86 : vector<64x1xf32> to vector<64x168xf32>
    %88 = arith.mulf %85, %87 : vector<64x168xf32>
    %c0_17 = arith.constant 0 : index
    %c0_18 = arith.constant 0 : index
    %89 = vector.load %arg8[%c0_17, %c0_18] : memref<64x1xf32, #tpu.memory_space<vmem>>, vector<64x1xf32>
    %90 = vector.broadcast %89 : vector<64x1xf32> to vector<64x168xf32>
    %91 = arith.addf %88, %90 : vector<64x168xf32>
    %cst_19 = arith.constant 0.000000e+00 : f32
    %92 = vector.broadcast %cst_19 : f32 to vector<64x168xf32>
    %93 = arith.maximumf %91, %92 : vector<64x168xf32>
    %94 = vector.extract_strided_slice %93 {offsets = [0, 0], sizes = [64, 167], strides = [1, 1]} : vector<64x168xf32> to vector<64x167xf32>
    %95 = vector.extract_strided_slice %93 {offsets = [0, 1], sizes = [64, 167], strides = [1, 1]} : vector<64x168xf32> to vector<64x167xf32>
    %96 = arith.maximumf %94, %95 : vector<64x167xf32>
    %97 = vector.extract_strided_slice %96 {offsets = [0, 0], sizes = [64, 153], strides = [1, 1]} : vector<64x167xf32> to vector<64x153xf32>
    %98 = vector.extract_strided_slice %96 {offsets = [0, 14], sizes = [64, 153], strides = [1, 1]} : vector<64x167xf32> to vector<64x153xf32>
    %99 = arith.maximumf %97, %98 : vector<64x153xf32>
    %c0_20 = arith.constant 0 : index
    %c0_21 = arith.constant 0 : index
    %100 = vector.load %arg9[%c0_20, %c0_21] : memref<153x36xf32, #tpu.memory_space<vmem>>, vector<153x36xf32>
    %cst_22 = arith.constant dense<0.000000e+00> : vector<64x36xf32>
    %101 = tpu.matmul %99, %100, %cst_22 {dimension_numbers = #tpu.dot_dimension_numbers<[1], [0], [0], [1], [0, 0, 1, 1], [], []>} : vector<64x153xf32>, vector<153x36xf32>, vector<64x36xf32> -> vector<64x36xf32>
    %c0_23 = arith.constant 0 : index
    %c0_24 = arith.constant 0 : index
    %c0_25 = arith.constant 0 : index
    %102 = vector.load %arg10[%c0_23, %c0_24, %c0_25] : memref<1x64x36xf32, #tpu.memory_space<vmem>>, vector<1x64x36xf32>
    %103 = vector.shape_cast %102 : vector<1x64x36xf32> to vector<64x36xf32>
    %104 = vector.shape_cast %101 : vector<64x36xf32> to vector<1x64x36xf32>
    tpu.vector_store %arg10[%c0_23, %c0_24, %c0_25], %104 {strides = array<i32>} : memref<1x64x36xf32, #tpu.memory_space<vmem>>, vector<1x64x36xf32>,
    return
  }
  func.func @transform_0(%arg0: i32) -> (i32, i32, i32) {
    %c0_i32 = arith.constant 0 : i32
    %c0_i32_0 = arith.constant 0 : i32
    %c0_i32_1 = arith.constant 0 : i32
    return %arg0, %c0_i32, %c0_i32_0 : i32, i32, i32
  }
  func.func @transform_1(%arg0: i32) -> (i32, i32) {
    %c0_i32 = arith.constant 0 : i32
    %c0_i32_0 = arith.constant 0 : i32
    %c0_i32_1 = arith.constant 0 : i32
    return %c0_i32, %c0_i32_0 : i32, i32
  }
  func.func @transform_2(%arg0: i32) -> (i32, i32) {
    %c0_i32 = arith.constant 0 : i32
    %c0_i32_0 = arith.constant 0 : i32
    %c0_i32_1 = arith.constant 0 : i32
    return %c0_i32, %c0_i32_0 : i32, i32
  }
  func.func @transform_3(%arg0: i32) -> (i32, i32) {
    %c0_i32 = arith.constant 0 : i32
    %c0_i32_0 = arith.constant 0 : i32
    %c0_i32_1 = arith.constant 0 : i32
    return %c0_i32, %c0_i32_0 : i32, i32
  }
  func.func @transform_4(%arg0: i32) -> (i32, i32) {
    %c0_i32 = arith.constant 0 : i32
    %c0_i32_0 = arith.constant 0 : i32
    %c0_i32_1 = arith.constant 0 : i32
    return %c0_i32, %c0_i32_0 : i32, i32
  }
  func.func @transform_5(%arg0: i32) -> (i32, i32) {
    %c0_i32 = arith.constant 0 : i32
    %c0_i32_0 = arith.constant 0 : i32
    %c0_i32_1 = arith.constant 0 : i32
    return %c0_i32, %c0_i32_0 : i32, i32
  }
  func.func @transform_6(%arg0: i32) -> (i32, i32) {
    %c0_i32 = arith.constant 0 : i32
    %c0_i32_0 = arith.constant 0 : i32
    %c0_i32_1 = arith.constant 0 : i32
    return %c0_i32, %c0_i32_0 : i32, i32
  }
  func.func @transform_7(%arg0: i32) -> (i32, i32) {
    %c0_i32 = arith.constant 0 : i32
    %c0_i32_0 = arith.constant 0 : i32
    %c0_i32_1 = arith.constant 0 : i32
    return %c0_i32, %c0_i32_0 : i32, i32
  }
  func.func @transform_8(%arg0: i32) -> (i32, i32) {
    %c0_i32 = arith.constant 0 : i32
    %c0_i32_0 = arith.constant 0 : i32
    %c0_i32_1 = arith.constant 0 : i32
    return %c0_i32, %c0_i32_0 : i32, i32
  }
  func.func @transform_9(%arg0: i32) -> (i32, i32, i32) {
    %c0_i32 = arith.constant 0 : i32
    %c0_i32_0 = arith.constant 0 : i32
    %c0_i32_1 = arith.constant 0 : i32
    return %arg0, %c0_i32, %c0_i32_0 : i32, i32, i32
  }
}

</mosaic_0001>

<bundles_post_ra>
// kernel: cnn_forward.3
= control target key start
LH: loop header
LB: loop body
LE: loop exit
PB: predicated region body
PF: predicated region fallthrough
CT: control target
= control target key end

     0   :  { %v1421_v27 = vmov 1983009808   ;;  %v324_v29 = vlaneseq  ;;  %s2346_s0 = inlined_call_operand.vmem [shape: f32[2,2304], index: 0, kind: input, shape index: {}]   ;;  %s2347_s1 = inlined_call_operand.vmem [shape: f32[2304,128], index: 1, kind: input, shape index: {}]   ;;  %s2348_s2 = inlined_call_operand.vmem [shape: f32[1,128], index: 2, kind: input, shape index: {}]   ;;  %s2349_s3 = inlined_call_operand.hbm [shape: f32[2,10], index: 3, kind: output, shape index: {}]  }
   0x1   :  { %v51_v0 = vld [vmem:[%s2347_s1 + $0xf8] sm:$0xff]  ;;  %v50_v2 = vld [vmem:[%s2347_s1 + $0xf0] sm:$0xff]  ;;  %v49_v6 = vld [vmem:[%s2347_s1 + $0xe8] sm:$0xff]  ;;  %v322_v28 = vunpack.c.l.s4 %v1421_v27 }
   0x2   :  { %v35_v1 = vld [vmem:[%s2347_s1 + $0x78] sm:$0xff]  ;;  %1074 = vmatprep.subr.mxu0 %v51_v0  ;;  %v34_v4 = vld [vmem:[%s2347_s1 + $0x70] sm:$0xff]  ;;  %v33_v8 = vld [vmem:[%s2347_s1 + $0x68] sm:$0xff]  ;;  %v325_v39 = vshrl.u32 %v324_v29, 7 }
   0x3   :  { %v83_v3 = vld [vmem:[%s2347_s1 + $0x1f8] sm:$0xff]  ;;  %1075 = vmatpush3.msra.mxu0 %v35_v1  ;;  %v82_v7 = vld [vmem:[%s2347_s1 + $0x1f0] sm:$0xff]  ;;  %v81_v10 = vld [vmem:[%s2347_s1 + $0x1e8] sm:$0xff]  ;;  %v323_v38 = vunpack.c.0.s8 %v322_v28 }
   0x4   :  { %v67_v5 = vld [vmem:[%s2347_s1 + $0x178] sm:$0xff]  ;;  %1109 = vmatprep.subr.mxu1 %v83_v3  ;;  %1076 = vmatprep.subr.mxu0 %v50_v2  ;;  %v66_v9 = vld [vmem:[%s2347_s1 + $0x170] sm:$0xff]  ;;  %v48_v11 = vld [vmem:[%s2347_s1 + $0xe0] sm:$0xff] }
   0x5   :  { %1110 = vmatpush3.msra.mxu1 %v67_v5  ;;  %1077 = vmatpush3.msra.mxu0 %v34_v4  ;;  %v65_v12 = vld [vmem:[%s2347_s1 + $0x168] sm:$0xff]  ;;  %v32_v13 = vld [vmem:[%s2347_s1 + $0x60] sm:$0xff]  ;;  %v47_v15 = vld [vmem:[%s2347_s1 + $0xd8] sm:$0xff]  ;;  %v1572_v48 = vsub.s32 %v323_v38, %v325_v39 }
   0x6   :  { %1111 = vmatprep.subr.mxu1 %v82_v7  ;;  %1078 = vmatprep.subr.mxu0 %v49_v6  ;;  %v80_v14 = vld [vmem:[%s2347_s1 + $0x1e0] sm:$0xff]  ;;  %v31_v17 = vld [vmem:[%s2347_s1 + $0x58] sm:$0xff]  ;;  %v46_v19 = vld [vmem:[%s2347_s1 + $0xd0] sm:$0xff] }
   0x7   :  { %1112 = vmatpush3.msra.mxu1 %v66_v9  ;;  %1079 = vmatpush3.msra.mxu0 %v33_v8  ;;  %v64_v16 = vld [vmem:[%s2347_s1 + $0x160] sm:$0xff]  ;;  %v79_v18 = vld [vmem:[%s2347_s1 + $0x1d8] sm:$0xff]  ;;  %v30_v21 = vld [vmem:[%s2347_s1 + $0x50] sm:$0xff] }
   0x8   :  { %1113 = vmatprep.subr.mxu1 %v81_v10  ;;  %1080 = vmatprep.subr.mxu0 %v48_v11  ;;  %v63_v20 = vld [vmem:[%s2347_s1 + $0x158] sm:$0xff]  ;;  %v78_v22 = vld [vmem:[%s2347_s1 + $0x1d0] sm:$0xff]  ;;  %v45_v23 = vld [vmem:[%s2347_s1 + $0xc8] sm:$0xff] }
   0x9   :  { %1114 = vmatpush3.msra.mxu1 %v65_v12  ;;  %1081 = vmatpush3.msra.mxu0 %v32_v13  ;;  %v62_v24 = vld [vmem:[%s2347_s1 + $0x150] sm:$0xff]  ;;  %v29_v25 = vld [vmem:[%s2347_s1 + $0x48] sm:$0xff]  ;;  %v44_v30 = vld [vmem:[%s2347_s1 + $0xc0] sm:$0xff] }
   0xa   :  { %1115 = vmatprep.subr.mxu1 %v80_v14  ;;  %1082 = vmatprep.subr.mxu0 %v47_v15  ;;  %v77_v26 = vld [vmem:[%s2347_s1 + $0x1c8] sm:$0xff]  ;;  %v28_v32 = vld [vmem:[%s2347_s1 + $0x40] sm:$0xff]  ;;  %v43_v34 = vld [vmem:[%s2347_s1 + $0xb8] sm:$0xff] }
   0xb   :  { %1116 = vmatpush3.msra.mxu1 %v64_v16  ;;  %1083 = vmatpush3.msra.mxu0 %v31_v17  ;;  %v61_v31 = vld [vmem:[%s2347_s1 + $0x148] sm:$0xff]  ;;  %v76_v33 = vld [vmem:[%s2347_s1 + $0x1c0] sm:$0xff]  ;;  %v27_v36 = vld [vmem:[%s2347_s1 + $0x38] sm:$0xff] }
   0xc   :  { %1117 = vmatprep.subr.mxu1 %v79_v18  ;;  %1084 = vmatprep.subr.mxu0 %v46_v19  ;;  %v60_v35 = vld [vmem:[%s2347_s1 + $0x140] sm:$0xff]  ;;  %v75_v37 = vld [vmem:[%s2347_s1 + $0x1b8] sm:$0xff]  ;;  %v42_v40 = vld [vmem:[%s2347_s1 + $0xb0] sm:$0xff] }
   0xd   :  { %1118 = vmatpush3.msra.mxu1 %v63_v20  ;;  %1085 = vmatpush3.msra.mxu0 %v30_v21  ;;  %v59_v41 = vld [vmem:[%s2347_s1 + $0x138] sm:$0xff]  ;;  %v26_v42 = vld [vmem:[%s2347_s1 + $0x30] sm:$0xff]  ;;  %v41_v44 = vld [vmem:[%s2347_s1 + $0xa8] sm:$0xff] }
   0xe   :  { %1119 = vmatprep.subr.mxu1 %v78_v22  ;;  %1086 = vmatprep.subr.mxu0 %v45_v23  ;;  %v74_v43 = vld [vmem:[%s2347_s1 + $0x1b0] sm:$0xff]  ;;  %v25_v46 = vld [vmem:[%s2347_s1 + $0x28] sm:$0xff]  ;;  %v40_v49 = vld [vmem:[%s2347_s1 + $0xa0] sm:$0xff] }
   0xf   :  { %1120 = vmatpush3.msra.mxu1 %v62_v24  ;;  %1087 = vmatpush3.msra.mxu0 %v29_v25  ;;  %v58_v45 = vld [vmem:[%s2347_s1 + $0x130] sm:$0xff]  ;;  %v73_v47 = vld [vmem:[%s2347_s1 + $0x1a8] sm:$0xff]  ;;  %v15_v51 = vld [vmem:[%s2346_s0] sm:$0xff] }
  0x10   :  { %1121 = vmatprep.subr.mxu1 %v77_v26  ;;  %1088 = vmatprep.subr.mxu0 %v44_v30  ;;  %v57_v50 = vld [vmem:[%s2347_s1 + $0x128] sm:$0xff]  ;;  %v24_v52 = vld [vmem:[%s2347_s1 + $0x20] sm:$0xff]  ;;  %v39_v54 = vld [vmem:[%s2347_s1 + $0x98] sm:$0xff]  ;;  %v327_v58 = vrot.slane %v15_v51, %v1572_v48  ;;  %v320_v59 = vcombine.high %v15_v51, %v15_v51 }
  0x11   :  { %1122 = vmatpush3.msra.mxu1 %v61_v31  ;;  %1089 = vmatpush3.msra.mxu0 %v28_v32  ;;  %v72_v53 = vld [vmem:[%s2347_s1 + $0x1a0] sm:$0xff]  ;;  %v23_v56 = vld [vmem:[%s2347_s1 + $0x18] sm:$0xff]  ;;  %v38_v60 = vld [vmem:[%s2347_s1 + $0x90] sm:$0xff] }
  0x12   :  { %1123 = vmatprep.subr.mxu1 %v76_v33  ;;  %1090 = vmatprep.subr.mxu0 %v43_v34  ;;  %v56_v55 = vld [vmem:[%s2347_s1 + $0x120] sm:$0xff]  ;;  %v71_v57 = vld [vmem:[%s2347_s1 + $0x198] sm:$0xff]  ;;  %v22_v62 = vld [vmem:[%s2347_s1 + $0x10] sm:$0xff]  ;;  %v335_v4 = vcombine.high %v327_v58, %v327_v58  ;;  %v334_v5 = vrot.slane %v320_v59, %v1572_v48 }
  0x13   :  { %1124 = vmatpush3.msra.mxu1 %v60_v35  ;;  %1091 = vmatpush3.msra.mxu0 %v27_v36  ;;  %v55_v61 = vld [vmem:[%s2347_s1 + $0x118] sm:$0xff]  ;;  %v70_v63 = vld [vmem:[%s2347_s1 + $0x190] sm:$0xff]  ;;  %v37_v0 = vld [vmem:[%s2347_s1 + $0x88] sm:$0xff] }
  0x14   :  { %1125 = vmatprep.subr.mxu1 %v75_v37  ;;  %1092 = vmatprep.subr.mxu0 %v42_v40  ;;  %v54_v1 = vld [vmem:[%s2347_s1 + $0x110] sm:$0xff]  ;;  %v21_v2 = vld [vmem:[%s2347_s1 + $0x8] sm:$0xff]  ;;  %v36_v6 = vld [vmem:[%s2347_s1 + $0x80] sm:$0xff]  ;;  %v336_v12 = vcombine.high %v334_v5, %v334_v5 }
  0x15   :  { %1126 = vmatpush3.msra.mxu1 %v59_v41  ;;  %1093 = vmatpush3.msra.mxu0 %v26_v42  ;;  %v69_v3 = vld [vmem:[%s2347_s1 + $0x188] sm:$0xff]  ;;  %v20_v7 = vld [vmem:[%s2347_s1] sm:$0xff]  ;;  %v115_v10 = vld [vmem:[%s2347_s1 + $0x2f8] sm:$0xff] }
  0x16   :  { %1127 = vmatprep.subr.mxu1 %v74_v43  ;;  %1094 = vmatprep.subr.mxu0 %v41_v44  ;;  %v53_v8 = vld [vmem:[%s2347_s1 + $0x108] sm:$0xff]  ;;  %v68_v9 = vld [vmem:[%s2347_s1 + $0x180] sm:$0xff]  ;;  %v99_v13 = vld [vmem:[%s2347_s1 + $0x278] sm:$0xff] }
  0x17   :  { %1128 = vmatpush3.msra.mxu1 %v58_v45  ;;  %1095 = vmatpush3.msra.mxu0 %v25_v46  ;;  %v52_v11 = vld [vmem:[%s2347_s1 + $0x100] sm:$0xff]  ;;  %v114_v14 = vld [vmem:[%s2347_s1 + $0x2f0] sm:$0xff]  ;;  %v147_v15 = vld [vmem:[%s2347_s1 + $0x3f8] sm:$0xff] }
  0x18   :  { %1129 = vmatprep.subr.mxu1 %v73_v47  ;;  %1096 = vmatprep.subr.mxu0 %v40_v49  ;;  %v98_v16 = vld [vmem:[%s2347_s1 + $0x270] sm:$0xff]  ;;  %v131_v17 = vld [vmem:[%s2347_s1 + $0x378] sm:$0xff]  ;;  %v113_v18 = vld [vmem:[%s2347_s1 + $0x2e8] sm:$0xff] }
  0x19   :  { %1130 = vmatpush3.msra.mxu1 %v57_v50  ;;  %1097 = vmatpush3.msra.mxu0 %v24_v52  ;;  %v146_v19 = vld [vmem:[%s2347_s1 + $0x3f0] sm:$0xff]  ;;  %v97_v20 = vld [vmem:[%s2347_s1 + $0x268] sm:$0xff]  ;;  %v112_v22 = vld [vmem:[%s2347_s1 + $0x2e0] sm:$0xff] }
  0x1a   :  { %1131 = vmatprep.subr.mxu1 %v72_v53  ;;  %1098 = vmatprep.subr.mxu0 %v39_v54  ;;  %v130_v21 = vld [vmem:[%s2347_s1 + $0x370] sm:$0xff]  ;;  %v145_v23 = vld [vmem:[%s2347_s1 + $0x3e8] sm:$0xff]  ;;  %v96_v24 = vld [vmem:[%s2347_s1 + $0x260] sm:$0xff] }
  0x1b   :  { %1132 = vmatpush3.msra.mxu1 %v56_v55  ;;  %1099 = vmatpush3.msra.mxu0 %v23_v56  ;;  %v129_v25 = vld [vmem:[%s2347_s1 + $0x368] sm:$0xff]  ;;  %v111_v26 = vld [vmem:[%s2347_s1 + $0x2d8] sm:$0xff]  ;;  %v144_v27 = vld [vmem:[%s2347_s1 + $0x3e0] sm:$0xff] }
  0x1c   :  { %1133 = vmatprep.subr.mxu1 %v71_v57  ;;  %1100 = vmatprep.subr.mxu0 %v38_v60  ;;  %v95_v28 = vld [vmem:[%s2347_s1 + $0x258] sm:$0xff]  ;;  %v128_v29 = vld [vmem:[%s2347_s1 + $0x360] sm:$0xff]  ;;  %v110_v30 = vld [vmem:[%s2347_s1 + $0x2d0] sm:$0xff] }
  0x1d   :  { %1134 = vmatpush3.msra.mxu1 %v55_v61  ;;  %1101 = vmatpush3.msra.mxu0 %v22_v62  ;;  %v143_v31 = vld [vmem:[%s2347_s1 + $0x3d8] sm:$0xff]  ;;  %v94_v32 = vld [vmem:[%s2347_s1 + $0x250] sm:$0xff]  ;;  %v109_v34 = vld [vmem:[%s2347_s1 + $0x2c8] sm:$0xff] }
  0x1e   :  { %1135 = vmatprep.subr.mxu1 %v70_v63  ;;  %1102 = vmatprep.subr.mxu0 %v37_v0  ;;  %v127_v33 = vld [vmem:[%s2347_s1 + $0x358] sm:$0xff]  ;;  %v142_v35 = vld [vmem:[%s2347_s1 + $0x3d0] sm:$0xff]  ;;  %v93_v36 = vld [vmem:[%s2347_s1 + $0x248] sm:$0xff] }
  0x1f   :  { %1136 = vmatpush3.msra.mxu1 %v54_v1  ;;  %1103 = vmatpush3.msra.mxu0 %v21_v2  ;;  %v126_v37 = vld [vmem:[%s2347_s1 + $0x350] sm:$0xff]  ;;  %v108_v38 = vld [vmem:[%s2347_s1 + $0x2c0] sm:$0xff]  ;;  %v141_v39 = vld [vmem:[%s2347_s1 + $0x3c8] sm:$0xff] }
  0x20   :  { %1137 = vmatprep.subr.mxu1 %v69_v3  ;;  %1104 = vmatprep.subr.mxu0 %v36_v6  ;;  %v92_v40 = vld [vmem:[%s2347_s1 + $0x240] sm:$0xff]  ;;  %v125_v41 = vld [vmem:[%s2347_s1 + $0x348] sm:$0xff]  ;;  %v107_v42 = vld [vmem:[%s2347_s1 + $0x2b8] sm:$0xff] }
  0x21   :  { %478 = vmatprep.mubr.f32.mxu0 %v335_v4  ;;  %1105 = vmatpush3.msra.mxu0 %v20_v7  ;;  %v140_v43 = vld [vmem:[%s2347_s1 + $0x3c0] sm:$0xff]  ;;  %v91_v44 = vld [vmem:[%s2347_s1 + $0x238] sm:$0xff]  ;;  %v106_v46 = vld [vmem:[%s2347_s1 + $0x2b0] sm:$0xff] }
  0x22   :  { %1138 = vmatpush3.msra.mxu1 %v53_v8  ;;  %479 = vmatmul.mubr.f32.vlgmr.msra.gmra.mxu0 %v327_v58  ;;  %v124_v45 = vld [vmem:[%s2347_s1 + $0x340] sm:$0xff]  ;;  %v139_v47 = vld [vmem:[%s2347_s1 + $0x3b8] sm:$0xff]  ;;  %v90_v49 = vld [vmem:[%s2347_s1 + $0x230] sm:$0xff] }
  0x23   :  { %1139 = vmatprep.subr.mxu1 %v68_v9  ;;  %1144 = vmatprep.subr.mxu0 %v115_v10  ;;  %v123_v50 = vld [vmem:[%s2347_s1 + $0x338] sm:$0xff]  ;;  %v105_v51 = vld [vmem:[%s2347_s1 + $0x2a8] sm:$0xff]  ;;  %v138_v52 = vld [vmem:[%s2347_s1 + $0x3b0] sm:$0xff] }
  0x24   :  { %1140 = vmatpush3.msra.mxu1 %v52_v11  ;;  %548 = vmatprep.mubr.f32.mxu1 %v336_v12  ;;  %v89_v53 = vld [vmem:[%s2347_s1 + $0x228] sm:$0xff]  ;;  %v122_v54 = vld [vmem:[%s2347_s1 + $0x330] sm:$0xff]  ;;  %v104_v55 = vld [vmem:[%s2347_s1 + $0x2a0] sm:$0xff] }
  0x25   :  { %1145 = vmatpush3.msra.mxu0 %v99_v13  ;;  %549 = vmatmul.mubr.f32.vlgmr.msra.gmra.mxu1 %v334_v5  ;;  %v137_v56 = vld [vmem:[%s2347_s1 + $0x3a8] sm:$0xff]  ;;  %v88_v57 = vld [vmem:[%s2347_s1 + $0x220] sm:$0xff]  ;;  %v103_v60 = vld [vmem:[%s2347_s1 + $0x298] sm:$0xff] }
  0x26   :  { %1146 = vmatprep.subr.mxu0 %v114_v14  ;;  %1179 = vmatprep.subr.mxu1 %v147_v15  ;;  %v16_v58 = vld [vmem:[%s2346_s0 + $0x8] sm:$0xff]  ;;  %v136_v61 = vld [vmem:[%s2347_s1 + $0x3a0] sm:$0xff]  ;;  %v87_v62 = vld [vmem:[%s2347_s1 + $0x218] sm:$0xff] }
  0x27   :  { %1147 = vmatpush3.msra.mxu0 %v98_v16  ;;  %1180 = vmatpush3.msra.mxu1 %v131_v17  ;;  %v121_v59 = vld [vmem:[%s2347_s1 + $0x328] sm:$0xff]  ;;  %v120_v63 = vld [vmem:[%s2347_s1 + $0x320] sm:$0xff]  ;;  %v102_v0 = vld [vmem:[%s2347_s1 + $0x290] sm:$0xff]  ;;  %v337_v1 = vcombine.high %v16_v58, %v16_v58  ;;  %v344_v4 = vrot.slane %v16_v58, %v1572_v48 }
  0x28   :  { %1148 = vmatprep.subr.mxu0 %v113_v18  ;;  %1181 = vmatprep.subr.mxu1 %v146_v19  ;;  %v135_v2 = vld [vmem:[%s2347_s1 + $0x398] sm:$0xff]  ;;  %v86_v3 = vld [vmem:[%s2347_s1 + $0x210] sm:$0xff]  ;;  %v101_v6 = vld [vmem:[%s2347_s1 + $0x288] sm:$0xff] }
  0x29   :  { %1149 = vmatpush3.msra.mxu0 %v97_v20  ;;  %1182 = vmatpush3.msra.mxu1 %v130_v21  ;;  %v119_v5 = vld [vmem:[%s2347_s1 + $0x318] sm:$0xff]  ;;  %v134_v7 = vld [vmem:[%s2347_s1 + $0x390] sm:$0xff]  ;;  %v85_v8 = vld [vmem:[%s2347_s1 + $0x208] sm:$0xff]  ;;  %v351_v11 = vrot.slane %v337_v1, %v1572_v48  ;;  %v352_v14 = vcombine.high %v344_v4, %v344_v4 }
  0x2a   :  { %1150 = vmatprep.subr.mxu0 %v112_v22  ;;  %1183 = vmatprep.subr.mxu1 %v145_v23  ;;  %v118_v9 = vld [vmem:[%s2347_s1 + $0x310] sm:$0xff]  ;;  %v100_v10 = vld [vmem:[%s2347_s1 + $0x280] sm:$0xff]  ;;  %v133_v12 = vld [vmem:[%s2347_s1 + $0x388] sm:$0xff] }
  0x2b   :  { %1151 = vmatpush3.msra.mxu0 %v96_v24  ;;  %1184 = vmatpush3.msra.mxu1 %v129_v25  ;;  %v84_v13 = vld [vmem:[%s2347_s1 + $0x200] sm:$0xff]  ;;  %v117_v15 = vld [vmem:[%s2347_s1 + $0x308] sm:$0xff]  ;;  %v179_v17 = vld [vmem:[%s2347_s1 + $0x4f8] sm:$0xff]  ;;  %v353_v19 = vcombine.high %v351_v11, %v351_v11 }
  0x2c   :  { %1152 = vmatprep.subr.mxu0 %v111_v26  ;;  %1185 = vmatprep.subr.mxu1 %v144_v27  ;;  %v132_v16 = vld [vmem:[%s2347_s1 + $0x380] sm:$0xff]  ;;  %v163_v20 = vld [vmem:[%s2347_s1 + $0x478] sm:$0xff]  ;;  %v178_v21 = vld [vmem:[%s2347_s1 + $0x4f0] sm:$0xff] }
  0x2d   :  { %1153 = vmatpush3.msra.mxu0 %v95_v28  ;;  %1186 = vmatpush3.msra.mxu1 %v128_v29  ;;  %v116_v18 = vld [vmem:[%s2347_s1 + $0x300] sm:$0xff]  ;;  %v211_v22 = vld [vmem:[%s2347_s1 + $0x5f8] sm:$0xff]  ;;  %v162_v23 = vld [vmem:[%s2347_s1 + $0x470] sm:$0xff] }
  0x2e   :  { %1154 = vmatprep.subr.mxu0 %v110_v30  ;;  %1187 = vmatprep.subr.mxu1 %v143_v31  ;;  %v195_v24 = vld [vmem:[%s2347_s1 + $0x578] sm:$0xff]  ;;  %v177_v25 = vld [vmem:[%s2347_s1 + $0x4e8] sm:$0xff]  ;;  %v210_v26 = vld [vmem:[%s2347_s1 + $0x5f0] sm:$0xff] }
  0x2f   :  { %1155 = vmatpush3.msra.mxu0 %v94_v32  ;;  %1188 = vmatpush3.msra.mxu1 %v127_v33  ;;  %v161_v27 = vld [vmem:[%s2347_s1 + $0x468] sm:$0xff]  ;;  %v194_v28 = vld [vmem:[%s2347_s1 + $0x570] sm:$0xff]  ;;  %v176_v29 = vld [vmem:[%s2347_s1 + $0x4e0] sm:$0xff] }
  0x30   :  { %1156 = vmatprep.subr.mxu0 %v109_v34  ;;  %1189 = vmatprep.subr.mxu1 %v142_v35  ;;  %v209_v30 = vld [vmem:[%s2347_s1 + $0x5e8] sm:$0xff]  ;;  %v160_v31 = vld [vmem:[%s2347_s1 + $0x460] sm:$0xff]  ;;  %v175_v33 = vld [vmem:[%s2347_s1 + $0x4d8] sm:$0xff] }
  0x31   :  { %1157 = vmatpush3.msra.mxu0 %v93_v36  ;;  %1190 = vmatpush3.msra.mxu1 %v126_v37  ;;  %v193_v32 = vld [vmem:[%s2347_s1 + $0x568] sm:$0xff]  ;;  %v208_v34 = vld [vmem:[%s2347_s1 + $0x5e0] sm:$0xff]  ;;  %v159_v35 = vld [vmem:[%s2347_s1 + $0x458] sm:$0xff] }
  0x32   :  { %1158 = vmatprep.subr.mxu0 %v108_v38  ;;  %1191 = vmatprep.subr.mxu1 %v141_v39  ;;  %v192_v36 = vld [vmem:[%s2347_s1 + $0x560] sm:$0xff]  ;;  %v174_v37 = vld [vmem:[%s2347_s1 + $0x4d0] sm:$0xff]  ;;  %v207_v38 = vld [vmem:[%s2347_s1 + $0x5d8] sm:$0xff] }
  0x33   :  { %1159 = vmatpush3.msra.mxu0 %v92_v40  ;;  %1192 = vmatpush3.msra.mxu1 %v125_v41  ;;  %v158_v39 = vld [vmem:[%s2347_s1 + $0x450] sm:$0xff]  ;;  %v191_v40 = vld [vmem:[%s2347_s1 + $0x558] sm:$0xff]  ;;  %v173_v41 = vld [vmem:[%s2347_s1 + $0x4c8] sm:$0xff] }
  0x34   :  { %1160 = vmatprep.subr.mxu0 %v107_v42  ;;  %1193 = vmatprep.subr.mxu1 %v140_v43  ;;  %v206_v42 = vld [vmem:[%s2347_s1 + $0x5d0] sm:$0xff]  ;;  %v157_v43 = vld [vmem:[%s2347_s1 + $0x448] sm:$0xff] }
  0x35   :  { %1161 = vmatpush3.msra.mxu0 %v91_v44  ;;  %1194 = vmatpush3.msra.mxu1 %v124_v45  ;;  %v190_v44 = vld [vmem:[%s2347_s1 + $0x550] sm:$0xff]  ;;  %v172_v45 = vld [vmem:[%s2347_s1 + $0x4c0] sm:$0xff]  ;;  %v169_v58 = vld [vmem:[%s2347_s1 + $0x4a8] sm:$0xff] }
  0x36   :  { %1162 = vmatprep.subr.mxu0 %v106_v46  ;;  %1195 = vmatprep.subr.mxu1 %v139_v47  ;;  %v205_v46 = vld [vmem:[%s2347_s1 + $0x5c8] sm:$0xff]  ;;  %v156_v47 = vld [vmem:[%s2347_s1 + $0x440] sm:$0xff]  ;;  %v17_v1 = vld [vmem:[%s2346_s0 + $0x10] sm:$0xff] }
  0x37   :  { %1163 = vmatpush3.msra.mxu0 %v90_v49  ;;  %1196 = vmatpush3.msra.mxu1 %v123_v50  ;;  %v189_v49 = vld [vmem:[%s2347_s1 + $0x548] sm:$0xff]  ;;  %v171_v50 = vld [vmem:[%s2347_s1 + $0x4b8] sm:$0xff] }
  0x38   :  { %1164 = vmatprep.subr.mxu0 %v105_v51  ;;  %1197 = vmatprep.subr.mxu1 %v138_v52  ;;  %v204_v51 = vld [vmem:[%s2347_s1 + $0x5c0] sm:$0xff]  ;;  %v155_v52 = vld [vmem:[%s2347_s1 + $0x438] sm:$0xff] }
  0x39   :  { %1165 = vmatpush3.msra.mxu0 %v89_v53  ;;  %1198 = vmatpush3.msra.mxu1 %v122_v54  ;;  %v188_v53 = vld [vmem:[%s2347_s1 + $0x540] sm:$0xff]  ;;  %v170_v54 = vld [vmem:[%s2347_s1 + $0x4b0] sm:$0xff] }
  0x3a   :  { %1166 = vmatprep.subr.mxu0 %v104_v55  ;;  %1199 = vmatprep.subr.mxu1 %v137_v56  ;;  %v203_v55 = vld [vmem:[%s2347_s1 + $0x5b8] sm:$0xff]  ;;  %v154_v56 = vld [vmem:[%s2347_s1 + $0x430] sm:$0xff] }
  0x3b   :  { %1167 = vmatpush3.msra.mxu0 %v88_v57  ;;  %1200 = vmatpush3.msra.mxu1 %v121_v59  ;;  %v187_v57 = vld [vmem:[%s2347_s1 + $0x538] sm:$0xff]  ;;  %v202_v59 = vld [vmem:[%s2347_s1 + $0x5b0] sm:$0xff] }
  0x3c   :  { %1168 = vmatprep.subr.mxu0 %v103_v60  ;;  %1201 = vmatprep.subr.mxu1 %v136_v61  ;;  %v153_v60 = vld [vmem:[%s2347_s1 + $0x428] sm:$0xff]  ;;  %v186_v61 = vld [vmem:[%s2347_s1 + $0x530] sm:$0xff] }
  0x3d   :  { %1169 = vmatpush3.msra.mxu0 %v87_v62  ;;  %1202 = vmatpush3.msra.mxu1 %v120_v63  ;;  %v168_v62 = vld [vmem:[%s2347_s1 + $0x4a0] sm:$0xff]  ;;  %v201_v63 = vld [vmem:[%s2347_s1 + $0x5a8] sm:$0xff] }
  0x3e   :  { %1170 = vmatprep.subr.mxu0 %v102_v0  ;;  %1203 = vmatprep.subr.mxu1 %v135_v2  ;;  %v152_v0 = vld [vmem:[%s2347_s1 + $0x420] sm:$0xff]  ;;  %v185_v2 = vld [vmem:[%s2347_s1 + $0x528] sm:$0xff] }
  0x3f   :  { %1171 = vmatpush3.msra.mxu0 %v86_v3  ;;  %1204 = vmatpush3.msra.mxu1 %v119_v5  ;;  %v167_v3 = vld [vmem:[%s2347_s1 + $0x498] sm:$0xff] }
  0x40   :  { %1172 = vmatprep.subr.mxu0 %v101_v6  ;;  %1205 = vmatprep.subr.mxu1 %v134_v7  ;;  %v151_v5 = vld [vmem:[%s2347_s1 + $0x418] sm:$0xff]  ;;  %v184_v6 = vld [vmem:[%s2347_s1 + $0x520] sm:$0xff]  ;;  %v166_v7 = vld [vmem:[%s2347_s1 + $0x490] sm:$0xff] }
  0x41   :  { %1173 = vmatpush3.msra.mxu0 %v85_v8  ;;  %1206 = vmatpush3.msra.mxu1 %v118_v9  ;;  %v354_v8 = vcombine.high %v17_v1, %v17_v1  ;;  %v199_v9 = vld [vmem:[%s2347_s1 + $0x598] sm:$0xff] }
  0x42   :  { %1174 = vmatprep.subr.mxu0 %v100_v10  ;;  %1207 = vmatprep.subr.mxu1 %v133_v12  ;;  %v150_v10 = vld [vmem:[%s2347_s1 + $0x410] sm:$0xff]  ;;  %v183_v12 = vld [vmem:[%s2347_s1 + $0x518] sm:$0xff] }
  0x43   :  { %1175 = vmatpush3.msra.mxu0 %v84_v13  ;;  %618 = vmatprep.mubr.f32.mxu0 %v352_v14  ;;  %v165_v13 = vld [vmem:[%s2347_s1 + $0x488] sm:$0xff]  ;;  %v198_v14 = vld [vmem:[%s2347_s1 + $0x590] sm:$0xff] }
  0x44   :  { %1208 = vmatpush3.msra.mxu1 %v117_v15  ;;  %619 = vmatmul.mubr.f32.vlgmr.msra.gmra.mxu0 %v344_v4  ;;  %v200_v4 = vld [vmem:[%s2347_s1 + $0x5a0] sm:$0xff]  ;;  %v149_v15 = vld [vmem:[%s2347_s1 + $0x408] sm:$0xff] }
  0x45   :  { %1209 = vmatprep.subr.mxu1 %v132_v16  ;;  %1214 = vmatprep.subr.mxu0 %v179_v17  ;;  %v182_v16 = vld [vmem:[%s2347_s1 + $0x510] sm:$0xff]  ;;  %v164_v17 = vld [vmem:[%s2347_s1 + $0x480] sm:$0xff] }
  0x46   :  { %1210 = vmatpush3.msra.mxu1 %v116_v18  ;;  %688 = vmatprep.mubr.f32.mxu1 %v353_v19  ;;  %v368_v18 = vrot.slane %v354_v8, %v1572_v48  ;;  %v197_v19 = vld [vmem:[%s2347_s1 + $0x588] sm:$0xff] }
  0x47   :  { %1215 = vmatpush3.msra.mxu0 %v163_v20  ;;  %689 = vmatmul.mubr.f32.vlgmr.msra.gmra.mxu1 %v351_v11  ;;  %v361_v11 = vrot.slane %v17_v1, %v1572_v48  ;;  %v148_v20 = vld [vmem:[%s2347_s1 + $0x400] sm:$0xff] }
  0x48   :  { %1216 = vmatprep.subr.mxu0 %v178_v21  ;;  %1249 = vmatprep.subr.mxu1 %v211_v22  ;;  %v181_v22 = vld [vmem:[%s2347_s1 + $0x508] sm:$0xff] }
  0x49   :  { %1217 = vmatpush3.msra.mxu0 %v162_v23  ;;  %1250 = vmatpush3.msra.mxu1 %v195_v24  ;;  %v369_v21 = vcombine.high %v361_v11, %v361_v11  ;;  %v196_v23 = vld [vmem:[%s2347_s1 + $0x580] sm:$0xff] }
  0x4a   :  { %1218 = vmatprep.subr.mxu0 %v177_v25  ;;  %1251 = vmatprep.subr.mxu1 %v210_v26 }
  0x4b   :  { %1219 = vmatpush3.msra.mxu0 %v161_v27  ;;  %1252 = vmatpush3.msra.mxu1 %v194_v28 }
  0x4c   :  { %1220 = vmatprep.subr.mxu0 %v176_v29  ;;  %1253 = vmatprep.subr.mxu1 %v209_v30 }
  0x4d   :  { %1221 = vmatpush3.msra.mxu0 %v160_v31  ;;  %1254 = vmatpush3.msra.mxu1 %v193_v32 }
  0x4e   :  { %1222 = vmatprep.subr.mxu0 %v175_v33  ;;  %1255 = vmatprep.subr.mxu1 %v208_v34 }
  0x4f   :  { %1223 = vmatpush3.msra.mxu0 %v159_v35  ;;  %1256 = vmatpush3.msra.mxu1 %v192_v36 }
  0x50   :  { %1224 = vmatprep.subr.mxu0 %v174_v37  ;;  %1257 = vmatprep.subr.mxu1 %v207_v38 }
  0x51   :  { %1225 = vmatpush3.msra.mxu0 %v158_v39  ;;  %1258 = vmatpush3.msra.mxu1 %v191_v40 }
  0x52   :  { %1226 = vmatprep.subr.mxu0 %v173_v41  ;;  %1259 = vmatprep.subr.mxu1 %v206_v42 }
  0x53   :  { %1227 = vmatpush3.msra.mxu0 %v157_v43  ;;  %1260 = vmatpush3.msra.mxu1 %v190_v44 }
  0x54   :  { %1228 = vmatprep.subr.mxu0 %v172_v45  ;;  %1261 = vmatprep.subr.mxu1 %v205_v46 }
  0x55   :  { %1229 = vmatpush3.msra.mxu0 %v156_v47  ;;  %1262 = vmatpush3.msra.mxu1 %v189_v49 }
  0x56   :  { %1230 = vmatprep.subr.mxu0 %v171_v50  ;;  %1263 = vmatprep.subr.mxu1 %v204_v51 }
  0x57   :  { %1231 = vmatpush3.msra.mxu0 %v155_v52  ;;  %1264 = vmatpush3.msra.mxu1 %v188_v53 }
  0x58   :  { %1232 = vmatprep.subr.mxu0 %v170_v54  ;;  %1265 = vmatprep.subr.mxu1 %v203_v55 }
  0x59   :  { %1233 = vmatpush3.msra.mxu0 %v154_v56  ;;  %1266 = vmatpush3.msra.mxu1 %v187_v57 }
  0x5a   :  { %1234 = vmatprep.subr.mxu0 %v169_v58  ;;  %1267 = vmatprep.subr.mxu1 %v202_v59 }
  0x5b   :  { %1235 = vmatpush3.msra.mxu0 %v153_v60  ;;  %1268 = vmatpush3.msra.mxu1 %v186_v61 }
  0x5c   :  { %1236 = vmatprep.subr.mxu0 %v168_v62  ;;  %1269 = vmatprep.subr.mxu1 %v201_v63 }
  0x5d   :  { %1237 = vmatpush3.msra.mxu0 %v152_v0  ;;  %1270 = vmatpush3.msra.mxu1 %v185_v2 }
  0x5e   :  { %1238 = vmatprep.subr.mxu0 %v167_v3  ;;  %1271 = vmatprep.subr.mxu1 %v200_v4 }
  0x5f   :  { %1239 = vmatpush3.msra.mxu0 %v151_v5  ;;  %1272 = vmatpush3.msra.mxu1 %v184_v6 }
  0x60   :  { %1240 = vmatprep.subr.mxu0 %v166_v7  ;;  %1273 = vmatprep.subr.mxu1 %v199_v9 }
  0x61   :  { %1241 = vmatpush3.msra.mxu0 %v150_v10  ;;  %1274 = vmatpush3.msra.mxu1 %v183_v12 }
  0x62   :  { %1242 = vmatprep.subr.mxu0 %v165_v13  ;;  %1275 = vmatprep.subr.mxu1 %v198_v14 }
  0x63   :  { %1243 = vmatpush3.msra.mxu0 %v149_v15  ;;  %1276 = vmatpush3.msra.mxu1 %v182_v16 }
  0x64   :  { %1244 = vmatprep.subr.mxu0 %v164_v17 }
  0x65   :  { %8 = vsyncpa [#allocation3], 0  ;;  %1277 = vmatprep.subr.mxu1 %v197_v19  ;;  %1245 = vmatpush3.msra.mxu0 %v148_v20  ;;  %v243_v24 = vld [vmem:[%s2347_s1 + $0x6f8] sm:$0xff]  ;;  %v180_v25 = vld [vmem:[%s2347_s1 + $0x500] sm:$0xff]  ;;  %v370_v26 = vcombine.high %v368_v18, %v368_v18  ;;  %vm1044_vm0 = vcmask 74752  }
  0x66   :  { %758 = vmatprep.mubr.f32.mxu0 %v369_v21  ;;  %1278 = vmatpush3.msra.mxu1 %v181_v22  ;;  %v227_v27 = vld [vmem:[%s2347_s1 + $0x678] sm:$0xff]  ;;  %v242_v28 = vld [vmem:[%s2347_s1 + $0x6f0] sm:$0xff]  ;;  %v241_v32 = vld [vmem:[%s2347_s1 + $0x6e8] sm:$0xff] }
  0x67   :  { %759 = vmatmul.mubr.f32.vlgmr.msra.gmra.mxu0 %v361_v11  ;;  %1279 = vmatprep.subr.mxu1 %v196_v23  ;;  %v275_v29 = vld [vmem:[%s2347_s1 + $0x7f8] sm:$0xff]  ;;  %v226_v30 = vld [vmem:[%s2347_s1 + $0x670] sm:$0xff]  ;;  %v225_v34 = vld [vmem:[%s2347_s1 + $0x668] sm:$0xff] }
  0x68   :  { %1284 = vmatprep.subr.mxu0 %v243_v24  ;;  %1280 = vmatpush3.msra.mxu1 %v180_v25  ;;  %v259_v31 = vld [vmem:[%s2347_s1 + $0x778] sm:$0xff]  ;;  %v274_v33 = vld [vmem:[%s2347_s1 + $0x7f0] sm:$0xff]  ;;  %v240_v36 = vld [vmem:[%s2347_s1 + $0x6e0] sm:$0xff] }
  0x69   :  { %828 = vmatprep.mubr.f32.mxu1 %v370_v26  ;;  %1285 = vmatpush3.msra.mxu0 %v227_v27  ;;  %v258_v35 = vld [vmem:[%s2347_s1 + $0x770] sm:$0xff]  ;;  %v273_v37 = vld [vmem:[%s2347_s1 + $0x7e8] sm:$0xff]  ;;  %v224_v38 = vld [vmem:[%s2347_s1 + $0x660] sm:$0xff] }
  0x6a   :  { %829 = vmatmul.mubr.f32.vlgmr.msra.gmra.mxu1 %v368_v18  ;;  %1286 = vmatprep.subr.mxu0 %v242_v28  ;;  %v257_v39 = vld [vmem:[%s2347_s1 + $0x768] sm:$0xff]  ;;  %v239_v40 = vld [vmem:[%s2347_s1 + $0x6d8] sm:$0xff]  ;;  %v272_v41 = vld [vmem:[%s2347_s1 + $0x7e0] sm:$0xff] }
  0x6b   :  { %1319 = vmatprep.subr.mxu1 %v275_v29  ;;  %1287 = vmatpush3.msra.mxu0 %v226_v30  ;;  %v223_v42 = vld [vmem:[%s2347_s1 + $0x658] sm:$0xff]  ;;  %v256_v43 = vld [vmem:[%s2347_s1 + $0x760] sm:$0xff]  ;;  %v238_v44 = vld [vmem:[%s2347_s1 + $0x6d0] sm:$0xff] }
  0x6c   :  { %1320 = vmatpush3.msra.mxu1 %v259_v31  ;;  %1288 = vmatprep.subr.mxu0 %v241_v32  ;;  %v271_v45 = vld [vmem:[%s2347_s1 + $0x7d8] sm:$0xff]  ;;  %v222_v46 = vld [vmem:[%s2347_s1 + $0x650] sm:$0xff]  ;;  %v237_v49 = vld [vmem:[%s2347_s1 + $0x6c8] sm:$0xff] }
  0x6d   :  { %1321 = vmatprep.subr.mxu1 %v274_v33  ;;  %1289 = vmatpush3.msra.mxu0 %v225_v34  ;;  %v255_v47 = vld [vmem:[%s2347_s1 + $0x758] sm:$0xff]  ;;  %v270_v50 = vld [vmem:[%s2347_s1 + $0x7d0] sm:$0xff]  ;;  %v221_v51 = vld [vmem:[%s2347_s1 + $0x648] sm:$0xff] }
  0x6e   :  { %1322 = vmatpush3.msra.mxu1 %v258_v35  ;;  %1290 = vmatprep.subr.mxu0 %v240_v36  ;;  %v254_v52 = vld [vmem:[%s2347_s1 + $0x750] sm:$0xff]  ;;  %v236_v53 = vld [vmem:[%s2347_s1 + $0x6c0] sm:$0xff]  ;;  %v269_v54 = vld [vmem:[%s2347_s1 + $0x7c8] sm:$0xff] }
  0x6f   :  { %1323 = vmatprep.subr.mxu1 %v273_v37  ;;  %1291 = vmatpush3.msra.mxu0 %v224_v38  ;;  %v220_v55 = vld [vmem:[%s2347_s1 + $0x640] sm:$0xff]  ;;  %v253_v56 = vld [vmem:[%s2347_s1 + $0x748] sm:$0xff]  ;;  %v235_v57 = vld [vmem:[%s2347_s1 + $0x6b8] sm:$0xff] }
  0x70   :  { %1324 = vmatpush3.msra.mxu1 %v257_v39  ;;  %1292 = vmatprep.subr.mxu0 %v239_v40  ;;  %v268_v58 = vld [vmem:[%s2347_s1 + $0x7c0] sm:$0xff]  ;;  %v219_v59 = vld [vmem:[%s2347_s1 + $0x638] sm:$0xff]  ;;  %v234_v61 = vld [vmem:[%s2347_s1 + $0x6b0] sm:$0xff] }
  0x71   :  { %1325 = vmatprep.subr.mxu1 %v272_v41  ;;  %1293 = vmatpush3.msra.mxu0 %v223_v42  ;;  %v252_v60 = vld [vmem:[%s2347_s1 + $0x740] sm:$0xff]  ;;  %v267_v62 = vld [vmem:[%s2347_s1 + $0x7b8] sm:$0xff]  ;;  %v218_v63 = vld [vmem:[%s2347_s1 + $0x630] sm:$0xff] }
  0x72   :  { %1326 = vmatpush3.msra.mxu1 %v256_v43  ;;  %1294 = vmatprep.subr.mxu0 %v238_v44  ;;  %v251_v0 = vld [vmem:[%s2347_s1 + $0x738] sm:$0xff]  ;;  %v233_v1 = vld [vmem:[%s2347_s1 + $0x6a8] sm:$0xff]  ;;  %v266_v2 = vld [vmem:[%s2347_s1 + $0x7b0] sm:$0xff] }
  0x73   :  { %1327 = vmatprep.subr.mxu1 %v271_v45  ;;  %1295 = vmatpush3.msra.mxu0 %v222_v46  ;;  %v217_v3 = vld [vmem:[%s2347_s1 + $0x628] sm:$0xff]  ;;  %v250_v4 = vld [vmem:[%s2347_s1 + $0x730] sm:$0xff]  ;;  %v232_v5 = vld [vmem:[%s2347_s1 + $0x6a0] sm:$0xff] }
  0x74   :  { %1328 = vmatpush3.msra.mxu1 %v255_v47  ;;  %1296 = vmatprep.subr.mxu0 %v237_v49  ;;  %v265_v6 = vld [vmem:[%s2347_s1 + $0x7a8] sm:$0xff]  ;;  %v216_v7 = vld [vmem:[%s2347_s1 + $0x620] sm:$0xff]  ;;  %v18_v8 = vld [vmem:[%s2346_s0 + $0x18] sm:$0xff] }
  0x75   :  { %1329 = vmatprep.subr.mxu1 %v270_v50  ;;  %1297 = vmatpush3.msra.mxu0 %v221_v51  ;;  %v249_v9 = vld [vmem:[%s2347_s1 + $0x728] sm:$0xff]  ;;  %v231_v10 = vld [vmem:[%s2347_s1 + $0x698] sm:$0xff]  ;;  %v264_v11 = vld [vmem:[%s2347_s1 + $0x7a0] sm:$0xff]  ;;  %v371_v15 = vcombine.high %v18_v8, %v18_v8  ;;  %v378_v18 = vrot.slane %v18_v8, %v1572_v48 }
  0x76   :  { %1330 = vmatpush3.msra.mxu1 %v254_v52  ;;  %1298 = vmatprep.subr.mxu0 %v236_v53  ;;  %v215_v12 = vld [vmem:[%s2347_s1 + $0x618] sm:$0xff]  ;;  %v248_v13 = vld [vmem:[%s2347_s1 + $0x720] sm:$0xff]  ;;  %v230_v14 = vld [vmem:[%s2347_s1 + $0x690] sm:$0xff] }
  0x77   :  { %1331 = vmatprep.subr.mxu1 %v269_v54  ;;  %1299 = vmatpush3.msra.mxu0 %v220_v55  ;;  %v263_v16 = vld [vmem:[%s2347_s1 + $0x798] sm:$0xff]  ;;  %v214_v17 = vld [vmem:[%s2347_s1 + $0x610] sm:$0xff]  ;;  %v229_v20 = vld [vmem:[%s2347_s1 + $0x688] sm:$0xff]  ;;  %v385_v25 = vrot.slane %v371_v15, %v1572_v48  ;;  %v386_v28 = vcombine.high %v378_v18, %v378_v18 }
  0x78   :  { %1332 = vmatpush3.msra.mxu1 %v253_v56  ;;  %1300 = vmatprep.subr.mxu0 %v235_v57  ;;  %v247_v19 = vld [vmem:[%s2347_s1 + $0x718] sm:$0xff]  ;;  %v262_v21 = vld [vmem:[%s2347_s1 + $0x790] sm:$0xff]  ;;  %v213_v22 = vld [vmem:[%s2347_s1 + $0x608] sm:$0xff] }
  0x79   :  { %1333 = vmatprep.subr.mxu1 %v268_v58  ;;  %1301 = vmatpush3.msra.mxu0 %v219_v59  ;;  %v246_v23 = vld [vmem:[%s2347_s1 + $0x710] sm:$0xff]  ;;  %v228_v24 = vld [vmem:[%s2347_s1 + $0x680] sm:$0xff]  ;;  %v261_v26 = vld [vmem:[%s2347_s1 + $0x788] sm:$0xff]  ;;  %v387_v33 = vcombine.high %v385_v25, %v385_v25 }
  0x7a   :  { %1334 = vmatpush3.msra.mxu1 %v252_v60  ;;  %1302 = vmatprep.subr.mxu0 %v234_v61  ;;  %v212_v27 = vld [vmem:[%s2347_s1 + $0x600] sm:$0xff]  ;;  %v245_v29 = vld [vmem:[%s2347_s1 + $0x708] sm:$0xff]  ;;  %v307_v31 = vld [vmem:[%s2347_s1 + $0x8f8] sm:$0xff] }
  0x7b   :  { %1335 = vmatprep.subr.mxu1 %v267_v62  ;;  %1303 = vmatpush3.msra.mxu0 %v218_v63  ;;  %v260_v48 = vld [vmem:[%s2347_s1 + $0x780] sm:$0xff]  ;;  %v291_v34 = vld [vmem:[%s2347_s1 + $0x878] sm:$0xff]  ;;  %v306_v35 = vld [vmem:[%s2347_s1 + $0x8f0] sm:$0xff] }
  0x7c   :  { %1336 = vmatpush3.msra.mxu1 %v251_v0  ;;  %1304 = vmatprep.subr.mxu0 %v233_v1  ;;  %v2233_v30 = vld.sshfl [vmem:[%s2346_s0 + $0x20] sm:$0x33 pattern:$0x76325410]  ;;  %v290_v37 = vld [vmem:[%s2347_s1 + $0x870] sm:$0xff]  ;;  %v305_v38 = vld [vmem:[%s2347_s1 + $0x8e8] sm:$0xff] }
  0x7d   :  { %1337 = vmatprep.subr.mxu1 %v266_v2  ;;  %1305 = vmatpush3.msra.mxu0 %v217_v3  ;;  %v244_v32 = vld [vmem:[%s2347_s1 + $0x700] sm:$0xff]  ;;  %v395_v36 = vcombine.high %v2233_v30, %v2233_v30  ;;  %v289_v39 = vld [vmem:[%s2347_s1 + $0x868] sm:$0xff]  ;;  %v303_v42 = vld [vmem:[%s2347_s1 + $0x8d8] sm:$0xff] }
  0x7e   :  { %1338 = vmatpush3.msra.mxu1 %v250_v4  ;;  %1306 = vmatprep.subr.mxu0 %v232_v5  ;;  %v304_v40 = vld [vmem:[%s2347_s1 + $0x8e0] sm:$0xff]  ;;  %v287_v43 = vld [vmem:[%s2347_s1 + $0x858] sm:$0xff]  ;;  %v302_v44 = vld [vmem:[%s2347_s1 + $0x8d0] sm:$0xff] }
  0x7f   :  { %1339 = vmatprep.subr.mxu1 %v265_v6  ;;  %1307 = vmatpush3.msra.mxu0 %v216_v7  ;;  %v288_v41 = vld [vmem:[%s2347_s1 + $0x860] sm:$0xff]  ;;  %v286_v45 = vld [vmem:[%s2347_s1 + $0x850] sm:$0xff]  ;;  %v301_v46 = vld [vmem:[%s2347_s1 + $0x8c8] sm:$0xff] }
  0x80   :  { %1340 = vmatpush3.msra.mxu1 %v249_v9  ;;  %1308 = vmatprep.subr.mxu0 %v231_v10  ;;  %v285_v47 = vld [vmem:[%s2347_s1 + $0x848] sm:$0xff]  ;;  %v300_v49 = vld [vmem:[%s2347_s1 + $0x8c0] sm:$0xff]  ;;  %v299_v51 = vld [vmem:[%s2347_s1 + $0x8b8] sm:$0xff] }
  0x81   :  { %1341 = vmatprep.subr.mxu1 %v264_v11  ;;  %1309 = vmatpush3.msra.mxu0 %v215_v12  ;;  %v284_v50 = vld [vmem:[%s2347_s1 + $0x840] sm:$0xff]  ;;  %v283_v52 = vld [vmem:[%s2347_s1 + $0x838] sm:$0xff]  ;;  %v298_v53 = vld [vmem:[%s2347_s1 + $0x8b0] sm:$0xff] }
  0x82   :  { %1342 = vmatpush3.msra.mxu1 %v248_v13  ;;  %1310 = vmatprep.subr.mxu0 %v230_v14  ;;  %v282_v54 = vld [vmem:[%s2347_s1 + $0x830] sm:$0xff]  ;;  %v297_v55 = vld [vmem:[%s2347_s1 + $0x8a8] sm:$0xff]  ;;  %v296_v57 = vld [vmem:[%s2347_s1 + $0x8a0] sm:$0xff] }
  0x83   :  { %1343 = vmatprep.subr.mxu1 %v263_v16  ;;  %1311 = vmatpush3.msra.mxu0 %v214_v17  ;;  %v281_v56 = vld [vmem:[%s2347_s1 + $0x828] sm:$0xff]  ;;  %v280_v58 = vld [vmem:[%s2347_s1 + $0x820] sm:$0xff]  ;;  %v295_v59 = vld [vmem:[%s2347_s1 + $0x898] sm:$0xff] }
  0x84   :  { %1344 = vmatpush3.msra.mxu1 %v247_v19  ;;  %1312 = vmatprep.subr.mxu0 %v229_v20  ;;  %v279_v60 = vld [vmem:[%s2347_s1 + $0x818] sm:$0xff]  ;;  %v294_v61 = vld [vmem:[%s2347_s1 + $0x890] sm:$0xff]  ;;  %v293_v63 = vld [vmem:[%s2347_s1 + $0x888] sm:$0xff] }
  0x85   :  { %1345 = vmatprep.subr.mxu1 %v262_v21  ;;  %1313 = vmatpush3.msra.mxu0 %v213_v22  ;;  %v278_v62 = vld [vmem:[%s2347_s1 + $0x810] sm:$0xff]  ;;  %v277_v0 = vld [vmem:[%s2347_s1 + $0x808] sm:$0xff]  ;;  %v292_v1 = vld [vmem:[%s2347_s1 + $0x880] sm:$0xff] }
  0x86   :  { %1346 = vmatpush3.msra.mxu1 %v246_v23  ;;  %1314 = vmatprep.subr.mxu0 %v228_v24  ;;  %v276_v2 = vld [vmem:[%s2347_s1 + $0x800] sm:$0xff]  ;;  %s1422_s1 = smov [#allocation2]  }
  0x87   :  { %1347 = vmatprep.subr.mxu1 %v261_v26  ;;  %1315 = vmatpush3.msra.mxu0 %v212_v27  ;;  %v1072_v8 = vld [vmem:[%s2348_s2] ss:$0 sm:$0xff]  ;;  %s1064_s2 = sshll.u32 %s1422_s1, 4  ;;  %s1065_s2 = int_to_ptr.vmem [resolvable:$true] %s1064_s2 }
  0x88   :  { %898 = vmatprep.mubr.f32.mxu0 %v386_v28  ;;  %1348 = vmatpush3.msra.mxu1 %v245_v29  ;;  %s1399_s30 = scalar_lea.vmem %s1065_s2, 32  ;;  %p1404_p1 = scmp.lt.s32.totalorder %s1065_s2, %s1065_s2 }
  0x89   :  { %899 = vmatmul.mubr.f32.vlgmr.msra.gmra.mxu0 %v378_v18  ;;  %1349 = vmatprep.subr.mxu1 %v260_v48  ;;  %p1400_p0 = scmp.ne.s32.totalorder %s1065_s2, %s1399_s30  ;;  %p1405_p2 = scmp.lt.s32.totalorder %s1399_s30, %s1399_s30 }
  0x8a   :  { %1354 = vmatprep.subr.mxu0 %v307_v31  ;;  %1350 = vmatpush3.msra.mxu1 %v244_v32 }
  0x8b   :  { %968 = vmatprep.mubr.f32.mxu1 %v387_v33  ;;  %1355 = vmatpush3.msra.mxu0 %v291_v34  ;;  %p1406_p3 = por %p1405_p2, %p1404_p1 }
  0x8c   :  { %969 = vmatmul.mubr.f32.vlgmr.msra.gmra.mxu1 %v385_v25  ;;  %1356 = vmatprep.subr.mxu0 %v306_v35 }
  0x8d   :  { %1357 = vmatpush3.msra.mxu0 %v290_v37  ;;  %1038 = vmatprep.mubr.f32.mxu0 %v395_v36  ;;  %p1407_p4 = pnand %p1406_p3, %p1400_p0 }
  0x8e   :  { %1358 = vmatprep.subr.mxu0 %v305_v38 }
  0x8f   :  { %1359 = vmatpush3.msra.mxu0 %v289_v39 }
  0x90   :  { %1360 = vmatprep.subr.mxu0 %v304_v40 }
  0x91   :  { %1361 = vmatpush3.msra.mxu0 %v288_v41 }
  0x92   :  { %1362 = vmatprep.subr.mxu0 %v303_v42 }
  0x93   :  { %1363 = vmatpush3.msra.mxu0 %v287_v43 }
  0x94   :  { %1364 = vmatprep.subr.mxu0 %v302_v44 }
  0x95   :  { %1365 = vmatpush3.msra.mxu0 %v286_v45 }
  0x96   :  { %1366 = vmatprep.subr.mxu0 %v301_v46 }
  0x97   :  { %1367 = vmatpush3.msra.mxu0 %v285_v47 }
  0x98   :  { %1368 = vmatprep.subr.mxu0 %v300_v49 }
  0x99   :  { %1369 = vmatpush3.msra.mxu0 %v284_v50 }
  0x9a   :  { %1370 = vmatprep.subr.mxu0 %v299_v51 }
  0x9b   :  { %1371 = vmatpush3.msra.mxu0 %v283_v52 }
  0x9c   :  { %1372 = vmatprep.subr.mxu0 %v298_v53 }
  0x9d   :  { %1373 = vmatpush3.msra.mxu0 %v282_v54 }
  0x9e   :  { %1374 = vmatprep.subr.mxu0 %v297_v55 }
  0x9f   :  { %1375 = vmatpush3.msra.mxu0 %v281_v56 }
  0xa0   :  { %1376 = vmatprep.subr.mxu0 %v296_v57 }
  0xa1   :  { %1377 = vmatpush3.msra.mxu0 %v280_v58 }
  0xa2   :  { %1378 = vmatprep.subr.mxu0 %v295_v59 }
  0xa3   :  { %1379 = vmatpush3.msra.mxu0 %v279_v60 }
  0xa4   :  { %1380 = vmatprep.subr.mxu0 %v294_v61 }
  0xa5   :  { %1381 = vmatpush3.msra.mxu0 %v278_v62 }
  0xa6   :  { %1382 = vmatprep.subr.mxu0 %v293_v63 }
  0xa7   :  { %1383 = vmatpush3.msra.mxu0 %v277_v0 }
  0xa8   :  { %1384 = vmatprep.subr.mxu0 %v292_v1 }
  0xa9   :  { %1385 = vmatpush3.msra.mxu0 %v276_v2 }
  0xaa   :  { %1039 = vmatmul.mubr.f32.vlgmr.msra.gmra.mxu0 %v2233_v30 }
  0xe2   :  { %v1106_v3 = vpop.f32.mrf.mxu0 }
  0xe4   :  { %v1107_v4 = vpop.f32.mrf.mxu0 }
  0xe5   :  { %v1141_v5 = vpop.f32.mrf.mxu1  ;;  %v1108_v7 = vadd.f32 %v1107_v4, %v1106_v3 }
  0xe7   :  { %v1142_v9 = vpop.f32.mrf.mxu1  ;;  %v481_v12 = vadd.f32 %v1108_v7, %v1072_v8 }
  0xe8   :  { %v1143_v13 = vadd.f32 %v1142_v9, %v1141_v5 }
  0xea   :  { %v551_v17 = vadd.f32 %v1143_v13, %v481_v12 }
 0x104   :  { %v1176_v6 = vpop.f32.mrf.mxu0 }
 0x106   :  { %v1177_v10 = vpop.f32.mrf.mxu0 }
 0x107   :  { %v1211_v11 = vpop.f32.mrf.mxu1  ;;  %v1178_v15 = vadd.f32 %v1177_v10, %v1176_v6 }
 0x109   :  { %v1212_v16 = vpop.f32.mrf.mxu1  ;;  %v621_v20 = vadd.f32 %v1178_v15, %v551_v17 }
 0x10a   :  { %v1213_v21 = vadd.f32 %v1212_v16, %v1211_v11 }
 0x10c   :  { %v691_v25 = vadd.f32 %v1213_v21, %v621_v20 }
 0x127   :  { %v1246_v14 = vpop.f32.mrf.mxu0 }
 0x129   :  { %v1247_v18 = vpop.f32.mrf.mxu0 }
 0x12a   :  { %v1281_v19 = vpop.f32.mrf.mxu1  ;;  %v1248_v23 = vadd.f32 %v1247_v18, %v1246_v14 }
 0x12c   :  { %v1282_v24 = vpop.f32.mrf.mxu1  ;;  %v761_v28 = vadd.f32 %v1248_v23, %v691_v25 }
 0x12d   :  { %v1283_v29 = vadd.f32 %v1282_v24, %v1281_v19 }
 0x12f   :  { %v831_v31 = vadd.f32 %v1283_v29, %v761_v28 }
 0x149   :  { %v1316_v22 = vpop.f32.mrf.mxu0 }
 0x14b   :  { %v1317_v26 = vpop.f32.mrf.mxu0 }
 0x14c   :  { %v1351_v27 = vpop.f32.mrf.mxu1  ;;  %v1318_v48 = vadd.f32 %v1317_v26, %v1316_v22 }
 0x14e   :  { %v1352_v30 = vpop.f32.mrf.mxu1  ;;  %v901_v32 = vadd.f32 %v1318_v48, %v831_v31 }
 0x14f   :  { %v1353_v33 = vadd.f32 %v1352_v30, %v1351_v27 }
 0x151   :  { %v971_v36 = vadd.f32 %v1353_v33, %v901_v32 }
 0x16a   :  { %v1386_v34 = vpop.f32.mrf.mxu0 }
 0x16c   :  { %v1387_v35 = vpop.f32.mrf.mxu0 }
 0x16d   :  { %v1388_v37 = vadd.f32 %v1387_v35, %v1386_v34 }
 0x16f   :  { %v1041_v38 = vadd.f32 %v1388_v37, %v971_v36 }
 0x171   :  { %v1045_v39 = vsel %vm1044_vm0, %v1041_v38, -inf }
 0x172   :  { %1046 = vmax.xlane.f32.xlu0 %v1045_v39 }
 0x1fb   :  { %v1047_v40 = vpop.xlane.xlu0 %1046 }
 0x1fc   :  { %v1048_v41 = vsub.f32 %v1041_v38, %v1047_v40 }
 0x1fe   :  { %v1049_v42 = vmul.f32 1.442695, %v1048_v41 }
 0x200   :  { %1395 = vpow2.f32 %v1049_v42 }
 0x20d   :  { %v1396_v43 = vpop.eup %1395 }
 0x20e   :  { %v1051_v44 = vsel %vm1044_vm0, %v1396_v43, 0.0 }
 0x20f   :  { %1052 = vadd.xlane.f32.xlu0 %v1051_v44 }
 0x298   :  { %v1053_v45 = vpop.xlane.xlu0 %1052 }
 0x299   :  { %1397 = vlog2.f32 %v1053_v45 }
 0x2a6   :  { %v1398_v46 = vpop.eup %1397 }
 0x2a7   :  { %v1055_v47 = vmul.f32 0.6931472, %v1398_v46 }
 0x2a9   :  { %v1056_v49 = vsub.f32 %v1048_v41, %v1055_v47 }
 0x2ab   :  { %1057 = vst.msk [vmem:[#allocation2] sm:$0x3] %vm1044_vm0, %v1056_v49 }
 0x2ac   :  { %1410 = shalt.err (!%p1407_p4)
}
 0x2ad   :  { %1067 = dma.vmem_to_hbm [thread:$0]  %s1065_s2, 32, %s2349_s3, [#allocation3]  }
 0x2ae   :  { %1419 = dma.done.wait [#allocation3], 32  }
 0x2af   :  { %1420 = vsyncadd [#allocation3], 4294967264 }
 0x2b0   :  { %1071 = vsyncpa [#allocation3], 1 }

// kernel: cnn_forward.2
= control target key start
LH: loop header
LB: loop body
LE: loop exit
PB: predicated region body
PF: predicated region fallthrough
CT: control target
= control target key end

     0   :  { %14 = vsyncpa [#allocation3], 0  ;;  %s8371_s0 = inlined_call_operand.vmem [shape: f32[2,1,1024], index: 0, kind: input, shape index: {}]   ;;  %s8372_s1 = inlined_call_operand.vmem [shape: f32[32,9], index: 1, kind: input, shape index: {}]   ;;  %s8373_s2 = inlined_call_operand.vmem [shape: f32[32,1], index: 2, kind: input, shape index: {}]   ;;  %s8374_s3 = inlined_call_operand.vmem [shape: f32[32,1], index: 3, kind: input, shape index: {}]   ;;  %s8375_s4 = inlined_call_operand.hbm [shape: f32[863,256], index: 4, kind: input, shape index: {}]   ;;  %s8376_s5 = inlined_call_operand.hbm [shape: f32[64,288], index: 5, kind: input, shape index: {}]   ;;  %s8377_s6 = inlined_call_operand.vmem [shape: f32[64,1], index: 6, kind: input, shape index: {}]   ;;  %s8378_s7 = inlined_call_operand.vmem [shape: f32[64,1], index: 7, kind: input, shape index: {}]   ;;  %s8379_s8 = inlined_call_operand.vmem [shape: f32[153,36], index: 8, kind: input, shape index: {}]   ;;  %s8380_s9 = inlined_call_operand.vmem [shape: f32[2,64,36], index: 9, kind: output, shape index: {}]  }
   0x1   :  { %15 = vsyncpa [#allocation5], 0  ;;  %s4903_s30 = smov 0  }
   0x2 LB: > { %s4823_s10 = smov [#allocation2]   ;;  %s4909_s12 = sadd.s32 4294967295, %s4821_s30   ;;  %s4821_s30 = sphi %s4903_s30, %s21_s30  }
   0x3   : > { %s267_s11 = sshll.u32 %s4823_s10, 4  ;;  %p4440_p0 = scmp.ge.s32.totalorder %s4821_s30, 1  ;;  %s268_s11 = int_to_ptr.vmem [resolvable:$true] %s267_s11 }
   0x4   : > { %p246_p1 = scmp.lt.s32.totalorder %s4821_s30, 3  ;;  %p4531_p3 = scmp.eq.s32.totalorder %s4909_s12, 0 }
   0x5   : > { %s4824_s14 = smov [#allocation4]   ;;  %s4766_s17 = scalar_lea.vmem %s268_s11, 27648 }
   0x6   : > { %p4913_p2 = pnand %p4440_p0, %p246_p1  ;;  %s280_s15 = sshll.u32 %s4824_s14, 4  ;;  %s281_s15 = int_to_ptr.vmem [resolvable:$true] %s280_s15 }
   0x7   : > { %p4767_p7 = scmp.ne.s32.totalorder %s268_s11, %s4766_s17  ;;  %p4774_p10 = scmp.lt.s32.totalorder %s268_s11, %s268_s11 }
   0x8   : > { %p4524_p4 = pneg %p4913_p2  ;;  %p4775_p11 = scmp.lt.s32.totalorder %s4766_s17, %s4766_s17 }
   0xa   : > { %p4922_p5 = pnand %p4531_p3, %p4524_p4  ;;  %p4776_p12 = por %p4775_p11, %p4774_p10 }
   0xc   : > { %p4757_p6 = pneg %p4922_p5 }
   0xe   : > { %p4769_p8 = pnand %p4767_p7, %p4757_p6 }
  0x10   : > { %p4770_p9 = pneg %p4769_p8 }
  0x12   : > { %p4777_p13 = pnand %p4776_p12, %p4770_p9 }
  0x14   : > { %4780 = shalt.err (!%p4777_p13)
}
  0x15   : > { %s4825_s18 = smov 256   ;;  %s4826_s19 = smov 16  }
  0x16   : > { %4527 = dma.hbm_to_vmem [thread:$0]  (!%p4922_p5), %s8375_s4, 27648, %s268_s11, [#allocation3], %s4825_s18, %s4825_s18, %s4826_s19  }
  0x17   : > { %s4792_s22 = scalar_lea.vmem %s281_s15, 3072  ;;  %p4800_p7 = scmp.lt.s32.totalorder %s281_s15, %s281_s15 }
  0x18   : > { %p4793_p0 = scmp.ne.s32.totalorder %s281_s15, %s4792_s22  ;;  %p4801_p8 = scmp.lt.s32.totalorder %s4792_s22, %s4792_s22 }
  0x1a   : > { %p4795_p1 = pnand %p4793_p0, %p4757_p6  ;;  %p4802_p10 = por %p4801_p8, %p4800_p7 }
  0x1c   : > { %p4796_p4 = pneg %p4795_p1 }
  0x1e   : > { %p4803_p9 = pnand %p4802_p10, %p4796_p4 }
  0x20   : > { %4806 = shalt.err (!%p4803_p9)
}
  0x21   : > { %s4827_s23 = smov 384   ;;  %s4828_s24 = smov 24  }
  0x22   : > { %4530 = dma.hbm_to_vmem [thread:$0]  (!%p4922_p5), %s8376_s5, 3072, %s281_s15, [#allocation5], %s4827_s23, %s4827_s23, %s4828_s24  }
  0x23   : > { %312 = sbr.rel (%p4913_p2) target bundleno = 2189 (0x88d), region = 56 }
  0x28   : > { %4812 = dma.done.wait (%p4531_p3), [#allocation3], 27648  }
  0x29   : > { %4814 = vsyncadd (%p4531_p3), [#allocation3], 4294939648 }
  0x2a   : > { %4816 = dma.done.wait (%p4531_p3), [#allocation5], 3072  }
  0x2b   : > { %4818 = vsyncadd (%p4531_p3), [#allocation5], 4294964224  ;;  %v4829_v0 = vmov 1   ;;  %v4830_v1 = vmov 3   ;;  %p351_p2 = scmp.lt.s32.totalorder %s4909_s12, 1  ;;  %v386_v2 = vlaneseq  ;;  %v361_v4 = vld [vmem:[%s8372_s1] sm:$0xff] }
  0x2c   : > { %4573 = vset.pattern.permute.xlu0 %v4829_v0  ;;  %4575 = vset.pattern.permute.xlu1 %v4830_v1  ;;  %v4831_v12 = vmov 2   ;;  %v4832_v13 = vmov 4   ;;  %v4985_v14 = vld [vmem:[%s8372_s1 + $0x8] sm:$0xff]  ;;  %v4833_v15 = vmov 5   ;;  %v4834_v16 = vmov 7   ;;  %v4995_v19 = vld [vmem:[%s8372_s1 + $0x10] sm:$0xff] }
  0x2d   : > { %s9021_s12 = smov (!%p351_p2, %s4909_s12), 1  ;;  %v4959_v3 = vshrl.u32 %v386_v2, 7  ;;  %478 = vperm.xlu0 %4573, %v361_v4   ;;  %941 = vperm.xlu1 %4575, %v361_v4   ;;  %v4835_v17 = vmov 8   ;;  %v4836_v18 = vmov 6   ;;  %v5002_v20 = vld [vmem:[%s8372_s1 + $0x18] sm:$0xff]  ;;  %v4837_v21 = vmov 0  }
  0x2e   : > { %s4447_s27 = sshll.u32 %s9021_s12, 3  ;;  %s4838_s20 = smov 127   ;;  %vm626_vm0 = vcmask 1039360   ;;  %vm855_vm1 = vcmask 1031168   ;;  %vm1084_vm2 = vcmask 785408   ;;  %vm1313_vm3 = vcmask 777216  }
  0x2f   : > { %s354_s10 = scalar_lea.vmem %s8371_s0, %s4447_s27  ;;  %v412_v5 = vsub.s32 6, %v4959_v3  ;;  %v408_v6 = vsub.s32 5, %v4959_v3  ;;  %v495_v8 = vsub.s32 7, %v4959_v3  ;;  %v400_v22 = vsub.s32 3, %v4959_v3  ;;  %s4839_s21 = smov 126  }
  0x30   : > { %v4970_v7 = vld [vmem:[%s354_s10] sm:$0xff]  ;;  %v392_v23 = vsub.s32 1, %v4959_v3  ;;  %v396_v26 = vsub.s32 2, %v4959_v3  ;;  %v388_v27 = vsub.s32 0, %v4959_v3  ;;  %v404_v29 = vsub.s32 4, %v4959_v3  ;;  %s4840_s22 = smov 96  }
  0x31   : > { %v4974_v9 = vrot.slane %v4970_v7, %v412_v5  ;;  %v4977_v10 = vrot.slane %v4970_v7, %v408_v6  ;;  %v4980_v11 = vrot.slane %v4970_v7, %v495_v8  ;;  %4574 = vset.pattern.permute.xlu0 %v4831_v12  ;;  %4576 = vset.pattern.permute.xlu1 %v4832_v13  ;;  %s4841_s23 = smov 95   ;;  %s4842_s24 = smov 94   ;;  %vm1542_vm4 = vcmask 769024  }
  0x32   : > { %712 = vperm.xlu0 %4574, %v361_v4   ;;  %1170 = vperm.xlu1 %4576, %v361_v4   ;;  %v5027_v24 = vrot.slane %v4970_v7, %v400_v22  ;;  %v5030_v25 = vrot.slane %v4970_v7, %v392_v23  ;;  %v5042_v32 = vrot.slane %v4970_v7, %v396_v26  ;;  %s4843_s25 = smov 64   ;;  %s4844_s26 = smov 63   ;;  %vm1771_vm5 = vcmask 523264  }
  0x33   : > { %8576 = vst [vmem:[#allocation8_spill] sm:$0xff] %v4974_v9  ;;  %v5045_v33 = vrot.slane %v4970_v7, %v388_v27  ;;  %v5058_v38 = vrot.slane %v4970_v7, %v404_v29  ;;  %v2314_v27 = vld [vmem:[%s8373_s2] sm:$0xff]  ;;  %s4845_s29 = smov 62   ;;  %vm2000_vm6 = vcmask 515072   ;;  %vm2229_vm7 = vcmask 506880  }
  0x34   : > { %8577 = vst [vmem:[#allocation9_spill] sm:$0xff] %v5027_v24  ;;  %8578 = vst [vmem:[#allocation10_spill] sm:$0xff] %v5030_v25  ;;  %vm3002_vm8 = vcmask 1046528   ;;  %vm3561_vm9 = vcmask 809984   ;;  %vm3445_vm10 = vcmask 932864   ;;  %vm3590_vm11 = vcmask 801792  }
  0x35   : > { %8579 = vst [vmem:[#allocation11_spill] sm:$0xff] %v5042_v32  ;;  %8580 = vst [vmem:[#allocation12_spill] sm:$0xff] %v5045_v33  ;;  %vm3532_vm12 = vcmask 818176   ;;  %vm3503_vm13 = vcmask 916480   ;;  %vm3474_vm14 = vcmask 924672   ;;  %vm3627_vm15 = vcmask 261120  }
  0x36   : > { %4577 = vset.pattern.permute.xlu1 %v4833_v15  ;;  %4580 = vset.pattern.permute.xlu0 %v4829_v0 }
  0x37   : > { %1399 = vperm.xlu1 %4577, %v361_v4   ;;  %482 = vperm.xlu0 %4580, %v4985_v14  }
  0x3b   : > { %4578 = vset.pattern.permute.xlu1 %v4834_v16  ;;  %4583 = vset.pattern.permute.xlu0 %v4830_v1 }
  0x3c   : > { %1857 = vperm.xlu1 %4578, %v361_v4   ;;  %945 = vperm.xlu0 %4583, %v4985_v14  }
  0x40   : > { %4579 = vset.pattern.permute.xlu1 %v4835_v17  ;;  %4588 = vset.pattern.permute.xlu0 %v4833_v15 }
  0x41   : > { %2086 = vperm.xlu1 %4579, %v361_v4   ;;  %1403 = vperm.xlu0 %4588, %v4985_v14  }
  0x45   : > { %4581 = vset.pattern.permute.xlu1 %v4831_v12  ;;  %4589 = vset.pattern.permute.xlu0 %v4836_v18 }
  0x46   : > { %716 = vperm.xlu1 %4581, %v4985_v14   ;;  %1628 = vperm.xlu0 %4589, %v361_v4  }
  0x4a   : > { %4582 = vset.pattern.permute.xlu1 %v4829_v0  ;;  %1632 = vperm.xlu0 %4589, %v4985_v14  }
  0x4b   : > { %486 = vperm.xlu1 %4582, %v4995_v19  }
  0x4e   : > { %4594 = vset.pattern.permute.xlu0 %v4832_v13 }
  0x4f   : > { %4584 = vset.pattern.permute.xlu1 %v4831_v12  ;;  %1182 = vperm.xlu0 %4594, %v5002_v20  }
  0x50   : > { %720 = vperm.xlu1 %4584, %v4995_v19  }
  0x53   : > { %4595 = vset.pattern.permute.xlu0 %v4834_v16 }
  0x54   : > { %4585 = vset.pattern.permute.xlu1 %v4832_v13  ;;  %1861 = vperm.xlu0 %4595, %v4985_v14  }
  0x55   : > { %1174 = vperm.xlu1 %4585, %v4985_v14  }
  0x58   : > { %1865 = vperm.xlu0 %4595, %v4995_v19  }
  0x59   : > { %4586 = vset.pattern.permute.xlu1 %v4829_v0 }
  0x5a   : > { %490 = vperm.xlu1 %4586, %v5002_v20  }
  0x5c   : > { %4600 = vset.pattern.permute.xlu0 %v4835_v17 }
  0x5d   : > { %2094 = vperm.xlu0 %4600, %v4995_v19  }
  0x5e   : > { %4587 = vset.pattern.permute.xlu1 %v4830_v1 }
  0x5f   : > { %949 = vperm.xlu1 %4587, %v4995_v19  }
  0x61   : > { %4601 = vset.pattern.permute.xlu0 %v4837_v21 }
  0x62   : > { %367 = vperm.xlu0 %4601, %v361_v4  }
  0x63   : > { %4590 = vset.pattern.permute.xlu1 %v4831_v12 }
  0x64   : > { %724 = vperm.xlu1 %4590, %v5002_v20  }
  0x68   : > { %4591 = vset.pattern.permute.xlu1 %v4832_v13 }
  0x69   : > { %1178 = vperm.xlu1 %4591, %v4995_v19  }
  0x6d   : > { %4592 = vset.pattern.permute.xlu1 %v4830_v1 }
  0x6e   : > { %953 = vperm.xlu1 %4592, %v5002_v20  }
  0x72   : > { %4593 = vset.pattern.permute.xlu1 %v4833_v15 }
  0x73   : > { %1407 = vperm.xlu1 %4593, %v4995_v19  }
  0x77   : > { %4596 = vset.pattern.permute.xlu1 %v4836_v18 }
  0x78   : > { %1636 = vperm.xlu1 %4596, %v4995_v19  }
  0x7c   : > { %4597 = vset.pattern.permute.xlu1 %v4835_v17 }
  0x7d   : > { %2090 = vperm.xlu1 %4597, %v4985_v14  }
  0x81   : > { %4598 = vset.pattern.permute.xlu1 %v4833_v15 }
  0x82   : > { %1411 = vperm.xlu1 %4598, %v5002_v20  }
  0x86   : > { %4599 = vset.pattern.permute.xlu1 %v4836_v18 }
  0x87   : > { %1640 = vperm.xlu1 %4599, %v5002_v20  }
  0x8b   : > { %4602 = vset.pattern.permute.xlu1 %v4834_v16 }
  0x8c   : > { %1869 = vperm.xlu1 %4602, %v5002_v20  }
  0x90   : > { %4603 = vset.pattern.permute.xlu1 %v4835_v17 }
  0x91   : > { %2098 = vperm.xlu1 %4603, %v5002_v20  }
  0x95   : > { %4604 = vset.pattern.permute.xlu1 %v4837_v21 }
  0xa8   : > { %v5034_v28 = vpop.permute.xlu0 %478  ;;  %v5047_v34 = vpop.permute.xlu1 %941 }
  0xa9   : > { %v501_v30 = vmul.f32 %v5034_v28, %v5027_v24  ;;  %v499_v31 = vmul.f32 %v5034_v28, %v5030_v25  ;;  %v500_v35 = vmul.f32 %v5034_v28, %v5042_v32  ;;  %v498_v36 = vmul.f32 %v5034_v28, %v5045_v33 }
  0xaa   : > { %v502_v41 = vmul.f32 %v5034_v28, %v5058_v38  ;;  %v958_v45 = vmul.f32 %v5047_v34, %v5042_v32  ;;  %v960_v48 = vmul.f32 %v5047_v34, %v5058_v38  ;;  %v957_v52 = vmul.f32 %v5047_v34, %v5030_v25 }
  0xab   : > { %568 = vrot.lane.b32.xlu0 %v501_v30, %s4838_s20  ;;  %564 = vrot.lane.b32.xlu1 %v499_v31, %s4838_s20  ;;  %v959_v56 = vmul.f32 %v5047_v34, %v5027_v24  ;;  %v956_v59 = vmul.f32 %v5047_v34, %v5045_v33 }
  0xad   : > { %v5055_v37 = vpop.permute.xlu0 %712  ;;  %v5060_v39 = vpop.permute.xlu1 %1170 }
  0xae   : > { %v729_v40 = vmul.f32 %v5055_v37, %v5042_v32  ;;  %v728_v43 = vmul.f32 %v5055_v37, %v5030_v25  ;;  %v731_v44 = vmul.f32 %v5055_v37, %v5058_v38  ;;  %v730_v47 = vmul.f32 %v5055_v37, %v5027_v24 }
  0xaf   : > { %566 = vrot.lane.b32.xlu1 %v500_v35, %s4838_s20  ;;  %562 = vrot.lane.b32.xlu0 %v498_v36, %s4838_s20  ;;  %v727_v50 = vmul.f32 %v5055_v37, %v5045_v33  ;;  %v1187_v51 = vmul.f32 %v5060_v39, %v5042_v32  ;;  %v1189_v55 = vmul.f32 %v5060_v39, %v5058_v38 }
  0xb0   : > { %v1185_v60 = vmul.f32 %v5060_v39, %v5045_v33  ;;  %v1186_v62 = vmul.f32 %v5060_v39, %v5030_v25  ;;  %v1188_v2 = vmul.f32 %v5060_v39, %v5027_v24 }
  0xb2   : > { %v5068_v42 = vpop.permute.xlu1 %1399  ;;  %v5100_v54 = vpop.permute.xlu0 %482 }
  0xb3   : > { %570 = vrot.lane.b32.xlu1 %v502_v41, %s4838_s20  ;;  %795 = vrot.lane.b32.xlu0 %v729_v40, %s4839_s21  ;;  %v1416_v63 = vmul.f32 %v5068_v42, %v5042_v32  ;;  %v1418_v3 = vmul.f32 %v5068_v42, %v5058_v38  ;;  %v1415_v5 = vmul.f32 %v5068_v42, %v5030_v25 }
  0xb4   : > { %v1414_v6 = vmul.f32 %v5068_v42, %v5045_v33  ;;  %v1417_v12 = vmul.f32 %v5068_v42, %v5027_v24 }
  0xb7   : > { %793 = vrot.lane.b32.xlu1 %v728_v43, %s4839_s21  ;;  %799 = vrot.lane.b32.xlu0 %v731_v44, %s4839_s21  ;;  %v5080_v46 = vpop.permute.xlu1 %1857  ;;  %v5112_v58 = vpop.permute.xlu0 %945 }
  0xb8   : > { %8581 = vst [vmem:[#allocation13_spill] sm:$0xff] %v5080_v46  ;;  %v1873_v18 = vmul.f32 %v5080_v46, %v5030_v25  ;;  %v1875_v23 = vmul.f32 %v5080_v46, %v5027_v24  ;;  %v1874_v29 = vmul.f32 %v5080_v46, %v5042_v32  ;;  %v1876_v30 = vmul.f32 %v5080_v46, %v5058_v38 }
  0xb9   : > { %v1872_v36 = vmul.f32 %v5080_v46, %v5045_v33 }
  0xbb   : > { %797 = vrot.lane.b32.xlu1 %v730_v47, %s4839_s21  ;;  %1024 = vrot.lane.b32.xlu0 %v958_v45, %s4840_s22  ;;  %v504_v47 = vmul.f32 %v5034_v28, %v4974_v9 }
  0xbc   : > { %v5088_v49 = vpop.permute.xlu1 %2086  ;;  %v5126_v0 = vpop.permute.xlu0 %1403 }
  0xbd   : > { %8582 = vst [vmem:[#allocation14_spill] sm:$0xff] %v5088_v49  ;;  %v2103_v31 = vmul.f32 %v5088_v49, %v5042_v32  ;;  %v2105_v40 = vmul.f32 %v5088_v49, %v5058_v38  ;;  %v2102_v43 = vmul.f32 %v5088_v49, %v5030_v25  ;;  %v2101_v44 = vmul.f32 %v5088_v49, %v5045_v33 }
  0xbe   : > { %v2104_v45 = vmul.f32 %v5088_v49, %v5027_v24 }
  0xbf   : > { %791 = vrot.lane.b32.xlu1 %v727_v50, %s4839_s21  ;;  %1028 = vrot.lane.b32.xlu0 %v960_v48, %s4840_s22 }
  0xc1   : > { %v5098_v53 = vpop.permute.xlu1 %716  ;;  %v5138_v4 = vpop.permute.xlu0 %1628 }
  0xc2   : > { %v1645_v8 = vmul.f32 %v5138_v4, %v5042_v32  ;;  %v1644_v13 = vmul.f32 %v5138_v4, %v5030_v25  ;;  %v1647_v15 = vmul.f32 %v5138_v4, %v5058_v38  ;;  %v1646_v17 = vmul.f32 %v5138_v4, %v5027_v24 }
  0xc3   : > { %1022 = vrot.lane.b32.xlu1 %v957_v52, %s4840_s22  ;;  %1253 = vrot.lane.b32.xlu0 %v1187_v51, %s4841_s23  ;;  %v1643_v22 = vmul.f32 %v5138_v4, %v5045_v33  ;;  %v2366_v51 = vld [vmem:[%s8374_s3] sm:$0xff]  ;;  %v733_v52 = vmul.f32 %v5055_v37, %v4974_v9 }
  0xc5   : > { %v5212_v50 = vpop.permute.xlu0 %1632 }
  0xc6   : > { %v5108_v57 = vpop.permute.xlu1 %486 }
  0xc7   : > { %1026 = vrot.lane.b32.xlu1 %v959_v56, %s4840_s22  ;;  %1257 = vrot.lane.b32.xlu0 %v1189_v55, %s4841_s23 }
  0xca   : > { %v5224_v56 = vpop.permute.xlu0 %1182 }
  0xcb   : > { %1020 = vrot.lane.b32.xlu1 %v956_v59, %s4840_s22  ;;  %1249 = vrot.lane.b32.xlu0 %v1185_v60, %s4841_s23  ;;  %v5120_v61 = vpop.permute.xlu1 %720  ;;  %v503_v59 = vmul.f32 %v5034_v28, %v4977_v10  ;;  %v961_v60 = vmul.f32 %v5047_v34, %v4977_v10 }
  0xcf   : > { %1251 = vrot.lane.b32.xlu1 %v1186_v62, %s4841_s23  ;;  %1482 = vrot.lane.b32.xlu0 %v1416_v63, %s4842_s24  ;;  %v732_v62 = vmul.f32 %v5055_v37, %v4977_v10  ;;  %v1190_v63 = vmul.f32 %v5060_v39, %v4977_v10 }
  0xd0   : > { %v5130_v1 = vpop.permute.xlu1 %1174 }
  0xd3   : > { %1255 = vrot.lane.b32.xlu1 %v1188_v2, %s4841_s23  ;;  %1486 = vrot.lane.b32.xlu0 %v1418_v3, %s4842_s24  ;;  %v5238_v3 = vpop.permute.xlu0 %1861 }
  0xd5   : > { %v5144_v7 = vpop.permute.xlu1 %490 }
  0xd7   : > { %1480 = vrot.lane.b32.xlu1 %v1415_v5, %s4842_s24  ;;  %1478 = vrot.lane.b32.xlu0 %v1414_v6, %s4842_s24  ;;  %v5246_v6 = vpop.permute.xlu0 %1865 }
  0xd8   : > { %8583 = vst [vmem:[#allocation15_spill] sm:$0xff] %v5246_v6 }
  0xda   : > { %v5158_v16 = vpop.permute.xlu1 %949 }
  0xdb   : > { %1484 = vrot.lane.b32.xlu1 %v1417_v12, %s4842_s24  ;;  %1711 = vrot.lane.b32.xlu0 %v1645_v8, %s4843_s25  ;;  %v962_v8 = vmul.f32 %v5047_v34, %v4974_v9  ;;  %v1420_v12 = vmul.f32 %v5068_v42, %v4974_v9 }
  0xdf   : > { %1709 = vrot.lane.b32.xlu1 %v1644_v13, %s4843_s25  ;;  %1715 = vrot.lane.b32.xlu0 %v1647_v15, %s4843_s25  ;;  %v5166_v21 = vpop.permute.xlu1 %724  ;;  %v1191_v13 = vmul.f32 %v5060_v39, %v4974_v9  ;;  %v5260_v15 = vpop.permute.xlu0 %2094 }
  0xe0   : > { %8584 = vst [vmem:[#allocation16_spill] sm:$0xff] %v5260_v15 }
  0xe3   : > { %1713 = vrot.lane.b32.xlu1 %v1646_v17, %s4843_s25  ;;  %1938 = vrot.lane.b32.xlu0 %v1873_v18, %s4844_s26  ;;  %v1419_v17 = vmul.f32 %v5068_v42, %v4977_v10  ;;  %v510_v18 = vmul.f32 %v5100_v54, %v5058_v38 }
  0xe4   : > { %v5176_v26 = vpop.permute.xlu1 %1178 }
  0xe7   : > { %1707 = vrot.lane.b32.xlu1 %v1643_v22, %s4843_s25  ;;  %1942 = vrot.lane.b32.xlu0 %v1875_v23, %s4844_s26  ;;  %v5272_v23 = vpop.permute.xlu0 %367 }
  0xe8   : > { %8586 = vst [vmem:[#allocation18_spill] sm:$0xff] %v5272_v23 }
  0xe9   : > { %v5188_v35 = vpop.permute.xlu1 %953 }
  0xeb   : > { %1940 = vrot.lane.b32.xlu1 %v1874_v29, %s4844_s26  ;;  %2320 = vperm.xlu0 %4601, %v2314_v27   ;;  %v507_v27 = vmul.f32 %v5100_v54, %v5030_v25  ;;  %v1648_v29 = vmul.f32 %v5138_v4, %v4977_v10 }
  0xee   : > { %v5198_v41 = vpop.permute.xlu1 %1407 }
  0xef   : > { %1944 = vrot.lane.b32.xlu1 %v1876_v30, %s4844_s26  ;;  %2169 = vrot.lane.b32.xlu0 %v2103_v31, %s4845_s29 }
  0xf3   : > { %1936 = vrot.lane.b32.xlu1 %v1872_v36, %s4844_s26  ;;  %2173 = vrot.lane.b32.xlu0 %v2105_v40, %s4845_s29  ;;  %v5210_v48 = vpop.permute.xlu1 %1636  ;;  %v509_v36 = vmul.f32 %v5100_v54, %v5027_v24 }
  0xf7   : > { %2167 = vrot.lane.b32.xlu1 %v2102_v43, %s4845_s29  ;;  %2165 = vrot.lane.b32.xlu0 %v2101_v44, %s4845_s29  ;;  %v506_v44 = vmul.f32 %v5100_v54, %v5045_v33 }
  0xf8   : > { %v5222_v55 = vpop.permute.xlu1 %2090 }
  0xfb   : > { %2171 = vrot.lane.b32.xlu1 %v2104_v45, %s4845_s29  ;;  %574 = vrot.lane.b32.xlu0 %v504_v47, %s4838_s20  ;;  %v512_v45 = vmul.f32 %v5100_v54, %v4974_v9 }
  0xfd   : > { %v5236_v2 = vpop.permute.xlu1 %1411 }
  0xff   : > { %2372 = vperm.xlu1 %4604, %v2366_v51   ;;  %803 = vrot.lane.b32.xlu0 %v733_v52, %s4839_s21  ;;  %v737_v52 = vmul.f32 %v5098_v53, %v5042_v32 }
 0x102   : > { %v5244_v5 = vpop.permute.xlu1 %1640 }
 0x103   : > { %572 = vrot.lane.b32.xlu1 %v503_v59, %s4838_s20  ;;  %1030 = vrot.lane.b32.xlu0 %v961_v60, %s4840_s22 }
 0x107   : > { %801 = vrot.lane.b32.xlu1 %v732_v62, %s4839_s21  ;;  %1259 = vrot.lane.b32.xlu0 %v1190_v63, %s4841_s23  ;;  %v511_v62 = vmul.f32 %v5100_v54, %v4977_v10  ;;  %v739_v63 = vmul.f32 %v5098_v53, %v5058_v38 }
 0x10b   : > { %372 = vperm.xlu1 %4604, %v4985_v14   ;;  %377 = vperm.xlu0 %4601, %v4995_v19   ;;  %v508_v14 = vmul.f32 %v5100_v54, %v5042_v32  ;;  %v5258_v19 = vpop.permute.xlu1 %1869 }
 0x10f   : > { %1032 = vrot.lane.b32.xlu1 %v962_v8, %s4840_s22  ;;  %1490 = vrot.lane.b32.xlu0 %v1420_v12, %s4842_s24  ;;  %v5270_v22 = vpop.permute.xlu1 %2098 }
 0x110   : > { %8585 = vst [vmem:[#allocation17_spill] sm:$0xff] %v5270_v22 }
 0x113   : > { %1261 = vrot.lane.b32.xlu1 %v1191_v13, %s4841_s23  ;;  %582 = vrot.lane.b32.xlu0 %v508_v14, %s4838_s20  ;;  %v736_v13 = vmul.f32 %v5098_v53, %v5030_v25  ;;  %v1877_v14 = vmul.f32 %v5080_v46, %v4977_v10 }
 0x117   : > { %1488 = vrot.lane.b32.xlu1 %v1419_v17, %s4842_s24  ;;  %586 = vrot.lane.b32.xlu0 %v510_v18, %s4838_s20 }
 0x11b   : > { %580 = vrot.lane.b32.xlu1 %v507_v27, %s4838_s20  ;;  %1717 = vrot.lane.b32.xlu0 %v1648_v29, %s4843_s25  ;;  %v738_v27 = vmul.f32 %v5098_v53, %v5027_v24  ;;  %v515_v29 = vmul.f32 %v5108_v57, %v5030_v25 }
 0x11d   : > { %v5280_v30 = vpop.permute.xlu0 %568  ;;  %v5282_v31 = vpop.permute.xlu1 %564 }
 0x11f   : > { %584 = vrot.lane.b32.xlu1 %v509_v36, %s4838_s20  ;;  %382 = vperm.xlu0 %4601, %v5002_v20   ;;  %v1649_v20 = vmul.f32 %v5138_v4, %v4974_v9 }
 0x121   : > { %v5288_v40 = vpop.permute.xlu1 %566  ;;  %v5290_v43 = vpop.permute.xlu0 %562 }
 0x123   : > { %578 = vrot.lane.b32.xlu1 %v506_v44, %s4838_s20  ;;  %590 = vrot.lane.b32.xlu0 %v512_v45, %s4838_s20  ;;  %v735_v45 = vmul.f32 %v5098_v53, %v5045_v33 }
 0x125   : > { %v5298_v47 = vpop.permute.xlu1 %570  ;;  %v5300_v51 = vpop.permute.xlu0 %795 }
 0x127   : > { %1719 = vrot.lane.b32.xlu1 %v1649_v20, %s4843_s25  ;;  %811 = vrot.lane.b32.xlu0 %v737_v52, %s4839_s21  ;;  %v517_v20 = vmul.f32 %v5108_v57, %v5027_v24 }
 0x129   : > { %v5308_v59 = vpop.permute.xlu1 %793  ;;  %v5310_v60 = vpop.permute.xlu0 %799 }
 0x12b   : > { %588 = vrot.lane.b32.xlu1 %v511_v62, %s4838_s20  ;;  %815 = vrot.lane.b32.xlu0 %v739_v63, %s4839_s21  ;;  %v1878_v63 = vmul.f32 %v5080_v46, %v4974_v9 }
 0x12d   : > { %v5318_v8 = vpop.permute.xlu1 %797  ;;  %v5320_v12 = vpop.permute.xlu0 %1024 }
 0x12f   : > { %809 = vrot.lane.b32.xlu1 %v736_v13, %s4839_s21  ;;  %1946 = vrot.lane.b32.xlu0 %v1877_v14, %s4844_s26  ;;  %v740_v13 = vmul.f32 %v5098_v53, %v4977_v10 }
 0x131   : > { %v5328_v17 = vpop.permute.xlu1 %791  ;;  %v5330_v18 = vpop.permute.xlu0 %1028 }
 0x133   : > { %813 = vrot.lane.b32.xlu1 %v738_v27, %s4839_s21  ;;  %596 = vrot.lane.b32.xlu0 %v515_v29, %s4838_s20  ;;  %v516_v29 = vmul.f32 %v5108_v57, %v5042_v32 }
 0x135   : > { %v5338_v36 = vpop.permute.xlu1 %1022  ;;  %v5340_v44 = vpop.permute.xlu0 %1253 }
 0x137   : > { %807 = vrot.lane.b32.xlu1 %v735_v45, %s4839_s21  ;;  %600 = vrot.lane.b32.xlu0 %v517_v20, %s4838_s20  ;;  %v965_v45 = vmul.f32 %v5112_v58, %v5030_v25 }
 0x139   : > { %v5348_v52 = vpop.permute.xlu1 %1026  ;;  %v5350_v62 = vpop.permute.xlu0 %1257 }
 0x13a   : > { %8587 = vst [vmem:[#allocation19_spill] sm:$0xff] %v5350_v62 }
 0x13b   : > { %1948 = vrot.lane.b32.xlu1 %v1878_v63, %s4844_s26  ;;  %817 = vrot.lane.b32.xlu0 %v740_v13, %s4839_s21  ;;  %v518_v63 = vmul.f32 %v5108_v57, %v5058_v38  ;;  %v967_v13 = vmul.f32 %v5112_v58, %v5027_v24 }
 0x13d   : > { %v5358_v14 = vpop.permute.xlu1 %1020  ;;  %v5360_v27 = vpop.permute.xlu0 %1249 }
 0x13e   : > { %8588 = vst [vmem:[#allocation20_spill] sm:$0xff] %v5360_v27 }
 0x13f   : > { %598 = vrot.lane.b32.xlu1 %v516_v29, %s4838_s20  ;;  %1038 = vrot.lane.b32.xlu0 %v965_v45, %s4840_s22  ;;  %v741_v29 = vmul.f32 %v5098_v53, %v4974_v9  ;;  %v514_v45 = vmul.f32 %v5108_v57, %v5045_v33 }
 0x141   : > { %v5368_v20 = vpop.permute.xlu1 %1251  ;;  %v5370_v46 = vpop.permute.xlu0 %1482 }
 0x142   : > { %8589 = vst [vmem:[#allocation21_spill] sm:$0xff] %v5370_v46 }
 0x143   : > { %602 = vrot.lane.b32.xlu1 %v518_v63, %s4838_s20  ;;  %1042 = vrot.lane.b32.xlu0 %v967_v13, %s4840_s22  ;;  %v966_v63 = vmul.f32 %v5112_v58, %v5042_v32  ;;  %v2106_v13 = vmul.f32 %v5088_v49, %v4977_v10 }
 0x145   : > { %v5378_v22 = vpop.permute.xlu1 %1255  ;;  %v5380_v62 = vpop.permute.xlu0 %1486 }
 0x146   : > { %8590 = vst [vmem:[#allocation22_spill] sm:$0xff] %v5378_v22  ;;  %8591 = vst [vmem:[#allocation23_spill] sm:$0xff] %v5380_v62 }
 0x147   : > { %819 = vrot.lane.b32.xlu1 %v741_v29, %s4839_s21  ;;  %594 = vrot.lane.b32.xlu0 %v514_v45, %s4838_s20  ;;  %v968_v29 = vmul.f32 %v5112_v58, %v5058_v38  ;;  %v519_v45 = vmul.f32 %v5108_v57, %v4977_v10 }
 0x149   : > { %v5388_v46 = vpop.permute.xlu1 %1480  ;;  %v5394_v27 = vpop.permute.xlu0 %1478 }
 0x14a   : > { %8592 = vst [vmem:[#allocation24_spill] sm:$0xff] %v5388_v46  ;;  %8593 = vst [vmem:[#allocation25_spill] sm:$0xff] %v5394_v27 }
 0x14b   : > { %1040 = vrot.lane.b32.xlu1 %v966_v63, %s4840_s22  ;;  %2175 = vrot.lane.b32.xlu0 %v2106_v13, %s4845_s29  ;;  %v964_v63 = vmul.f32 %v5112_v58, %v5045_v33  ;;  %v744_v13 = vmul.f32 %v5120_v61, %v5030_v25 }
 0x14d   : > { %v5398_v62 = vpop.permute.xlu1 %1484  ;;  %v5406_v46 = vpop.permute.xlu0 %1711 }
 0x14e   : > { %8594 = vst [vmem:[#allocation26_spill] sm:$0xff] %v5406_v46 }
 0x14f   : > { %1044 = vrot.lane.b32.xlu1 %v968_v29, %s4840_s22  ;;  %604 = vrot.lane.b32.xlu0 %v519_v45, %s4838_s20  ;;  %v2107_v29 = vmul.f32 %v5088_v49, %v4974_v9  ;;  %v746_v45 = vmul.f32 %v5120_v61, %v5027_v24 }
 0x151   : > { %v5408_v22 = vpop.permute.xlu1 %1709  ;;  %v5422_v46 = vpop.permute.xlu0 %1715 }
 0x152   : > { %8595 = vst [vmem:[#allocation27_spill] sm:$0xff] %v5408_v22  ;;  %8597 = vst [vmem:[#allocation29_spill] sm:$0xff] %v5422_v46  ;;  %v745_v46 = vmul.f32 %v5120_v61, %v5042_v32 }
 0x153   : > { %1036 = vrot.lane.b32.xlu1 %v964_v63, %s4840_s22  ;;  %825 = vrot.lane.b32.xlu0 %v744_v13, %s4839_s21  ;;  %v520_v63 = vmul.f32 %v5108_v57, %v4974_v9  ;;  %v969_v13 = vmul.f32 %v5112_v58, %v4977_v10 }
 0x155   : > { %v5416_v27 = vpop.permute.xlu1 %1713  ;;  %v5434_v49 = vpop.permute.xlu0 %1938 }
 0x156   : > { %8596 = vst [vmem:[#allocation28_spill] sm:$0xff] %v5416_v27  ;;  %8599 = vst [vmem:[#allocation31_spill] sm:$0xff] %v5434_v49 }
 0x157   : > { %2177 = vrot.lane.b32.xlu1 %v2107_v29, %s4845_s29  ;;  %829 = vrot.lane.b32.xlu0 %v746_v45, %s4839_s21  ;;  %v1194_v29 = vmul.f32 %v5130_v1, %v5030_v25 }
 0x159   : > { %v5426_v22 = vpop.permute.xlu1 %1707 }
 0x15a   : > { %8598 = vst [vmem:[#allocation30_spill] sm:$0xff] %v5426_v22  ;;  %v747_v22 = vmul.f32 %v5120_v61, %v5058_v38 }
 0x15b   : > { %606 = vrot.lane.b32.xlu1 %v520_v63, %s4838_s20  ;;  %1046 = vrot.lane.b32.xlu0 %v969_v13, %s4840_s22  ;;  %v1196_v63 = vmul.f32 %v5130_v1, %v5027_v24  ;;  %v5448_v13 = vpop.permute.xlu0 %1942 }
 0x15c   : > { %8601 = vst [vmem:[#allocation33_spill] sm:$0xff] %v5448_v13  ;;  %v1195_v13 = vmul.f32 %v5130_v1, %v5042_v32 }
 0x15d   : > { %v5440_v45 = vpop.permute.xlu1 %1940 }
 0x15e   : > { %8600 = vst [vmem:[#allocation32_spill] sm:$0xff] %v5440_v45  ;;  %v970_v45 = vmul.f32 %v5112_v58, %v4974_v9 }
 0x15f   : > { %827 = vrot.lane.b32.xlu1 %v745_v46, %s4839_s21  ;;  %1267 = vrot.lane.b32.xlu0 %v1194_v29, %s4841_s23  ;;  %v743_v46 = vmul.f32 %v5120_v61, %v5045_v33 }
 0x161   : > { %v5452_v49 = vpop.permute.xlu1 %1944 }
 0x162   : > { %8602 = vst [vmem:[#allocation34_spill] sm:$0xff] %v5452_v49 }
 0x163   : > { %831 = vrot.lane.b32.xlu1 %v747_v22, %s4839_s21  ;;  %1271 = vrot.lane.b32.xlu0 %v1196_v63, %s4841_s23  ;;  %v523_v22 = vmul.f32 %v5144_v7, %v5030_v25 }
 0x165   : > { %v5466_v63 = vpop.permute.xlu1 %1936 }
 0x166   : > { %v5458_v29 = vpop.permute.xlu0 %2320  ;;  %8604 = vst [vmem:[#allocation36_spill] sm:$0xff] %v5466_v63 }
 0x167   : > { %8603 = vst [vmem:[#allocation35_spill] sm:$0xff] %v5458_v29  ;;  %1048 = vrot.lane.b32.xlu1 %v970_v45, %s4840_s22  ;;  %823 = vrot.lane.b32.xlu0 %v743_v46, %s4839_s21  ;;  %v1197_v29 = vmul.f32 %v5130_v1, %v5058_v38  ;;  %v525_v45 = vmul.f32 %v5144_v7, %v5027_v24 }
 0x169   : > { %v5480_v27 = vpop.permute.xlu1 %2167 }
 0x16a   : > { %v5468_v49 = vpop.permute.xlu0 %2169  ;;  %8607 = vst [vmem:[#allocation39_spill] sm:$0xff] %v5480_v27 }
 0x16b   : > { %8605 = vst [vmem:[#allocation37_spill] sm:$0xff] %v5468_v49  ;;  %1269 = vrot.lane.b32.xlu1 %v1195_v13, %s4841_s23  ;;  %612 = vrot.lane.b32.xlu0 %v523_v22, %s4838_s20  ;;  %v1193_v49 = vmul.f32 %v5130_v1, %v5045_v33  ;;  %v748_v13 = vmul.f32 %v5120_v61, %v4977_v10 }
 0x16e   : > { %v5476_v46 = vpop.permute.xlu0 %2173 }
 0x16f   : > { %8606 = vst [vmem:[#allocation38_spill] sm:$0xff] %v5476_v46  ;;  %1273 = vrot.lane.b32.xlu1 %v1197_v29, %s4841_s23  ;;  %616 = vrot.lane.b32.xlu0 %v525_v45, %s4838_s20  ;;  %v524_v46 = vmul.f32 %v5144_v7, %v5042_v32  ;;  %v973_v29 = vmul.f32 %v5158_v16, %v5030_v25  ;;  %v5494_v45 = vpop.permute.xlu1 %2171 }
 0x170   : > { %8609 = vst [vmem:[#allocation41_spill] sm:$0xff] %v5494_v45 }
 0x172   : > { %v5486_v22 = vpop.permute.xlu0 %2165 }
 0x173   : > { %8608 = vst [vmem:[#allocation40_spill] sm:$0xff] %v5486_v22  ;;  %1265 = vrot.lane.b32.xlu1 %v1193_v49, %s4841_s23  ;;  %833 = vrot.lane.b32.xlu0 %v748_v13, %s4839_s21  ;;  %v526_v22 = vmul.f32 %v5144_v7, %v5058_v38  ;;  %v975_v49 = vmul.f32 %v5158_v16, %v5027_v24 }
 0x176   : > { %v5496_v27 = vpop.permute.xlu0 %574 }
 0x177   : > { %8610 = vst [vmem:[#allocation42_spill] sm:$0xff] %v5496_v27  ;;  %614 = vrot.lane.b32.xlu1 %v524_v46, %s4838_s20  ;;  %1054 = vrot.lane.b32.xlu0 %v973_v29, %s4840_s22  ;;  %v749_v27 = vmul.f32 %v5120_v61, %v4974_v9  ;;  %v1198_v46 = vmul.f32 %v5130_v1, %v4977_v10 }
 0x17a   : > { %v5504_v13 = vpop.permute.xlu1 %2372  ;;  %v5506_v63 = vpop.permute.xlu0 %803 }
 0x17b   : > { %8611 = vst [vmem:[#allocation43_spill] sm:$0xff] %v5504_v13  ;;  %8612 = vst [vmem:[#allocation44_spill] sm:$0xff] %v5506_v63  ;;  %618 = vrot.lane.b32.xlu1 %v526_v22, %s4838_s20  ;;  %1058 = vrot.lane.b32.xlu0 %v975_v49, %s4840_s22  ;;  %v974_v63 = vmul.f32 %v5158_v16, %v5042_v32  ;;  %v1423_v22 = vmul.f32 %v5126_v0, %v5030_v25 }
 0x17e   : > { %v5514_v29 = vpop.permute.xlu1 %572  ;;  %v5516_v45 = vpop.permute.xlu0 %1030 }
 0x17f   : > { %8613 = vst [vmem:[#allocation45_spill] sm:$0xff] %v5514_v29  ;;  %8614 = vst [vmem:[#allocation46_spill] sm:$0xff] %v5516_v45  ;;  %835 = vrot.lane.b32.xlu1 %v749_v27, %s4839_s21  ;;  %1275 = vrot.lane.b32.xlu0 %v1198_v46, %s4841_s23  ;;  %v976_v45 = vmul.f32 %v5158_v16, %v5058_v38  ;;  %v1425_v27 = vmul.f32 %v5126_v0, %v5027_v24 }
 0x182   : > { %v5524_v49 = vpop.permute.xlu1 %801  ;;  %v5526_v13 = vpop.permute.xlu0 %1259 }
 0x183   : > { %8615 = vst [vmem:[#allocation47_spill] sm:$0xff] %v5524_v49  ;;  %8616 = vst [vmem:[#allocation48_spill] sm:$0xff] %v5526_v13  ;;  %1056 = vrot.lane.b32.xlu1 %v974_v63, %s4840_s22  ;;  %1496 = vrot.lane.b32.xlu0 %v1423_v22, %s4842_s24  ;;  %v1199_v13 = vmul.f32 %v5130_v1, %v4974_v9  ;;  %v522_v63 = vmul.f32 %v5144_v7, %v5045_v33 }
 0x186   : > { %v5534_v46 = vpop.permute.xlu1 %372  ;;  %v5536_v29 = vpop.permute.xlu0 %377 }
 0x187   : > { %8617 = vst [vmem:[#allocation49_spill] sm:$0xff] %v5534_v46  ;;  %8618 = vst [vmem:[#allocation50_spill] sm:$0xff] %v5536_v29  ;;  %1060 = vrot.lane.b32.xlu1 %v976_v45, %s4840_s22  ;;  %1500 = vrot.lane.b32.xlu0 %v1425_v27, %s4842_s24  ;;  %v1424_v29 = vmul.f32 %v5126_v0, %v5042_v32  ;;  %v1422_v45 = vmul.f32 %v5126_v0, %v5045_v33 }
 0x18a   : > { %v5544_v22 = vpop.permute.xlu1 %1032  ;;  %v5546_v49 = vpop.permute.xlu0 %1490 }
 0x18b   : > { %8619 = vst [vmem:[#allocation51_spill] sm:$0xff] %v5544_v22  ;;  %8620 = vst [vmem:[#allocation52_spill] sm:$0xff] %v5546_v49  ;;  %1277 = vrot.lane.b32.xlu1 %v1199_v13, %s4841_s23  ;;  %610 = vrot.lane.b32.xlu0 %v522_v63, %s4838_s20  ;;  %v1426_v49 = vmul.f32 %v5126_v0, %v5058_v38  ;;  %v528_v13 = vmul.f32 %v5144_v7, %v4974_v9 }
 0x18e   : > { %v5554_v27 = vpop.permute.xlu1 %1261  ;;  %v5556_v46 = vpop.permute.xlu0 %582 }
 0x18f   : > { %8621 = vst [vmem:[#allocation53_spill] sm:$0xff] %v5554_v27  ;;  %8622 = vst [vmem:[#allocation54_spill] sm:$0xff] %v5556_v46  ;;  %1498 = vrot.lane.b32.xlu1 %v1424_v29, %s4842_s24  ;;  %1494 = vrot.lane.b32.xlu0 %v1422_v45, %s4842_s24  ;;  %v972_v46 = vmul.f32 %v5158_v16, %v5045_v33  ;;  %v753_v29 = vmul.f32 %v5166_v21, %v5042_v32 }
 0x192   : > { %v5564_v63 = vpop.permute.xlu1 %1488  ;;  %v5566_v22 = vpop.permute.xlu0 %586 }
 0x193   : > { %8623 = vst [vmem:[#allocation55_spill] sm:$0xff] %v5564_v63  ;;  %8624 = vst [vmem:[#allocation56_spill] sm:$0xff] %v5566_v22  ;;  %1502 = vrot.lane.b32.xlu1 %v1426_v49, %s4842_s24  ;;  %622 = vrot.lane.b32.xlu0 %v528_v13, %s4838_s20  ;;  %v527_v22 = vmul.f32 %v5144_v7, %v4977_v10  ;;  %v755_v49 = vmul.f32 %v5166_v21, %v5058_v38 }
 0x196   : > { %v5574_v45 = vpop.permute.xlu1 %580  ;;  %v5576_v27 = vpop.permute.xlu0 %1717 }
 0x197   : > { %8625 = vst [vmem:[#allocation57_spill] sm:$0xff] %v5574_v45  ;;  %8626 = vst [vmem:[#allocation58_spill] sm:$0xff] %v5576_v27  ;;  %1052 = vrot.lane.b32.xlu1 %v972_v46, %s4840_s22  ;;  %843 = vrot.lane.b32.xlu0 %v753_v29, %s4839_s21  ;;  %v752_v27 = vmul.f32 %v5166_v21, %v5030_v25  ;;  %v978_v46 = vmul.f32 %v5158_v16, %v4974_v9 }
 0x19a   : > { %v5584_v13 = vpop.permute.xlu1 %584  ;;  %v5586_v63 = vpop.permute.xlu0 %382 }
 0x19b   : > { %8627 = vst [vmem:[#allocation59_spill] sm:$0xff] %v5584_v13  ;;  %8628 = vst [vmem:[#allocation60_spill] sm:$0xff] %v5586_v63  ;;  %620 = vrot.lane.b32.xlu1 %v527_v22, %s4838_s20  ;;  %847 = vrot.lane.b32.xlu0 %v755_v49, %s4839_s21  ;;  %v754_v63 = vmul.f32 %v5166_v21, %v5027_v24  ;;  %v1203_v22 = vmul.f32 %v5176_v26, %v5042_v32 }
 0x19e   : > { %v5594_v29 = vpop.permute.xlu1 %578  ;;  %v5596_v45 = vpop.permute.xlu0 %590 }
 0x19f   : > { %8629 = vst [vmem:[#allocation61_spill] sm:$0xff] %v5594_v29  ;;  %8630 = vst [vmem:[#allocation62_spill] sm:$0xff] %v5596_v45  ;;  %841 = vrot.lane.b32.xlu1 %v752_v27, %s4839_s21  ;;  %1064 = vrot.lane.b32.xlu0 %v978_v46, %s4840_s22  ;;  %v977_v45 = vmul.f32 %v5158_v16, %v4977_v10  ;;  %v1205_v27 = vmul.f32 %v5176_v26, %v5058_v38 }
 0x1a2   : > { %v5604_v49 = vpop.permute.xlu1 %1719  ;;  %v5606_v13 = vpop.permute.xlu0 %811 }
 0x1a3   : > { %8631 = vst [vmem:[#allocation63_spill] sm:$0xff] %v5604_v49  ;;  %8632 = vst [vmem:[#allocation64_spill] sm:$0xff] %v5606_v13  ;;  %845 = vrot.lane.b32.xlu1 %v754_v63, %s4839_s21  ;;  %1285 = vrot.lane.b32.xlu0 %v1203_v22, %s4841_s23  ;;  %v1202_v13 = vmul.f32 %v5176_v26, %v5030_v25  ;;  %v1428_v63 = vmul.f32 %v5126_v0, %v4974_v9 }
 0x1a6   : > { %v5614_v46 = vpop.permute.xlu1 %588  ;;  %v5616_v29 = vpop.permute.xlu0 %815 }
 0x1a7   : > { %8633 = vst [vmem:[#allocation65_spill] sm:$0xff] %v5614_v46  ;;  %8634 = vst [vmem:[#allocation66_spill] sm:$0xff] %v5616_v29  ;;  %1062 = vrot.lane.b32.xlu1 %v977_v45, %s4840_s22  ;;  %1289 = vrot.lane.b32.xlu0 %v1205_v27, %s4841_s23  ;;  %v1204_v29 = vmul.f32 %v5176_v26, %v5027_v24  ;;  %v1653_v45 = vmul.f32 %v5212_v50, %v5042_v32 }
 0x1aa   : > { %v5624_v22 = vpop.permute.xlu1 %809  ;;  %v5626_v49 = vpop.permute.xlu0 %1946 }
 0x1ab   : > { %8635 = vst [vmem:[#allocation67_spill] sm:$0xff] %v5624_v22  ;;  %8636 = vst [vmem:[#allocation68_spill] sm:$0xff] %v5626_v49  ;;  %1283 = vrot.lane.b32.xlu1 %v1202_v13, %s4841_s23  ;;  %1506 = vrot.lane.b32.xlu0 %v1428_v63, %s4842_s24  ;;  %v1427_v22 = vmul.f32 %v5126_v0, %v4977_v10  ;;  %v1655_v13 = vmul.f32 %v5212_v50, %v5058_v38 }
 0x1ae   : > { %v5634_v27 = vpop.permute.xlu1 %813  ;;  %v5636_v46 = vpop.permute.xlu0 %596 }
 0x1af   : > { %8637 = vst [vmem:[#allocation69_spill] sm:$0xff] %v5634_v27  ;;  %8638 = vst [vmem:[#allocation70_spill] sm:$0xff] %v5636_v46  ;;  %1287 = vrot.lane.b32.xlu1 %v1204_v29, %s4841_s23  ;;  %1727 = vrot.lane.b32.xlu0 %v1653_v45, %s4843_s25  ;;  %v1652_v46 = vmul.f32 %v5212_v50, %v5030_v25  ;;  %v1201_v29 = vmul.f32 %v5176_v26, %v5045_v33 }
 0x1b2   : > { %v5644_v63 = vpop.permute.xlu1 %807  ;;  %v5646_v49 = vpop.permute.xlu0 %600 }
 0x1b3   : > { %8639 = vst [vmem:[#allocation71_spill] sm:$0xff] %v5644_v63  ;;  %8640 = vst [vmem:[#allocation72_spill] sm:$0xff] %v5646_v49  ;;  %1504 = vrot.lane.b32.xlu1 %v1427_v22, %s4842_s24  ;;  %1731 = vrot.lane.b32.xlu0 %v1655_v13, %s4843_s25  ;;  %v1654_v49 = vmul.f32 %v5212_v50, %v5027_v24  ;;  %v505_v22 = vmul.f32 %v4980_v11, %v5034_v28 }
 0x1b4   : > { %v1651_v28 = vmul.f32 %v5212_v50, %v5045_v33 }
 0x1b6   : > { %v5654_v45 = vpop.permute.xlu1 %1948  ;;  %v5656_v27 = vpop.permute.xlu0 %817 }
 0x1b7   : > { %8641 = vst [vmem:[#allocation73_spill] sm:$0xff] %v5654_v45  ;;  %8642 = vst [vmem:[#allocation74_spill] sm:$0xff] %v5656_v27  ;;  %1725 = vrot.lane.b32.xlu1 %v1652_v46, %s4843_s25  ;;  %1281 = vrot.lane.b32.xlu0 %v1201_v29, %s4841_s23  ;;  %v751_v27 = vmul.f32 %v5166_v21, %v5045_v33  ;;  %v757_v46 = vmul.f32 %v5166_v21, %v4974_v9 }
 0x1ba   : > { %v5664_v13 = vpop.permute.xlu1 %598  ;;  %v5666_v63 = vpop.permute.xlu0 %1038 }
 0x1bb   : > { %8643 = vst [vmem:[#allocation75_spill] sm:$0xff] %v5664_v13  ;;  %8644 = vst [vmem:[#allocation76_spill] sm:$0xff] %v5666_v63  ;;  %1729 = vrot.lane.b32.xlu1 %v1654_v49, %s4843_s25  ;;  %576 = vrot.lane.b32.xlu0 %v505_v22, %s4838_s20  ;;  %v982_v49 = vmul.f32 %v5188_v35, %v5042_v32 }
 0x1be   : > { %v5674_v29 = vpop.permute.xlu1 %602  ;;  %v5676_v45 = vpop.permute.xlu0 %1042 }
 0x1bf   : > { %8645 = vst [vmem:[#allocation77_spill] sm:$0xff] %v5674_v29  ;;  %8646 = vst [vmem:[#allocation78_spill] sm:$0xff] %v5676_v45  ;;  %839 = vrot.lane.b32.xlu1 %v751_v27, %s4839_s21  ;;  %851 = vrot.lane.b32.xlu0 %v757_v46, %s4839_s21  ;;  %v756_v29 = vmul.f32 %v5166_v21, %v4977_v10  ;;  %v984_v27 = vmul.f32 %v5188_v35, %v5058_v38 }
 0x1c2   : > { %v5684_v22 = vpop.permute.xlu1 %819  ;;  %v5686_v13 = vpop.permute.xlu0 %594 }
 0x1c3   : > { %8647 = vst [vmem:[#allocation79_spill] sm:$0xff] %v5684_v22  ;;  %8648 = vst [vmem:[#allocation80_spill] sm:$0xff] %v5686_v13  ;;  %1723 = vrot.lane.b32.xlu1 %v1651_v28, %s4843_s25  ;;  %1072 = vrot.lane.b32.xlu0 %v982_v49, %s4840_s22  ;;  %v981_v13 = vmul.f32 %v5188_v35, %v5030_v25  ;;  %v1207_v28 = vmul.f32 %v5176_v26, %v4974_v9 }
 0x1c6   : > { %v5694_v46 = vpop.permute.xlu1 %1040  ;;  %v5696_v45 = vpop.permute.xlu0 %2175 }
 0x1c7   : > { %8649 = vst [vmem:[#allocation81_spill] sm:$0xff] %v5694_v46  ;;  %849 = vrot.lane.b32.xlu1 %v756_v29, %s4839_s21  ;;  %1076 = vrot.lane.b32.xlu0 %v984_v27, %s4840_s22  ;;  %v983_v46 = vmul.f32 %v5188_v35, %v5027_v24  ;;  %v1432_v29 = vmul.f32 %v5198_v41, %v5042_v32 }
 0x1ca   : > { %v5704_v49 = vpop.permute.xlu1 %1044  ;;  %v5706_v22 = vpop.permute.xlu0 %604 }
 0x1cb   : > { %8650 = vst [vmem:[#allocation82_spill] sm:$0xff] %v5704_v49  ;;  %8651 = vst [vmem:[#allocation83_spill] sm:$0xff] %v5706_v22  ;;  %1070 = vrot.lane.b32.xlu1 %v981_v13, %s4840_s22  ;;  %1293 = vrot.lane.b32.xlu0 %v1207_v28, %s4841_s23  ;;  %v1206_v22 = vmul.f32 %v5176_v26, %v4977_v10  ;;  %v1434_v13 = vmul.f32 %v5198_v41, %v5058_v38 }
 0x1ce   : > { %v5714_v27 = vpop.permute.xlu1 %1036  ;;  %v5716_v63 = vpop.permute.xlu0 %825 }
 0x1cf   : > { %8652 = vst [vmem:[#allocation84_spill] sm:$0xff] %v5714_v27  ;;  %8653 = vst [vmem:[#allocation85_spill] sm:$0xff] %v5716_v63  ;;  %1074 = vrot.lane.b32.xlu1 %v983_v46, %s4840_s22  ;;  %1514 = vrot.lane.b32.xlu0 %v1432_v29, %s4842_s24  ;;  %v1431_v63 = vmul.f32 %v5198_v41, %v5030_v25  ;;  %v1657_v46 = vmul.f32 %v5212_v50, %v4974_v9 }
 0x1d2   : > { %v5724_v28 = vpop.permute.xlu1 %2177  ;;  %v5726_v49 = vpop.permute.xlu0 %829 }
 0x1d3   : > { %8654 = vst [vmem:[#allocation86_spill] sm:$0xff] %v5724_v28  ;;  %8655 = vst [vmem:[#allocation87_spill] sm:$0xff] %v5726_v49  ;;  %1291 = vrot.lane.b32.xlu1 %v1206_v22, %s4841_s23  ;;  %1518 = vrot.lane.b32.xlu0 %v1434_v13, %s4842_s24  ;;  %v1433_v49 = vmul.f32 %v5198_v41, %v5027_v24  ;;  %v1882_v22 = vmul.f32 %v5238_v3, %v5042_v32 }
 0x1d6   : > { %v5734_v29 = vpop.permute.xlu1 %606  ;;  %v5736_v27 = vpop.permute.xlu0 %1046 }
 0x1d7   : > { %8656 = vst [vmem:[#allocation88_spill] sm:$0xff] %v5734_v29  ;;  %8657 = vst [vmem:[#allocation89_spill] sm:$0xff] %v5736_v27  ;;  %1512 = vrot.lane.b32.xlu1 %v1431_v63, %s4842_s24  ;;  %1735 = vrot.lane.b32.xlu0 %v1657_v46, %s4843_s25  ;;  %v1656_v29 = vmul.f32 %v5212_v50, %v4977_v10  ;;  %v1884_v63 = vmul.f32 %v5238_v3, %v5058_v38 }
 0x1da   : > { %v5744_v13 = vpop.permute.xlu1 %827  ;;  %v5746_v28 = vpop.permute.xlu0 %1267 }
 0x1db   : > { %8658 = vst [vmem:[#allocation90_spill] sm:$0xff] %v5744_v13  ;;  %8659 = vst [vmem:[#allocation91_spill] sm:$0xff] %v5746_v28  ;;  %1516 = vrot.lane.b32.xlu1 %v1433_v49, %s4842_s24  ;;  %1956 = vrot.lane.b32.xlu0 %v1882_v22, %s4844_s26  ;;  %v1881_v13 = vmul.f32 %v5238_v3, %v5030_v25  ;;  %v980_v49 = vmul.f32 %v5188_v35, %v5045_v33 }
 0x1de   : > { %v5754_v46 = vpop.permute.xlu1 %831  ;;  %v5756_v27 = vpop.permute.xlu0 %1271 }
 0x1df   : > { %8660 = vst [vmem:[#allocation92_spill] sm:$0xff] %v5754_v46  ;;  %8661 = vst [vmem:[#allocation93_spill] sm:$0xff] %v5756_v27  ;;  %1733 = vrot.lane.b32.xlu1 %v1656_v29, %s4843_s25  ;;  %1960 = vrot.lane.b32.xlu0 %v1884_v63, %s4844_s26  ;;  %v1883_v46 = vmul.f32 %v5238_v3, %v5027_v24  ;;  %v1880_v29 = vmul.f32 %v5238_v3, %v5045_v33 }
 0x1e2   : > { %v5764_v22 = vpop.permute.xlu1 %1048  ;;  %v5766_v28 = vpop.permute.xlu0 %823 }
 0x1e3   : > { %8662 = vst [vmem:[#allocation94_spill] sm:$0xff] %v5764_v22  ;;  %8663 = vst [vmem:[#allocation95_spill] sm:$0xff] %v5766_v28  ;;  %1954 = vrot.lane.b32.xlu1 %v1881_v13, %s4844_s26  ;;  %1068 = vrot.lane.b32.xlu0 %v980_v49, %s4840_s22  ;;  %v2315_v13 = vld [vmem:[%s8373_s2 + $0x8] sm:$0xff]  ;;  %v985_v49 = vmul.f32 %v5188_v35, %v4977_v10 }
 0x1e6   : > { %v5774_v63 = vpop.permute.xlu1 %1269  ;;  %v5776_v27 = vpop.permute.xlu0 %612 }
 0x1e7   : > { %8664 = vst [vmem:[#allocation96_spill] sm:$0xff] %v5774_v63  ;;  %8665 = vst [vmem:[#allocation97_spill] sm:$0xff] %v5776_v27  ;;  %1958 = vrot.lane.b32.xlu1 %v1883_v46, %s4844_s26  ;;  %1952 = vrot.lane.b32.xlu0 %v1880_v29, %s4844_s26  ;;  %v1430_v27 = vmul.f32 %v5198_v41, %v5045_v33  ;;  %v1210_v46 = vmul.f32 %v5224_v56, %v5030_v25 }
 0x1ea   : > { %v5785_v28 = vpop.permute.xlu1 %1273  ;;  %v5787_v22 = vpop.permute.xlu0 %616 }
 0x1eb   : > { %8666 = vst [vmem:[#allocation98_spill] sm:$0xff] %v5785_v28  ;;  %8667 = vst [vmem:[#allocation99_spill] sm:$0xff] %v5787_v22  ;;  %2325 = vperm.xlu1 %4604, %v2315_v13   ;;  %1078 = vrot.lane.b32.xlu0 %v985_v49, %s4840_s22  ;;  %v734_v22 = vmul.f32 %v5055_v37, %v4980_v11  ;;  %v1212_v13 = vmul.f32 %v5224_v56, %v5027_v24 }
 0x1ee   : > { %v5794_v29 = vpop.permute.xlu1 %1265  ;;  %v5796_v63 = vpop.permute.xlu0 %833 }
 0x1ef   : > { %8668 = vst [vmem:[#allocation100_spill] sm:$0xff] %v5796_v63  ;;  %1510 = vrot.lane.b32.xlu1 %v1430_v27, %s4842_s24  ;;  %1299 = vrot.lane.b32.xlu0 %v1210_v46, %s4841_s23  ;;  %v986_v63 = vmul.f32 %v5188_v35, %v4974_v9  ;;  %v1435_v27 = vmul.f32 %v5198_v41, %v4977_v10 }
 0x1f2   : > { %v5804_v49 = vpop.permute.xlu1 %614  ;;  %v5806_v28 = vpop.permute.xlu0 %1054 }
 0x1f3   : > { %8669 = vst [vmem:[#allocation101_spill] sm:$0xff] %v5804_v49  ;;  %8670 = vst [vmem:[#allocation102_spill] sm:$0xff] %v5806_v28  ;;  %805 = vrot.lane.b32.xlu1 %v734_v22, %s4839_s21  ;;  %1303 = vrot.lane.b32.xlu0 %v1212_v13, %s4841_s23  ;;  %v1211_v49 = vmul.f32 %v5224_v56, %v5042_v32  ;;  %v1660_v22 = vmul.f32 %v5210_v48, %v5030_v25 }
 0x1f6   : > { %v5814_v46 = vpop.permute.xlu1 %618  ;;  %v5816_v37 = vpop.permute.xlu0 %1058 }
 0x1f7   : > { %8671 = vst [vmem:[#allocation103_spill] sm:$0xff] %v5814_v46  ;;  %8672 = vst [vmem:[#allocation104_spill] sm:$0xff] %v5816_v37  ;;  %1080 = vrot.lane.b32.xlu1 %v986_v63, %s4840_s22  ;;  %1520 = vrot.lane.b32.xlu0 %v1435_v27, %s4842_s24  ;;  %v1213_v46 = vmul.f32 %v5224_v56, %v5058_v38  ;;  %v1662_v63 = vmul.f32 %v5210_v48, %v5027_v24 }
 0x1fa   : > { %v5824_v13 = vpop.permute.xlu1 %835  ;;  %v5826_v28 = vpop.permute.xlu0 %1275 }
 0x1fb   : > { %8673 = vst [vmem:[#allocation105_spill] sm:$0xff] %v5824_v13  ;;  %8674 = vst [vmem:[#allocation106_spill] sm:$0xff] %v5826_v28  ;;  %1301 = vrot.lane.b32.xlu1 %v1211_v49, %s4841_s23  ;;  %1741 = vrot.lane.b32.xlu0 %v1660_v22, %s4843_s25  ;;  %v1436_v13 = vmul.f32 %v5198_v41, %v4974_v9  ;;  %v1885_v49 = vmul.f32 %v5238_v3, %v4977_v10 }
 0x1fe   : > { %v5834_v27 = vpop.permute.xlu1 %1056  ;;  %v5836_v37 = vpop.permute.xlu0 %1496 }
 0x1ff   : > { %8675 = vst [vmem:[#allocation107_spill] sm:$0xff] %v5834_v27  ;;  %8676 = vst [vmem:[#allocation108_spill] sm:$0xff] %v5836_v37  ;;  %1305 = vrot.lane.b32.xlu1 %v1213_v46, %s4841_s23  ;;  %1745 = vrot.lane.b32.xlu0 %v1662_v63, %s4843_s25  ;;  %v1661_v27 = vmul.f32 %v5210_v48, %v5042_v32  ;;  %v2110_v46 = vmul.f32 %v5222_v55, %v5030_v25 }
 0x202   : > { %v5844_v22 = vpop.permute.xlu1 %1060  ;;  %v5846_v28 = vpop.permute.xlu0 %1500 }
 0x203   : > { %8677 = vst [vmem:[#allocation109_spill] sm:$0xff] %v5844_v22  ;;  %8678 = vst [vmem:[#allocation110_spill] sm:$0xff] %v5846_v28  ;;  %1522 = vrot.lane.b32.xlu1 %v1436_v13, %s4842_s24  ;;  %1962 = vrot.lane.b32.xlu0 %v1885_v49, %s4844_s26  ;;  %v1663_v22 = vmul.f32 %v5210_v48, %v5058_v38  ;;  %v2112_v13 = vmul.f32 %v5222_v55, %v5027_v24 }
 0x206   : > { %v5854_v63 = vpop.permute.xlu1 %1277  ;;  %v5856_v37 = vpop.permute.xlu0 %610 }
 0x207   : > { %8679 = vst [vmem:[#allocation111_spill] sm:$0xff] %v5854_v63  ;;  %8680 = vst [vmem:[#allocation112_spill] sm:$0xff] %v5856_v37  ;;  %1743 = vrot.lane.b32.xlu1 %v1661_v27, %s4843_s25  ;;  %2183 = vrot.lane.b32.xlu0 %v2110_v46, %s4845_s29  ;;  %v2367_v27 = vld [vmem:[%s8374_s3 + $0x8] sm:$0xff]  ;;  %v1886_v46 = vmul.f32 %v5238_v3, %v4974_v9 }
 0x20a   : > { %v5864_v49 = vpop.permute.xlu1 %1498  ;;  %v5866_v28 = vpop.permute.xlu0 %1494 }
 0x20b   : > { %8681 = vst [vmem:[#allocation113_spill] sm:$0xff] %v5864_v49  ;;  %8682 = vst [vmem:[#allocation114_spill] sm:$0xff] %v5866_v28  ;;  %1747 = vrot.lane.b32.xlu1 %v1663_v22, %s4843_s25  ;;  %2187 = vrot.lane.b32.xlu0 %v2112_v13, %s4845_s29  ;;  %v2111_v49 = vmul.f32 %v5222_v55, %v5042_v32  ;;  %v1659_v22 = vmul.f32 %v5210_v48, %v5045_v33 }
 0x20e   : > { %v5875_v37 = vpop.permute.xlu1 %1502  ;;  %v5877_v63 = vpop.permute.xlu0 %622 }
 0x20f   : > { %8683 = vst [vmem:[#allocation115_spill] sm:$0xff] %v5875_v37  ;;  %8684 = vst [vmem:[#allocation116_spill] sm:$0xff] %v5877_v63  ;;  %1964 = vrot.lane.b32.xlu1 %v1886_v46, %s4844_s26  ;;  %2377 = vperm.xlu0 %4601, %v2367_v27   ;;  %v2113_v63 = vmul.f32 %v5222_v55, %v5058_v38  ;;  %v513_v27 = vmul.f32 %v4980_v11, %v5100_v54 }
 0x210   : > { %v2109_v54 = vmul.f32 %v5222_v55, %v5045_v33 }
 0x212   : > { %v5884_v13 = vpop.permute.xlu1 %1052  ;;  %v5886_v28 = vpop.permute.xlu0 %843 }
 0x213   : > { %8685 = vst [vmem:[#allocation117_spill] sm:$0xff] %v5884_v13  ;;  %8686 = vst [vmem:[#allocation118_spill] sm:$0xff] %v5886_v28  ;;  %2185 = vrot.lane.b32.xlu1 %v2111_v49, %s4845_s29  ;;  %1739 = vrot.lane.b32.xlu0 %v1659_v22, %s4843_s25  ;;  %v1209_v28 = vmul.f32 %v5224_v56, %v5045_v33  ;;  %v1214_v49 = vmul.f32 %v5224_v56, %v4977_v10 }
 0x216   : > { %v5894_v46 = vpop.permute.xlu1 %620  ;;  %v5896_v37 = vpop.permute.xlu0 %847 }
 0x217   : > { %8687 = vst [vmem:[#allocation119_spill] sm:$0xff] %v5894_v46  ;;  %8688 = vst [vmem:[#allocation120_spill] sm:$0xff] %v5896_v37  ;;  %2189 = vrot.lane.b32.xlu1 %v2113_v63, %s4845_s29  ;;  %592 = vrot.lane.b32.xlu0 %v513_v27, %s4838_s20  ;;  %v1439_v63 = vmul.f32 %v5236_v2, %v5030_v25 }
 0x21a   : > { %v5904_v22 = vpop.permute.xlu1 %841  ;;  %v5906_v13 = vpop.permute.xlu0 %1064 }
 0x21b   : > { %8689 = vst [vmem:[#allocation121_spill] sm:$0xff] %v5904_v22  ;;  %8690 = vst [vmem:[#allocation122_spill] sm:$0xff] %v5906_v13  ;;  %1297 = vrot.lane.b32.xlu1 %v1209_v28, %s4841_s23  ;;  %1307 = vrot.lane.b32.xlu0 %v1214_v49, %s4841_s23  ;;  %v963_v22 = vmul.f32 %v5047_v34, %v4980_v11  ;;  %v1441_v28 = vmul.f32 %v5236_v2, %v5027_v24 }
 0x21c   : > { %v1440_v13 = vmul.f32 %v5236_v2, %v5042_v32 }
 0x21e   : > { %v5914_v27 = vpop.permute.xlu1 %845  ;;  %v5916_v37 = vpop.permute.xlu0 %1285 }
 0x21f   : > { %8691 = vst [vmem:[#allocation123_spill] sm:$0xff] %v5914_v27  ;;  %8692 = vst [vmem:[#allocation124_spill] sm:$0xff] %v5916_v37  ;;  %2181 = vrot.lane.b32.xlu1 %v2109_v54, %s4845_s29  ;;  %1528 = vrot.lane.b32.xlu0 %v1439_v63, %s4842_s24  ;;  %v1215_v27 = vmul.f32 %v5224_v56, %v4974_v9  ;;  %v1664_v54 = vmul.f32 %v5210_v48, %v4977_v10 }
 0x222   : > { %v5924_v49 = vpop.permute.xlu1 %1062  ;;  %v5926_v46 = vpop.permute.xlu0 %1289 }
 0x223   : > { %8693 = vst [vmem:[#allocation125_spill] sm:$0xff] %v5924_v49  ;;  %8694 = vst [vmem:[#allocation126_spill] sm:$0xff] %v5926_v46  ;;  %1034 = vrot.lane.b32.xlu1 %v963_v22, %s4840_s22  ;;  %1532 = vrot.lane.b32.xlu0 %v1441_v28, %s4842_s24  ;;  %v1889_v22 = vmul.f32 %v5246_v6, %v5030_v25  ;;  %v1442_v46 = vmul.f32 %v5236_v2, %v5058_v38 }
 0x226   : > { %v5934_v63 = vpop.permute.xlu1 %1283  ;;  %v5936_v34 = vpop.permute.xlu0 %1506 }
 0x227   : > { %8695 = vst [vmem:[#allocation127_spill] sm:$0xff] %v5934_v63  ;;  %8696 = vst [vmem:[#allocation128_spill] sm:$0xff] %v5936_v34  ;;  %1309 = vrot.lane.b32.xlu1 %v1215_v27, %s4841_s23  ;;  %1749 = vrot.lane.b32.xlu0 %v1664_v54, %s4843_s25  ;;  %v1891_v27 = vmul.f32 %v5246_v6, %v5027_v24 }
 0x22a   : > { %v5944_v28 = vpop.permute.xlu1 %1287  ;;  %v5946_v49 = vpop.permute.xlu0 %1727 }
 0x22b   : > { %8697 = vst [vmem:[#allocation129_spill] sm:$0xff] %v5944_v28  ;;  %8698 = vst [vmem:[#allocation130_spill] sm:$0xff] %v5946_v49  ;;  %1530 = vrot.lane.b32.xlu1 %v1440_v13, %s4842_s24  ;;  %1970 = vrot.lane.b32.xlu0 %v1889_v22, %s4844_s26  ;;  %v1665_v28 = vmul.f32 %v5210_v48, %v4974_v9  ;;  %v2114_v13 = vmul.f32 %v5222_v55, %v4977_v10 }
 0x22e   : > { %v5954_v54 = vpop.permute.xlu1 %1504  ;;  %v5956_v63 = vpop.permute.xlu0 %1731 }
 0x22f   : > { %8699 = vst [vmem:[#allocation131_spill] sm:$0xff] %v5954_v54  ;;  %1534 = vrot.lane.b32.xlu1 %v1442_v46, %s4842_s24  ;;  %1974 = vrot.lane.b32.xlu0 %v1891_v27, %s4844_s26  ;;  %v2316_v46 = vld [vmem:[%s8373_s2 + $0x10] sm:$0xff]  ;;  %v1890_v27 = vmul.f32 %v5246_v6, %v5042_v32 }
 0x232   : > { %v5964_v22 = vpop.permute.xlu1 %1725  ;;  %v5966_v37 = vpop.permute.xlu0 %1281 }
 0x233   : > { %8700 = vst [vmem:[#allocation132_spill] sm:$0xff] %v5966_v37  ;;  %1751 = vrot.lane.b32.xlu1 %v1665_v28, %s4843_s25  ;;  %2191 = vrot.lane.b32.xlu0 %v2114_v13, %s4845_s29  ;;  %v1892_v37 = vmul.f32 %v5246_v6, %v5058_v38  ;;  %v1888_v28 = vmul.f32 %v5246_v6, %v5045_v33 }
 0x236   : > { %v5975_v54 = vpop.permute.xlu1 %1729  ;;  %v5977_v34 = vpop.permute.xlu0 %576 }
 0x237   : > { %8701 = vst [vmem:[#allocation133_spill] sm:$0xff] %v5975_v54  ;;  %8702 = vst [vmem:[#allocation134_spill] sm:$0xff] %v5977_v34  ;;  %1972 = vrot.lane.b32.xlu1 %v1890_v27, %s4844_s26  ;;  %2330 = vperm.xlu0 %4601, %v2316_v46   ;;  %v2115_v34 = vmul.f32 %v5222_v55, %v4974_v9  ;;  %v1192_v46 = vmul.f32 %v5060_v39, %v4980_v11 }
 0x238   : > { %v742_v39 = vmul.f32 %v5098_v53, %v4980_v11 }
 0x23a   : > { %v5984_v13 = vpop.permute.xlu1 %839  ;;  %v5986_v49 = vpop.permute.xlu0 %851 }
 0x23b   : > { %8703 = vst [vmem:[#allocation135_spill] sm:$0xff] %v5984_v13  ;;  %8704 = vst [vmem:[#allocation136_spill] sm:$0xff] %v5986_v49  ;;  %1976 = vrot.lane.b32.xlu1 %v1892_v37, %s4844_s26  ;;  %1968 = vrot.lane.b32.xlu0 %v1888_v28, %s4844_s26  ;;  %v1438_v49 = vmul.f32 %v5236_v2, %v5045_v33  ;;  %v1444_v37 = vmul.f32 %v5236_v2, %v4974_v9 }
 0x23e   : > { %v5994_v27 = vpop.permute.xlu1 %1723  ;;  %v5996_v54 = vpop.permute.xlu0 %1072 }
 0x23f   : > { %8705 = vst [vmem:[#allocation137_spill] sm:$0xff] %v5996_v54  ;;  %2193 = vrot.lane.b32.xlu1 %v2115_v34, %s4845_s29  ;;  %1263 = vrot.lane.b32.xlu0 %v1192_v46, %s4841_s23  ;;  %v1669_v34 = vmul.f32 %v5244_v5, %v5042_v32 }
 0x242   : > { %v6004_v28 = vpop.permute.xlu1 %849  ;;  %v6006_v13 = vpop.permute.xlu0 %1076 }
 0x243   : > { %8706 = vst [vmem:[#allocation138_spill] sm:$0xff] %v6004_v28  ;;  %8707 = vst [vmem:[#allocation139_spill] sm:$0xff] %v6006_v13  ;;  %1526 = vrot.lane.b32.xlu1 %v1438_v49, %s4842_s24  ;;  %1538 = vrot.lane.b32.xlu0 %v1444_v37, %s4842_s24  ;;  %v1443_v28 = vmul.f32 %v5236_v2, %v4977_v10  ;;  %v1671_v49 = vmul.f32 %v5244_v5, %v5058_v38 }
 0x244   : > { %v1668_v13 = vmul.f32 %v5244_v5, %v5030_v25 }
 0x246   : > { %v6014_v46 = vpop.permute.xlu1 %1070  ;;  %v6016_v54 = vpop.permute.xlu0 %1293 }
 0x247   : > { %8708 = vst [vmem:[#allocation140_spill] sm:$0xff] %v6014_v46  ;;  %8709 = vst [vmem:[#allocation141_spill] sm:$0xff] %v6016_v54  ;;  %821 = vrot.lane.b32.xlu1 %v742_v39, %s4839_s21  ;;  %1759 = vrot.lane.b32.xlu0 %v1669_v34, %s4843_s25  ;;  %v1894_v39 = vmul.f32 %v5246_v6, %v4974_v9 }
 0x24a   : > { %v6024_v37 = vpop.permute.xlu1 %1074  ;;  %v6026_v53 = vpop.permute.xlu0 %1514 }
 0x24b   : > { %8710 = vst [vmem:[#allocation142_spill] sm:$0xff] %v6024_v37  ;;  %8711 = vst [vmem:[#allocation143_spill] sm:$0xff] %v6026_v53  ;;  %1536 = vrot.lane.b32.xlu1 %v1443_v28, %s4842_s24  ;;  %1763 = vrot.lane.b32.xlu0 %v1671_v49, %s4843_s25  ;;  %v1670_v37 = vmul.f32 %v5244_v5, %v5027_v24  ;;  %v2119_v28 = vmul.f32 %v5260_v15, %v5042_v32 }
 0x24e   : > { %v6034_v34 = vpop.permute.xlu1 %1291  ;;  %v6036_v46 = vpop.permute.xlu0 %1518 }
 0x24f   : > { %8712 = vst [vmem:[#allocation144_spill] sm:$0xff] %v6034_v34  ;;  %8713 = vst [vmem:[#allocation145_spill] sm:$0xff] %v6036_v46  ;;  %1757 = vrot.lane.b32.xlu1 %v1668_v13, %s4843_s25  ;;  %1980 = vrot.lane.b32.xlu0 %v1894_v39, %s4844_s26  ;;  %v1893_v34 = vmul.f32 %v5246_v6, %v4977_v10  ;;  %v2121_v13 = vmul.f32 %v5260_v15, %v5058_v38 }
 0x252   : > { %v6044_v49 = vpop.permute.xlu1 %1512  ;;  %v6046_v54 = vpop.permute.xlu0 %1735 }
 0x253   : > { %8714 = vst [vmem:[#allocation146_spill] sm:$0xff] %v6044_v49  ;;  %8715 = vst [vmem:[#allocation147_spill] sm:$0xff] %v6046_v54  ;;  %1761 = vrot.lane.b32.xlu1 %v1670_v37, %s4843_s25  ;;  %2201 = vrot.lane.b32.xlu0 %v2119_v28, %s4845_s29  ;;  %v2118_v49 = vmul.f32 %v5260_v15, %v5030_v25  ;;  %v1667_v37 = vmul.f32 %v5244_v5, %v5045_v33 }
 0x256   : > { %v6054_v39 = vpop.permute.xlu1 %1516  ;;  %v6056_v46 = vpop.permute.xlu0 %1956 }
 0x257   : > { %8716 = vst [vmem:[#allocation148_spill] sm:$0xff] %v6054_v39  ;;  %8717 = vst [vmem:[#allocation149_spill] sm:$0xff] %v6056_v46  ;;  %1978 = vrot.lane.b32.xlu1 %v1893_v34, %s4844_s26  ;;  %2205 = vrot.lane.b32.xlu0 %v2121_v13, %s4845_s29  ;;  %v2120_v39 = vmul.f32 %v5260_v15, %v5027_v24  ;;  %v521_v34 = vmul.f32 %v4980_v11, %v5108_v57 }
 0x258   : > { %v2117_v57 = vmul.f32 %v5260_v15, %v5045_v33 }
 0x25a   : > { %v6064_v28 = vpop.permute.xlu1 %1733  ;;  %v6066_v53 = vpop.permute.xlu0 %1960 }
 0x25b   : > { %8718 = vst [vmem:[#allocation150_spill] sm:$0xff] %v6064_v28  ;;  %8719 = vst [vmem:[#allocation151_spill] sm:$0xff] %v6066_v53  ;;  %2199 = vrot.lane.b32.xlu1 %v2118_v49, %s4845_s29  ;;  %1755 = vrot.lane.b32.xlu0 %v1667_v37, %s4843_s25  ;;  %v2368_v49 = vld [vmem:[%s8374_s3 + $0x10] sm:$0xff]  ;;  %v1421_v37 = vmul.f32 %v5068_v42, %v4980_v11  ;;  %v971_v42 = vmul.f32 %v5112_v58, %v4980_v11 }
 0x25c   : > { %v627_v53 = vsel %vm626_vm0, %v5290_v43, %v5282_v31 }
 0x25e   : > { %v6074_v13 = vpop.permute.xlu1 %1954  ;;  %v6076_v6 = vpop.permute.xlu0 %1068 }
 0x25f   : > { %8720 = vst [vmem:[#allocation152_spill] sm:$0xff] %v6074_v13  ;;  %8721 = vst [vmem:[#allocation153_spill] sm:$0xff] %v6076_v6  ;;  %2203 = vrot.lane.b32.xlu1 %v2120_v39, %s4845_s29  ;;  %608 = vrot.lane.b32.xlu0 %v521_v34, %s4838_s20  ;;  %v1673_v39 = vmul.f32 %v5244_v5, %v4974_v9  ;;  %v1086_v13 = vsel %vm1084_vm2, %v5338_v36, %v5320_v12 }
 0x262   : > { %v6085_v28 = vpop.permute.xlu1 %1958  ;;  %v6087_v54 = vpop.permute.xlu0 %1952 }
 0x263   : > { %8722 = vst [vmem:[#allocation154_spill] sm:$0xff] %v6085_v28  ;;  %8723 = vst [vmem:[#allocation155_spill] sm:$0xff] %v6087_v54  ;;  %2382 = vperm.xlu1 %4604, %v2368_v49   ;;  %1492 = vrot.lane.b32.xlu0 %v1421_v37, %s4842_s24  ;;  %v1898_v49 = vmul.f32 %v5258_v19, %v5042_v32  ;;  %v629_v28 = vsel %vm626_vm0, %v5288_v40, %v5280_v30 }
 0x264   : > { %v630_v54 = vsel %vm626_vm0, %v5280_v30, %v5298_v47  ;;  %v857_v30 = vsel %vm855_vm1, %v5308_v59, %v5300_v51 }
 0x266   : > { %v6094_v34 = vpop.permute.xlu1 %2325  ;;  %v6096_v6 = vpop.permute.xlu0 %1078 }
 0x267   : > { %8724 = vst [vmem:[#allocation156_spill] sm:$0xff] %v6094_v34  ;;  %8725 = vst [vmem:[#allocation157_spill] sm:$0xff] %v6096_v6  ;;  %2197 = vrot.lane.b32.xlu1 %v2117_v57, %s4845_s29  ;;  %1767 = vrot.lane.b32.xlu0 %v1673_v39, %s4843_s25  ;;  %v1672_v6 = vmul.f32 %v5244_v5, %v4977_v10  ;;  %v1900_v57 = vmul.f32 %v5258_v19, %v5058_v38 }
 0x26a   : > { %v6104_v37 = vpop.permute.xlu1 %1510  ;;  %v6106_v46 = vpop.permute.xlu0 %1299 }
 0x26b   : > { %8726 = vst [vmem:[#allocation158_spill] sm:$0xff] %v6104_v37  ;;  %8727 = vst [vmem:[#allocation159_spill] sm:$0xff] %v6106_v46  ;;  %1050 = vrot.lane.b32.xlu1 %v971_v42, %s4840_s22  ;;  %1988 = vrot.lane.b32.xlu0 %v1898_v49, %s4844_s26  ;;  %v1897_v46 = vmul.f32 %v5258_v19, %v5030_v25  ;;  %v2123_v42 = vmul.f32 %v5260_v15, %v4974_v9 }
 0x26e   : > { %v6114_v39 = vpop.permute.xlu1 %805  ;;  %v6116_v58 = vpop.permute.xlu0 %1303 }
 0x26f   : > { %8728 = vst [vmem:[#allocation160_spill] sm:$0xff] %v6114_v39  ;;  %8729 = vst [vmem:[#allocation161_spill] sm:$0xff] %v6116_v58  ;;  %1765 = vrot.lane.b32.xlu1 %v1672_v6, %s4843_s25  ;;  %1992 = vrot.lane.b32.xlu0 %v1900_v57, %s4844_s26  ;;  %v422_v6 = vmul.f32 %v5030_v25, %v5272_v23  ;;  %v1899_v57 = vmul.f32 %v5258_v19, %v5027_v24 }
 0x270   : > { %v1896_v39 = vmul.f32 %v5258_v19, %v5045_v33  ;;  %v424_v58 = vmul.f32 %v5027_v24, %v5272_v23 }
 0x272   : > { %v6124_v49 = vpop.permute.xlu1 %1080  ;;  %v6126_v37 = vpop.permute.xlu0 %1520 }
 0x273   : > { %8730 = vst [vmem:[#allocation162_spill] sm:$0xff] %v6124_v49  ;;  %8731 = vst [vmem:[#allocation163_spill] sm:$0xff] %v6126_v37  ;;  %1986 = vrot.lane.b32.xlu1 %v1897_v46, %s4844_s26  ;;  %2209 = vrot.lane.b32.xlu0 %v2123_v42, %s4845_s29  ;;  %v423_v49 = vmul.f32 %v5042_v32, %v5272_v23  ;;  %v628_v46 = vsel %vm626_vm0, %v5282_v31, %v5288_v40 }
 0x274   : > { %v421_v42 = vmul.f32 %v5045_v33, %v5272_v23  ;;  %v750_v40 = vmul.f32 %v5120_v61, %v4980_v11  ;;  %v6168_v31 = vmul.f32 %v5138_v4, %v4980_v11  ;;  %v684_v43 = vadd.f32 %v628_v46, %v422_v6 }
 0x275   : > { %v686_v61 = vadd.f32 %v630_v54, %v424_v58  ;;  %v859_v4 = vsel %vm855_vm1, %v5318_v8, %v5310_v60 }
 0x276   : > { %v6145_v37 = vpop.permute.xlu1 %1301  ;;  %v6147_v34 = vpop.permute.xlu0 %1741 }
 0x277   : > { %8732 = vst [vmem:[#allocation164_spill] sm:$0xff] %v6145_v37  ;;  %8733 = vst [vmem:[#allocation165_spill] sm:$0xff] %v6147_v34  ;;  %1990 = vrot.lane.b32.xlu1 %v1899_v57, %s4844_s26  ;;  %1984 = vrot.lane.b32.xlu0 %v1896_v39, %s4844_s26  ;;  %v2122_v37 = vmul.f32 %v5260_v15, %v4977_v10  ;;  %v1200_v34 = vmul.f32 %v5130_v1, %v4980_v11 }
 0x278   : > { %v858_v39 = vsel %vm855_vm1, %v5300_v51, %v5318_v8  ;;  %v856_v1 = vsel %vm855_vm1, %v5328_v17, %v5308_v59  ;;  %v685_v57 = vadd.f32 %v629_v28, %v423_v49  ;;  %v683_v15 = vadd.f32 %v627_v53, %v421_v42  ;;  %v2317_v53 = vld [vmem:[%s8373_s2 + $0x18] sm:$0xff]  ;;  %v8737_v42 = vld [vmem:[#allocation20_spill] sm:$0xff] }
 0x279   : > { %v1087_v51 = vsel %vm1084_vm2, %v5320_v12, %v5348_v52  ;;  %v1085_v59 = vsel %vm1084_vm2, %v5358_v14, %v5338_v36  ;;  %v913_v8 = vadd.f32 %v857_v30, %v684_v43  ;;  %v1901_v28 = vmul.f32 %v5258_v19, %v4977_v10 }
 0x27a   : > { %v6182_v6 = vpop.permute.xlu1 %1305  ;;  %v6184_v46 = vpop.permute.xlu0 %1745  ;;  %v914_v17 = vadd.f32 %v858_v39, %v685_v57  ;;  %v912_v54 = vadd.f32 %v856_v1, %v683_v15  ;;  %v915_v12 = vadd.f32 %v859_v4, %v686_v61  ;;  %v1088_v36 = vsel %vm1084_vm2, %v5348_v52, %v5330_v18  ;;  %v8740_v52 = vld [vmem:[#allocation19_spill] sm:$0xff]  ;;  %v8741_v57 = vld [vmem:[#allocation21_spill] sm:$0xff]  ;;  %v8742_v61 = vld [vmem:[#allocation24_spill] sm:$0xff] }
 0x27b   : > { %8734 = vst [vmem:[#allocation166_spill] sm:$0xff] %v6182_v6  ;;  %8735 = vst [vmem:[#allocation167_spill] sm:$0xff] %v6184_v46  ;;  %2207 = vrot.lane.b32.xlu1 %v2122_v37, %s4845_s29  ;;  %1279 = vrot.lane.b32.xlu0 %v1200_v34, %s4841_s23  ;;  %v1315_v14 = vsel %vm1313_vm3, %v5368_v20, %v5340_v44  ;;  %v8736_v34 = vld [vmem:[#allocation22_spill] sm:$0xff]  ;;  %v1142_v37 = vadd.f32 %v1086_v13, %v913_v8 }
 0x27c   : > { %v1316_v15 = vsel %vm1313_vm3, %v5340_v44, %v8736_v34  ;;  %v1143_v58 = vadd.f32 %v1087_v51, %v914_v17  ;;  %v1141_v49 = vadd.f32 %v1085_v59, %v912_v54  ;;  %v1314_v43 = vsel %vm1313_vm3, %v8737_v42, %v5368_v20  ;;  %v8743_v59 = vld [vmem:[#allocation17_spill] sm:$0xff]  ;;  %v8745_v42 = vld [vmem:[#allocation23_spill] sm:$0xff] }
 0x27d   : > { %v1317_v1 = vsel %vm1313_vm3, %v8736_v34, %v8740_v52  ;;  %v1544_v4 = vsel %vm1542_vm4, %v8742_v61, %v8741_v57  ;;  %v1545_v44 = vsel %vm1542_vm4, %v8741_v57, %v5398_v62  ;;  %v1144_v20 = vadd.f32 %v1088_v36, %v915_v12  ;;  %v8744_v54 = vld [vmem:[#allocation25_spill] sm:$0xff]  ;;  %v8746_v57 = vld [vmem:[#allocation26_spill] sm:$0xff] }
 0x27e   : > { %v6214_v30 = vpop.permute.xlu1 %1522  ;;  %v6216_v39 = vpop.permute.xlu0 %1962  ;;  %v1371_v13 = vadd.f32 %v1315_v14, %v1142_v37  ;;  %v1372_v51 = vadd.f32 %v1316_v15, %v1143_v58  ;;  %v2126_v8 = vmul.f32 %v8743_v59, %v5030_v25  ;;  %v1370_v17 = vadd.f32 %v1314_v43, %v1141_v49  ;;  %v8748_v14 = vld [vmem:[#allocation28_spill] sm:$0xff]  ;;  %v8750_v49 = vld [vmem:[#allocation29_spill] sm:$0xff] }
 0x27f   : > { %8738 = vst [vmem:[#allocation22_spill] sm:$0xff] %v6214_v30  ;;  %8739 = vst [vmem:[#allocation20_spill] sm:$0xff] %v6216_v39  ;;  %2335 = vperm.xlu1 %4604, %v2317_v53   ;;  %1994 = vrot.lane.b32.xlu0 %v1901_v28, %s4844_s26  ;;  %v1543_v34 = vsel %vm1542_vm4, %v8744_v54, %v8742_v61  ;;  %v1546_v6 = vsel %vm1542_vm4, %v5398_v62, %v8745_v42  ;;  %v8747_v30 = vld [vmem:[#allocation27_spill] sm:$0xff]  ;;  %v8751_v62 = vld [vmem:[#allocation30_spill] sm:$0xff] }
 0x280   : > { %v1773_v53 = vsel %vm1771_vm5, %v8747_v30, %v8746_v57  ;;  %v1373_v28 = vadd.f32 %v1317_v1, %v1144_v20  ;;  %v1600_v12 = vadd.f32 %v1544_v4, %v1371_v13  ;;  %v1601_v36 = vadd.f32 %v1545_v44, %v1372_v51  ;;  %v8752_v54 = vld [vmem:[#allocation32_spill] sm:$0xff]  ;;  %v8753_v1 = vld [vmem:[#allocation31_spill] sm:$0xff] }
 0x281   : > { %v1774_v15 = vsel %vm1771_vm5, %v8746_v57, %v8748_v14  ;;  %v1775_v43 = vsel %vm1771_vm5, %v8748_v14, %v8750_v49  ;;  %v1772_v61 = vsel %vm1771_vm5, %v8751_v62, %v8747_v30  ;;  %v2002_v4 = vsel %vm2000_vm6, %v8753_v1, %v8752_v54  ;;  %v8754_v14 = vld [vmem:[#allocation33_spill] sm:$0xff]  ;;  %v8755_v62 = vld [vmem:[#allocation34_spill] sm:$0xff] }
 0x282   : > { %v6242_v37 = vpop.permute.xlu1 %1743  ;;  %v6244_v58 = vpop.permute.xlu0 %2183  ;;  %v1599_v44 = vadd.f32 %v1543_v34, %v1370_v17  ;;  %v1602_v20 = vadd.f32 %v1546_v6, %v1373_v28  ;;  %v1829_v13 = vadd.f32 %v1773_v53, %v1600_v12  ;;  %v2128_v51 = vmul.f32 %v8743_v59, %v5027_v24  ;;  %v8757_v34 = vld [vmem:[#allocation37_spill] sm:$0xff]  ;;  %v8758_v53 = vld [vmem:[#allocation39_spill] sm:$0xff] }
 0x283   : > { %8749 = vst [vmem:[#allocation19_spill] sm:$0xff] %v6242_v37  ;;  %837 = vrot.lane.b32.xlu1 %v750_v40, %s4839_s21  ;;  %2215 = vrot.lane.b32.xlu0 %v2126_v8, %s4845_s29  ;;  %v1830_v57 = vadd.f32 %v1774_v15, %v1601_v36  ;;  %v2003_v30 = vsel %vm2000_vm6, %v8752_v54, %v8754_v14  ;;  %v8756_v37 = vld [vmem:[#allocation36_spill] sm:$0xff]  ;;  %v8760_v15 = vld [vmem:[#allocation41_spill] sm:$0xff] }
 0x284   : > { %v2004_v46 = vsel %vm2000_vm6, %v8754_v14, %v8755_v62  ;;  %v2001_v40 = vsel %vm2000_vm6, %v8756_v37, %v8753_v1  ;;  %v1831_v8 = vadd.f32 %v1775_v43, %v1602_v20  ;;  %v1828_v17 = vadd.f32 %v1772_v61, %v1599_v44  ;;  %v8761_v14 = vld [vmem:[#allocation38_spill] sm:$0xff]  ;;  %v8762_v37 = vld [vmem:[#allocation40_spill] sm:$0xff]  ;;  %v2369_v44 = vld [vmem:[%s8374_s3 + $0x18] sm:$0xff] }
 0x285   : > { %v2058_v6 = vadd.f32 %v2002_v4, %v1829_v13  ;;  %v2231_v28 = vsel %vm2229_vm7, %v8758_v53, %v8757_v34  ;;  %v2232_v54 = vsel %vm2229_vm7, %v8757_v34, %v8760_v15  ;;  %v2233_v39 = vsel %vm2229_vm7, %v8760_v15, %v8761_v14 }
 0x286   : > { %v6271_v12 = vpop.permute.xlu1 %1747  ;;  %v6273_v36 = vpop.permute.xlu0 %2187  ;;  %v2230_v43 = vsel %vm2229_vm7, %v8762_v37, %v8758_v53  ;;  %v2059_v61 = vadd.f32 %v2003_v30, %v1830_v57  ;;  %v2060_v1 = vadd.f32 %v2004_v46, %v1831_v8  ;;  %v2057_v4 = vadd.f32 %v2001_v40, %v1828_v17  ;;  %v8765_v46 = vld [vmem:[#allocation13_spill] sm:$0xff]  ;;  %v8767_v40 = vld [vmem:[#allocation35_spill] sm:$0xff] }
 0x287   : > { %8759 = vst [vmem:[#allocation21_spill] sm:$0xff] %v6271_v12  ;;  %1721 = vrot.lane.b32.xlu1 %v6168_v31, %s4843_s25  ;;  %2219 = vrot.lane.b32.xlu0 %v2128_v51, %s4845_s29  ;;  %v2287_v20 = vadd.f32 %v2231_v28, %v2058_v6  ;;  %v1902_v13 = vmul.f32 %v5258_v19, %v4974_v9  ;;  %v8768_v17 = vld [vmem:[#allocation45_spill] sm:$0xff] }
 0x288   : > { %v2288_v34 = vadd.f32 %v2232_v54, %v2059_v61  ;;  %v2289_v15 = vadd.f32 %v2233_v39, %v2060_v1  ;;  %v2286_v12 = vadd.f32 %v2230_v43, %v2057_v4  ;;  %v1429_v31 = vmul.f32 %v5126_v0, %v4980_v11  ;;  %v8766_v39 = vld [vmem:[#allocation14_spill] sm:$0xff] }
 0x289   : > { %v6301_v51 = vmul.f32 %v8765_v46, %v4980_v11  ;;  %v6305_v57 = vmul.f32 %v5212_v50, %v4980_v11  ;;  %v6309_v30 = vmul.f32 %v8766_v39, %v4980_v11  ;;  %v2339_v8 = vmul.f32 %v8767_v40, %v2287_v20 }
 0x28a   : > { %v6292_v53 = vpop.permute.xlu1 %1964  ;;  %v6294_v37 = vpop.permute.xlu0 %2377  ;;  %v631_v6 = vsel %vm626_vm0, %v5298_v47, %v8768_v17  ;;  %v2127_v0 = vmul.f32 %v8743_v59, %v5042_v32  ;;  %v529_v28 = vmul.f32 %v4980_v11, %v5144_v7  ;;  %v2340_v54 = vmul.f32 %v8767_v40, %v2288_v34  ;;  %v8770_v47 = vld [vmem:[#allocation47_spill] sm:$0xff] }
 0x28b   : > { %8763 = vst [vmem:[#allocation24_spill] sm:$0xff] %v6292_v53  ;;  %8764 = vst [vmem:[#allocation17_spill] sm:$0xff] %v6294_v37  ;;  %1996 = vrot.lane.b32.xlu1 %v1902_v13, %s4844_s26  ;;  %2387 = vperm.xlu0 %4601, %v2369_v44   ;;  %v2341_v50 = vmul.f32 %v8767_v40, %v2289_v15  ;;  %v2338_v43 = vmul.f32 %v8767_v40, %v2286_v12  ;;  %v8771_v7 = vld [vmem:[#allocation43_spill] sm:$0xff] }
 0x28c   : > { %v425_v61 = vmul.f32 %v5058_v38, %v5272_v23  ;;  %v860_v44 = vsel %vm855_vm1, %v5310_v60, %v8770_v47  ;;  %v6334_v20 = vadd.f32 %v8771_v7, %v2339_v8  ;;  %v6338_v12 = vmul.f32 %v5224_v56, %v4980_v11 }
 0x28d   : > { %v6341_v34 = vadd.f32 %v8771_v7, %v2340_v54  ;;  %v6344_v15 = vadd.f32 %v8771_v7, %v2338_v43  ;;  %v6347_v60 = vadd.f32 %v8771_v7, %v2341_v50  ;;  %v426_v46 = vmul.f32 %v4977_v10, %v5272_v23 }
 0x28e   : > { %v6324_v1 = vpop.permute.xlu1 %2185  ;;  %v6326_v4 = vpop.permute.xlu0 %1739  ;;  %8772 = vst [vmem:[#allocation23_spill] sm:$0xff] %v6334_v20  ;;  %v687_v13 = vadd.f32 %v631_v6, %v425_v61  ;;  %v2129_v39 = vmul.f32 %v8743_v59, %v5058_v38  ;;  %v979_v56 = vmul.f32 %v5158_v16, %v4980_v11  ;;  %v6357_v8 = vmul.f32 %v5238_v3, %v4980_v11  ;;  %v8777_v16 = vld [vmem:[#allocation42_spill] sm:$0xff] }
 0x28f   : > { %8769 = vst [vmem:[#allocation25_spill] sm:$0xff] %v6326_v4  ;;  %2217 = vrot.lane.b32.xlu1 %v2127_v0, %s4845_s29  ;;  %624 = vrot.lane.b32.xlu0 %v529_v28, %s4838_s20  ;;  %8773 = vst [vmem:[#allocation26_spill] sm:$0xff] %v6341_v34  ;;  %v758_v54 = vmul.f32 %v5166_v21, %v4980_v11  ;;  %v6367_v50 = vmul.f32 %v5188_v35, %v4980_v11  ;;  %v8797_v4 = vld [vmem:[#allocation56_spill] sm:$0xff] }
 0x290   : > { %8774 = vst [vmem:[#allocation27_spill] sm:$0xff] %v6344_v15  ;;  %8775 = vst [vmem:[#allocation28_spill] sm:$0xff] %v6347_v60  ;;  %v916_v6 = vadd.f32 %v860_v44, %v687_v13  ;;  %v6371_v43 = vmul.f32 %v5176_v26, %v4980_v11  ;;  %v632_v3 = vsel %vm626_vm0, %v8768_v17, %v8777_v16  ;;  %v8778_v13 = vld [vmem:[#allocation46_spill] sm:$0xff]  ;;  %v8794_v16 = vld [vmem:[#allocation57_spill] sm:$0xff] }
 0x291   : > { %v6380_v61 = vmul.f32 %v5210_v48, %v4980_v11  ;;  %v6384_v21 = vmul.f32 %v5198_v41, %v4980_v11  ;;  %v2125_v41 = vmul.f32 %v8743_v59, %v5045_v33  ;;  %v2130_v35 = vmul.f32 %v8743_v59, %v4977_v10 }
 0x292   : > { %v6359_v0 = vpop.permute.xlu1 %2189  ;;  %v6361_v28 = vpop.permute.xlu0 %592  ;;  %v6406_v17 = vmul.f32 %v5236_v2, %v4980_v11  ;;  %v6423_v2 = vmul.f32 %v5258_v19, %v4980_v11 }
 0x293   : > { %8776 = vst [vmem:[#allocation29_spill] sm:$0xff] %v6361_v28  ;;  %2221 = vrot.lane.b32.xlu1 %v2129_v39, %s4845_s29  ;;  %1508 = vrot.lane.b32.xlu0 %v1429_v31, %s4842_s24  ;;  %v1089_v31 = vsel %vm1084_vm2, %v5330_v18, %v8778_v13  ;;  %v8779_v39 = vld [vmem:[#allocation44_spill] sm:$0xff]  ;;  %v688_v28 = vadd.f32 %v632_v3, %v426_v46  ;;  %v8783_v3 = vmax.f32 %v6334_v20, 0.0 }
 0x294   : > { %v861_v48 = vsel %vm855_vm1, %v8770_v47, %v8779_v39  ;;  %v1145_v26 = vadd.f32 %v1089_v31, %v916_v6  ;;  %v6410_v18 = vmul.f32 %v5222_v55, %v4980_v11  ;;  %v8782_v47 = vld [vmem:[#allocation51_spill] sm:$0xff]  ;;  %v6419_v46 = vmul.f32 %v5244_v5, %v4980_v11 }
 0x295   : > { %v1090_v39 = vsel %vm1084_vm2, %v8778_v13, %v8782_v47  ;;  %v917_v6 = vadd.f32 %v861_v48, %v688_v28  ;;  %v2131_v55 = vmul.f32 %v8743_v59, %v4974_v9  ;;  %v8784_v13 = vmax.f32 %v6341_v34, 0.0  ;;  %v8787_v47 = vld [vmem:[#allocation48_spill] sm:$0xff]  ;;  %v8788_v28 = vld [vmem:[#allocation53_spill] sm:$0xff]  ;;  %v8789_v9 = vld [vmem:[#allocation55_spill] sm:$0xff] }
 0x296   : > { %v6400_v23 = vpop.permute.xlu1 %1297  ;;  %v6402_v44 = vpop.permute.xlu0 %1307  ;;  %v1318_v19 = vsel %vm1313_vm3, %v8740_v52, %v8787_v47  ;;  %v1319_v48 = vsel %vm1313_vm3, %v8787_v47, %v8788_v28  ;;  %v1547_v34 = vsel %vm1542_vm4, %v8745_v42, %v8789_v9  ;;  %v8792_v47 = vld [vmem:[#allocation52_spill] sm:$0xff]  ;;  %v8793_v42 = vld [vmem:[#allocation54_spill] sm:$0xff] }
 0x297   : > { %8780 = vst [vmem:[#allocation30_spill] sm:$0xff] %v6400_v23  ;;  %8781 = vst [vmem:[#allocation32_spill] sm:$0xff] %v6402_v44  ;;  %2213 = vrot.lane.b32.xlu1 %v2125_v41, %s4845_s29  ;;  %2223 = vrot.lane.b32.xlu0 %v2130_v35, %s4845_s29  ;;  %v6431_v31 = vpack.i.bf16 %v8784_v13, %v8783_v3  ;;  %v8785_v35 = vmax.f32 %v6347_v60, 0.0  ;;  %v8786_v41 = vmax.f32 %v6344_v15, 0.0  ;;  %v8790_v3 = vld [vmem:[#allocation49_spill] sm:$0xff]  ;;  %v8796_v23 = vld [vmem:[#allocation59_spill] sm:$0xff] }
 0x298   : > { %v429_v13 = vmul.f32 %v5030_v25, %v8790_v3  ;;  %v1374_v60 = vadd.f32 %v1318_v19, %v1145_v26  ;;  %v1146_v20 = vadd.f32 %v1090_v39, %v917_v6  ;;  %v1548_v28 = vsel %vm1542_vm4, %v8789_v9, %v8792_v47  ;;  %v8795_v26 = vld [vmem:[#allocation58_spill] sm:$0xff] }
 0x299   : > { %v6437_v5 = vpack.i.bf16 %v8786_v41, %v8785_v35  ;;  %v430_v35 = vmul.f32 %v5042_v32, %v8790_v3  ;;  %v431_v41 = vmul.f32 %v5027_v24, %v8790_v3  ;;  %v635_v44 = vsel %vm626_vm0, %v8794_v16, %v8793_v42  ;;  %v8798_v24 = vld [vmem:[#allocation63_spill] sm:$0xff] }
 0x29a   : > { %v6454_v52 = vpop.permute.xlu1 %2181  ;;  %v6456_v15 = vpop.permute.xlu0 %1528  ;;  %v1776_v39 = vsel %vm1771_vm5, %v8750_v49, %v8795_v26  ;;  %v1375_v6 = vadd.f32 %v1319_v48, %v1146_v20  ;;  %v1603_v19 = vadd.f32 %v1547_v34, %v1374_v60  ;;  %v637_v9 = vsel %vm626_vm0, %v8796_v23, %v8797_v4  ;;  %v8799_v48 = vld [vmem:[#allocation68_spill] sm:$0xff] }
 0x29b   : > { %8791 = vst [vmem:[#allocation31_spill] sm:$0xff] %v6456_v15  ;;  %1066 = vrot.lane.b32.xlu1 %v979_v56, %s4840_s22  ;;  %853 = vrot.lane.b32.xlu0 %v758_v54, %s4839_s21  ;;  %v636_v15 = vsel %vm626_vm0, %v8793_v42, %v8796_v23  ;;  %v428_v47 = vmul.f32 %v5045_v33, %v8790_v3 }
 0x29c   : > { %v1777_v49 = vsel %vm1771_vm5, %v8795_v26, %v8798_v24  ;;  %v432_v56 = vmul.f32 %v5058_v38, %v8790_v3  ;;  %v433_v20 = vmul.f32 %v4977_v10, %v8790_v3  ;;  %v1604_v34 = vadd.f32 %v1548_v28, %v1375_v6  ;;  %v8801_v26 = vld [vmem:[#allocation73_spill] sm:$0xff]  ;;  %v8806_v6 = vld [vmem:[#allocation67_spill] sm:$0xff]  ;;  %v8813_v3 = vld [vmem:[#allocation84_spill] sm:$0xff] }
 0x29d   : > { %v691_v60 = vadd.f32 %v635_v44, %v429_v13  ;;  %v1832_v54 = vadd.f32 %v1776_v39, %v1603_v19  ;;  %v2005_v23 = vsel %vm2000_vm6, %v8755_v62, %v8799_v48  ;;  %v692_v32 = vadd.f32 %v636_v15, %v430_v35  ;;  %v8802_v44 = vld [vmem:[#allocation61_spill] sm:$0xff]  ;;  %v8805_v39 = vld [vmem:[#allocation64_spill] sm:$0xff] }
 0x29e   : > { %v6487_v42 = vpop.permute.xlu1 %1034  ;;  %v6489_v33 = vpop.permute.xlu0 %1532  ;;  %v693_v25 = vadd.f32 %v637_v9, %v431_v41  ;;  %v2006_v24 = vsel %vm2000_vm6, %v8799_v48, %v8801_v26  ;;  %v634_v62 = vsel %vm626_vm0, %v8802_v44, %v8794_v16  ;;  %v1833_v28 = vadd.f32 %v1777_v49, %v1604_v34  ;;  %v8803_v13 = vld [vmem:[#allocation65_spill] sm:$0xff]  ;;  %v8804_v41 = vld [vmem:[#allocation62_spill] sm:$0xff]  ;;  %v8810_v48 = vld [vmem:[#allocation71_spill] sm:$0xff] }
 0x29f   : > { %8800 = vst [vmem:[#allocation33_spill] sm:$0xff] %v6487_v42  ;;  %1950 = vrot.lane.b32.xlu1 %v6301_v51, %s4844_s26  ;;  %1737 = vrot.lane.b32.xlu0 %v6305_v57, %s4843_s25  ;;  %v638_v15 = vsel %vm626_vm0, %v8797_v4, %v8803_v13  ;;  %v2234_v35 = vsel %vm2229_vm7, %v8761_v14, %v5696_v45  ;;  %v8807_v9 = vld [vmem:[#allocation86_spill] sm:$0xff]  ;;  %v8808_v49 = vld [vmem:[#allocation69_spill] sm:$0xff] }
 0x2a0   : > { %v639_v51 = vsel %vm626_vm0, %v8803_v13, %v8804_v41  ;;  %v864_v57 = vsel %vm855_vm1, %v8806_v6, %v8805_v39  ;;  %v2061_v19 = vadd.f32 %v2005_v23, %v1832_v54  ;;  %v2235_v16 = vsel %vm2229_vm7, %v5696_v45, %v8807_v9  ;;  %v8809_v34 = vld [vmem:[#allocation66_spill] sm:$0xff] }
 0x2a1   : > { %v865_v4 = vsel %vm855_vm1, %v8805_v39, %v8808_v49  ;;  %v866_v14 = vsel %vm855_vm1, %v8808_v49, %v8809_v34  ;;  %v863_v44 = vsel %vm855_vm1, %v8810_v48, %v8806_v6  ;;  %v2062_v13 = vadd.f32 %v2006_v24, %v1833_v28  ;;  %v8812_v49 = vld [vmem:[#allocation76_spill] sm:$0xff] }
 0x2a2   : > { %v6525_v26 = vpop.permute.xlu1 %1309  ;;  %v6527_v54 = vpop.permute.xlu0 %1749  ;;  %v690_v23 = vadd.f32 %v634_v62, %v428_v47  ;;  %v694_v42 = vadd.f32 %v638_v15, %v432_v56  ;;  %v2290_v45 = vadd.f32 %v2234_v35, %v2061_v19  ;;  %v695_v39 = vadd.f32 %v639_v51, %v433_v20  ;;  %v8815_v56 = vld [vmem:[#allocation79_spill] sm:$0xff]  ;;  %v8816_v62 = vld [vmem:[#allocation81_spill] sm:$0xff]  ;;  %v8817_v20 = vld [vmem:[#allocation82_spill] sm:$0xff] }
 0x2a3   : > { %8811 = vst [vmem:[#allocation34_spill] sm:$0xff] %v6525_v26  ;;  %2225 = vrot.lane.b32.xlu1 %v2131_v55, %s4845_s29  ;;  %1082 = vrot.lane.b32.xlu0 %v6367_v50, %s4840_s22  ;;  %v920_v9 = vadd.f32 %v864_v57, %v691_v60  ;;  %v1092_v41 = vsel %vm1084_vm2, %v8813_v3, %v8812_v49  ;;  %v8814_v26 = vld [vmem:[#allocation74_spill] sm:$0xff]  ;;  %v8819_v15 = vld [vmem:[#allocation91_spill] sm:$0xff] }
 0x2a4   : > { %v2291_v6 = vadd.f32 %v2235_v16, %v2062_v13  ;;  %v921_v24 = vadd.f32 %v865_v4, %v692_v32  ;;  %v922_v28 = vadd.f32 %v866_v14, %v693_v25  ;;  %v919_v48 = vadd.f32 %v863_v44, %v690_v23  ;;  %v8818_v60 = vld [vmem:[#allocation78_spill] sm:$0xff]  ;;  %v8821_v4 = vld [vmem:[#allocation93_spill] sm:$0xff]  ;;  %v8822_v14 = vld [vmem:[#allocation108_spill] sm:$0xff] }
 0x2a5   : > { %v867_v47 = vsel %vm855_vm1, %v8809_v34, %v8814_v26  ;;  %v868_v55 = vsel %vm855_vm1, %v8814_v26, %v8815_v56  ;;  %v1093_v50 = vsel %vm1084_vm2, %v8812_v49, %v8816_v62  ;;  %v1095_v3 = vsel %vm1084_vm2, %v8818_v60, %v8817_v20  ;;  %v8820_v16 = vld [vmem:[#allocation98_spill] sm:$0xff] }
 0x2a6   : > { %v1321_v25 = vsel %vm1313_vm3, %v5794_v29, %v8819_v15  ;;  %v6550_v32 = vpop.permute.xlu1 %1530  ;;  %v6552_v35 = vpop.permute.xlu0 %1970  ;;  %v1094_v26 = vsel %vm1084_vm2, %v8816_v62, %v8818_v60  ;;  %v2342_v51 = vmul.f32 %v8767_v40, %v2290_v45  ;;  %v1148_v57 = vadd.f32 %v1092_v41, %v919_v48  ;;  %v8823_v44 = vld [vmem:[#allocation114_spill] sm:$0xff]  ;;  %v8824_v41 = vld [vmem:[#allocation89_spill] sm:$0xff] }
 0x2a7   : > { %1295 = vrot.lane.b32.xlu1 %v6371_v43, %s4841_s23  ;;  %1966 = vrot.lane.b32.xlu0 %v6357_v8, %s4844_s26  ;;  %v923_v19 = vadd.f32 %v867_v47, %v694_v42  ;;  %v2343_v29 = vmul.f32 %v8767_v40, %v2291_v6  ;;  %v1324_v34 = vsel %vm1313_vm3, %v8821_v4, %v8820_v16  ;;  %v8825_v42 = vld [vmem:[#allocation115_spill] sm:$0xff]  ;;  %v8826_v47 = vld [vmem:[#allocation110_spill] sm:$0xff] }
 0x2a8   : > { %v1550_v13 = vsel %vm1542_vm4, %v8823_v44, %v8822_v14  ;;  %v924_v23 = vadd.f32 %v868_v55, %v695_v39  ;;  %v1151_v45 = vadd.f32 %v1095_v3, %v922_v28  ;;  %v1096_v43 = vsel %vm1084_vm2, %v8817_v20, %v8824_v41  ;;  %v8830_v20 = vld [vmem:[#allocation152_spill] sm:$0xff]  ;;  %v8831_v3 = vld [vmem:[#allocation155_spill] sm:$0xff] }
 0x2a9   : > { %v1377_v49 = vadd.f32 %v1321_v25, %v1148_v57  ;;  %v1149_v48 = vadd.f32 %v1093_v50, %v920_v9  ;;  %v1150_v8 = vadd.f32 %v1094_v26, %v921_v24  ;;  %v1553_v6 = vsel %vm1542_vm4, %v8826_v47, %v8825_v42  ;;  %v8832_v26 = vld [vmem:[#allocation94_spill] sm:$0xff] }
 0x2aa   : > { %v1779_v62 = vsel %vm1771_vm5, %v5994_v27, %v5964_v22  ;;  %v6578_v60 = vpop.permute.xlu1 %1534  ;;  %v6580_v44 = vpop.permute.xlu0 %1974  ;;  %v6583_v39 = vadd.f32 %v8771_v7, %v2342_v51  ;;  %v1380_v28 = vadd.f32 %v1324_v34, %v1151_v45  ;;  %v6590_v9 = vadd.f32 %v8771_v7, %v2343_v29  ;;  %v8829_v27 = vld [vmem:[#allocation133_spill] sm:$0xff]  ;;  %v8834_v34 = vld [vmem:[#allocation106_spill] sm:$0xff]  ;;  %v8835_v45 = vld [vmem:[#allocation151_spill] sm:$0xff] }
 0x2ab   : > { %v1606_v55 = vadd.f32 %v1550_v13, %v1377_v49  ;;  %2179 = vrot.lane.b32.xlu1 %v6309_v30, %s4845_s29  ;;  %1753 = vrot.lane.b32.xlu0 %v6380_v61, %s4843_s25  ;;  %v1152_v24 = vadd.f32 %v1096_v43, %v923_v19  ;;  %v1782_v50 = vsel %vm1771_vm5, %v8829_v27, %v5956_v63  ;;  %v8833_v30 = vld [vmem:[#allocation96_spill] sm:$0xff]  ;;  %v8836_v43 = vld [vmem:[#allocation154_spill] sm:$0xff] }
 0x2ac   : > { %8827 = vst [vmem:[#allocation36_spill] sm:$0xff] %v6583_v39  ;;  %8828 = vst [vmem:[#allocation37_spill] sm:$0xff] %v6590_v9  ;;  %v2008_v25 = vsel %vm2000_vm6, %v8831_v3, %v8830_v20  ;;  %v1097_v51 = vsel %vm1084_vm2, %v8824_v41, %v8832_v26  ;;  %v1322_v61 = vsel %vm1313_vm3, %v8819_v15, %v8833_v30 }
 0x2ad   : > { %v1609_v57 = vadd.f32 %v1553_v6, %v1380_v28  ;;  %v1835_v29 = vadd.f32 %v1779_v62, %v1606_v55  ;;  %v1323_v19 = vsel %vm1313_vm3, %v8833_v30, %v8821_v4  ;;  %v1325_v13 = vsel %vm1313_vm3, %v8820_v16, %v8834_v34  ;;  %v8838_v6 = vld [vmem:[#allocation113_spill] sm:$0xff] }
 0x2ae   : > { %v2011_v49 = vsel %vm2000_vm6, %v8836_v43, %v8835_v45  ;;  %v2237_v41 = vsel %vm2229_vm7, %v6454_v52, %v6244_v58  ;;  %v6616_v3 = vpop.permute.xlu1 %1751  ;;  %v6618_v15 = vpop.permute.xlu0 %2191  ;;  %v1551_v4 = vsel %vm1542_vm4, %v8822_v14, %v8838_v6  ;;  %v1153_v16 = vadd.f32 %v1097_v51, %v924_v23  ;;  %v8839_v14 = vld [vmem:[#allocation111_spill] sm:$0xff] }
 0x2af   : > { %8837 = vst [vmem:[#allocation39_spill] sm:$0xff] %v6616_v3  ;;  %v1838_v62 = vadd.f32 %v1782_v50, %v1609_v57  ;;  %v2064_v28 = vadd.f32 %v2008_v25, %v1835_v29  ;;  %1524 = vrot.lane.b32.xlu1 %v6384_v21, %s4842_s24  ;;  %4606 = vrot.lane.b32.xlu0 %v6431_v31, %s4838_s20  ;;  %v8840_v31 = vld [vmem:[#allocation130_spill] sm:$0xff] }
 0x2b0   : > { %v1378_v55 = vadd.f32 %v1322_v61, %v1149_v48  ;;  %v1552_v52 = vsel %vm1542_vm4, %v8838_v6, %v8826_v47  ;;  %v2240_v30 = vsel %vm2229_vm7, %v6273_v36, %v6359_v0  ;;  %v1379_v7 = vadd.f32 %v1323_v19, %v1150_v8  ;;  %v8842_v61 = vld [vmem:[#allocation128_spill] sm:$0xff]  ;;  %v8843_v19 = vld [vmem:[#allocation131_spill] sm:$0xff] }
 0x2b1   : > { %v1326_v50 = vsel %vm1313_vm3, %v8834_v34, %v8839_v14  ;;  %v2067_v25 = vadd.f32 %v2011_v49, %v1838_v62  ;;  %v2293_v21 = vadd.f32 %v2237_v41, %v2064_v28  ;;  %v1381_v57 = vadd.f32 %v1325_v13, %v1152_v24  ;;  %v8889_v14 = vld [vmem:[#allocation145_spill] sm:$0xff] }
 0x2b2   : > { %v1607_v29 = vadd.f32 %v1551_v4, %v1378_v55  ;;  %v1780_v23 = vsel %vm1771_vm5, %v5964_v22, %v8840_v31  ;;  %v1781_v48 = vsel %vm1771_vm5, %v8840_v31, %v8829_v27  ;;  %v6642_v47 = vpop.permute.xlu1 %1972  ;;  %v6644_v51 = vpop.permute.xlu0 %2330  ;;  %v1608_v8 = vadd.f32 %v1552_v52, %v1379_v7  ;;  %v8844_v27 = vld [vmem:[#allocation149_spill] sm:$0xff]  ;;  %v8845_v4 = vld [vmem:[#allocation147_spill] sm:$0xff] }
 0x2b3   : > { %8841 = vst [vmem:[#allocation41_spill] sm:$0xff] %v6644_v51  ;;  %v1555_v34 = vsel %vm1542_vm4, %v8843_v19, %v8842_v61  ;;  %v2296_v49 = vadd.f32 %v2240_v30, %v2067_v25  ;;  %1311 = vrot.lane.b32.xlu1 %v6338_v12, %s4841_s23  ;;  %1540 = vrot.lane.b32.xlu0 %v6406_v17, %s4842_s24  ;;  %v8846_v12 = vld [vmem:[#allocation150_spill] sm:$0xff]  ;;  %v8847_v17 = vld [vmem:[#allocation156_spill] sm:$0xff]  ;;  %s4848_s23 = smov 99   ;;  %s4849_s24 = smov 100  }
 0x2b4   : > { %v1382_v22 = vadd.f32 %v1326_v50, %v1153_v16  ;;  %v1554_v24 = vsel %vm1542_vm4, %v8825_v42, %v8843_v19  ;;  %v2009_v7 = vsel %vm2000_vm6, %v8830_v20, %v8844_v27  ;;  %v2010_v13 = vsel %vm2000_vm6, %v8844_v27, %v8836_v43  ;;  %v8853_v27 = vld [vmem:[#allocation15_spill] sm:$0xff] }
 0x2b5   : > { %v1836_v41 = vadd.f32 %v1780_v23, %v1607_v29  ;;  %v1837_v6 = vadd.f32 %v1781_v48, %v1608_v8  ;;  %v1784_v62 = vsel %vm1771_vm5, %v8846_v12, %v8845_v4  ;;  %v2345_v28 = vmul.f32 %v8847_v17, %v2293_v21 }
 0x2b6   : > { %v1611_v16 = vadd.f32 %v1555_v34, %v1382_v22  ;;  %v1783_v42 = vsel %vm1771_vm5, %v5956_v63, %v8846_v12  ;;  %v2238_v20 = vsel %vm2229_vm7, %v6244_v58, %v6324_v1  ;;  %v2239_v43 = vsel %vm2229_vm7, %v6324_v1, %v6273_v36  ;;  %v6675_v55 = vpop.permute.xlu1 %1976  ;;  %v6677_v52 = vpop.permute.xlu0 %1968  ;;  %v8848_v36 = vld [vmem:[#allocation20_spill] sm:$0xff] }
 0x2b7   : > { %v2065_v30 = vadd.f32 %v2009_v7, %v1836_v41  ;;  %v2066_v50 = vadd.f32 %v2010_v13, %v1837_v6  ;;  %v2348_v25 = vmul.f32 %v8847_v17, %v2296_v49  ;;  %2195 = vrot.lane.b32.xlu1 %v6410_v18, %s4845_s29  ;;  %1769 = vrot.lane.b32.xlu0 %v6419_v46, %s4843_s25  ;;  %v8539_v63 = vmax.f32 %v6590_v9, 0.0  ;;  %s4850_s25 = smov 112  }
 0x2b8   : > { %v1610_v58 = vadd.f32 %v1554_v24, %v1381_v57  ;;  %v1840_v21 = vadd.f32 %v1784_v62, %v1611_v16  ;;  %v2013_v1 = vsel %vm2000_vm6, %v8848_v36, %v6292_v53  ;;  %v2012_v29 = vsel %vm2000_vm6, %v8835_v45, %v8848_v36  ;;  %v8854_v62 = vld [vmem:[#allocation16_spill] sm:$0xff] }
 0x2b9   : > { %v2294_v31 = vadd.f32 %v2238_v20, %v2065_v30  ;;  %v2295_v23 = vadd.f32 %v2239_v43, %v2066_v50  ;;  %v6692_v48 = vadd.f32 %v6294_v37, %v2345_v28  ;;  %v8544_v18 = vmax.f32 %v6583_v39, 0.0  ;;  %v8876_v39 = vld [vmem:[#allocation92_spill] sm:$0xff] }
 0x2ba   : > { %v1839_v46 = vadd.f32 %v1783_v42, %v1610_v58  ;;  %v6695_v8 = vpop.permute.xlu1 %2193  ;;  %v6697_v57 = vpop.permute.xlu0 %1263  ;;  %v2069_v19 = vadd.f32 %v2013_v1, %v1840_v21  ;;  %v6700_v34 = vadd.f32 %v6294_v37, %v2348_v25  ;;  %v2241_v22 = vsel %vm2229_vm7, %v6359_v0, %v6618_v15 }
 0x2bb   : > { %8849 = vst [vmem:[#allocation38_spill] sm:$0xff] %v6692_v48  ;;  %8850 = vst [vmem:[#allocation40_spill] sm:$0xff] %v6695_v8  ;;  %v2242_v45 = vsel %vm2229_vm7, %v6618_v15, %v6695_v8  ;;  %1998 = vrot.lane.b32.xlu0 %v6423_v2, %s4844_s26  ;;  %4611 = vrot.lane.b32.xlu1 %v6437_v5, %s4838_s20  ;;  %v4615_v24 = vpack.i.bf16 %v8539_v63, %v8544_v18  ;;  %v8541_v41 = vmax.f32 %v6692_v48, 0.0  ;;  %v8870_v63 = vld [vmem:[#allocation102_spill] sm:$0xff]  ;;  %v8873_v18 = vld [vmem:[#allocation9_spill] sm:$0xff] }
 0x2bc   : > { %8851 = vst [vmem:[#allocation13_spill] sm:$0xff] %v6697_v57  ;;  %8852 = vst [vmem:[#allocation14_spill] sm:$0xff] %v6700_v34  ;;  %v2068_v49 = vadd.f32 %v2012_v29, %v1839_v46  ;;  %v1895_v7 = vmul.f32 %v8853_v27, %v4980_v11  ;;  %v2346_v13 = vmul.f32 %v8847_v17, %v2294_v31  ;;  %v8540_v0 = vmax.f32 %v6700_v34, 0.0  ;;  %v8860_v46 = vld [vmem:[#allocation75_spill] sm:$0xff]  ;;  %v8874_v34 = vld [vmem:[#allocation124_spill] sm:$0xff] }
 0x2bd   : > { %v2347_v2 = vmul.f32 %v8847_v17, %v2295_v23  ;;  %v2298_v5 = vadd.f32 %v2242_v45, %v2069_v19  ;;  %v2124_v28 = vmul.f32 %v8854_v62, %v4980_v11  ;;  %v2132_v1 = vmul.f32 %v8743_v59, %v4980_v11  ;;  %v8861_v19 = vld [vmem:[#allocation70_spill] sm:$0xff]  ;;  %v8875_v48 = vld [vmem:[#allocation127_spill] sm:$0xff]  ;;  %v8881_v8 = vld [vmem:[#allocation129_spill] sm:$0xff] }
 0x2be   : > { %v6721_v6 = vpop.permute.xlu1 %1526  ;;  %v6723_v12 = vpop.permute.xlu0 %1538  ;;  %v2297_v15 = vadd.f32 %v2241_v22, %v2068_v49  ;;  %v6731_v16 = vadd.f32 %v6294_v37, %v2346_v13  ;;  %v4625_v43 = vpack.i.bf16 %v8541_v41, %v8540_v0  ;;  %v642_v45 = vsel %vm626_vm0, %v8861_v19, %v8860_v46  ;;  %v8862_v49 = vld [vmem:[#allocation50_spill] sm:$0xff]  ;;  %v8871_v41 = vld [vmem:[#allocation77_spill] sm:$0xff] }
 0x2bf   : > { %4616 = vrot.lane.b32.xlu0 %v4615_v24, %s4838_s20  ;;  %1982 = vrot.lane.b32.xlu1 %v1895_v7, %s4844_s26  ;;  %v6734_v42 = vadd.f32 %v6294_v37, %v2347_v2  ;;  %v2350_v20 = vmul.f32 %v8847_v17, %v2298_v5  ;;  %v8863_v22 = vld [vmem:[#allocation10_spill] sm:$0xff]  ;;  %v8865_v7 = vld [vmem:[#allocation85_spill] sm:$0xff]  ;;  %v438_v9 = vmul.f32 %v8873_v18, %v8862_v49  ;;  %s4852_s26 = smov 98  }
 0x2c0   : > { %8855 = vst [vmem:[#allocation45_spill] sm:$0xff] %v6731_v16  ;;  %v2349_v25 = vmul.f32 %v8847_v17, %v2297_v15  ;;  %v8542_v58 = vmax.f32 %v6731_v16, 0.0  ;;  %v436_v24 = vmul.f32 %v8863_v22, %v8862_v49  ;;  %v8864_v59 = vld [vmem:[#allocation90_spill] sm:$0xff]  ;;  %v8867_v15 = vld [vmem:[#allocation72_spill] sm:$0xff]  ;;  %v1329_v16 = vsel %vm1313_vm3, %v8875_v48, %v8874_v34 }
 0x2c1   : > { %8856 = vst [vmem:[#allocation47_spill] sm:$0xff] %v6734_v42  ;;  %v8543_v21 = vmax.f32 %v6734_v42, 0.0  ;;  %v6751_v36 = vadd.f32 %v6294_v37, %v2350_v20  ;;  %v871_v13 = vsel %vm855_vm1, %v8865_v7, %v8864_v59  ;;  %v643_v62 = vsel %vm626_vm0, %v8860_v46, %v8867_v15 }
 0x2c2   : > { %v6741_v30 = vpop.permute.xlu1 %821  ;;  %v6743_v50 = vpop.permute.xlu0 %1759  ;;  %v6760_v23 = vadd.f32 %v6294_v37, %v2349_v25  ;;  %v8880_v37 = vld [vmem:[#allocation109_spill] sm:$0xff]  ;;  %v2016_v61 = vsel %vm2000_vm6, %v6552_v35, %v6642_v47 }
 0x2c3   : > { %8857 = vst [vmem:[#allocation46_spill] sm:$0xff] %v6741_v30  ;;  %4626 = vrot.lane.b32.xlu0 %v4625_v43, %s4838_s20  ;;  %2211 = vrot.lane.b32.xlu1 %v2124_v28, %s4845_s29  ;;  %8858 = vst [vmem:[#allocation48_spill] sm:$0xff] %v6751_v36  ;;  %v8551_v27 = vmax.f32 %v6751_v36, 0.0  ;;  %v4620_v11 = vpack.i.bf16 %v8543_v21, %v8542_v58  ;;  %v698_v28 = vadd.f32 %v642_v45, %v436_v24  ;;  %v8868_v43 = vld [vmem:[#allocation11_spill] sm:$0xff]  ;;  %v8879_v36 = vld [vmem:[#allocation146_spill] sm:$0xff] }
 0x2c4   : > { %8859 = vst [vmem:[#allocation55_spill] sm:$0xff] %v6760_v23  ;;  %v8552_v20 = vmax.f32 %v6760_v23, 0.0  ;;  %v437_v25 = vmul.f32 %v8868_v43, %v8862_v49  ;;  %v644_v58 = vsel %vm626_vm0, %v8867_v15, %v8871_v41  ;;  %v8872_v21 = vld [vmem:[#allocation87_spill] sm:$0xff] }
 0x2c5   : > { %v872_v46 = vsel %vm855_vm1, %v8864_v59, %v8872_v21  ;;  %v927_v45 = vadd.f32 %v871_v13, %v698_v28  ;;  %v873_v59 = vsel %vm855_vm1, %v8872_v21, %v8876_v39  ;;  %v8877_v13 = vld [vmem:[#allocation104_spill] sm:$0xff]  ;;  %v1330_v21 = vsel %vm1313_vm3, %v8874_v34, %v8881_v8 }
 0x2c6   : > { %v6755_v29 = vpop.permute.xlu1 %1536  ;;  %v6757_v31 = vpop.permute.xlu0 %1763  ;;  %v4630_v24 = vpack.i.bf16 %v8551_v27, %v8552_v20  ;;  %v8878_v20 = vld [vmem:[#allocation143_spill] sm:$0xff]  ;;  %v1102_v40 = vsel %vm1084_vm2, %v8877_v13, %v8880_v37  ;;  %v8886_v34 = vld [vmem:[#allocation148_spill] sm:$0xff] }
 0x2c7   : > { %2227 = vrot.lane.b32.xlu1 %v2132_v1, %s4845_s29  ;;  %v8869_v1 = vld [vmem:[#allocation107_spill] sm:$0xff]  ;;  %v1558_v23 = vsel %vm1542_vm4, %v8879_v36, %v8878_v20 }
 0x2c8   : > { %v1100_v0 = vsel %vm1084_vm2, %v8870_v63, %v8869_v1  ;;  %v1101_v28 = vsel %vm1084_vm2, %v8869_v1, %v8877_v13  ;;  %v8885_v13 = vld [vmem:[#allocation126_spill] sm:$0xff] }
 0x2c9   : > { %v1156_v27 = vadd.f32 %v1100_v0, %v927_v45  ;;  %v8882_v0 = vld [vmem:[#allocation19_spill] sm:$0xff]  ;;  %v8883_v45 = vld [vmem:[#allocation165_spill] sm:$0xff] }
 0x2ca   : > { %v6776_v2 = vpop.permute.xlu1 %1757  ;;  %v6778_v5 = vpop.permute.xlu0 %1980 }
 0x2cb   : > { %8866 = vst [vmem:[#allocation54_spill] sm:$0xff] %v6778_v5  ;;  %4621 = vrot.lane.b32.xlu1 %v4620_v11, %s4838_s20  ;;  %v699_v11 = vadd.f32 %v643_v62, %v437_v25  ;;  %v700_v62 = vadd.f32 %v644_v58, %v438_v9  ;;  %v1385_v17 = vadd.f32 %v1329_v16, %v1156_v27 }
 0x2cc   : > { %v1787_v9 = vsel %vm1771_vm5, %v8883_v45, %v8882_v0  ;;  %v1331_v16 = vsel %vm1313_vm3, %v8881_v8, %v8885_v13  ;;  %v8890_v8 = vld [vmem:[#allocation167_spill] sm:$0xff] }
 0x2cd   : > { %v928_v25 = vadd.f32 %v872_v46, %v699_v11  ;;  %v929_v53 = vadd.f32 %v873_v59, %v700_v62  ;;  %v1614_v27 = vadd.f32 %v1558_v23, %v1385_v17  ;;  %v1559_v59 = vsel %vm1542_vm4, %v8878_v20, %v8886_v34 }
 0x2ce   : > { %v6805_v42 = vpop.permute.xlu1 %1761  ;;  %v2202_v15 = vpop.permute.xlu0 %2201  ;;  %v1560_v17 = vsel %vm1542_vm4, %v8886_v34, %v8889_v14  ;;  %v1788_v23 = vsel %vm1771_vm5, %v8882_v0, %v8890_v8  ;;  %v2017_v34 = vsel %vm2000_vm6, %v6642_v47, %v6580_v44 }
 0x2cf   : > { %4631 = vrot.lane.b32.xlu1 %v4630_v24, %s4838_s20  ;;  %v1157_v1 = vadd.f32 %v1101_v28, %v928_v25  ;;  %v8884_v24 = vld [vmem:[#allocation80_spill] sm:$0xff]  ;;  %v1158_v25 = vadd.f32 %v1102_v40, %v929_v53  ;;  %v1843_v20 = vadd.f32 %v1787_v9, %v1614_v27  ;;  %v8891_v53 = vld [vmem:[#allocation117_spill] sm:$0xff] }
 0x2d0   : > { %v641_v11 = vsel %vm626_vm0, %v8884_v24, %v8861_v19  ;;  %v8887_v28 = vld [vmem:[#allocation12_spill] sm:$0xff]  ;;  %v8888_v19 = vld [vmem:[#allocation95_spill] sm:$0xff]  ;;  %v1099_v40 = vsel %vm1084_vm2, %v8891_v53, %v8870_v63 }
 0x2d1   : > { %v435_v62 = vmul.f32 %v8887_v28, %v8862_v49  ;;  %v1386_v4 = vadd.f32 %v1330_v21, %v1157_v1  ;;  %v870_v24 = vsel %vm855_vm1, %v8888_v19, %v8865_v7  ;;  %v1387_v21 = vadd.f32 %v1331_v16, %v1158_v25  ;;  %v8892_v7 = vld [vmem:[#allocation21_spill] sm:$0xff]  ;;  %v8893_v63 = vld [vmem:[#allocation132_spill] sm:$0xff] }
 0x2d2   : > { %v6826_v58 = vpop.permute.xlu1 %1978  ;;  %v6828_v46 = vpop.permute.xlu0 %2205  ;;  %v1789_v19 = vsel %vm1771_vm5, %v8890_v8, %v8892_v7  ;;  %v2072_v0 = vadd.f32 %v2016_v61, %v1843_v20  ;;  %v2018_v16 = vsel %vm2000_vm6, %v6580_v44, %v6675_v55  ;;  %v8894_v61 = vld [vmem:[#allocation158_spill] sm:$0xff]  ;;  %v8895_v44 = vld [vmem:[#allocation25_spill] sm:$0xff] }
 0x2d3   : > { %v697_v26 = vadd.f32 %v641_v11, %v435_v62  ;;  %v1615_v1 = vadd.f32 %v1559_v59, %v1386_v4  ;;  %v1616_v27 = vadd.f32 %v1560_v17, %v1387_v21  ;;  %v1328_v4 = vsel %vm1313_vm3, %v8893_v63, %v8875_v48 }
 0x2d5   : > { %v926_v11 = vadd.f32 %v870_v24, %v697_v26  ;;  %v1844_v62 = vadd.f32 %v1788_v23, %v1615_v1  ;;  %v1845_v8 = vadd.f32 %v1789_v19, %v1616_v27  ;;  %v1557_v26 = vsel %vm1542_vm4, %v8894_v61, %v8879_v36 }
 0x2d6   : > { %v2200_v57 = vpop.permute.xlu1 %2199  ;;  %v6856_v56 = vpop.permute.xlu0 %1755 }
 0x2d7   : > { %v2245_v9 = vsel %vm2229_vm7, %v2200_v57, %v2202_v15  ;;  %v1155_v25 = vadd.f32 %v1099_v40, %v926_v11  ;;  %v2073_v53 = vadd.f32 %v2017_v34, %v1844_v62  ;;  %v2074_v23 = vadd.f32 %v2018_v16, %v1845_v8 }
 0x2d8   : > { %v2301_v59 = vadd.f32 %v2245_v9, %v2072_v0  ;;  %v1786_v40 = vsel %vm1771_vm5, %v8895_v44, %v8883_v45  ;;  %v8903_v44 = vld [vmem:[#allocation100_spill] sm:$0xff] }
 0x2d9   : > { %v1384_v17 = vadd.f32 %v1328_v4, %v1155_v25 }
 0x2da   : > { %v2204_v30 = vpop.permute.xlu1 %2203  ;;  %v6871_v47 = vpop.permute.xlu0 %608  ;;  %v2353_v21 = vmul.f32 %v6644_v51, %v2301_v59 }
 0x2db   : > { %v2246_v24 = vsel %vm2229_vm7, %v2202_v15, %v2204_v30  ;;  %v2247_v48 = vsel %vm2229_vm7, %v2204_v30, %v6828_v46  ;;  %v1613_v1 = vadd.f32 %v1557_v26, %v1384_v17  ;;  %v2015_v30 = vsel %vm2000_vm6, %v6677_v52, %v6552_v35  ;;  %v8900_v26 = vld [vmem:[#allocation83_spill] sm:$0xff] }
 0x2dc   : > { %v2302_v20 = vadd.f32 %v2246_v24, %v2073_v53  ;;  %v2303_v19 = vadd.f32 %v2247_v48, %v2074_v23  ;;  %v8901_v24 = vld [vmem:[#allocation88_spill] sm:$0xff]  ;;  %v439_v17 = vmul.f32 %v5058_v38, %v8862_v49  ;;  %v440_v23 = vmul.f32 %v4977_v10, %v8862_v49 }
 0x2dd   : > { %v1842_v9 = vadd.f32 %v1786_v40, %v1613_v1  ;;  %v646_v48 = vsel %vm626_vm0, %v8900_v26, %v8901_v24  ;;  %v874_v40 = vsel %vm855_vm1, %v8876_v39, %v8903_v44 }
 0x2de   : > { %v2354_v34 = vmul.f32 %v6644_v51, %v2302_v20  ;;  %v6884_v0 = vpop.permute.xlu1 %2382  ;;  %v6886_v36 = vpop.permute.xlu0 %1492  ;;  %v2355_v62 = vmul.f32 %v6644_v51, %v2303_v19  ;;  %v702_v19 = vadd.f32 %v646_v48, %v440_v23  ;;  %v8908_v48 = vld [vmem:[#allocation141_spill] sm:$0xff] }
 0x2df   : > { %8896 = vst [vmem:[#allocation57_spill] sm:$0xff] %v6884_v0  ;;  %v6892_v15 = vadd.f32 %v6884_v0, %v2353_v21  ;;  %v2071_v27 = vadd.f32 %v2015_v30, %v1842_v9  ;;  %v8904_v21 = vld [vmem:[#allocation105_spill] sm:$0xff] }
 0x2e0   : > { %v6895_v45 = vadd.f32 %v6884_v0, %v2354_v34  ;;  %v6914_v61 = vadd.f32 %v6884_v0, %v2355_v62  ;;  %v8905_v62 = vld [vmem:[#allocation125_spill] sm:$0xff] }
 0x2e1   : > { %8897 = vst [vmem:[#allocation58_spill] sm:$0xff] %v6892_v15  ;;  %v8563_v11 = vmax.f32 %v6892_v15, 0.0  ;;  %v8921_v15 = vld [vmem:[#allocation118_spill] sm:$0xff] }
 0x2e2   : > { %8898 = vst [vmem:[#allocation59_spill] sm:$0xff] %v6895_v45  ;;  %v2198_v63 = vpop.permute.xlu1 %2197  ;;  %v6899_v4 = vpop.permute.xlu0 %1767  ;;  %v8561_v16 = vmax.f32 %v6895_v45, 0.0  ;;  %8899 = vst [vmem:[#allocation56_spill] sm:$0xff] %v6914_v61  ;;  %v8919_v45 = vld [vmem:[#allocation116_spill] sm:$0xff] }
 0x2e3   : > { %v2244_v59 = vsel %vm2229_vm7, %v2198_v63, %v2200_v57  ;;  %v645_v57 = vsel %vm626_vm0, %v8871_v41, %v8900_v26  ;;  %v875_v41 = vsel %vm855_vm1, %v8903_v44, %v8904_v21  ;;  %v1103_v63 = vsel %vm1084_vm2, %v8880_v37, %v8905_v62  ;;  %v8907_v26 = vld [vmem:[#allocation144_spill] sm:$0xff] }
 0x2e4   : > { %v2300_v35 = vadd.f32 %v2244_v59, %v2071_v27  ;;  %v4635_v52 = vpack.i.bf16 %v8561_v16, %v8563_v11  ;;  %v701_v1 = vadd.f32 %v645_v57, %v439_v17  ;;  %v8560_v27 = vmax.f32 %v6914_v61, 0.0  ;;  %v8906_v59 = vld [vmem:[#allocation122_spill] sm:$0xff]  ;;  %v8918_v11 = vld [vmem:[#allocation119_spill] sm:$0xff] }
 0x2e5   : > { %v1104_v39 = vsel %vm1084_vm2, %v8905_v62, %v8906_v59  ;;  %v1332_v57 = vsel %vm1313_vm3, %v8885_v13, %v8907_v26  ;;  %v1333_v17 = vsel %vm1313_vm3, %v8907_v26, %v8908_v48  ;;  %v8931_v48 = vld [vmem:[#allocation135_spill] sm:$0xff] }
 0x2e6   : > { %v2352_v25 = vmul.f32 %v6644_v51, %v2300_v35  ;;  %v6908_v8 = vpop.permute.xlu1 %1050  ;;  %4636 = vrot.lane.b32.xlu0 %v4635_v52, %s4838_s20  ;;  %v6911_v53 = vpop.permute.xlu0 %1988  ;;  %v930_v35 = vadd.f32 %v874_v40, %v701_v1  ;;  %v931_v52 = vadd.f32 %v875_v41, %v702_v19  ;;  %v8910_v40 = vld [vmem:[#allocation163_spill] sm:$0xff]  ;;  %v8911_v1 = vld [vmem:[#allocation22_spill] sm:$0xff] }
 0x2e7   : > { %v1561_v41 = vsel %vm1542_vm4, %v8889_v14, %v8910_v40  ;;  %v1562_v13 = vsel %vm1542_vm4, %v8910_v40, %v8911_v1  ;;  %v2019_v14 = vsel %vm2000_vm6, %v6675_v55, %v6826_v58  ;;  %v2867_v1 = vld [vmem:[#allocation2 + $0x2e8] sm:$0xff] }
 0x2e8   : > { %v6927_v20 = vadd.f32 %v6884_v0, %v2352_v25  ;;  %v1159_v37 = vadd.f32 %v1103_v63, %v930_v35  ;;  %v1160_v23 = vadd.f32 %v1104_v39, %v931_v52  ;;  %v1790_v63 = vsel %vm1771_vm5, %v8892_v7, %v6527_v54 }
 0x2e9   : > { %v1791_v39 = vsel %vm1771_vm5, %v6527_v54, %v6616_v3 }
 0x2ea   : > { %8902 = vst [vmem:[#allocation68_spill] sm:$0xff] %v6927_v20  ;;  %v8562_v34 = vmax.f32 %v6927_v20, 0.0  ;;  %v6936_v30 = vpop.permute.xlu1 %1765  ;;  %v6938_v9 = vpop.permute.xlu0 %1992  ;;  %v1388_v19 = vadd.f32 %v1332_v57, %v1159_v37  ;;  %v2020_v57 = vsel %vm2000_vm6, %v6826_v58, %v6778_v5  ;;  %v2804_v58 = vld [vmem:[#allocation2 + $0xf0] sm:$0xff] }
 0x2ec   : > { %v4640_v25 = vpack.i.bf16 %v8562_v34, %v8560_v27  ;;  %v1389_v27 = vadd.f32 %v1333_v17, %v1160_v23  ;;  %v1617_v35 = vadd.f32 %v1561_v41, %v1388_v19  ;;  %v2805_v34 = vld [vmem:[#allocation2 + $0xf8] sm:$0xff] }
 0x2ed   : > { %3009 = vmatprep.subr.mxu0 %v2805_v34  ;;  %v8917_v34 = vld [vmem:[#allocation112_spill] sm:$0xff] }
 0x2ee   : > { %v6957_v44 = vpop.permute.xlu1 %1986  ;;  %v6959_v62 = vpop.permute.xlu0 %2209  ;;  %4641 = vrot.lane.b32.xlu1 %v4640_v25, %s4838_s20  ;;  %v1618_v52 = vadd.f32 %v1562_v13, %v1389_v27  ;;  %v1846_v17 = vadd.f32 %v1790_v63, %v1617_v35  ;;  %v8912_v13 = vld [vmem:[#allocation60_spill] sm:$0xff]  ;;  %v2803_v63 = vld [vmem:[#allocation2 + $0xe8] sm:$0xff]  ;;  %3010 = vmatpush1.msra.mxu0 %v2804_v58  ;;  %v653_v58 = vsel %vm626_vm0, %v8918_v11, %v8919_v45 }
 0x2ef   : > { %8909 = vst [vmem:[#allocation61_spill] sm:$0xff] %v6959_v62  ;;  %v443_v55 = vmul.f32 %v8863_v22, %v8912_v13  ;;  %v8913_v35 = vld [vmem:[#allocation101_spill] sm:$0xff]  ;;  %v2802_v22 = vld [vmem:[#allocation2 + $0xe0] sm:$0xff]  ;;  %3011 = vmatprep.subr.mxu0 %v2803_v63 }
 0x2f0   : > { %v1847_v7 = vadd.f32 %v1791_v39, %v1618_v52  ;;  %v2075_v37 = vadd.f32 %v2019_v14, %v1846_v17  ;;  %v444_v39 = vmul.f32 %v8868_v43, %v8912_v13  ;;  %v8914_v52 = vld [vmem:[#allocation97_spill] sm:$0xff]  ;;  %v8915_v17 = vld [vmem:[#allocation99_spill] sm:$0xff]  ;;  %3012 = vmatpush1.msra.mxu0 %v2802_v22  ;;  %v2796_v22 = vld [vmem:[#allocation2 + $0xb0] sm:$0xff] }
 0x2f1   : > { %v649_v14 = vsel %vm626_vm0, %v8914_v52, %v8913_v35 }
 0x2f2   : > { %v6974_v25 = vpop.permute.xlu1 %1990  ;;  %v6976_v26 = vpop.permute.xlu0 %1984  ;;  %v2076_v23 = vadd.f32 %v2020_v57, %v1847_v7  ;;  %v442_v57 = vmul.f32 %v8887_v28, %v8912_v13  ;;  %v650_v7 = vsel %vm626_vm0, %v8913_v35, %v8915_v17  ;;  %v2801_v28 = vld [vmem:[#allocation2 + $0xd8] sm:$0xff]  ;;  %v446_v35 = vmul.f32 %v5058_v38, %v8912_v13  ;;  %v2799_v38 = vld [vmem:[#allocation2 + $0xc8] sm:$0xff] }
 0x2f3   : > { %v705_v61 = vadd.f32 %v649_v14, %v443_v55  ;;  %3013 = vmatprep.subr.mxu0 %v2801_v28  ;;  %v8926_v28 = vld [vmem:[#allocation137_spill] sm:$0xff] }
 0x2f6   : > { %v2208_v40 = vpop.permute.xlu1 %2207  ;;  %v6984_v54 = vpop.permute.xlu0 %1279 }
 0x2f7   : > { %v2248_v27 = vsel %vm2229_vm7, %v6828_v46, %v2208_v40  ;;  %v2249_v41 = vsel %vm2229_vm7, %v2208_v40, %v6959_v62  ;;  %v445_v46 = vmul.f32 %v8873_v18, %v8912_v13  ;;  %v2868_v62 = vld [vmem:[#allocation2 + $0x2f0] sm:$0xff] }
 0x2f8   : > { %v2304_v19 = vadd.f32 %v2248_v27, %v2075_v37  ;;  %v2305_v16 = vadd.f32 %v2249_v41, %v2076_v23  ;;  %v8916_v37 = vld [vmem:[#allocation103_spill] sm:$0xff]  ;;  %v648_v41 = vsel %vm626_vm0, %v8917_v34, %v8914_v52 }
 0x2f9   : > { %v651_v43 = vsel %vm626_vm0, %v8915_v17, %v8916_v37  ;;  %v447_v17 = vmul.f32 %v4977_v10, %v8912_v13  ;;  %v706_v10 = vadd.f32 %v650_v7, %v444_v39  ;;  %v704_v14 = vadd.f32 %v648_v41, %v442_v57  ;;  %v8927_v57 = vld [vmem:[#allocation140_spill] sm:$0xff] }
 0x2fa   : > { %v2356_v23 = vmul.f32 %v6644_v51, %v2304_v19  ;;  %v2357_v40 = vmul.f32 %v6644_v51, %v2305_v16  ;;  %v7009_v27 = vpop.permute.xlu1 %2335  ;;  %v7011_v18 = vpop.permute.xlu0 %1994  ;;  %v652_v16 = vsel %vm626_vm0, %v8916_v37, %v8918_v11  ;;  %v2800_v19 = vld [vmem:[#allocation2 + $0xd0] sm:$0xff]  ;;  %v707_v34 = vadd.f32 %v651_v43, %v445_v46  ;;  %v8922_v51 = vld [vmem:[#allocation121_spill] sm:$0xff]  ;;  %v8923_v37 = vld [vmem:[#allocation123_spill] sm:$0xff] }
 0x2fb   : > { %v878_v63 = vsel %vm855_vm1, %v8922_v51, %v8921_v15  ;;  %v879_v55 = vsel %vm855_vm1, %v8921_v15, %v8923_v37  ;;  %v2798_v11 = vld [vmem:[#allocation2 + $0xc0] sm:$0xff]  ;;  %3014 = vmatpush1.msra.mxu0 %v2800_v19  ;;  %v2797_v46 = vld [vmem:[#allocation2 + $0xb8] sm:$0xff]  ;;  %v7046_v7 = vadd.f32 %v653_v58, %v447_v17  ;;  %v1107_v41 = vsel %vm1084_vm2, %v8927_v57, %v8926_v28 }
 0x2fc   : > { %v7027_v20 = vadd.f32 %v6884_v0, %v2356_v23  ;;  %v7030_v52 = vadd.f32 %v6884_v0, %v2357_v40  ;;  %v7038_v23 = vadd.f32 %v652_v16, %v446_v35  ;;  %v8925_v43 = vld [vmem:[#allocation120_spill] sm:$0xff]  ;;  %v8928_v35 = vld [vmem:[#allocation142_spill] sm:$0xff]  ;;  %3015 = vmatprep.subr.mxu0 %v2799_v38  ;;  %v2869_v40 = vld [vmem:[#allocation2 + $0x2f8] sm:$0xff]  ;;  %v934_v19 = vadd.f32 %v878_v63, %v705_v61 }
 0x2fd   : > { %v880_v15 = vsel %vm855_vm1, %v8923_v37, %v8925_v43  ;;  %v1108_v16 = vsel %vm1084_vm2, %v8926_v28, %v8928_v35  ;;  %v935_v5 = vadd.f32 %v879_v55, %v706_v10  ;;  %3016 = vmatpush1.msra.mxu0 %v2798_v11  ;;  %v2795_v37 = vld [vmem:[#allocation2 + $0xa8] sm:$0xff]  ;;  %3098 = vmatprep.subr.mxu1 %v2869_v40  ;;  %v8932_v28 = vld [vmem:[#allocation164_spill] sm:$0xff]  ;;  %v8933_v38 = vld [vmem:[#allocation159_spill] sm:$0xff] }
 0x2fe   : > { %8920 = vst [vmem:[#allocation65_spill] sm:$0xff] %v7030_v52  ;;  %v7042_v0 = vpop.permute.xlu1 %837  ;;  %v7044_v39 = vpop.permute.xlu0 %2215  ;;  %v8929_v17 = vmax.f32 %v7027_v20, 0.0  ;;  %v8930_v58 = vmax.f32 %v7030_v52, 0.0  ;;  %v877_v59 = vsel %vm855_vm1, %v8931_v48, %v8922_v51  ;;  %v1336_v21 = vsel %vm1313_vm3, %v8933_v38, %v8932_v28  ;;  %3017 = vmatprep.subr.mxu0 %v2797_v46  ;;  %v2794_v10 = vld [vmem:[#allocation2 + $0xa0] sm:$0xff]  ;;  %3099 = vmatpush1.msra.mxu1 %v2868_v62  ;;  %v2793_v48 = vld [vmem:[#allocation2 + $0x98] sm:$0xff] }
 0x2ff   : > { %8924 = vst [vmem:[#allocation64_spill] sm:$0xff] %v7042_v0  ;;  %v8934_v0 = vld [vmem:[#allocation161_spill] sm:$0xff]  ;;  %v2866_v63 = vld [vmem:[#allocation2 + $0x2e0] sm:$0xff]  ;;  %v936_v55 = vadd.f32 %v880_v15, %v707_v34  ;;  %v1163_v11 = vadd.f32 %v1107_v41, %v934_v19  ;;  %v1164_v40 = vadd.f32 %v1108_v16, %v935_v5  ;;  %3018 = vmatpush1.msra.mxu0 %v2796_v22  ;;  %v8936_v46 = vld [vmem:[#allocation31_spill] sm:$0xff] }
 0x300   : > { %v4645_v3 = vpack.i.bf16 %v8930_v58, %v8929_v17  ;;  %v1337_v61 = vsel %vm1313_vm3, %v8932_v28, %v8934_v0  ;;  %v8935_v58 = vld [vmem:[#allocation139_spill] sm:$0xff]  ;;  %v1565_v62 = vsel %vm1542_vm4, %v8936_v46, %v6550_v32  ;;  %v1566_v5 = vsel %vm1542_vm4, %v6550_v32, %v6489_v33  ;;  %3019 = vmatprep.subr.mxu0 %v2795_v37  ;;  %v2792_v34 = vld [vmem:[#allocation2 + $0x90] sm:$0xff]  ;;  %v2791_v22 = vld [vmem:[#allocation2 + $0x88] sm:$0xff] }
 0x301   : > { %v1109_v52 = vsel %vm1084_vm2, %v8928_v35, %v8935_v58  ;;  %3100 = vmatprep.subr.mxu1 %v2867_v1  ;;  %v1392_v15 = vadd.f32 %v1336_v21, %v1163_v11  ;;  %v1393_v41 = vadd.f32 %v1337_v61, %v1164_v40  ;;  %3020 = vmatpush1.msra.mxu0 %v2794_v10  ;;  %v8937_v16 = vld [vmem:[#allocation138_spill] sm:$0xff]  ;;  %v8940_v11 = vld [vmem:[#allocation136_spill] sm:$0xff] }
 0x302   : > { %v7070_v17 = vpop.permute.xlu1 %1721  ;;  %4646 = vrot.lane.b32.xlu0 %v4645_v3, %s4838_s20  ;;  %v7073_v51 = vpop.permute.xlu0 %2219  ;;  %v933_v3 = vadd.f32 %v877_v59, %v704_v14  ;;  %3101 = vmatpush1.msra.mxu1 %v2866_v63  ;;  %v881_v35 = vsel %vm855_vm1, %v8925_v43, %v8937_v16  ;;  %v8938_v19 = vld [vmem:[#allocation166_spill] sm:$0xff]  ;;  %v1794_v32 = vsel %vm1771_vm5, %v6776_v2, %v6743_v50  ;;  %v2790_v59 = vld [vmem:[#allocation2 + $0x80] sm:$0xff]  ;;  %v8939_v14 = vld [vmem:[#allocation153_spill] sm:$0xff] }
 0x303   : > { %v1338_v28 = vsel %vm1313_vm3, %v8934_v0, %v8938_v19  ;;  %v1795_v21 = vsel %vm1771_vm5, %v6743_v50, %v6805_v42  ;;  %3021 = vmatprep.subr.mxu0 %v2793_v48  ;;  %v1165_v1 = vadd.f32 %v1109_v52, %v936_v55  ;;  %v1106_v37 = vsel %vm1084_vm2, %v8939_v14, %v8927_v57  ;;  %v2789_v63 = vld [vmem:[#allocation2 + $0x78] sm:$0xff]  ;;  %v2788_v55 = vld [vmem:[#allocation2 + $0x70] sm:$0xff] }
 0x304   : > { %v1621_v43 = vadd.f32 %v1565_v62, %v1392_v15  ;;  %v1622_v61 = vadd.f32 %v1566_v5, %v1393_v41  ;;  %3022 = vmatpush1.msra.mxu0 %v2792_v34  ;;  %v7106_v40 = vsel %vm855_vm1, %v8937_v16, %v8940_v11  ;;  %v1567_v50 = vsel %vm1542_vm4, %v6489_v33, %v6578_v60  ;;  %v8941_v62 = vld [vmem:[#allocation30_spill] sm:$0xff]  ;;  %v8942_v16 = vld [vmem:[#allocation157_spill] sm:$0xff] }
 0x305   : > { %v2023_v52 = vsel %vm2000_vm6, %v6957_v44, %v6911_v53  ;;  %v2024_v57 = vsel %vm2000_vm6, %v6911_v53, %v6974_v25  ;;  %3023 = vmatprep.subr.mxu0 %v2791_v22  ;;  %v1394_v48 = vadd.f32 %v1338_v28, %v1165_v1  ;;  %v1335_v5 = vsel %vm1313_vm3, %v8941_v62, %v8933_v38  ;;  %v2865_v1 = vld [vmem:[#allocation2 + $0x2d8] sm:$0xff]  ;;  %v2862_v62 = vld [vmem:[#allocation2 + $0x2c0] sm:$0xff] }
 0x306   : > { %v7099_v10 = vpop.permute.xlu1 %1996  ;;  %v7101_v0 = vpop.permute.xlu0 %2387  ;;  %v1850_v34 = vadd.f32 %v1794_v32, %v1621_v43  ;;  %v1851_v15 = vadd.f32 %v1795_v21, %v1622_v61  ;;  %3024 = vmatpush1.msra.mxu0 %v2790_v59  ;;  %v937_v33 = vadd.f32 %v881_v35, %v7038_v23  ;;  %v1162_v41 = vadd.f32 %v1106_v37, %v933_v3  ;;  %v2787_v35 = vld [vmem:[#allocation2 + $0x68] sm:$0xff]  ;;  %v2786_v43 = vld [vmem:[#allocation2 + $0x60] sm:$0xff]  ;;  %v2864_v61 = vld [vmem:[#allocation2 + $0x2d0] sm:$0xff] }
 0x307   : > { %v1110_v14 = vsel %vm1084_vm2, %v8935_v58, %v8942_v16  ;;  %v1796_v53 = vsel %vm1771_vm5, %v6805_v42, %v6757_v31  ;;  %3025 = vmatprep.subr.mxu0 %v2789_v63  ;;  %v1623_v22 = vadd.f32 %v1567_v50, %v1394_v48  ;;  %v1564_v38 = vsel %vm1542_vm4, %v6721_v6, %v8936_v46  ;;  %v2785_v63 = vld [vmem:[#allocation2 + $0x58] sm:$0xff]  ;;  %v8943_v50 = vld [vmem:[#allocation32_spill] sm:$0xff]  ;;  %v2784_v48 = vld [vmem:[#allocation2 + $0x50] sm:$0xff] }
 0x308   : > { %v2079_v28 = vadd.f32 %v2023_v52, %v1850_v34  ;;  %v2080_v32 = vadd.f32 %v2024_v57, %v1851_v15  ;;  %3026 = vmatpush1.msra.mxu0 %v2788_v55  ;;  %v1391_v23 = vadd.f32 %v1335_v5, %v1162_v41  ;;  %v2025_v58 = vsel %vm2000_vm6, %v6974_v25, %v6938_v9  ;;  %v2863_v55 = vld [vmem:[#allocation2 + $0x2c8] sm:$0xff] }
 0x309   : > { %v1852_v6 = vadd.f32 %v1796_v53, %v1623_v22  ;;  %3027 = vmatprep.subr.mxu0 %v2787_v35  ;;  %3102 = vmatprep.subr.mxu1 %v2865_v1  ;;  %v1339_v25 = vsel %vm1313_vm3, %v8938_v19, %v8943_v50  ;;  %v1793_v57 = vsel %vm1771_vm5, %v6856_v56, %v6776_v2  ;;  %v2783_v19 = vld [vmem:[#allocation2 + $0x48] sm:$0xff]  ;;  %v2861_v22 = vld [vmem:[#allocation2 + $0x2b8] sm:$0xff]  ;;  %v2858_v1 = vld [vmem:[#allocation2 + $0x2a0] sm:$0xff] }
 0x30a   : > { %v2218_v21 = vpop.permute.xlu1 %2217  ;;  %v7130_v59 = vpop.permute.xlu0 %624  ;;  %v1620_v52 = vadd.f32 %v1564_v38, %v1391_v23  ;;  %3028 = vmatpush1.msra.mxu0 %v2786_v43  ;;  %3103 = vmatpush1.msra.mxu1 %v2864_v61  ;;  %v2782_v38 = vld [vmem:[#allocation2 + $0x40] sm:$0xff]  ;;  %v1166_v56 = vadd.f32 %v1110_v14, %v937_v33  ;;  %v2022_v2 = vsel %vm2000_vm6, %v6976_v26, %v6957_v44  ;;  %v2859_v14 = vld [vmem:[#allocation2 + $0x2a8] sm:$0xff]  ;;  %v8944_v44 = vld [vmem:[#allocation162_spill] sm:$0xff] }
 0x30b   : > { %v2252_v42 = vsel %vm2229_vm7, %v7044_v39, %v2218_v21  ;;  %v2253_v3 = vsel %vm2229_vm7, %v2218_v21, %v7073_v51  ;;  %v2081_v5 = vadd.f32 %v2025_v58, %v1852_v6  ;;  %3029 = vmatprep.subr.mxu0 %v2785_v63  ;;  %3104 = vmatprep.subr.mxu1 %v2863_v55  ;;  %v2781_v21 = vld [vmem:[#allocation2 + $0x38] sm:$0xff] }
 0x30c   : > { %v2308_v46 = vadd.f32 %v2252_v42, %v2079_v28  ;;  %v2309_v37 = vadd.f32 %v2253_v3, %v2080_v32  ;;  %3030 = vmatpush1.msra.mxu0 %v2784_v48  ;;  %3105 = vmatpush1.msra.mxu1 %v2862_v62  ;;  %v2860_v32 = vld [vmem:[#allocation2 + $0x2b0] sm:$0xff]  ;;  %v1849_v23 = vadd.f32 %v1793_v57, %v1620_v52  ;;  %v2779_v52 = vld [vmem:[#allocation2 + $0x28] sm:$0xff]  ;;  %v2857_v57 = vld [vmem:[#allocation2 + $0x298] sm:$0xff] }
 0x30d   : > { %3031 = vmatprep.subr.mxu0 %v2783_v19  ;;  %v2780_v3 = vld [vmem:[#allocation2 + $0x30] sm:$0xff]  ;;  %v1111_v26 = vsel %vm1084_vm2, %v8942_v16, %v8944_v44  ;;  %v1568_v35 = vsel %vm1542_vm4, %v6578_v60, %v6755_v29  ;;  %3106 = vmatprep.subr.mxu1 %v2861_v22  ;;  %v938_v16 = vadd.f32 %v7106_v40, %v7046_v7  ;;  %v2778_v7 = vld [vmem:[#allocation2 + $0x20] sm:$0xff]  ;;  %v2855_v19 = vld [vmem:[#allocation2 + $0x288] sm:$0xff] }
 0x30e   : > { %v2360_v34 = vmul.f32 %v7009_v27, %v2308_v46  ;;  %v2361_v15 = vmul.f32 %v7009_v27, %v2309_v37  ;;  %v7147_v41 = vpop.permute.xlu1 %2221  ;;  %v7149_v53 = vpop.permute.xlu0 %1508  ;;  %3032 = vmatpush1.msra.mxu0 %v2782_v38  ;;  %v2078_v6 = vadd.f32 %v2022_v2, %v1849_v23  ;;  %3107 = vmatpush1.msra.mxu1 %v2860_v32  ;;  %v2856_v40 = vld [vmem:[#allocation2 + $0x290] sm:$0xff]  ;;  %v2854_v32 = vld [vmem:[#allocation2 + $0x280] sm:$0xff]  ;;  %v2775_v23 = vld [vmem:[#allocation2 + $0x8] sm:$0xff] }
 0x30f   : > { %v2254_v28 = vsel %vm2229_vm7, %v7073_v51, %v7147_v41  ;;  %v1395_v51 = vadd.f32 %v1339_v25, %v1166_v56  ;;  %3033 = vmatprep.subr.mxu0 %v2781_v21  ;;  %v1797_v60 = vsel %vm1771_vm5, %v6757_v31, %v6936_v30  ;;  %3108 = vmatprep.subr.mxu1 %v2859_v14  ;;  %v8945_v31 = vld [vmem:[#allocation34_spill] sm:$0xff] }
 0x310   : > { %v7158_v58 = vadd.f32 %v7101_v0, %v2360_v34  ;;  %v7161_v42 = vadd.f32 %v7101_v0, %v2361_v15  ;;  %v2310_v33 = vadd.f32 %v2254_v28, %v2081_v5  ;;  %3034 = vmatpush1.msra.mxu0 %v2780_v3  ;;  %3109 = vmatpush1.msra.mxu1 %v2858_v1  ;;  %v2777_v5 = vld [vmem:[#allocation2 + $0x18] sm:$0xff] }
 0x311   : > { %v1624_v55 = vadd.f32 %v1568_v35, %v1395_v51  ;;  %v1167_v34 = vadd.f32 %v1111_v26, %v938_v16  ;;  %v2026_v15 = vsel %vm2000_vm6, %v6938_v9, %v7011_v18  ;;  %3035 = vmatprep.subr.mxu0 %v2779_v52  ;;  %3110 = vmatprep.subr.mxu1 %v2857_v57  ;;  %v2774_v51 = vld [vmem:[#allocation2] sm:$0xff]  ;;  %v2852_v35 = vld [vmem:[#allocation2 + $0x270] sm:$0xff]  ;;  %v2837_v1 = vld [vmem:[#allocation2 + $0x1f8] sm:$0xff] }
 0x312   : > { %v2440_v46 = vmax.f32 %v7158_v58, 0.0  ;;  %v2441_v37 = vmax.f32 %v7161_v42, 0.0  ;;  %v2362_v43 = vmul.f32 %v7009_v27, %v2310_v33  ;;  %v2214_v61 = vpop.permute.xlu1 %2213  ;;  %v7172_v63 = vpop.permute.xlu0 %2223  ;;  %3036 = vmatpush1.msra.mxu0 %v2778_v7  ;;  %v1569_v9 = vsel %vm1542_vm4, %v6755_v29, %v6723_v12  ;;  %3111 = vmatpush1.msra.mxu1 %v2856_v40  ;;  %v2853_v33 = vld [vmem:[#allocation2 + $0x278] sm:$0xff]  ;;  %v2836_v52 = vld [vmem:[#allocation2 + $0x1f0] sm:$0xff]  ;;  %v2850_v57 = vld [vmem:[#allocation2 + $0x260] sm:$0xff] }
 0x313   : > { %v2251_v25 = vsel %vm2229_vm7, %v2214_v61, %v7044_v39  ;;  %v1340_v39 = vsel %vm1313_vm3, %v8943_v50, %v8945_v31  ;;  %v1853_v22 = vadd.f32 %v1797_v60, %v1624_v55  ;;  %v2776_v50 = vld [vmem:[#allocation2 + $0x10] sm:$0xff]  ;;  %v2255_v21 = vsel %vm2229_vm7, %v7147_v41, %v7172_v63  ;;  %3037 = vmatprep.subr.mxu0 %v2777_v5  ;;  %v2851_v41 = vld [vmem:[#allocation2 + $0x268] sm:$0xff]  ;;  %v2849_v7 = vld [vmem:[#allocation2 + $0x258] sm:$0xff] }
 0x314   : > { %v2307_v48 = vadd.f32 %v2251_v25, %v2078_v6  ;;  %v4650_v62 = vpack.i.bf16 %v2441_v37, %v2440_v46  ;;  %v7192_v38 = vadd.f32 %v7101_v0, %v2362_v43  ;;  %v1396_v14 = vadd.f32 %v1340_v39, %v1167_v34  ;;  %3112 = vmatprep.subr.mxu1 %v2855_v19  ;;  %v2835_v55 = vld [vmem:[#allocation2 + $0x1e8] sm:$0xff]  ;;  %v2834_v40 = vld [vmem:[#allocation2 + $0x1e0] sm:$0xff]  ;;  %v2848_v5 = vld [vmem:[#allocation2 + $0x250] sm:$0xff] }
 0x315   : > { %v2082_v3 = vadd.f32 %v2026_v15, %v1853_v22  ;;  %v1798_v29 = vsel %vm1771_vm5, %v6936_v30, %v6899_v4  ;;  %3038 = vmatpush1.msra.mxu0 %v2776_v50  ;;  %3113 = vmatpush1.msra.mxu1 %v2854_v32  ;;  %v2027_v30 = vsel %vm2000_vm6, %v7011_v18, %v7099_v10  ;;  %v2833_v34 = vld [vmem:[#allocation2 + $0x1d8] sm:$0xff]  ;;  %v2847_v22 = vld [vmem:[#allocation2 + $0x248] sm:$0xff]  ;;  %v2846_v32 = vld [vmem:[#allocation2 + $0x240] sm:$0xff] }
 0x316   : > { %v2359_v56 = vmul.f32 %v7009_v27, %v2307_v48  ;;  %v7195_v2 = vpop.permute.xlu1 %1066  ;;  %v7197_v28 = vpop.permute.xlu0 %853  ;;  %4651 = vrot.lane.b32.xlu1 %v4650_v62, %s4838_s20  ;;  %v1625_v6 = vadd.f32 %v1569_v9, %v1396_v14  ;;  %v2442_v43 = vmax.f32 %v7192_v38, 0.0  ;;  %3039 = vmatprep.subr.mxu0 %v2775_v23  ;;  %v2831_v9 = vld [vmem:[#allocation2 + $0x1c8] sm:$0xff]  ;;  %v2845_v23 = vld [vmem:[#allocation2 + $0x238] sm:$0xff]  ;;  %v2844_v14 = vld [vmem:[#allocation2 + $0x230] sm:$0xff] }
 0x317   : > { %v2311_v16 = vadd.f32 %v2255_v21, %v2082_v3  ;;  %3114 = vmatprep.subr.mxu1 %v2853_v33  ;;  %3040 = vmatpush1.msra.mxu0 %v2774_v51  ;;  %v2830_v33 = vld [vmem:[#allocation2 + $0x1c0] sm:$0xff]  ;;  %v2829_v3 = vld [vmem:[#allocation2 + $0x1b8] sm:$0xff]  ;;  %v8946_v51 = vld [vmem:[#allocation134_spill] sm:$0xff] }
 0x318   : > { %v7207_v26 = vadd.f32 %v7101_v0, %v2359_v56  ;;  %3115 = vmatpush1.msra.mxu1 %v2852_v35  ;;  %v1854_v48 = vadd.f32 %v1798_v29, %v1625_v6  ;;  %3041 = vmatprep.subr.mxu0 %v2837_v1  ;;  %v2832_v56 = vld [vmem:[#allocation2 + $0x1d0] sm:$0xff]  ;;  %v2989_v58 = vld [vmem:[#allocation2 + $0x6b8] sm:$0x7f] }
 0x319   : > { %3116 = vmatprep.subr.mxu1 %v2851_v41  ;;  %3042 = vmatpush2.msra.mxu0 %v2836_v52  ;;  %v2363_v18 = vmul.f32 %v7009_v27, %v2311_v16  ;;  %v8947_v35 = vld [vmem:[#allocation42_spill] sm:$0xff]  ;;  %v2843_v16 = vld [vmem:[#allocation2 + $0x228] sm:$0xff] }
 0x31a   : > { %v2439_v61 = vmax.f32 %v7207_v26, 0.0  ;;  %v7214_v60 = vpop.permute.xlu1 %1950  ;;  %v7216_v25 = vpop.permute.xlu0 %1737  ;;  %3117 = vmatpush1.msra.mxu1 %v2850_v57  ;;  %v2083_v39 = vadd.f32 %v2027_v30, %v1854_v48  ;;  %3043 = vmatprep.subr.mxu0 %v2835_v55  ;;  %v633_v29 = vsel %vm626_vm0, %v8947_v35, %v8946_v51  ;;  %v2828_v52 = vld [vmem:[#allocation2 + $0x1b0] sm:$0xff]  ;;  %v8949_v30 = vld [vmem:[#allocation8_spill] sm:$0xff]  ;;  %v8950_v48 = vld [vmem:[#allocation29_spill] sm:$0xff] }
 0x31b   : > { %3118 = vmatprep.subr.mxu1 %v2849_v7  ;;  %3044 = vmatpush2.msra.mxu0 %v2834_v40  ;;  %v7238_v1 = vadd.f32 %v7101_v0, %v2363_v18  ;;  %v8948_v57 = vld [vmem:[#allocation18_spill] sm:$0xff]  ;;  %v2842_v40 = vld [vmem:[#allocation2 + $0x220] sm:$0xff] }
 0x31c   : > { %v4655_v62 = vpack.i.bf16 %v2439_v61, %v2442_v43  ;;  %3119 = vmatpush1.msra.mxu1 %v2848_v5  ;;  %3045 = vmatprep.subr.mxu0 %v2833_v34  ;;  %v427_v55 = vmul.f32 %v8949_v30, %v8948_v57  ;;  %v2827_v5 = vld [vmem:[#allocation2 + $0x1a8] sm:$0xff]  ;;  %v8952_v34 = vld [vmem:[#allocation160_spill] sm:$0xff]  ;;  %v8955_v51 = vld [vmem:[#allocation46_spill] sm:$0xff] }
 0x31d   : > { %3120 = vmatprep.subr.mxu1 %v2847_v22  ;;  %3046 = vmatpush2.msra.mxu0 %v2832_v56  ;;  %v8954_v22 = vld [vmem:[#allocation49_spill] sm:$0xff]  ;;  %v2840_v35 = vld [vmem:[#allocation2 + $0x210] sm:$0xff]  ;;  %v2825_v57 = vld [vmem:[#allocation2 + $0x198] sm:$0xff] }
 0x31e   : > { %v7226_v15 = vpop.permute.xlu1 %2225  ;;  %4656 = vrot.lane.b32.xlu0 %v4655_v62, %s4838_s20  ;;  %v7229_v19 = vpop.permute.xlu0 %1082  ;;  %3121 = vmatpush1.msra.mxu1 %v2846_v32  ;;  %v8951_v62 = vld [vmem:[#allocation62_spill] sm:$0xff]  ;;  %v434_v56 = vmul.f32 %v8949_v30, %v8954_v22  ;;  %v2841_v32 = vld [vmem:[#allocation2 + $0x218] sm:$0xff]  ;;  %v8959_v22 = vld [vmem:[#allocation13_spill] sm:$0xff] }
 0x31f   : > { %v2256_v50 = vsel %vm2229_vm7, %v7172_v63, %v7226_v15  ;;  %3047 = vmatprep.subr.mxu0 %v2831_v9  ;;  %v640_v7 = vsel %vm626_vm0, %v8951_v62, %v8950_v48  ;;  %3122 = vmatprep.subr.mxu1 %v2845_v23  ;;  %v2826_v9 = vld [vmem:[#allocation2 + $0x1a0] sm:$0xff]  ;;  %v8956_v23 = vld [vmem:[#allocation79_spill] sm:$0xff]  ;;  %v8957_v62 = vld [vmem:[#allocation33_spill] sm:$0xff] }
 0x320   : > { %v2312_v21 = vadd.f32 %v2256_v50, %v2083_v39  ;;  %3048 = vmatpush2.msra.mxu0 %v2830_v33  ;;  %v8953_v39 = vld [vmem:[#allocation44_spill] sm:$0xff]  ;;  %3123 = vmatpush1.msra.mxu1 %v2844_v14  ;;  %v869_v33 = vsel %vm855_vm1, %v8956_v23, %v8955_v51  ;;  %v696_v48 = vadd.f32 %v640_v7, %v434_v56  ;;  %v8960_v51 = vld [vmem:[#allocation53_spill] sm:$0xff]  ;;  %v8961_v56 = vld [vmem:[#allocation94_spill] sm:$0xff] }
 0x321   : > { %v862_v18 = vsel %vm855_vm1, %v8953_v39, %v8952_v34  ;;  %3049 = vmatprep.subr.mxu0 %v2829_v3  ;;  %3124 = vmatprep.subr.mxu1 %v2843_v16  ;;  %v8958_v34 = vld [vmem:[#allocation51_spill] sm:$0xff]  ;;  %v2824_v16 = vld [vmem:[#allocation2 + $0x190] sm:$0xff]  ;;  %v1320_v7 = vsel %vm1313_vm3, %v8960_v51, %v8959_v22  ;;  %v1098_v23 = vsel %vm1084_vm2, %v8961_v56, %v6908_v8  ;;  %v8964_v51 = vld [vmem:[#allocation128_spill] sm:$0xff] }
 0x322   : > { %v2364_v63 = vmul.f32 %v7009_v27, %v2312_v21  ;;  %v7241_v41 = vpop.permute.xlu1 %1295  ;;  %v7243_v6 = vpop.permute.xlu0 %1966  ;;  %v689_v21 = vadd.f32 %v633_v29, %v427_v55  ;;  %3050 = vmatpush2.msra.mxu0 %v2828_v52  ;;  %v1091_v39 = vsel %vm1084_vm2, %v8958_v34, %v8957_v62  ;;  %3125 = vmatpush1.msra.mxu1 %v2842_v40  ;;  %v2839_v55 = vld [vmem:[#allocation2 + $0x208] sm:$0xff]  ;;  %v2838_v62 = vld [vmem:[#allocation2 + $0x200] sm:$0xff] }
 0x323   : > { %3051 = vmatprep.subr.mxu0 %v2827_v5  ;;  %3126 = vmatprep.subr.mxu1 %v2841_v32  ;;  %v925_v34 = vadd.f32 %v869_v33, %v696_v48  ;;  %v647_v40 = vsel %vm626_vm0, %v8901_v24, %v6871_v47  ;;  %v441_v8 = vmul.f32 %v8949_v30, %v8862_v49  ;;  %v8962_v32 = vld [vmem:[#allocation111_spill] sm:$0xff]  ;;  %v2822_v47 = vld [vmem:[#allocation2 + $0x180] sm:$0xff]  ;;  %v2900_v24 = vld [vmem:[#allocation2 + $0x3f0] sm:$0xff] }
 0x324   : > { %v7256_v50 = vadd.f32 %v7101_v0, %v2364_v63  ;;  %v2443_v63 = vmax.f32 %v7238_v1, 0.0  ;;  %v918_v52 = vadd.f32 %v862_v18, %v689_v21  ;;  %3052 = vmatpush2.msra.mxu0 %v2826_v9  ;;  %3127 = vmatpush1.msra.mxu1 %v2840_v35  ;;  %v2823_v18 = vld [vmem:[#allocation2 + $0x188] sm:$0xff]  ;;  %v2901_v21 = vld [vmem:[#allocation2 + $0x3f8] sm:$0xff]  ;;  %v1327_v9 = vsel %vm1313_vm3, %v8962_v32, %v6984_v54  ;;  %v8963_v33 = vld [vmem:[#allocation52_spill] sm:$0xff] }
 0x325   : > { %3053 = vmatprep.subr.mxu0 %v2825_v57  ;;  %3128 = vmatprep.subr.mxu1 %v2839_v55  ;;  %v1549_v48 = vsel %vm1542_vm4, %v8963_v33, %v6886_v36  ;;  %v1154_v35 = vadd.f32 %v1098_v23, %v925_v34  ;;  %v448_v57 = vmul.f32 %v8949_v30, %v8912_v13  ;;  %v2821_v49 = vld [vmem:[#allocation2 + $0x178] sm:$0xff]  ;;  %v2899_v54 = vld [vmem:[#allocation2 + $0x3e8] sm:$0xff]  ;;  %v2820_v36 = vld [vmem:[#allocation2 + $0x170] sm:$0xff] }
 0x326   : > { %v2444_v14 = vmax.f32 %v7256_v50, 0.0  ;;  %v7266_v3 = vpop.permute.xlu1 %2179  ;;  %v7268_v29 = vpop.permute.xlu0 %1753  ;;  %v1147_v22 = vadd.f32 %v1091_v39, %v918_v52  ;;  %3054 = vmatpush2.msra.mxu0 %v2824_v16  ;;  %3129 = vmatpush1.msra.mxu1 %v2838_v62  ;;  %v703_v16 = vadd.f32 %v647_v40, %v441_v8  ;;  %v1556_v56 = vsel %vm1542_vm4, %v8964_v51, %v7149_v53  ;;  %v2898_v23 = vld [vmem:[#allocation2 + $0x3e0] sm:$0xff]  ;;  %v8965_v30 = vld [vmem:[#allocation63_spill] sm:$0xff]  ;;  %v8967_v53 = vld [vmem:[#allocation105_spill] sm:$0xff] }
 0x327   : > { %3055 = vmatprep.subr.mxu0 %v2823_v18  ;;  %3130 = vmatprep.subr.mxu1 %v2901_v21  ;;  %v1383_v13 = vadd.f32 %v1327_v9, %v1154_v35  ;;  %v1778_v34 = vsel %vm1771_vm5, %v8965_v30, %v7070_v17  ;;  %v654_v62 = vsel %vm626_vm0, %v8919_v45, %v7130_v59  ;;  %v2897_v40 = vld [vmem:[#allocation2 + $0x3d8] sm:$0xff]  ;;  %v2818_v17 = vld [vmem:[#allocation2 + $0x160] sm:$0xff]  ;;  %v2896_v32 = vld [vmem:[#allocation2 + $0x3d0] sm:$0xff] }
 0x328   : > { %v4660_v5 = vpack.i.bf16 %v2444_v14, %v2443_v63  ;;  %v1376_v55 = vadd.f32 %v1320_v7, %v1147_v22  ;;  %3056 = vmatpush2.msra.mxu0 %v2822_v47  ;;  %3131 = vmatpush2.msra.mxu1 %v2900_v24  ;;  %v2819_v7 = vld [vmem:[#allocation2 + $0x168] sm:$0xff]  ;;  %v8966_v22 = vld [vmem:[#allocation64_spill] sm:$0xff]  ;;  %v8968_v21 = vld [vmem:[#allocation147_spill] sm:$0xff]  ;;  %v883_v45 = vsel %vm855_vm1, %v8940_v11, %v7197_v28 }
 0x329   : > { %v876_v18 = vsel %vm855_vm1, %v8967_v53, %v8966_v22  ;;  %v1785_v8 = vsel %vm1771_vm5, %v8968_v21, %v7216_v25  ;;  %3057 = vmatprep.subr.mxu0 %v2821_v49  ;;  %3132 = vmatprep.subr.mxu1 %v2899_v54  ;;  %v1612_v9 = vadd.f32 %v1556_v56, %v1383_v13  ;;  %v8969_v59 = vld [vmem:[#allocation73_spill] sm:$0xff]  ;;  %v8970_v54 = vld [vmem:[#allocation24_spill] sm:$0xff]  ;;  %v2816_v11 = vld [vmem:[#allocation2 + $0x150] sm:$0xff] }
 0x32a   : > { %v7293_v39 = vpop.permute.xlu1 %1524  ;;  %v7295_v52 = vpop.permute.xlu0 %4606  ;;  %4661 = vrot.lane.b32.xlu1 %v4660_v5, %s4838_s20  ;;  %v1605_v5 = vadd.f32 %v1549_v48, %v1376_v55  ;;  %v2007_v47 = vsel %vm2000_vm6, %v8969_v59, %v7214_v60  ;;  %3058 = vmatpush2.msra.mxu0 %v2820_v36  ;;  %v2817_v48 = vld [vmem:[#allocation2 + $0x158] sm:$0xff]  ;;  %v2895_v25 = vld [vmem:[#allocation2 + $0x3c8] sm:$0xff]  ;;  %v710_v49 = vadd.f32 %v654_v62, %v448_v57  ;;  %v2894_v28 = vld [vmem:[#allocation2 + $0x3c0] sm:$0xff] }
 0x32b   : > { %3133 = vmatpush2.msra.mxu1 %v2898_v23  ;;  %v2014_v55 = vsel %vm2000_vm6, %v8970_v54, %v7243_v6  ;;  %3059 = vmatprep.subr.mxu0 %v2819_v7  ;;  %v932_v51 = vadd.f32 %v876_v18, %v703_v16  ;;  %v1841_v56 = vadd.f32 %v1785_v8, %v1612_v9  ;;  %v8971_v60 = vld [vmem:[#allocation86_spill] sm:$0xff]  ;;  %v2815_v36 = vld [vmem:[#allocation2 + $0x148] sm:$0xff]  ;;  %v2893_v23 = vld [vmem:[#allocation2 + $0x3b8] sm:$0xff] }
 0x32c   : > { %v1834_v35 = vadd.f32 %v1778_v34, %v1605_v5  ;;  %3134 = vmatprep.subr.mxu1 %v2897_v40  ;;  %v2236_v13 = vsel %vm2229_vm7, %v8971_v60, %v7266_v3  ;;  %3060 = vmatpush2.msra.mxu0 %v2818_v17  ;;  %v8972_v57 = vld [vmem:[#allocation122_spill] sm:$0xff]  ;;  %v939_v34 = vadd.f32 %v883_v45, %v710_v49  ;;  %v2814_v62 = vld [vmem:[#allocation2 + $0x140] sm:$0xff]  ;;  %v4609_v3 = vunpack.i.h.bf16 %v7295_v52  ;;  %v2891_v18 = vld [vmem:[#allocation2 + $0x3a8] sm:$0xff] }
 0x32d   : > { %3135 = vmatpush2.msra.mxu1 %v2896_v32  ;;  %v1105_v30 = vsel %vm1084_vm2, %v8972_v57, %v7195_v2  ;;  %3061 = vmatprep.subr.mxu0 %v2817_v48  ;;  %v2892_v7 = vld [vmem:[#allocation2 + $0x3b0] sm:$0xff]  ;;  %v1112_v16 = vsel %vm1084_vm2, %v8944_v44, %v7229_v19  ;;  %v2070_v40 = vadd.f32 %v2014_v55, %v1841_v56  ;;  %v4608_v5 = vunpack.i.l.bf16 %v7295_v52  ;;  %v2813_v2 = vld [vmem:[#allocation2 + $0x138] sm:$0xff]  ;;  %v8973_v21 = vld [vmem:[#allocation141_spill] sm:$0xff] }
 0x32e   : > { %v1312_v24 = vpop.permute.xlu1 %1311  ;;  %v7319_v33 = vpop.permute.xlu0 %1540  ;;  %v2063_v6 = vadd.f32 %v2007_v47, %v1834_v35  ;;  %3136 = vmatprep.subr.mxu1 %v2895_v25  ;;  %3062 = vmatpush2.msra.mxu0 %v2816_v11  ;;  %v1334_v8 = vsel %vm1313_vm3, %v8973_v21, %v7241_v41  ;;  %v8974_v32 = vld [vmem:[#allocation40_spill] sm:$0xff]  ;;  %v2812_v19 = vld [vmem:[#allocation2 + $0x130] sm:$0xff]  ;;  %v1161_v52 = vadd.f32 %v1105_v30, %v932_v51  ;;  %v2811_v59 = vld [vmem:[#allocation2 + $0x128] sm:$0xff] }
 0x32f   : > { %3137 = vmatpush2.msra.mxu1 %v2894_v28  ;;  %3063 = vmatprep.subr.mxu0 %v2815_v36  ;;  %v2890_v9 = vld [vmem:[#allocation2 + $0x3a0] sm:$0xff]  ;;  %v2889_v47 = vld [vmem:[#allocation2 + $0x398] sm:$0xff]  ;;  %v1168_v48 = vadd.f32 %v1112_v16, %v939_v34  ;;  %v8975_v25 = vld [vmem:[#allocation22_spill] sm:$0xff]  ;;  %v1341_v41 = vsel %vm1313_vm3, %v8945_v31, %v1312_v24  ;;  %v2531_v11 = vsel %vm626_vm0, %v4608_v5, %v4609_v3 }
 0x330   : > { %v2292_v17 = vadd.f32 %v2236_v13, %v2063_v6  ;;  %3138 = vmatprep.subr.mxu1 %v2893_v23  ;;  %3064 = vmatpush2.msra.mxu0 %v2814_v62  ;;  %v1563_v35 = vsel %vm1542_vm4, %v8975_v25, %v7293_v39  ;;  %v2810_v49 = vld [vmem:[#allocation2 + $0x120] sm:$0xff]  ;;  %v2888_v54 = vld [vmem:[#allocation2 + $0x390] sm:$0xff]  ;;  %v1390_v55 = vadd.f32 %v1334_v8, %v1161_v52  ;;  %v2809_v13 = vld [vmem:[#allocation2 + $0x118] sm:$0xff] }
 0x331   : > { %3139 = vmatpush2.msra.mxu1 %v2892_v7  ;;  %3065 = vmatprep.subr.mxu0 %v2813_v2  ;;  %v8976_v28 = vld [vmem:[#allocation156_spill] sm:$0xff]  ;;  %v2887_v36 = vld [vmem:[#allocation2 + $0x388] sm:$0xff]  ;;  %v8977_v39 = vld [vmem:[#allocation35_spill] sm:$0xff]  ;;  %v1397_v7 = vadd.f32 %v1341_v41, %v1168_v48  ;;  %v1570_v25 = vsel %vm1542_vm4, %v6723_v12, %v7319_v33 }
 0x332   : > { %v2196_v22 = vpop.permute.xlu1 %2195  ;;  %v7335_v53 = vpop.permute.xlu0 %1769  ;;  %3140 = vmatprep.subr.mxu1 %v2891_v18  ;;  %3066 = vmatpush2.msra.mxu0 %v2812_v19  ;;  %v2344_v23 = vmul.f32 %v8977_v39, %v2292_v17  ;;  %v2808_v57 = vld [vmem:[#allocation2 + $0x110] sm:$0xff]  ;;  %v2886_v30 = vld [vmem:[#allocation2 + $0x380] sm:$0xff]  ;;  %v8978_v34 = vld [vmem:[#allocation39_spill] sm:$0xff]  ;;  %v1619_v62 = vadd.f32 %v1563_v35, %v1390_v55 }
 0x333   : > { %v2243_v44 = vsel %vm2229_vm7, %v8974_v32, %v2196_v22  ;;  %3141 = vmatpush2.msra.mxu1 %v2890_v9  ;;  %3067 = vmatprep.subr.mxu0 %v2811_v59  ;;  %v1792_v6 = vsel %vm1771_vm5, %v8978_v34, %v7268_v29  ;;  %v2807_v16 = vld [vmem:[#allocation2 + $0x108] sm:$0xff]  ;;  %v8979_v22 = vld [vmem:[#allocation23_spill] sm:$0xff]  ;;  %v2806_v17 = vld [vmem:[#allocation2 + $0x100] sm:$0xff]  ;;  %v1799_v12 = vsel %vm1771_vm5, %v6899_v4, %v7335_v53 }
 0x334   : > { %v2299_v45 = vadd.f32 %v2243_v44, %v2070_v40  ;;  %3142 = vmatprep.subr.mxu1 %v2889_v47  ;;  %3068 = vmatpush2.msra.mxu0 %v2810_v49  ;;  %v2885_v40 = vld [vmem:[#allocation2 + $0x378] sm:$0xff]  ;;  %v8980_v2 = vmax.f32 %v8979_v22, 0.0  ;;  %v8981_v29 = vld [vmem:[#allocation17_spill] sm:$0xff]  ;;  %v8982_v44 = vld [vmem:[#allocation26_spill] sm:$0xff] }
 0x335   : > { %3143 = vmatpush2.msra.mxu1 %v2888_v54  ;;  %3069 = vmatprep.subr.mxu0 %v2809_v13  ;;  %v8983_v19 = vmax.f32 %v8982_v44, 0.0  ;;  %v8986_v48 = vld [vmem:[#allocation43_spill] sm:$0xff]  ;;  %v8987_v35 = vld [vmem:[#allocation54_spill] sm:$0xff]  ;;  %v2883_v49 = vld [vmem:[#allocation2 + $0x368] sm:$0xff]  ;;  %v1626_v54 = vadd.f32 %v1570_v25, %v1397_v7 }
 0x336   : > { %v2351_v51 = vmul.f32 %v8976_v28, %v2299_v45  ;;  %v1999_v56 = vpop.permute.xlu0 %1998  ;;  %v7349_v60 = vpop.permute.xlu1 %4611  ;;  %v7359_v18 = vmax.f32 %v8980_v2, %v2531_v11  ;;  %3144 = vmatprep.subr.mxu1 %v2887_v36  ;;  %v8984_v45 = vld [vmem:[#allocation27_spill] sm:$0xff]  ;;  %3070 = vmatpush2.msra.mxu0 %v2808_v57  ;;  %v1848_v11 = vadd.f32 %v1792_v6, %v1619_v62  ;;  %v8988_v34 = vld [vmem:[#allocation61_spill] sm:$0xff] }
 0x337   : > { %v4614_v31 = vunpack.i.h.bf16 %v7349_v60  ;;  %v4613_v24 = vunpack.i.l.bf16 %v7349_v60  ;;  %v8985_v59 = vmax.f32 %v8984_v45, 0.0  ;;  %3145 = vmatpush2.msra.mxu1 %v2886_v30  ;;  %3071 = vmatprep.subr.mxu0 %v2807_v16  ;;  %v2881_v33 = vld [vmem:[#allocation2 + $0x358] sm:$0xff]  ;;  %v2879_v53 = vld [vmem:[#allocation2 + $0x348] sm:$0xff]  ;;  %v1855_v62 = vadd.f32 %v1799_v12, %v1626_v54  ;;  %v2878_v16 = vld [vmem:[#allocation2 + $0x340] sm:$0xff] }
 0x338   : > { %v7366_v32 = vadd.f32 %v8981_v29, %v2351_v51  ;;  %3146 = vmatprep.subr.mxu1 %v2885_v40  ;;  %3072 = vmatpush2.msra.mxu0 %v2806_v17  ;;  %v2882_v51 = vld [vmem:[#allocation2 + $0x360] sm:$0xff]  ;;  %v8989_v40 = vld [vmem:[#allocation41_spill] sm:$0xff]  ;;  %v2873_v60 = vld [vmem:[#allocation2 + $0x318] sm:$0xff] }
 0x339   : > { %v2530_v21 = vsel %vm626_vm0, %v4614_v31, %v4608_v5  ;;  %v2532_v8 = vsel %vm626_vm0, %v4609_v3, %v4613_v24  ;;  %v2884_v5 = vld [vmem:[#allocation2 + $0x370] sm:$0xff]  ;;  %v7377_v3 = vadd.f32 %v8986_v48, %v2344_v23  ;;  %v2028_v31 = vsel %vm2000_vm6, %v7099_v10, %v1999_v56  ;;  %v2877_v10 = vld [vmem:[#allocation2 + $0x338] sm:$0xff]  ;;  %v2875_v44 = vld [vmem:[#allocation2 + $0x328] sm:$0xff] }
 0x33a   : > { %v7370_v9 = vmax.f32 %v8983_v19, %v2532_v8  ;;  %v1983_v52 = vpop.permute.xlu1 %1982  ;;  %v7374_v47 = vmax.f32 %v8985_v59, %v2530_v21  ;;  %v7384_v55 = vpop.permute.xlu0 %4616  ;;  %3147 = vmatpush2.msra.mxu1 %v2884_v5  ;;  %v2431_v13 = vmax.f32 %v7366_v32, 0.0  ;;  %v2880_v23 = vld [vmem:[#allocation2 + $0x350] sm:$0xff]  ;;  %v2084_v56 = vadd.f32 %v2028_v31, %v1855_v62  ;;  %v2874_v5 = vld [vmem:[#allocation2 + $0x320] sm:$0xff]  ;;  %v2925_v32 = vld [vmem:[#allocation2 + $0x4b8] sm:$0xff] }
 0x33b   : > { %v2021_v41 = vsel %vm2000_vm6, %v8987_v35, %v1983_v52  ;;  %3148 = vmatprep.subr.mxu1 %v2883_v49  ;;  %v4619_v57 = vunpack.i.h.bf16 %v7384_v55  ;;  %v4618_v30 = vunpack.i.l.bf16 %v7384_v55  ;;  %v2424_v6 = vmax.f32 %v7377_v3, 0.0  ;;  %v2876_v21 = vld [vmem:[#allocation2 + $0x330] sm:$0xff]  ;;  %v8990_v52 = vld [vmem:[#allocation57_spill] sm:$0xff]  ;;  %v8991_v48 = vld [vmem:[#allocation28_spill] sm:$0xff] }
 0x33c   : > { %2638 = vrot.lane.b32.xlu1 %v7374_v47, %s4840_s22  ;;  %v4665_v28 = vpack.i.bf16 %v7370_v9, %v7359_v18  ;;  %v2077_v36 = vadd.f32 %v2021_v41, %v1848_v11  ;;  %3149 = vmatpush2.msra.mxu1 %v2882_v51  ;;  %v8993_v35 = vld [vmem:[#allocation36_spill] sm:$0xff]  ;;  %v2929_v55 = vld [vmem:[#allocation2 + $0x4d8] sm:$0xff] }
 0x33d   : > { %3150 = vmatprep.subr.mxu1 %v2881_v33  ;;  %v2533_v8 = vsel %vm626_vm0, %v4613_v24, %v4618_v30  ;;  %v2534_v17 = vsel %vm626_vm0, %v4618_v30, %v4619_v57  ;;  %v8992_v24 = vmax.f32 %v8991_v48, 0.0  ;;  %v8994_v41 = vmax.f32 %v8993_v35, 0.0 }
 0x33e   : > { %v2212_v39 = vpop.permute.xlu1 %2211  ;;  %4666 = vrot.lane.b32.xlu0 %v4665_v28, %s4840_s22  ;;  %3151 = vmatpush2.msra.mxu1 %v2880_v23  ;;  %v4627_v19 = vpop.permute.xlu0 %4626  ;;  %v2872_v28 = vld [vmem:[#allocation2 + $0x310] sm:$0xff]  ;;  %v2870_v23 = vld [vmem:[#allocation2 + $0x300] sm:$0xff] }
 0x33f   : > { %v2250_v4 = vsel %vm2229_vm7, %v8988_v34, %v2212_v39  ;;  %3152 = vmatprep.subr.mxu1 %v2879_v53  ;;  %v7422_v25 = vmax.f32 %v8992_v24, %v2533_v8  ;;  %v7426_v49 = vmax.f32 %v8994_v41, %v2534_v17  ;;  %v4628_v51 = vunpack.i.l.bf16 %v4627_v19 }
 0x340   : > { %v2306_v7 = vadd.f32 %v2250_v4, %v2077_v36  ;;  %2500 = vrot.lane.b32.xlu1 %v2431_v13, %s4838_s20  ;;  %3153 = vmatpush2.msra.mxu1 %v2878_v16  ;;  %v2871_v36 = vld [vmem:[#allocation2 + $0x308] sm:$0xff]  ;;  %v4629_v31 = vunpack.i.h.bf16 %v4627_v19  ;;  %v8995_v4 = vld [vmem:[#allocation47_spill] sm:$0xff] }
 0x341   : > { %3154 = vmatprep.subr.mxu1 %v2877_v10  ;;  %v8996_v53 = vmax.f32 %v8995_v4, 0.0 }
 0x342   : > { %v2358_v22 = vmul.f32 %v8989_v40, %v2306_v7  ;;  %v2228_v2 = vpop.permute.xlu1 %2227  ;;  %2486 = vrot.lane.b32.xlu0 %v2424_v6, %s4838_s20  ;;  %3155 = vmatpush2.msra.mxu1 %v2876_v21  ;;  %v8999_v21 = vld [vmem:[#allocation38_spill] sm:$0xff] }
 0x343   : > { %v2257_v29 = vsel %vm2229_vm7, %v7226_v15, %v2228_v2  ;;  %3156 = vmatprep.subr.mxu1 %v2875_v44  ;;  %v9000_v8 = vmax.f32 %v8999_v21, 0.0  ;;  %v2933_v21 = vld [vmem:[#allocation2 + $0x4f8] sm:$0xff] }
 0x344   : > { %v7418_v45 = vadd.f32 %v8990_v52, %v2358_v22  ;;  %v2313_v59 = vadd.f32 %v2257_v29, %v2084_v56  ;;  %3157 = vmatpush2.msra.mxu1 %v2874_v5  ;;  %v4670_v56 = vpack.i.bf16 %v7426_v49, %v7422_v25  ;;  %v9001_v29 = vld [vmem:[#allocation14_spill] sm:$0xff]  ;;  %3187 = vmatprep.subr.mxu0 %v2933_v21 }
 0x345   : > { %3158 = vmatprep.subr.mxu1 %v2873_v60  ;;  %v9002_v44 = vmax.f32 %v9001_v29, 0.0 }
 0x346   : > { %v2438_v15 = vmax.f32 %v7418_v45, 0.0  ;;  %v2365_v54 = vmul.f32 %v7009_v27, %v2313_v59  ;;  %v4622_v11 = vpop.permute.xlu1 %4621  ;;  %3159 = vmatpush2.msra.mxu1 %v2872_v28  ;;  %v2922_v45 = vld [vmem:[#allocation2 + $0x4a0] sm:$0xff] }
 0x347   : > { %v4624_v12 = vunpack.i.h.bf16 %v4622_v11  ;;  %v4623_v33 = vunpack.i.l.bf16 %v4622_v11  ;;  %3160 = vmatprep.subr.mxu1 %v2871_v36 }
 0x348   : > { %v7431_v39 = vadd.f32 %v7101_v0, %v2365_v54  ;;  %2514 = vrot.lane.b32.xlu0 %v2438_v15, %s4838_s20  ;;  %v8997_v0 = vld [vmem:[#allocation45_spill] sm:$0xff]  ;;  %3161 = vmatpush2.msra.mxu1 %v2870_v23  ;;  %v9003_v54 = vld [vmem:[#allocation55_spill] sm:$0xff] }
 0x349   : > { %v2538_v27 = vsel %vm626_vm0, %v4624_v12, %v4628_v51  ;;  %v2537_v30 = vsel %vm626_vm0, %v4623_v33, %v4624_v12  ;;  %v8998_v7 = vmax.f32 %v8997_v0, 0.0  ;;  %v2536_v40 = vsel %vm626_vm0, %v4629_v31, %v4623_v33  ;;  %4450 = vmatprep.subr.msk.mxu1 %vm3002_vm8, %v2989_v58 }
 0x34a   : > { %v2445_v34 = vmax.f32 %v7431_v39, 0.0  ;;  %v7441_v62 = vmax.f32 %v8996_v53, %v2538_v27  ;;  %v7447_v10 = vpop.permute.xlu1 %4631  ;;  %v7460_v17 = vmax.f32 %v9000_v8, %v2536_v40  ;;  %v9004_v11 = vmax.f32 %v9003_v54, 0.0  ;;  %v9007_v53 = vld [vmem:[#allocation68_spill] sm:$0xff]  ;;  %v2919_v39 = vld [vmem:[#allocation2 + $0x488] sm:$0xff] }
 0x34b   : > { %v7445_v16 = vmax.f32 %v8998_v7, %v2537_v30  ;;  %v4633_v22 = vunpack.i.l.bf16 %v7447_v10  ;;  %v4634_v5 = vunpack.i.h.bf16 %v7447_v10  ;;  %v9008_v0 = vmax.f32 %v9007_v53, 0.0 }
 0x34c   : > { %2528 = vrot.lane.b32.xlu1 %v2445_v34, %s4838_s20  ;;  %4671 = vrot.lane.b32.xlu0 %v4670_v56, %s4840_s22  ;;  %v9009_v56 = vld [vmem:[#allocation59_spill] sm:$0xff] }
 0x34d   : > { %v2539_v2 = vsel %vm626_vm0, %v4628_v51, %v4633_v22  ;;  %v4675_v52 = vpack.i.bf16 %v7441_v62, %v7445_v16  ;;  %v2540_v48 = vsel %vm626_vm0, %v4633_v22, %v4634_v5  ;;  %v9005_v51 = vld [vmem:[#allocation58_spill] sm:$0xff]  ;;  %v9010_v40 = vmax.f32 %v9009_v56, 0.0 }
 0x34e   : > { %v7464_v19 = vmax.f32 %v9002_v44, %v2539_v2  ;;  %v7479_v28 = vmax.f32 %v9004_v11, %v2540_v48  ;;  %v9006_v12 = vmax.f32 %v9005_v51, 0.0 }
 0x350   : > { %4676 = vrot.lane.b32.xlu1 %v4675_v52, %s4840_s22  ;;  %v4680_v59 = vpack.i.bf16 %v7464_v19, %v7460_v17 }
 0x352   : > { %4681 = vrot.lane.b32.xlu0 %v4680_v59, %s4840_s22 }
 0x358   : > { %v4637_v60 = vpop.permute.xlu0 %4636 }
 0x359   : > { %v4639_v24 = vunpack.i.h.bf16 %v4637_v60  ;;  %v4638_v35 = vunpack.i.l.bf16 %v4637_v60  ;;  %v9011_v60 = vld [vmem:[#allocation56_spill] sm:$0xff] }
 0x35a   : > { %v9012_v48 = vmax.f32 %v9011_v60, 0.0 }
 0x35b   : > { %v2543_v41 = vsel %vm626_vm0, %v4638_v35, %v4639_v24 }
 0x35c   : > { %v7483_v33 = vmax.f32 %v9006_v12, %v2543_v41 }
 0x35e   : > { %v4685_v36 = vpack.i.bf16 %v7483_v33, %v7479_v28 }
 0x360   : > { %v4642_v23 = vpop.permute.xlu1 %4641  ;;  %4686 = vrot.lane.b32.xlu1 %v4685_v36, %s4840_s22 }
 0x361   : > { %v4644_v31 = vunpack.i.h.bf16 %v4642_v23  ;;  %v4643_v27 = vunpack.i.l.bf16 %v4642_v23 }
 0x363   : > { %v2542_v30 = vsel %vm626_vm0, %v4644_v31, %v4638_v35  ;;  %v2544_v4 = vsel %vm626_vm0, %v4639_v24, %v4643_v27  ;;  %v9013_v35 = vmax.f32 %v7027_v20, 0.0 }
 0x364   : > { %v7492_v7 = vmax.f32 %v9008_v0, %v2542_v30  ;;  %v7496_v22 = vmax.f32 %v9010_v40, %v2544_v4 }
 0x366   : > { %v4690_v2 = vpack.i.bf16 %v7492_v7, %v7496_v22 }
 0x368   : > { %4691 = vrot.lane.b32.xlu0 %v4690_v2, %s4840_s22 }
 0x374   : > { %v7501_v8 = vpop.permute.xlu0 %4646 }
 0x375   : > { %v4649_v29 = vunpack.i.h.bf16 %v7501_v8  ;;  %v4648_v44 = vunpack.i.l.bf16 %v7501_v8 }
 0x377   : > { %v2545_v52 = vsel %vm626_vm0, %v4643_v27, %v4648_v44  ;;  %v2546_v59 = vsel %vm626_vm0, %v4648_v44, %v4649_v29 }
 0x378   : > { %v7511_v24 = vmax.f32 %v9012_v48, %v2545_v52  ;;  %v7515_v41 = vmax.f32 %v9013_v35, %v2546_v59 }
 0x37a   : > { %v4695_v54 = vpack.i.bf16 %v7515_v41, %v7511_v24 }
 0x37c   : > { %4696 = vrot.lane.b32.xlu1 %v4695_v54, %s4840_s22 }
 0x388   : > { %v4652_v11 = vpop.permute.xlu1 %4651 }
 0x389   : > { %v4654_v51 = vunpack.i.h.bf16 %v4652_v11  ;;  %v4653_v12 = vunpack.i.l.bf16 %v4652_v11 }
 0x38b   : > { %v2549_v23 = vsel %vm626_vm0, %v4653_v12, %v4654_v51 }
 0x38c   : > { %v7524_v30 = vmax.f32 %v2440_v46, %v2549_v23  ;;  %v9014_v23 = vld [vmem:[#allocation37_spill] sm:$0xff] }
 0x390   : > { %v4657_v36 = vpop.permute.xlu0 %4656 }
 0x391   : > { %v4658_v31 = vunpack.i.l.bf16 %v4657_v36  ;;  %v4659_v53 = vunpack.i.h.bf16 %v4657_v36 }
 0x393   : > { %v2550_v27 = vsel %vm626_vm0, %v4654_v51, %v4658_v31  ;;  %v2548_v56 = vsel %vm626_vm0, %v4659_v53, %v4653_v12  ;;  %v2932_v51 = vld [vmem:[#allocation2 + $0x4f0] sm:$0xff]  ;;  %v2926_v53 = vld [vmem:[#allocation2 + $0x4c0] sm:$0xff] }
 0x394   : > { %v7528_v20 = vmax.f32 %v2441_v37, %v2550_v27  ;;  %v7541_v46 = vmax.f32 %v2439_v61, %v2548_v56 }
 0x396   : > { %v4700_v4 = vpack.i.bf16 %v7528_v20, %v7524_v30 }
 0x398   : > { %4701 = vrot.lane.b32.xlu0 %v4700_v4, %s4840_s22  ;;  %v2927_v4 = vld [vmem:[#allocation2 + $0x4c8] sm:$0xff] }
 0x39c   : > { %v7533_v0 = vpop.permute.xlu1 %4661 }
 0x39d   : > { %v4663_v40 = vunpack.i.l.bf16 %v7533_v0  ;;  %v4664_v21 = vunpack.i.h.bf16 %v7533_v0  ;;  %v9016_v0 = vld [vmem:[#allocation48_spill] sm:$0xff] }
 0x39e   : > { %v9017_v10 = vmax.f32 %v9016_v0, 0.0  ;;  %v2984_v0 = vld [vmem:[#allocation2 + $0x690] sm:$0xff] }
 0x39f   : > { %v2551_v42 = vsel %vm626_vm0, %v4658_v31, %v4663_v40  ;;  %v2552_v48 = vsel %vm626_vm0, %v4663_v40, %v4664_v21  ;;  %v9015_v31 = vmax.f32 %v9014_v23, 0.0  ;;  %v2924_v40 = vld [vmem:[#allocation2 + $0x4b0] sm:$0xff] }
 0x3a0   : > { %v7545_v37 = vmax.f32 %v2442_v43, %v2551_v42  ;;  %v7565_v36 = vmax.f32 %v2443_v63, %v2552_v48 }
 0x3a2   : > { %v4705_v2 = vpack.i.bf16 %v7545_v37, %v7541_v46 }
 0x3a4   : > { %4706 = vrot.lane.b32.xlu1 %v4705_v2, %s4840_s22  ;;  %v2923_v2 = vld [vmem:[#allocation2 + $0x4a8] sm:$0xff] }
 0x3ae   : > { %v2639_v44 = vpop.permute.xlu1 %2638 }
 0x3b0   : > { %v4667_v52 = vpop.permute.xlu0 %4666 }
 0x3b1   : > { %v4669_v59 = vunpack.i.h.bf16 %v4667_v52  ;;  %v4668_v60 = vunpack.i.l.bf16 %v4667_v52 }
 0x3b2   : > { %v2501_v12 = vpop.permute.xlu1 %2500 }
 0x3b3   : > { %v2695_v26 = vsel %vm1084_vm2, %v4668_v60, %v4669_v59  ;;  %v2694_v61 = vsel %vm1084_vm2, %v2639_v44, %v4668_v60  ;;  %v2541_v1 = vsel %vm626_vm0, %v4634_v5, %v2501_v12  ;;  %v7580_v63 = vmax.f32 %v2431_v13, %v2501_v12  ;;  %v2921_v60 = vld [vmem:[#allocation2 + $0x498] sm:$0xff] }
 0x3b4   : > { %v2487_v38 = vpop.permute.xlu0 %2486  ;;  %v2747_v43 = vmax.f32 %v7359_v18, %v2695_v26  ;;  %v2746_v35 = vmax.f32 %v7374_v47, %v2694_v61  ;;  %v2931_v18 = vld [vmem:[#allocation2 + $0x4e8] sm:$0xff]  ;;  %v2930_v47 = vld [vmem:[#allocation2 + $0x4e0] sm:$0xff]  ;;  %v7587_v56 = vmax.f32 %v9017_v10, %v2541_v1 }
 0x3b5   : > { %v2535_v54 = vsel %vm626_vm0, %v4619_v57, %v2487_v38  ;;  %v7561_v11 = vmax.f32 %v2424_v6, %v2487_v38  ;;  %v2928_v57 = vld [vmem:[#allocation2 + $0x4d0] sm:$0xff]  ;;  %v2986_v1 = vld [vmem:[#allocation2 + $0x6a0] sm:$0xff]  ;;  %v2983_v10 = vld [vmem:[#allocation2 + $0x688] sm:$0xff] }
 0x3b6   : > { %v7569_v27 = vmax.f32 %v9015_v31, %v2535_v54  ;;  %3073 = vmatprep.mubr.f32.mxu0 %v2747_v43  ;;  %v2920_v43 = vld [vmem:[#allocation2 + $0x490] sm:$0xff] }
 0x3b7   : > { %2650 = vrot.lane.b32.xlu1 %v7561_v11, %s4840_s22  ;;  %3074 = vmatmul.mubr.f32.vlgmr.msra.gmra.mxu0 %v2746_v35 }
 0x3b8   : > { %v4710_v3 = vpack.i.bf16 %v7569_v27, %v7565_v36  ;;  %3188 = vmatpush1.msra.mxu0 %v2932_v51 }
 0x3b9   : > { %3189 = vmatprep.subr.mxu0 %v2931_v18 }
 0x3ba   : > { %4711 = vrot.lane.b32.xlu0 %v4710_v3, %s4840_s22  ;;  %v2515_v6 = vpop.permute.xlu0 %2514  ;;  %3190 = vmatpush1.msra.mxu0 %v2930_v47  ;;  %v2916_v47 = vld [vmem:[#allocation2 + $0x470] sm:$0xff]  ;;  %v2987_v3 = vld [vmem:[#allocation2 + $0x6a8] sm:$0xff] }
 0x3bb   : > { %2664 = vrot.lane.b32.xlu1 %v7580_v63, %s4840_s22  ;;  %3191 = vmatprep.subr.mxu0 %v2929_v55  ;;  %v2547_v13 = vsel %vm626_vm0, %v4649_v29, %v2515_v6  ;;  %v7594_v5 = vmax.f32 %v2438_v15, %v2515_v6  ;;  %v9018_v15 = vld [vmem:[#allocation65_spill] sm:$0xff]  ;;  %v2914_v6 = vld [vmem:[#allocation2 + $0x460] sm:$0xff] }
 0x3bc   : > { %3192 = vmatpush1.msra.mxu0 %v2928_v57  ;;  %v9019_v29 = vmax.f32 %v9018_v15, 0.0  ;;  %v2907_v15 = vld [vmem:[#allocation2 + $0x428] sm:$0xff] }
 0x3bd   : > { %3193 = vmatprep.subr.mxu0 %v2927_v4  ;;  %v2985_v4 = vld [vmem:[#allocation2 + $0x698] sm:$0xff] }
 0x3be   : > { %v2529_v58 = vpop.permute.xlu1 %2528  ;;  %2662 = vrot.lane.b32.xlu0 %v7587_v56, %s4840_s22  ;;  %v7598_v42 = vpop.permute.xlu0 %4671  ;;  %3194 = vmatpush1.msra.mxu0 %v2926_v53  ;;  %v7606_v52 = vmax.f32 %v9019_v29, %v2547_v13  ;;  %v2913_v53 = vld [vmem:[#allocation2 + $0x458] sm:$0xff]  ;;  %v2982_v13 = vld [vmem:[#allocation2 + $0x680] sm:$0xff] }
 0x3bf   : > { %v4674_v44 = vunpack.i.h.bf16 %v7598_v42  ;;  %v4673_v8 = vunpack.i.l.bf16 %v7598_v42  ;;  %2678 = vrot.lane.b32.xlu1 %v7594_v5, %s4840_s22  ;;  %3195 = vmatprep.subr.mxu0 %v2925_v32  ;;  %v2553_v48 = vsel %vm626_vm0, %v4664_v21, %v2529_v58  ;;  %v7611_v26 = vmax.f32 %v2445_v34, %v2529_v58  ;;  %v2911_v32 = vld [vmem:[#allocation2 + $0x448] sm:$0xff]  ;;  %v2981_v58 = vld [vmem:[#allocation2 + $0x678] sm:$0xff]  ;;  %v2978_v29 = vld [vmem:[#allocation2 + $0x660] sm:$0xff] }
 0x3c0   : > { %3196 = vmatpush1.msra.mxu0 %v2924_v40  ;;  %v7629_v12 = vmax.f32 %v2444_v14, %v2553_v48  ;;  %v2915_v14 = vld [vmem:[#allocation2 + $0x468] sm:$0xff]  ;;  %v2910_v40 = vld [vmem:[#allocation2 + $0x440] sm:$0xff] }
 0x3c1   : > { %v2697_v61 = vsel %vm1084_vm2, %v4673_v8, %v4674_v44  ;;  %v2696_v38 = vsel %vm1084_vm2, %v4669_v59, %v4673_v8  ;;  %3197 = vmatprep.subr.mxu0 %v2923_v2  ;;  %v2918_v59 = vld [vmem:[#allocation2 + $0x480] sm:$0xff]  ;;  %v2980_v2 = vld [vmem:[#allocation2 + $0x670] sm:$0xff] }
 0x3c2   : > { %v7617_v35 = vpop.permute.xlu1 %4676  ;;  %2676 = vrot.lane.b32.xlu0 %v7606_v52, %s4840_s22  ;;  %v2749_v54 = vmax.f32 %v7422_v25, %v2697_v61  ;;  %v2748_v21 = vmax.f32 %v7370_v9, %v2696_v38  ;;  %3198 = vmatpush1.msra.mxu0 %v2922_v45  ;;  %v2917_v9 = vld [vmem:[#allocation2 + $0x478] sm:$0xff]  ;;  %v2988_v25 = vld [vmem:[#allocation2 + $0x6b0] sm:$0x7f]  ;;  %v2979_v45 = vld [vmem:[#allocation2 + $0x668] sm:$0xff] }
 0x3c3   : > { %v4679_v34 = vunpack.i.h.bf16 %v7617_v35  ;;  %v4678_v51 = vunpack.i.l.bf16 %v7617_v35  ;;  %2692 = vrot.lane.b32.xlu1 %v7611_v26, %s4840_s22  ;;  %3199 = vmatprep.subr.mxu0 %v2921_v60  ;;  %v2908_v8 = vld [vmem:[#allocation2 + $0x430] sm:$0xff]  ;;  %v2906_v48 = vld [vmem:[#allocation2 + $0x420] sm:$0xff]  ;;  %v2977_v61 = vld [vmem:[#allocation2 + $0x658] sm:$0xff] }
 0x3c4   : > { %v7631_v23 = vpop.permute.xlu0 %4681  ;;  %3162 = vmatprep.mubr.f32.mxu1 %v2749_v54  ;;  %3200 = vmatpush1.msra.mxu0 %v2920_v43  ;;  %v2905_v38 = vld [vmem:[#allocation2 + $0x418] sm:$0xff]  ;;  %v2976_v43 = vld [vmem:[#allocation2 + $0x650] sm:$0xff] }
 0x3c5   : > { %v4683_v31 = vunpack.i.l.bf16 %v7631_v23  ;;  %3163 = vmatmul.mubr.f32.vlgmr.msra.gmra.mxu1 %v2748_v21  ;;  %v2701_v18 = vsel %vm1084_vm2, %v4678_v51, %v4679_v34  ;;  %3201 = vmatprep.subr.mxu0 %v2919_v39  ;;  %v4684_v60 = vunpack.i.h.bf16 %v7631_v23  ;;  %v2904_v21 = vld [vmem:[#allocation2 + $0x410] sm:$0xff]  ;;  %v2975_v39 = vld [vmem:[#allocation2 + $0x648] sm:$0xff]  ;;  %v2974_v23 = vld [vmem:[#allocation2 + $0x640] sm:$0xff] }
 0x3c6   : > { %2690 = vrot.lane.b32.xlu0 %v7629_v12, %s4840_s22  ;;  %v2754_v50 = vmax.f32 %v7445_v16, %v2701_v18  ;;  %3202 = vmatpush1.msra.mxu0 %v2918_v59  ;;  %v2912_v16 = vld [vmem:[#allocation2 + $0x450] sm:$0xff]  ;;  %v2903_v59 = vld [vmem:[#allocation2 + $0x408] sm:$0xff]  ;;  %s4847_s22 = smov 114  }
 0x3c7   : > { %v2700_v55 = vsel %vm1084_vm2, %v4683_v31, %v4678_v51  ;;  %3203 = vmatprep.subr.mxu0 %v2917_v9  ;;  %4451 = vmatpush1.msk.msra.mxu1 %vm3002_vm8, %v2988_v25  ;;  %v2702_v9 = vsel %vm1084_vm2, %v4679_v34, %v4684_v60  ;;  %v2902_v25 = vld [vmem:[#allocation2 + $0x400] sm:$0xff]  ;;  %v2973_v31 = vld [vmem:[#allocation2 + $0x638] sm:$0xff]  ;;  %v2963_v34 = vld [vmem:[#allocation2 + $0x5e8] sm:$0xff] }
 0x3c8   : > { %3079 = vmatprep.mubr.f32.mxu0 %v2754_v50  ;;  %v2753_v57 = vmax.f32 %v7460_v17, %v2700_v55  ;;  %3204 = vmatpush1.msra.mxu0 %v2916_v47  ;;  %v2909_v17 = vld [vmem:[#allocation2 + $0x438] sm:$0xff]  ;;  %v2755_v35 = vmax.f32 %v7441_v62, %v2702_v9  ;;  %v2962_v55 = vld [vmem:[#allocation2 + $0x5e0] sm:$0xff]  ;;  %v2944_v9 = vld [vmem:[#allocation2 + $0x550] sm:$0xff] }
 0x3c9   : > { %3205 = vmatprep.subr.mxu0 %v2915_v14  ;;  %3286 = vmatprep.subr.mxu1 %v2987_v3  ;;  %v2965_v47 = vld [vmem:[#allocation2 + $0x5f8] sm:$0xff]  ;;  %v2964_v14 = vld [vmem:[#allocation2 + $0x5f0] sm:$0xff] }
 0x3ca   : > { %3080 = vmatmul.mubr.f32.gmra.mxu0 %v2753_v57  ;;  %3287 = vmatpush1.msra.mxu1 %v2986_v1  ;;  %v2972_v3 = vld [vmem:[#allocation2 + $0x630] sm:$0xff]  ;;  %v2971_v1 = vld [vmem:[#allocation2 + $0x628] sm:$0xff]  ;;  %v2961_v57 = vld [vmem:[#allocation2 + $0x5d8] sm:$0xff] }
 0x3cb   : > { %3206 = vmatpush1.msra.mxu0 %v2914_v6  ;;  %3288 = vmatprep.subr.mxu1 %v2985_v4  ;;  %v2970_v6 = vld [vmem:[#allocation2 + $0x620] sm:$0xff] }
 0x3cc   : > { %3207 = vmatprep.subr.mxu0 %v2913_v53  ;;  %3289 = vmatpush1.msra.mxu1 %v2984_v0  ;;  %v2969_v53 = vld [vmem:[#allocation2 + $0x618] sm:$0xff] }
 0x3cd   : > { %3208 = vmatpush1.msra.mxu0 %v2912_v16  ;;  %3290 = vmatprep.subr.mxu1 %v2983_v10  ;;  %v2959_v10 = vld [vmem:[#allocation2 + $0x5c8] sm:$0xff] }
 0x3ce   : > { %3209 = vmatprep.subr.mxu0 %v2911_v32  ;;  %3291 = vmatpush1.msra.mxu1 %v2982_v13  ;;  %v2968_v32 = vld [vmem:[#allocation2 + $0x610] sm:$0xff]  ;;  %v2958_v13 = vld [vmem:[#allocation2 + $0x5c0] sm:$0xff] }
 0x3cf   : > { %3210 = vmatpush1.msra.mxu0 %v2910_v40  ;;  %3292 = vmatprep.subr.mxu1 %v2981_v58  ;;  %v2967_v40 = vld [vmem:[#allocation2 + $0x608] sm:$0xff] }
 0x3d0   : > { %3211 = vmatprep.subr.mxu0 %v2909_v17  ;;  %3293 = vmatpush1.msra.mxu1 %v2980_v2  ;;  %v2957_v2 = vld [vmem:[#allocation2 + $0x5b8] sm:$0xff] }
 0x3d1   : > { %3212 = vmatpush1.msra.mxu0 %v2908_v8  ;;  %3294 = vmatprep.subr.mxu1 %v2979_v45 }
 0x3d2   : > { %v7644_v54 = vpop.permute.xlu1 %4686  ;;  %3213 = vmatprep.subr.mxu0 %v2907_v15  ;;  %3295 = vmatpush1.msra.mxu1 %v2978_v29  ;;  %v2966_v15 = vld [vmem:[#allocation2 + $0x600] sm:$0xff]  ;;  %v2956_v29 = vld [vmem:[#allocation2 + $0x5b0] sm:$0xff] }
 0x3d3   : > { %v4688_v51 = vunpack.i.l.bf16 %v7644_v54  ;;  %3214 = vmatpush1.msra.mxu0 %v2906_v48  ;;  %3296 = vmatprep.subr.mxu1 %v2977_v61  ;;  %v4689_v62 = vunpack.i.h.bf16 %v7644_v54  ;;  %v2954_v48 = vld [vmem:[#allocation2 + $0x5a0] sm:$0xff]  ;;  %v2953_v61 = vld [vmem:[#allocation2 + $0x598] sm:$0xff] }
 0x3d4   : > { %3215 = vmatprep.subr.mxu0 %v2905_v38  ;;  %3297 = vmatpush1.msra.mxu1 %v2976_v43  ;;  %v2952_v38 = vld [vmem:[#allocation2 + $0x590] sm:$0xff]  ;;  %v2949_v43 = vld [vmem:[#allocation2 + $0x578] sm:$0xff] }
 0x3d5   : > { %v2703_v18 = vsel %vm1084_vm2, %v4684_v60, %v4688_v51  ;;  %3216 = vmatpush1.msra.mxu0 %v2904_v21  ;;  %3298 = vmatprep.subr.mxu1 %v2975_v39  ;;  %v2955_v60 = vld [vmem:[#allocation2 + $0x5a8] sm:$0xff]  ;;  %v2948_v21 = vld [vmem:[#allocation2 + $0x570] sm:$0xff] }
 0x3d6   : > { %v2756_v50 = vmax.f32 %v7464_v19, %v2703_v18  ;;  %3217 = vmatprep.subr.mxu0 %v2903_v59  ;;  %3299 = vmatpush1.msra.mxu1 %v2974_v23  ;;  %v2960_v19 = vld [vmem:[#allocation2 + $0x5d0] sm:$0xff]  ;;  %v2947_v39 = vld [vmem:[#allocation2 + $0x568] sm:$0xff]  ;;  %v2946_v59 = vld [vmem:[#allocation2 + $0x560] sm:$0xff] }
 0x3d7   : > { %3218 = vmatpush1.msra.mxu0 %v2902_v25  ;;  %3300 = vmatprep.subr.mxu1 %v2973_v31  ;;  %v2945_v23 = vld [vmem:[#allocation2 + $0x558] sm:$0xff]  ;;  %v2943_v25 = vld [vmem:[#allocation2 + $0x548] sm:$0xff]  ;;  %v2942_v31 = vld [vmem:[#allocation2 + $0x540] sm:$0xff] }
 0x3d8   : > { %3168 = vmatprep.mubr.f32.mxu1 %v2756_v50  ;;  %3219 = vmatprep.subr.mxu0 %v2965_v47  ;;  %v2941_v47 = vld [vmem:[#allocation2 + $0x538] sm:$0xff] }
 0x3d9   : > { %3169 = vmatmul.mubr.f32.gmra.mxu1 %v2755_v35  ;;  %3220 = vmatpush2.msra.mxu0 %v2964_v14  ;;  %v2940_v35 = vld [vmem:[#allocation2 + $0x530] sm:$0xff] }
 0x3da   : > { %v7655_v4 = vpop.permute.xlu0 %4691  ;;  %3221 = vmatprep.subr.mxu0 %v2963_v34  ;;  %3301 = vmatpush1.msra.mxu1 %v2972_v3  ;;  %v2939_v34 = vld [vmem:[#allocation2 + $0x528] sm:$0xff] }
 0x3db   : > { %v4694_v0 = vunpack.i.h.bf16 %v7655_v4  ;;  %v4693_v16 = vunpack.i.l.bf16 %v7655_v4  ;;  %3222 = vmatpush2.msra.mxu0 %v2962_v55  ;;  %3302 = vmatprep.subr.mxu1 %v2971_v1  ;;  %v2938_v1 = vld [vmem:[#allocation2 + $0x520] sm:$0xff] }
 0x3dc   : > { %3223 = vmatprep.subr.mxu0 %v2961_v57  ;;  %3303 = vmatpush1.msra.mxu1 %v2970_v6 }
 0x3dd   : > { %v2707_v58 = vsel %vm1084_vm2, %v4689_v62, %v4693_v16  ;;  %v2706_v17 = vsel %vm1084_vm2, %v4694_v0, %v4689_v62  ;;  %3224 = vmatpush2.msra.mxu0 %v2960_v19  ;;  %3304 = vmatprep.subr.mxu1 %v2969_v53  ;;  %v2937_v19 = vld [vmem:[#allocation2 + $0x518] sm:$0xff]  ;;  %v2936_v53 = vld [vmem:[#allocation2 + $0x510] sm:$0xff]  ;;  %v2935_v62 = vld [vmem:[#allocation2 + $0x508] sm:$0xff] }
 0x3de   : > { %v2761_v8 = vmax.f32 %v7483_v33, %v2707_v58  ;;  %v2760_v45 = vmax.f32 %v7492_v7, %v2706_v17  ;;  %3225 = vmatprep.subr.mxu0 %v2959_v10  ;;  %3305 = vmatpush1.msra.mxu1 %v2968_v32  ;;  %v2951_v33 = vld [vmem:[#allocation2 + $0x588] sm:$0xff]  ;;  %v2950_v7 = vld [vmem:[#allocation2 + $0x580] sm:$0xff] }
 0x3df   : > { %3226 = vmatpush2.msra.mxu0 %v2958_v13  ;;  %3306 = vmatprep.subr.mxu1 %v2967_v40  ;;  %v2934_v0 = vld [vmem:[#allocation2 + $0x500] sm:$0xff] }
 0x3e0   : > { %3085 = vmatprep.mubr.f32.mxu0 %v2761_v8  ;;  %3227 = vmatprep.subr.mxu0 %v2957_v2 }
 0x3e1   : > { %3086 = vmatmul.mubr.f32.gmra.mxu0 %v2760_v45  ;;  %3307 = vmatpush1.msra.mxu1 %v2966_v15 }
 0x3e2   : > { %3228 = vmatpush2.msra.mxu0 %v2956_v29 }
 0x3e3   : > { %3229 = vmatprep.subr.mxu0 %v2955_v60 }
 0x3e4   : > { %3230 = vmatpush2.msra.mxu0 %v2954_v48 }
 0x3e5   : > { %3231 = vmatprep.subr.mxu0 %v2953_v61 }
 0x3e6   : > { %3232 = vmatpush2.msra.mxu0 %v2952_v38 }
 0x3e7   : > { %3233 = vmatprep.subr.mxu0 %v2951_v33 }
 0x3e8   : > { %3234 = vmatpush2.msra.mxu0 %v2950_v7 }
 0x3e9   : > { %3235 = vmatprep.subr.mxu0 %v2949_v43 }
 0x3ea   : > { %3236 = vmatpush2.msra.mxu0 %v2948_v21 }
 0x3eb   : > { %3237 = vmatprep.subr.mxu0 %v2947_v39 }
 0x3ec   : > { %3238 = vmatpush2.msra.mxu0 %v2946_v59 }
 0x3ed   : > { %3239 = vmatprep.subr.mxu0 %v2945_v23 }
 0x3ee   : > { %v7666_v18 = vpop.permute.xlu1 %4696  ;;  %3240 = vmatpush2.msra.mxu0 %v2944_v9 }
 0x3ef   : > { %v4699_v50 = vunpack.i.h.bf16 %v7666_v18  ;;  %v4698_v14 = vunpack.i.l.bf16 %v7666_v18  ;;  %3241 = vmatprep.subr.mxu0 %v2943_v25 }
 0x3f0   : > { %3242 = vmatpush2.msra.mxu0 %v2942_v31 }
 0x3f1   : > { %v2709_v3 = vsel %vm1084_vm2, %v4698_v14, %v4699_v50  ;;  %v2708_v55 = vsel %vm1084_vm2, %v4693_v16, %v4698_v14  ;;  %3243 = vmatprep.subr.mxu0 %v2941_v47 }
 0x3f2   : > { %v2763_v57 = vmax.f32 %v7511_v24, %v2709_v3  ;;  %v2762_v6 = vmax.f32 %v7496_v22, %v2708_v55  ;;  %3244 = vmatpush2.msra.mxu0 %v2940_v35 }
 0x3f3   : > { %3245 = vmatprep.subr.mxu0 %v2939_v34 }
 0x3f4   : > { %3174 = vmatprep.mubr.f32.mxu1 %v2763_v57  ;;  %3246 = vmatpush2.msra.mxu0 %v2938_v1 }
 0x3f5   : > { %3175 = vmatmul.mubr.f32.gmra.mxu1 %v2762_v6  ;;  %3247 = vmatprep.subr.mxu0 %v2937_v19 }
 0x3f6   : > { %3248 = vmatpush2.msra.mxu0 %v2936_v53 }
 0x3f7   : > { %3249 = vmatprep.subr.mxu0 %v2935_v62 }
 0x3f8   : > { %3250 = vmatpush2.msra.mxu0 %v2934_v0 }
 0x40a   : > { %v4702_v4 = vpop.permute.xlu0 %4701 }
 0x40b   : > { %v4704_v16 = vunpack.i.h.bf16 %v4702_v4  ;;  %v4703_v10 = vunpack.i.l.bf16 %v4702_v4 }
 0x40d   : > { %v2713_v24 = vsel %vm1084_vm2, %v4703_v10, %v4704_v16 }
 0x40e   : > { %v2768_v22 = vmax.f32 %v7524_v30, %v2713_v24 }
 0x410   : > { %3091 = vmatprep.mubr.f32.mxu0 %v2768_v22 }
 0x416   : > { %v4707_v32 = vpop.permute.xlu1 %4706 }
 0x417   : > { %v4708_v13 = vunpack.i.l.bf16 %v4707_v32  ;;  %v4709_v2 = vunpack.i.h.bf16 %v4707_v32 }
 0x419   : > { %v2712_v40 = vsel %vm1084_vm2, %v4708_v13, %v4703_v10  ;;  %v2714_v60 = vsel %vm1084_vm2, %v4704_v16, %v4709_v2 }
 0x41a   : > { %v2767_v58 = vmax.f32 %v7541_v46, %v2712_v40  ;;  %v2769_v21 = vmax.f32 %v7528_v20, %v2714_v60 }
 0x41c   : > { %3092 = vmatmul.mubr.f32.gmra.mxu0 %v2767_v58 }
 0x429   : > { %v2651_v17 = vpop.permute.xlu1 %2650 }
 0x42c   : > { %v4712_v8 = vpop.permute.xlu0 %4711 }
 0x42d   : > { %v4714_v45 = vunpack.i.h.bf16 %v4712_v8  ;;  %v4713_v15 = vunpack.i.l.bf16 %v4712_v8  ;;  %v2665_v29 = vpop.permute.xlu1 %2664 }
 0x42f   : > { %v2698_v30 = vsel %vm1084_vm2, %v4674_v44, %v4714_v45  ;;  %v2715_v48 = vsel %vm1084_vm2, %v4709_v2, %v4713_v15  ;;  %v2699_v61 = vsel %vm1084_vm2, %v4714_v45, %v2651_v17 }
 0x430   : > { %v2750_v38 = vmax.f32 %v7426_v49, %v2698_v30  ;;  %v2663_v46 = vpop.permute.xlu0 %2662  ;;  %v2770_v33 = vmax.f32 %v7545_v37, %v2715_v48  ;;  %v2751_v7 = vmax.f32 %v7569_v27, %v2699_v61  ;;  %v4846_v37 = vmov 0.0  }
 0x431   : > { %v2705_v43 = vsel %vm1084_vm2, %v2663_v46, %v2665_v29  ;;  %v2704_v42 = vsel %vm1084_vm2, %v4688_v51, %v2663_v46  ;;  %v2679_v44 = vpop.permute.xlu1 %2678  ;;  %v2752_v27 = vmax.f32 %v7561_v11, %v2651_v17  ;;  %v2759_v11 = vmax.f32 %v7580_v63, %v2665_v29 }
 0x432   : > { %3180 = vmatprep.mubr.f32.mxu1 %v2770_v33  ;;  %3251 = vmatprep.mubr.f32.mxu0 %v2751_v7  ;;  %v2758_v39 = vmax.f32 %v7587_v56, %v2705_v43  ;;  %v2757_v54 = vmax.f32 %v7479_v28, %v2704_v42 }
 0x433   : > { %3181 = vmatmul.mubr.f32.gmra.mxu1 %v2769_v21  ;;  %3252 = vmatmul.mubr.f32.vlgmr.msra.gmra.mxu0 %v2750_v38 }
 0x434   : > { %v2677_v49 = vpop.permute.xlu0 %2676  ;;  %3257 = vmatprep.mubr.f32.mxu0 %v2758_v39  ;;  %3340 = vmatprep.mubr.f32.mxu1 %v4846_v37 }
 0x435   : > { %v2711_v20 = vsel %vm1084_vm2, %v2677_v49, %v2679_v44  ;;  %v2710_v51 = vsel %vm1084_vm2, %v4699_v50, %v2677_v49  ;;  %v2693_v56 = vpop.permute.xlu1 %2692 }
 0x436   : > { %v2765_v59 = vmax.f32 %v7606_v52, %v2711_v20  ;;  %v2764_v28 = vmax.f32 %v7515_v41, %v2710_v51  ;;  %v2766_v52 = vmax.f32 %v7594_v5, %v2679_v44  ;;  %v2773_v41 = vmax.f32 %v7611_v26, %v2693_v56 }
 0x437   : > { %3258 = vmatmul.mubr.f32.gmra.mxu0 %v2757_v54  ;;  %4452 = vmatmul.mubr.msk.f32.vlgmr.msra.gmra.mxu1 %vm1313_vm3, %v2752_v27 }
 0x438   : > { %v2691_v23 = vpop.permute.xlu0 %2690  ;;  %3263 = vmatprep.mubr.f32.mxu0 %v2765_v59  ;;  %3346 = vmatprep.mubr.f32.mxu1 %v4846_v37 }
 0x439   : > { %v2717_v9 = vsel %vm1084_vm2, %v2691_v23, %v2693_v56  ;;  %v2716_v25 = vsel %vm1084_vm2, %v4713_v15, %v2691_v23  ;;  %vm4352_vm2 = vcmask 293888  }
 0x43a   : > { %v2772_v31 = vmax.f32 %v7629_v12, %v2717_v9  ;;  %v2771_v18 = vmax.f32 %v7565_v36, %v2716_v25  ;;  %v3604_v9 = vld [vmem:[#allocation4 + $0x8] sm:$0xff] }
 0x43b   : > { %3264 = vmatmul.mubr.f32.gmra.mxu0 %v2764_v28  ;;  %4453 = vmatmul.mubr.msk.f32.gmra.mxu1 %vm1313_vm3, %v2759_v11 }
 0x43c   : > { %3269 = vmatprep.mubr.f32.mxu0 %v2772_v31  ;;  %3352 = vmatprep.mubr.f32.mxu1 %v4846_v37 }
 0x43f   : > { %3270 = vmatmul.mubr.f32.gmra.mxu0 %v2771_v18  ;;  %4454 = vmatmul.mubr.msk.f32.gmra.mxu1 %vm1313_vm3, %v2766_v52 }
 0x440   : > { %3358 = vmatprep.mubr.f32.mxu1 %v4846_v37  ;;  %3829 = vmatprep.mubr.f32.mxu0 %v4846_v37 }
 0x443   : > { %4455 = vmatmul.mubr.msk.f32.gmra.mxu1 %vm1313_vm3, %v2773_v41 }
 0x444   : > { %3716 = vmatprep.mubr.f32.mxu1 %v3604_v9 }
 0x477   : > { %v3075_v63 = vpop.f32.mrf.mxu0 }
 0x479   : > { %v3077_v12 = vpop.f32.mrf.mxu0 }
 0x485   : > { %v3164_v47 = vpop.f32.mrf.mxu1 }
 0x486   : > { %v3165_v53 = vadd.f32 %v3164_v47, %v3075_v63  ;;  %v3878_v63 = vld [vmem:[%s8377_s6] sm:$0xff] }
 0x487   : > { %v3166_v14 = vpop.f32.mrf.mxu1  ;;  %v3942_v47 = vld [vmem:[%s8378_s7] sm:$0xff] }
 0x488   : > { %v3167_v4 = vadd.f32 %v3166_v14, %v3077_v12  ;;  %v3879_v14 = vld [vmem:[%s8377_s6 + $0x8] sm:$0xff] }
 0x48a   : > { %v3081_v50 = vpop.f32.mrf.mxu0 }
 0x48c   : > { %v3083_v35 = vpop.f32.mrf.mxu0 }
 0x499   : > { %v3170_v5 = vpop.f32.mrf.mxu1 }
 0x49a   : > { %v3171_v17 = vadd.f32 %v3170_v5, %v3081_v50  ;;  %v3943_v5 = vld [vmem:[%s8378_s7 + $0x8] sm:$0xff] }
 0x49b   : > { %v3172_v36 = vpop.f32.mrf.mxu1 }
 0x49c   : > { %v3173_v8 = vadd.f32 %v3172_v36, %v3083_v35  ;;  %v3880_v36 = vld [vmem:[%s8377_s6 + $0x10] sm:$0xff] }
 0x4a1   : > { %v3087_v34 = vpop.f32.mrf.mxu0 }
 0x4a3   : > { %v3089_v3 = vpop.f32.mrf.mxu0 }
 0x4b5   : > { %v3176_v55 = vpop.f32.mrf.mxu1 }
 0x4b6   : > { %v3177_v38 = vadd.f32 %v3176_v55, %v3087_v34  ;;  %v3883_v55 = vld [vmem:[%s8377_s6 + $0x28] sm:$0xff] }
 0x4b7   : > { %v3178_v57 = vpop.f32.mrf.mxu1 }
 0x4b8   : > { %v3179_v33 = vadd.f32 %v3178_v57, %v3089_v3  ;;  %v3944_v57 = vld [vmem:[%s8378_s7 + $0x10] sm:$0xff] }
 0x4dc   : > { %v7721_v1 = vpop.f32.mrf.mxu0 }
 0x4de   : > { %v7723_v6 = vpop.f32.mrf.mxu0 }
 0x4f3   : > { %v7725_v19 = vpop.f32.mrf.mxu1  ;;  %v3253_v26 = vpop.f32.mrf.mxu0 }
 0x4f4   : > { %v3254_v16 = vadd.f32 %v3253_v26, %v3165_v53  ;;  %v3183_v27 = vadd.f32 %v7725_v19, %v7721_v1  ;;  %v3947_v19 = vld [vmem:[%s8378_s7 + $0x28] sm:$0xff]  ;;  %v3881_v53 = vld [vmem:[%s8377_s6 + $0x18] sm:$0xff] }
 0x4f5   : > { %v7727_v62 = vpop.f32.mrf.mxu1  ;;  %v3255_v0 = vpop.f32.mrf.mxu0 }
 0x4f6   : > { %v3256_v24 = vadd.f32 %v3255_v0, %v3167_v4  ;;  %v3185_v54 = vadd.f32 %v7727_v62, %v7723_v6  ;;  %v3884_v0 = vld [vmem:[%s8377_s6 + $0x30] sm:$0xff] }
 0x4f7   : > { %v3342_v10 = vpop.f32.mrf.mxu1  ;;  %v3259_v40 = vpop.f32.mrf.mxu0 }
 0x4f8   : > { %v7729_v22 = vadd.f32 %v3342_v10, %v3254_v16  ;;  %v3260_v45 = vadd.f32 %v3259_v40, %v3171_v17  ;;  %v3945_v16 = vld [vmem:[%s8378_s7 + $0x18] sm:$0xff] }
 0x4f9   : > { %v3344_v32 = vpop.f32.mrf.mxu1  ;;  %v3261_v2 = vpop.f32.mrf.mxu0 }
 0x4fa   : > { %v7731_v13 = vadd.f32 %v3344_v32, %v3256_v24  ;;  %3429 = vrot.lane.b32.xlu0 %v7729_v22, %s4847_s22  ;;  %v3262_v29 = vadd.f32 %v3261_v2, %v3173_v8  ;;  %v3948_v24 = vld [vmem:[%s8378_s7 + $0x30] sm:$0xff]  ;;  %v3885_v2 = vld [vmem:[%s8377_s6 + $0x38] sm:$0xff] }
 0x4fb   : > { %v3348_v58 = vpop.f32.mrf.mxu1  ;;  %v3265_v48 = vpop.f32.mrf.mxu0 }
 0x4fc   : > { %3431 = vrot.lane.b32.xlu1 %v7731_v13, %s4847_s22  ;;  %v7751_v60 = vadd.f32 %v3348_v58, %v3260_v45  ;;  %v3266_v7 = vadd.f32 %v3265_v48, %v3177_v38  ;;  %v3882_v58 = vld [vmem:[%s8377_s6 + $0x20] sm:$0xff] }
 0x4fd   : > { %v3350_v15 = vpop.f32.mrf.mxu1  ;;  %v3267_v46 = vpop.f32.mrf.mxu0  ;;  %v3946_v45 = vld [vmem:[%s8378_s7 + $0x20] sm:$0xff] }
 0x4fe   : > { %3401 = vrot.lane.b32.xlu0 %v7729_v22, %s4839_s21  ;;  %v7755_v30 = vadd.f32 %v3350_v15, %v3262_v29  ;;  %v3268_v21 = vadd.f32 %v3267_v46, %v3179_v33  ;;  %v3949_v29 = vld [vmem:[%s8378_s7 + $0x38] sm:$0xff] }
 0x4ff   : > { %v3354_v61 = vpop.f32.mrf.mxu1  ;;  %v3271_v39 = vpop.f32.mrf.mxu0 }
 0x500   : > { %3403 = vrot.lane.b32.xlu1 %v7731_v13, %s4839_s21  ;;  %v7775_v42 = vadd.f32 %v3354_v61, %v3266_v7  ;;  %v3272_v51 = vadd.f32 %v3271_v39, %v3183_v27 }
 0x501   : > { %v3356_v43 = vpop.f32.mrf.mxu1  ;;  %v3273_v20 = vpop.f32.mrf.mxu0 }
 0x502   : > { %3373 = vrot.lane.b32.xlu0 %v7729_v22, %s4838_s20  ;;  %v7779_v44 = vadd.f32 %v3356_v43, %v3268_v21  ;;  %v3274_v56 = vadd.f32 %v3273_v20, %v3185_v54 }
 0x503   : > { %v3360_v49 = vpop.f32.mrf.mxu1 }
 0x504   : > { %3375 = vrot.lane.b32.xlu1 %v7731_v13, %s4838_s20  ;;  %v7803_v23 = vadd.f32 %v3360_v49, %v3272_v51 }
 0x505   : > { %v3362_v59 = vpop.f32.mrf.mxu1 }
 0x506   : > { %3545 = vrot.lane.b32.xlu0 %v7729_v22, %s4848_s23  ;;  %v7807_v11 = vadd.f32 %v3362_v59, %v3274_v56 }
 0x508   : > { %3547 = vrot.lane.b32.xlu1 %v7731_v13, %s4848_s23 }
 0x50a   : > { %3516 = vrot.lane.b32.xlu0 %v7729_v22, %s4849_s24 }
 0x50c   : > { %3518 = vrot.lane.b32.xlu1 %v7731_v13, %s4849_s24 }
 0x50e   : > { %3433 = vrot.lane.b32.xlu0 %v7751_v60, %s4847_s22 }
 0x510   : > { %3435 = vrot.lane.b32.xlu1 %v7755_v30, %s4847_s22 }
 0x512   : > { %3405 = vrot.lane.b32.xlu0 %v7751_v60, %s4839_s21 }
 0x514   : > { %3407 = vrot.lane.b32.xlu1 %v7755_v30, %s4839_s21 }
 0x516   : > { %3377 = vrot.lane.b32.xlu0 %v7751_v60, %s4838_s20 }
 0x518   : > { %3379 = vrot.lane.b32.xlu1 %v7755_v30, %s4838_s20 }
 0x51a   : > { %3549 = vrot.lane.b32.xlu0 %v7751_v60, %s4848_s23 }
 0x51c   : > { %3551 = vrot.lane.b32.xlu1 %v7755_v30, %s4848_s23 }
 0x51e   : > { %3520 = vrot.lane.b32.xlu0 %v7751_v60, %s4849_s24 }
 0x520   : > { %3522 = vrot.lane.b32.xlu1 %v7755_v30, %s4849_s24 }
 0x522   : > { %3437 = vrot.lane.b32.xlu0 %v7775_v42, %s4847_s22 }
 0x524   : > { %3439 = vrot.lane.b32.xlu1 %v7779_v44, %s4847_s22 }
 0x526   : > { %3409 = vrot.lane.b32.xlu0 %v7775_v42, %s4839_s21 }
 0x528   : > { %3411 = vrot.lane.b32.xlu1 %v7779_v44, %s4839_s21 }
 0x52a   : > { %3381 = vrot.lane.b32.xlu0 %v7775_v42, %s4838_s20 }
 0x52c   : > { %3383 = vrot.lane.b32.xlu1 %v7779_v44, %s4838_s20 }
 0x52e   : > { %3553 = vrot.lane.b32.xlu0 %v7775_v42, %s4848_s23 }
 0x530   : > { %3555 = vrot.lane.b32.xlu1 %v7779_v44, %s4848_s23 }
 0x532   : > { %3524 = vrot.lane.b32.xlu0 %v7775_v42, %s4849_s24 }
 0x534   : > { %3526 = vrot.lane.b32.xlu1 %v7779_v44, %s4849_s24 }
 0x536   : > { %3441 = vrot.lane.b32.xlu0 %v7803_v23, %s4847_s22 }
 0x538   : > { %3443 = vrot.lane.b32.xlu1 %v7807_v11, %s4847_s22 }
 0x53a   : > { %3495 = vrot.lane.b32.xlu0 %v7775_v42, %s4850_s25 }
 0x53c   : > { %3497 = vrot.lane.b32.xlu1 %v7779_v44, %s4850_s25 }
 0x53e   : > { %3413 = vrot.lane.b32.xlu0 %v7803_v23, %s4839_s21 }
 0x540   : > { %3415 = vrot.lane.b32.xlu1 %v7807_v11, %s4839_s21  ;;  %s4851_s21 = smov 113  }
 0x542   : > { %3385 = vrot.lane.b32.xlu0 %v7803_v23, %s4838_s20 }
 0x544   : > { %3493 = vrot.lane.b32.xlu1 %v7755_v30, %s4850_s25 }
 0x546   : > { %3557 = vrot.lane.b32.xlu0 %v7803_v23, %s4848_s23 }
 0x548   : > { %3387 = vrot.lane.b32.xlu1 %v7807_v11, %s4838_s20 }
 0x54a   : > { %3528 = vrot.lane.b32.xlu0 %v7803_v23, %s4849_s24 }
 0x54c   : > { %3559 = vrot.lane.b32.xlu1 %v7807_v11, %s4848_s23 }
 0x54e   : > { %3499 = vrot.lane.b32.xlu0 %v7803_v23, %s4850_s25 }
 0x550   : > { %3530 = vrot.lane.b32.xlu1 %v7807_v11, %s4849_s24 }
 0x552   : > { %3491 = vrot.lane.b32.xlu0 %v7751_v60, %s4850_s25 }
 0x554   : > { %3501 = vrot.lane.b32.xlu1 %v7807_v11, %s4850_s25 }
 0x556   : > { %3487 = vrot.lane.b32.xlu0 %v7729_v22, %s4850_s25 }
 0x558   : > { %3489 = vrot.lane.b32.xlu1 %v7731_v13, %s4850_s25 }
 0x55a   : > { %3470 = vrot.lane.b32.xlu0 %v7803_v23, %s4851_s21 }
 0x55c   : > { %3472 = vrot.lane.b32.xlu1 %v7807_v11, %s4851_s21 }
 0x55e   : > { %3586 = vrot.lane.b32.xlu0 %v7803_v23, %s4852_s26 }
 0x560   : > { %3588 = vrot.lane.b32.xlu1 %v7807_v11, %s4852_s26 }
 0x562   : > { %3466 = vrot.lane.b32.xlu0 %v7775_v42, %s4851_s21 }
 0x564   : > { %3468 = vrot.lane.b32.xlu1 %v7779_v44, %s4851_s21 }
 0x566   : > { %3582 = vrot.lane.b32.xlu0 %v7775_v42, %s4852_s26 }
 0x568   : > { %3584 = vrot.lane.b32.xlu1 %v7779_v44, %s4852_s26 }
 0x56a   : > { %3462 = vrot.lane.b32.xlu0 %v7751_v60, %s4851_s21 }
 0x56c   : > { %v7846_v28 = vpop.permute.xlu0 %3429  ;;  %3464 = vrot.lane.b32.xlu1 %v7755_v30, %s4851_s21 }
 0x56e   : > { %v7849_v25 = vpop.permute.xlu1 %3431  ;;  %3578 = vrot.lane.b32.xlu0 %v7751_v60, %s4852_s26 }
 0x570   : > { %v7852_v31 = vpop.permute.xlu0 %3401  ;;  %3580 = vrot.lane.b32.xlu1 %v7755_v30, %s4852_s26 }
 0x572   : > { %v7855_v52 = vpop.permute.xlu1 %3403  ;;  %3458 = vrot.lane.b32.xlu0 %v7729_v22, %s4851_s21 }
 0x574   : > { %v7858_v18 = vpop.permute.xlu0 %3373  ;;  %3460 = vrot.lane.b32.xlu1 %v7731_v13, %s4851_s21 }
 0x576   : > { %v7861_v41 = vpop.permute.xlu1 %3375  ;;  %3574 = vrot.lane.b32.xlu0 %v7729_v22, %s4852_s26 }
 0x578   : > { %v7867_v12 = vpop.permute.xlu0 %3545  ;;  %3576 = vrot.lane.b32.xlu1 %v7731_v13, %s4852_s26 }
 0x57a   : > { %v7873_v50 = vpop.permute.xlu1 %3547  ;;  %3888 = vperm.xlu0 %4601, %v3878_v63   ;;  %v3446_v63 = vsel %vm3445_vm10, %v7846_v28, %v7849_v25 }
 0x57c   : > { %v7878_v35 = vpop.permute.xlu0 %3516  ;;  %3952 = vperm.xlu1 %4604, %v3942_v47  }
 0x57e   : > { %v7883_v34 = vpop.permute.xlu1 %3518  ;;  %3893 = vperm.xlu0 %4601, %v3879_v14  }
 0x580   : > { %v3434_v3 = vpop.permute.xlu0 %3433  ;;  %3957 = vperm.xlu1 %4604, %v3943_v5  }
 0x582   : > { %v3436_v1 = vpop.permute.xlu1 %3435  ;;  %3898 = vperm.xlu0 %4601, %v3880_v36  }
 0x583   : > { %v3447_v56 = vsel %vm3445_vm10, %v3434_v3, %v3436_v1 }
 0x584   : > { %v7894_v6 = vpop.permute.xlu0 %3405  ;;  %3913 = vperm.xlu1 %4604, %v3883_v55  }
 0x586   : > { %v7899_v26 = vpop.permute.xlu1 %3407  ;;  %3962 = vperm.xlu0 %4601, %v3944_v57  }
 0x587   : > { %v3418_v55 = vsel %vm855_vm1, %v7894_v6, %v7899_v26 }
 0x588   : > { %v7904_v62 = vpop.permute.xlu0 %3377  ;;  %3977 = vperm.xlu1 %4604, %v3947_v19  }
 0x58a   : > { %v7909_v4 = vpop.permute.xlu1 %3379  ;;  %3903 = vperm.xlu0 %4601, %v3881_v53  }
 0x58c   : > { %v3550_v10 = vpop.permute.xlu0 %3549  ;;  %3918 = vperm.xlu1 %4604, %v3884_v0  }
 0x58e   : > { %v7917_v32 = vpop.permute.xlu1 %3551  ;;  %3967 = vperm.xlu0 %4601, %v3945_v16  }
 0x58f   : > { %v7921_v40 = vsel %vm3561_vm9, %v3550_v10, %v7917_v32 }
 0x590   : > { %v7926_v17 = vpop.permute.xlu0 %3520  ;;  %3982 = vperm.xlu1 %4604, %v3948_v24  }
 0x592   : > { %v7931_v8 = vpop.permute.xlu1 %3522  ;;  %3908 = vperm.xlu0 %4601, %v3882_v58  }
 0x594   : > { %v3438_v15 = vpop.permute.xlu0 %3437  ;;  %3923 = vperm.xlu1 %4604, %v3885_v2  }
 0x596   : > { %v3440_v48 = vpop.permute.xlu1 %3439  ;;  %3972 = vperm.xlu0 %4601, %v3946_v45  }
 0x597   : > { %v3448_v51 = vsel %vm3445_vm10, %v3438_v15, %v3440_v48 }
 0x598   : > { %v3410_v61 = vpop.permute.xlu0 %3409  ;;  %3987 = vperm.xlu1 %4604, %v3949_v29  }
 0x59a   : > { %v3412_v38 = vpop.permute.xlu1 %3411 }
 0x59b   : > { %v3419_v36 = vsel %vm855_vm1, %v3410_v61, %v3412_v38 }
 0x59c   : > { %v3382_v46 = vpop.permute.xlu0 %3381 }
 0x59e   : > { %v3384_v33 = vpop.permute.xlu1 %3383 }
 0x59f   : > { %v3391_v53 = vsel %vm626_vm0, %v3382_v46, %v3384_v33 }
 0x5a0   : > { %v7939_v7 = vpop.permute.xlu0 %3553 }
 0x5a2   : > { %v7941_v43 = vpop.permute.xlu1 %3555 }
 0x5a4   : > { %v7943_v21 = vpop.permute.xlu0 %3524 }
 0x5a6   : > { %v7945_v39 = vpop.permute.xlu1 %3526 }
 0x5a7   : > { %v3535_v24 = vsel %vm3532_vm12, %v7943_v21, %v7945_v39  ;;  %v3603_v21 = vld [vmem:[#allocation4] sm:$0xff] }
 0x5a8   : > { %v3442_v49 = vpop.permute.xlu0 %3441 }
 0x5aa   : > { %v3444_v27 = vpop.permute.xlu1 %3443 }
 0x5ab   : > { %v3449_v20 = vsel %vm3445_vm10, %v3442_v49, %v3444_v27  ;;  %3652 = vmatprep.subr.mxu1 %v3444_v27  ;;  %v3607_v49 = vld [vmem:[#allocation4 + $0x20] sm:$0xff] }
 0x5ac   : > { %v7948_v54 = vpop.permute.xlu0 %3495  ;;  %3653 = vmatpush1.msra.mxu1 %v3449_v20 }
 0x5ad   : > { %3654 = vmatprep.subr.mxu1 %v3440_v48 }
 0x5ae   : > { %3655 = vmatpush1.msra.mxu1 %v3448_v51  ;;  %v7951_v59 = vpop.permute.xlu1 %3497 }
 0x5af   : > { %3656 = vmatprep.subr.mxu1 %v3436_v1 }
 0x5b0   : > { %v3414_v9 = vpop.permute.xlu0 %3413  ;;  %3657 = vmatpush1.msra.mxu1 %v3447_v56  ;;  %v3610_v56 = vld [vmem:[#allocation4 + $0x38] sm:$0xff] }
 0x5b1   : > { %3658 = vmatprep.subr.mxu1 %v7849_v25  ;;  %v3417_v25 = vsel %vm855_vm1, %v7852_v31, %v7855_v52  ;;  %v3389_v31 = vsel %vm626_vm0, %v7858_v18, %v7861_v41 }
 0x5b2   : > { %3659 = vmatpush1.msra.mxu1 %v3446_v63  ;;  %v3416_v47 = vpop.permute.xlu1 %3415  ;;  %v3609_v63 = vld [vmem:[#allocation4 + $0x30] sm:$0xff] }
 0x5b3   : > { %v3420_v14 = vsel %vm855_vm1, %v3414_v9, %v3416_v47  ;;  %3660 = vmatprep.subr.mxu1 %v3416_v47  ;;  %v3608_v9 = vld [vmem:[#allocation4 + $0x28] sm:$0xff]  ;;  %v3613_v47 = vld [vmem:[#allocation4 + $0x50] sm:$0xff]  ;;  %vm4243_vm1 = vcmask 1040384  }
 0x5b4   : > { %v3386_v5 = vpop.permute.xlu0 %3385  ;;  %3661 = vmatpush1.msra.mxu1 %v3420_v14  ;;  %v3611_v14 = vld [vmem:[#allocation4 + $0x40] sm:$0xff] }
 0x5b5   : > { %3662 = vmatprep.subr.mxu1 %v3412_v38 }
 0x5b6   : > { %3663 = vmatpush1.msra.mxu1 %v3419_v36  ;;  %v7960_v3 = vpop.permute.xlu1 %3493  ;;  %v3616_v36 = vld [vmem:[#allocation4 + $0x68] sm:$0xff] }
 0x5b7   : > { %3664 = vmatprep.subr.mxu1 %v7899_v26  ;;  %v3390_v26 = vsel %vm626_vm0, %v7904_v62, %v7909_v4 }
 0x5b8   : > { %v3558_v28 = vpop.permute.xlu0 %3557  ;;  %3665 = vmatpush1.msra.mxu1 %v3418_v55  ;;  %v3615_v55 = vld [vmem:[#allocation4 + $0x60] sm:$0xff] }
 0x5b9   : > { %3666 = vmatprep.subr.mxu1 %v7855_v52 }
 0x5ba   : > { %3667 = vmatpush1.msra.mxu1 %v3417_v25  ;;  %v3388_v1 = vpop.permute.xlu1 %3387  ;;  %v3617_v25 = vld [vmem:[#allocation4 + $0x70] sm:$0xff] }
 0x5bb   : > { %v3392_v57 = vsel %vm626_vm0, %v3386_v5, %v3388_v1  ;;  %3668 = vmatprep.subr.mxu1 %v3388_v1  ;;  %v3612_v5 = vld [vmem:[#allocation4 + $0x48] sm:$0xff]  ;;  %v3618_v1 = vld [vmem:[#allocation4 + $0x78] sm:$0xff] }
 0x5bc   : > { %v3529_v19 = vpop.permute.xlu0 %3528  ;;  %3669 = vmatpush1.msra.mxu1 %v3392_v57  ;;  %v3622_v57 = vld [vmem:[#allocation4 + $0x98] sm:$0xff] }
 0x5bd   : > { %3670 = vmatprep.subr.mxu1 %v3384_v33 }
 0x5be   : > { %3671 = vmatpush1.msra.mxu1 %v3391_v53  ;;  %v3560_v6 = vpop.permute.xlu1 %3559  ;;  %v3621_v53 = vld [vmem:[#allocation4 + $0x90] sm:$0xff] }
 0x5bf   : > { %3672 = vmatprep.subr.mxu1 %v7909_v4 }
 0x5c0   : > { %v3500_v0 = vpop.permute.xlu0 %3499  ;;  %3673 = vmatpush1.msra.mxu1 %v3390_v26  ;;  %v3623_v26 = vld [vmem:[#allocation4 + $0xa0] sm:$0xff] }
 0x5c1   : > { %3674 = vmatprep.subr.mxu1 %v7861_v41 }
 0x5c2   : > { %3675 = vmatpush1.msra.mxu1 %v3389_v31  ;;  %v3531_v52 = vpop.permute.xlu1 %3530  ;;  %v3626_v31 = vld [vmem:[#allocation4 + $0xb8] sm:$0xff] }
 0x5c3   : > { %3676 = vmatprep.subr.mxu1 %v7807_v11  ;;  %v3565_v11 = vsel %vm3561_vm9, %v3558_v28, %v3560_v6  ;;  %v3619_v28 = vld [vmem:[#allocation4 + $0x80] sm:$0xff] }
 0x5c4   : > { %v3492_v16 = vpop.permute.xlu0 %3491  ;;  %3677 = vmatpush1.msra.mxu1 %v7803_v23 }
 0x5c5   : > { %3678 = vmatprep.subr.mxu1 %v7779_v44  ;;  %v3536_v44 = vsel %vm3532_vm12, %v3529_v19, %v3531_v52  ;;  %v3620_v19 = vld [vmem:[#allocation4 + $0x88] sm:$0xff] }
 0x5c6   : > { %3679 = vmatpush1.msra.mxu1 %v7775_v42  ;;  %v3502_v62 = vpop.permute.xlu1 %3501  ;;  %v3564_v42 = vsel %vm3561_vm9, %v7939_v7, %v7941_v43 }
 0x5c7   : > { %3680 = vmatprep.subr.mxu1 %v7755_v30  ;;  %v3507_v2 = vsel %vm3503_vm13, %v3500_v0, %v3502_v62  ;;  %v3624_v0 = vld [vmem:[#allocation4 + $0xa8] sm:$0xff] }
 0x5c8   : > { %v3488_v4 = vpop.permute.xlu0 %3487  ;;  %3681 = vmatpush1.msra.mxu1 %v7751_v60 }
 0x5c9   : > { %3682 = vmatprep.subr.mxu1 %v7731_v13 }
 0x5ca   : > { %3683 = vmatpush1.msra.mxu1 %v7729_v22  ;;  %v3490_v18 = vpop.permute.xlu1 %3489  ;;  %v3562_v22 = vsel %vm3561_vm9, %v7867_v12, %v7873_v50 }
 0x5cb   : > { %3684 = vmatprep.subr.mxu1 %v3560_v6  ;;  %v3504_v29 = vsel %vm3503_vm13, %v3488_v4, %v3490_v18  ;;  %v3625_v6 = vld [vmem:[#allocation4 + $0xb0] sm:$0xff] }
 0x5cc   : > { %v3471_v41 = vpop.permute.xlu0 %3470  ;;  %3685 = vmatpush2.msra.mxu1 %v3565_v11 }
 0x5cd   : > { %3686 = vmatprep.subr.mxu1 %v7941_v43 }
 0x5ce   : > { %3687 = vmatpush2.msra.mxu1 %v3564_v42  ;;  %v3473_v30 = vpop.permute.xlu1 %3472 }
 0x5cf   : > { %3688 = vmatprep.subr.mxu1 %v7917_v32  ;;  %v3478_v61 = vsel %vm3474_vm14, %v3471_v41, %v3473_v30 }
 0x5d0   : > { %v3587_v60 = vpop.permute.xlu0 %3586  ;;  %3689 = vmatpush2.msra.mxu1 %v7921_v40  ;;  %v3533_v40 = vsel %vm3532_vm12, %v7878_v35, %v7883_v34 }
 0x5d1   : > { %3690 = vmatprep.subr.mxu1 %v7873_v50  ;;  %v3534_v50 = vsel %vm3532_vm12, %v7926_v17, %v7931_v8 }
 0x5d2   : > { %3691 = vmatpush2.msra.mxu1 %v3562_v22  ;;  %v3589_v13 = vpop.permute.xlu1 %3588 }
 0x5d3   : > { %v3594_v23 = vsel %vm3590_vm11, %v3587_v60, %v3589_v13  ;;  %3692 = vmatprep.subr.mxu1 %v3531_v52  ;;  %3789 = vmatprep.subr.mxu0 %v3589_v13 }
 0x5d4   : > { %v3467_v10 = vpop.permute.xlu0 %3466  ;;  %3693 = vmatpush2.msra.mxu1 %v3536_v44  ;;  %3790 = vmatpush1.msra.mxu0 %v3594_v23 }
 0x5d5   : > { %3694 = vmatprep.subr.mxu1 %v7945_v39 }
 0x5d6   : > { %3695 = vmatpush2.msra.mxu1 %v3535_v24  ;;  %v3469_v12 = vpop.permute.xlu1 %3468 }
 0x5d7   : > { %3696 = vmatprep.subr.mxu1 %v7931_v8  ;;  %v3506_v8 = vsel %vm3503_vm13, %v7948_v54, %v7951_v59  ;;  %v3477_v33 = vsel %vm3474_vm14, %v3467_v10, %v3469_v12  ;;  %v3605_v54 = vld [vmem:[#allocation4 + $0x10] sm:$0xff] }
 0x5d8   : > { %v3583_v32 = vpop.permute.xlu0 %3582  ;;  %3697 = vmatpush2.msra.mxu1 %v3534_v50 }
 0x5d9   : > { %3698 = vmatprep.subr.mxu1 %v7883_v34  ;;  %v3505_v34 = vsel %vm3503_vm13, %v3492_v16, %v7960_v3 }
 0x5da   : > { %3699 = vmatpush2.msra.mxu1 %v3533_v40  ;;  %v3585_v58 = vpop.permute.xlu1 %3584 }
 0x5db   : > { %v3593_v45 = vsel %vm3590_vm11, %v3583_v32, %v3585_v58  ;;  %3700 = vmatprep.subr.mxu1 %v3502_v62  ;;  %3791 = vmatprep.subr.mxu0 %v3585_v58 }
 0x5dc   : > { %v3463_v17 = vpop.permute.xlu0 %3462  ;;  %3701 = vmatpush2.msra.mxu1 %v3507_v2  ;;  %3792 = vmatpush1.msra.mxu0 %v3593_v45 }
 0x5dd   : > { %3702 = vmatprep.subr.mxu1 %v7951_v59  ;;  %v3606_v59 = vld [vmem:[#allocation4 + $0x18] sm:$0xff] }
 0x5de   : > { %3703 = vmatpush2.msra.mxu1 %v3506_v8  ;;  %v3465_v35 = vpop.permute.xlu1 %3464 }
 0x5df   : > { %3704 = vmatprep.subr.mxu1 %v7960_v3  ;;  %v3476_v43 = vsel %vm3474_vm14, %v3463_v17, %v3465_v35  ;;  %v3614_v3 = vld [vmem:[#allocation4 + $0x58] sm:$0xff] }
 0x5e0   : > { %v3579_v15 = vpop.permute.xlu0 %3578  ;;  %3705 = vmatpush2.msra.mxu1 %v3505_v34 }
 0x5e1   : > { %3706 = vmatprep.subr.mxu1 %v3490_v18 }
 0x5e2   : > { %3707 = vmatpush2.msra.mxu1 %v3504_v29  ;;  %v3581_v48 = vpop.permute.xlu1 %3580 }
 0x5e3   : > { %v3592_v38 = vsel %vm3590_vm11, %v3579_v15, %v3581_v48  ;;  %3708 = vmatprep.subr.mxu1 %v3473_v30  ;;  %3793 = vmatprep.subr.mxu0 %v3581_v48 }
 0x5e4   : > { %v3459_v46 = vpop.permute.xlu0 %3458  ;;  %3709 = vmatpush2.msra.mxu1 %v3478_v61  ;;  %3794 = vmatpush1.msra.mxu0 %v3592_v38 }
 0x5e5   : > { %3710 = vmatprep.subr.mxu1 %v3469_v12 }
 0x5e6   : > { %3711 = vmatpush2.msra.mxu1 %v3477_v33  ;;  %v3461_v7 = vpop.permute.xlu1 %3460 }
 0x5e7   : > { %3712 = vmatprep.subr.mxu1 %v3465_v35  ;;  %v3475_v39 = vsel %vm3474_vm14, %v3459_v46, %v3461_v7 }
 0x5e8   : > { %3713 = vmatpush2.msra.mxu1 %v3476_v43  ;;  %v3575_v27 = vpop.permute.xlu0 %3574 }
 0x5e9   : > { %3714 = vmatprep.subr.mxu1 %v3461_v7 }
 0x5ea   : > { %3715 = vmatpush2.msra.mxu1 %v3475_v39  ;;  %v3577_v20 = vpop.permute.xlu1 %3576 }
 0x5eb   : > { %v3591_v51 = vsel %vm3590_vm11, %v3575_v27, %v3577_v20  ;;  %3795 = vmatprep.subr.mxu0 %v3577_v20  ;;  %3717 = vmatmul.mubr.f32.vlgmr.msra.gmra.mxu1 %v3603_v21 }
 0x5ec   : > { %3796 = vmatpush1.msra.mxu0 %v3591_v51  ;;  %3722 = vmatprep.mubr.f32.mxu1 %v3607_v49 }
 0x5ed   : > { %4456 = vmatmul.mubr.msk.f32.vlgmr.msra.gmra.mxu0 %vm3627_vm15, %v3605_v54  ;;  %4247 = vmatprep.subr.mxu0 %v4846_v37 }
 0x5ee   : > { %3835 = vmatprep.mubr.f32.mxu0 %v4846_v37  ;;  %4476 = vmatprep.subr.mxu1 %v4846_v37 }
 0x5ef   : > { %3723 = vmatmul.mubr.f32.gmra.mxu1 %v3606_v59 }
 0x5f0   : > { %3728 = vmatprep.mubr.f32.mxu1 %v3610_v56 }
 0x5f1   : > { %4457 = vmatmul.mubr.msk.f32.gmra.mxu0 %vm3627_vm15, %v3608_v9 }
 0x5f2   : > { %3841 = vmatprep.mubr.f32.mxu0 %v4846_v37 }
 0x5f3   : > { %3729 = vmatmul.mubr.f32.gmra.mxu1 %v3609_v63 }
 0x5f4   : > { %3734 = vmatprep.mubr.f32.mxu1 %v3613_v47 }
 0x5f5   : > { %4458 = vmatmul.mubr.msk.f32.gmra.mxu0 %vm3627_vm15, %v3611_v14  ;;  %v3889_v52 = vpop.permute.xlu0 %3888 }
 0x5f6   : > { %3847 = vmatprep.mubr.f32.mxu0 %v4846_v37 }
 0x5f7   : > { %3735 = vmatmul.mubr.f32.gmra.mxu1 %v3612_v5  ;;  %v3953_v16 = vpop.permute.xlu1 %3952 }
 0x5f8   : > { %3740 = vmatprep.mubr.f32.mxu1 %v3616_v36 }
 0x5f9   : > { %4459 = vmatmul.mubr.msk.f32.gmra.mxu0 %vm3627_vm15, %v3614_v3  ;;  %v3894_v62 = vpop.permute.xlu0 %3893 }
 0x5fa   : > { %3853 = vmatprep.mubr.f32.mxu0 %v4846_v37 }
 0x5fb   : > { %3741 = vmatmul.mubr.f32.gmra.mxu1 %v3615_v55  ;;  %v3958_v4 = vpop.permute.xlu1 %3957 }
 0x5fc   : > { %3746 = vmatprep.mubr.f32.mxu1 %v3619_v28 }
 0x5fd   : > { %4460 = vmatmul.mubr.msk.f32.gmra.mxu0 %vm3627_vm15, %v3617_v25  ;;  %v3899_v11 = vpop.permute.xlu0 %3898 }
 0x5fe   : > { %3859 = vmatprep.mubr.f32.mxu0 %v4846_v37 }
 0x5ff   : > { %3747 = vmatmul.mubr.f32.gmra.mxu1 %v3618_v1  ;;  %v8046_v13 = vpop.permute.xlu1 %3913 }
 0x600   : > { %3752 = vmatprep.mubr.f32.mxu1 %v3622_v57 }
 0x601   : > { %4461 = vmatmul.mubr.msk.f32.gmra.mxu0 %vm3627_vm15, %v3620_v19  ;;  %v3963_v12 = vpop.permute.xlu0 %3962 }
 0x602   : > { %3865 = vmatprep.mubr.f32.mxu0 %v4846_v37 }
 0x603   : > { %3753 = vmatmul.mubr.f32.gmra.mxu1 %v3621_v53  ;;  %v8052_v15 = vpop.permute.xlu1 %3977 }
 0x604   : > { %3758 = vmatprep.mubr.f32.mxu1 %v3625_v6 }
 0x605   : > { %4462 = vmatmul.mubr.msk.f32.gmra.mxu0 %vm3627_vm15, %v3623_v26  ;;  %v3904_v33 = vpop.permute.xlu0 %3903 }
 0x606   : > { %3871 = vmatprep.mubr.f32.mxu0 %v4846_v37 }
 0x607   : > { %3759 = vmatmul.mubr.f32.gmra.mxu1 %v3624_v0  ;;  %v3919_v9 = vpop.permute.xlu1 %3918 }
 0x609   : > { %4463 = vmatmul.mubr.msk.f32.gmra.mxu0 %vm3627_vm15, %v3626_v31  ;;  %v3968_v5 = vpop.permute.xlu0 %3967 }
 0x60b   : > { %v3983_v26 = vpop.permute.xlu1 %3982 }
 0x6ab   : > { %v3718_v18 = vpop.f32.mrf.mxu1 }
 0x6ad   : > { %v3831_v41 = vpop.f32.mrf.mxu0  ;;  %v3720_v42 = vpop.f32.mrf.mxu1 }
 0x6ae   : > { %v3832_v30 = vadd.f32 %v3831_v41, %v3718_v18 }
 0x6af   : > { %v3833_v60 = vpop.f32.mrf.mxu0  ;;  %v3724_v22 = vpop.f32.mrf.mxu1 }
 0x6b0   : > { %v3926_v44 = vmul.f32 %v3889_v52, %v3832_v30  ;;  %v3834_v23 = vadd.f32 %v3833_v60, %v3720_v42 }
 0x6b1   : > { %v3837_v10 = vpop.f32.mrf.mxu0  ;;  %v3726_v24 = vpop.f32.mrf.mxu1 }
 0x6b2   : > { %v3927_v50 = vmul.f32 %v3889_v52, %v3834_v23  ;;  %v3838_v32 = vadd.f32 %v3837_v10, %v3724_v22  ;;  %v8048_v2 = vadd.f32 %v3953_v16, %v3926_v44  ;;  %v3909_v22 = vpop.permute.xlu0 %3908 }
 0x6b3   : > { %v3839_v40 = vpop.f32.mrf.mxu0  ;;  %v3730_v58 = vpop.f32.mrf.mxu1 }
 0x6b4   : > { %v8050_v45 = vadd.f32 %v3953_v16, %v3927_v50  ;;  %v3928_v17 = vmul.f32 %v3894_v62, %v3838_v32  ;;  %v3840_v8 = vadd.f32 %v3839_v40, %v3726_v24  ;;  %v4006_v7 = vmax.f32 %v8048_v2, 0.0  ;;  %v3924_v32 = vpop.permute.xlu1 %3923 }
 0x6b5   : > { %v3843_v35 = vpop.f32.mrf.mxu0  ;;  %v3732_v34 = vpop.f32.mrf.mxu1 }
 0x6b6   : > { %v4007_v29 = vmax.f32 %v8050_v45, 0.0  ;;  %v8055_v48 = vadd.f32 %v3958_v4, %v3928_v17  ;;  %v3929_v61 = vmul.f32 %v3894_v62, %v3840_v8  ;;  %v3844_v51 = vadd.f32 %v3843_v35, %v3730_v58  ;;  %v4215_v45 = vld [vmem:[%s8379_s8 + $0x88] sm:$0xff] }
 0x6b7   : > { %v3845_v38 = vpop.f32.mrf.mxu0  ;;  %v3736_v46 = vpop.f32.mrf.mxu1 }
 0x6b8   : > { %v4008_v43 = vmax.f32 %v8055_v48, 0.0  ;;  %v3846_v21 = vadd.f32 %v3845_v38, %v3732_v34  ;;  %4040 = vrot.lane.b32.xlu1 %v4007_v29, %s4838_s20  ;;  %v8066_v20 = vadd.f32 %v3958_v4, %v3929_v61  ;;  %v3930_v28 = vmul.f32 %v3899_v11, %v3844_v51 }
 0x6b9   : > { %v3849_v39 = vpop.f32.mrf.mxu0  ;;  %v3738_v49 = vpop.f32.mrf.mxu1 }
 0x6ba   : > { %v4715_v27 = vpack.i.bf16 %v4008_v43, %v4006_v7  ;;  %v3931_v54 = vmul.f32 %v3899_v11, %v3846_v21  ;;  %v4009_v36 = vmax.f32 %v8066_v20, 0.0  ;;  %v3850_v57 = vadd.f32 %v3849_v39, %v3736_v46 }
 0x6bb   : > { %v3851_v59 = vpop.f32.mrf.mxu0  ;;  %v3742_v56 = vpop.f32.mrf.mxu1  ;;  %v8079_v16 = vadd.f32 %v3963_v12, %v3930_v28 }
 0x6bc   : > { %v3852_v63 = vadd.f32 %v3851_v59, %v3738_v49  ;;  %4716 = vrot.lane.b32.xlu0 %v4715_v27, %s4838_s20  ;;  %v8070_v3 = vadd.f32 %v3963_v12, %v3931_v54  ;;  %v3932_v18 = vmul.f32 %v3904_v33, %v3850_v57  ;;  %v3973_v27 = vpop.permute.xlu0 %3972 }
 0x6bd   : > { %v3855_v47 = vpop.f32.mrf.mxu0  ;;  %v3744_v14 = vpop.f32.mrf.mxu1  ;;  %v4010_v24 = vmax.f32 %v8079_v16, 0.0 }
 0x6be   : > { %v3933_v55 = vmul.f32 %v3904_v33, %v3852_v63  ;;  %v4011_v0 = vmax.f32 %v8070_v3, 0.0  ;;  %v3856_v42 = vadd.f32 %v3855_v47, %v3742_v56  ;;  %v8093_v40 = vadd.f32 %v3968_v5, %v3932_v18  ;;  %v3988_v47 = vpop.permute.xlu1 %3987 }
 0x6bf   : > { %v3857_v25 = vpop.f32.mrf.mxu0  ;;  %v3748_v1 = vpop.f32.mrf.mxu1 }
 0x6c0   : > { %v8072_v19 = vadd.f32 %v3968_v5, %v3933_v55  ;;  %4044 = vrot.lane.b32.xlu0 %v4009_v36, %s4838_s20  ;;  %v3934_v35 = vmul.f32 %v3909_v22, %v3856_v42  ;;  %v3858_v34 = vadd.f32 %v3857_v25, %v3744_v14  ;;  %v4012_v54 = vmax.f32 %v8093_v40, 0.0  ;;  %v4209_v42 = vld [vmem:[%s8379_s8 + $0x58] sm:$0xff] }
 0x6c1   : > { %v3861_v53 = vpop.f32.mrf.mxu0  ;;  %v3750_v6 = vpop.f32.mrf.mxu1 }
 0x6c2   : > { %v4013_v31 = vmax.f32 %v8072_v19, 0.0  ;;  %v3862_v52 = vadd.f32 %v3861_v53, %v3748_v1  ;;  %v8108_v56 = vadd.f32 %v3973_v27, %v3934_v35  ;;  %v4198_v35 = vld [vmem:[%s8379_s8] sm:$0xff] }
 0x6c3   : > { %v3863_v62 = vpop.f32.mrf.mxu0  ;;  %v3754_v4 = vpop.f32.mrf.mxu1 }
 0x6c4   : > { %v3936_v11 = vmul.f32 %v8046_v13, %v3862_v52  ;;  %v3864_v41 = vadd.f32 %v3863_v62, %v3750_v6  ;;  %4052 = vrot.lane.b32.xlu1 %v4013_v31, %s4838_s20  ;;  %4048 = vrot.lane.b32.xlu0 %v4011_v0, %s4838_s20  ;;  %v4014_v25 = vmax.f32 %v8108_v56, 0.0  ;;  %v4213_v52 = vld [vmem:[%s8379_s8 + $0x78] sm:$0xff]  ;;  %v4212_v62 = vld [vmem:[%s8379_s8 + $0x70] sm:$0xff] }
 0x6c5   : > { %v3867_v30 = vpop.f32.mrf.mxu0  ;;  %v3756_v60 = vpop.f32.mrf.mxu1  ;;  %4248 = vmatpush1.msra.mxu0 %v4213_v52  ;;  %4496 = vmatpush1.msra.mxu1 %v4213_v52 }
 0x6c6   : > { %v8089_v44 = vadd.f32 %v8052_v15, %v3936_v11  ;;  %v3937_v23 = vmul.f32 %v8046_v13, %v3864_v41  ;;  %v3868_v10 = vadd.f32 %v3867_v30, %v3754_v4  ;;  %4249 = vmatprep.subr.mxu0 %v4846_v37  ;;  %v4211_v11 = vld [vmem:[%s8379_s8 + $0x68] sm:$0xff]  ;;  %4477 = vmatprep.subr.mxu1 %v4846_v37  ;;  %v4210_v41 = vld [vmem:[%s8379_s8 + $0x60] sm:$0xff]  ;;  %v4208_v30 = vld [vmem:[%s8379_s8 + $0x50] sm:$0xff] }
 0x6c7   : > { %v3869_v12 = vpop.f32.mrf.mxu0  ;;  %v3760_v50 = vpop.f32.mrf.mxu1  ;;  %4250 = vmatpush1.msra.mxu0 %v4212_v62  ;;  %4497 = vmatpush1.msra.mxu1 %v4212_v62 }
 0x6c8   : > { %v4016_v58 = vmax.f32 %v8089_v44, 0.0  ;;  %v3938_v17 = vmul.f32 %v3919_v9, %v3868_v10  ;;  %v3870_v8 = vadd.f32 %v3869_v12, %v3756_v60  ;;  %v8101_v38 = vadd.f32 %v8052_v15, %v3937_v23  ;;  %4251 = vmatprep.subr.mxu0 %v4846_v37  ;;  %4478 = vmatprep.subr.mxu1 %v4846_v37  ;;  %v4207_v60 = vld [vmem:[%s8379_s8 + $0x48] sm:$0xff]  ;;  %v4205_v23 = vld [vmem:[%s8379_s8 + $0x38] sm:$0xff]  ;;  %v4204_v10 = vld [vmem:[%s8379_s8 + $0x30] sm:$0xff] }
 0x6c9   : > { %v3873_v61 = vpop.f32.mrf.mxu0  ;;  %v3762_v39 = vpop.f32.mrf.mxu1  ;;  %v3935_v15 = vmul.f32 %v3909_v22, %v3858_v34  ;;  %4252 = vmatpush1.msra.mxu0 %v4211_v11  ;;  %4498 = vmatpush1.msra.mxu1 %v4211_v11  ;;  %v4206_v22 = vld [vmem:[%s8379_s8 + $0x40] sm:$0xff]  ;;  %v4203_v12 = vld [vmem:[%s8379_s8 + $0x28] sm:$0xff]  ;;  %v4217_v34 = vld [vmem:[%s8379_s8 + $0x98] sm:$0x1] }
 0x6ca   : > { %v4720_v13 = vpack.i.bf16 %v4016_v58, %v4010_v24  ;;  %v8103_v46 = vadd.f32 %v3983_v26, %v3938_v17  ;;  %v3939_v33 = vmul.f32 %v3919_v9, %v3870_v8  ;;  %v3874_v21 = vadd.f32 %v3873_v61, %v3760_v50  ;;  %4253 = vmatprep.subr.mxu0 %v4846_v37  ;;  %v4202_v50 = vld [vmem:[%s8379_s8 + $0x20] sm:$0xff]  ;;  %v4200_v17 = vld [vmem:[%s8379_s8 + $0x10] sm:$0xff]  ;;  %v4199_v8 = vld [vmem:[%s8379_s8 + $0x8] sm:$0xff] }
 0x6cb   : > { %v3875_v49 = vpop.f32.mrf.mxu0  ;;  %v4017_v14 = vmax.f32 %v8101_v38, 0.0  ;;  %v8125_v57 = vadd.f32 %v3973_v27, %v3935_v15  ;;  %4254 = vmatpush1.msra.mxu0 %v4210_v41  ;;  %4479 = vmatprep.subr.mxu1 %v4846_v37 }
 0x6cc   : > { %v4018_v51 = vmax.f32 %v8103_v46, 0.0  ;;  %v3876_v59 = vadd.f32 %v3875_v49, %v3762_v39  ;;  %4721 = vrot.lane.b32.xlu1 %v4720_v13, %s4838_s20  ;;  %v3940_v63 = vmul.f32 %v3924_v32, %v3874_v21  ;;  %v8115_v5 = vadd.f32 %v3983_v26, %v3939_v33  ;;  %4255 = vmatprep.subr.mxu0 %v4846_v37  ;;  %v4216_v21 = vld [vmem:[%s8379_s8 + $0x90] sm:$0xff] }
 0x6cd   : > { %v4015_v4 = vmax.f32 %v8125_v57, 0.0  ;;  %4256 = vmatpush1.msra.mxu0 %v4209_v42  ;;  %4499 = vmatpush1.msra.mxu1 %v4210_v41 }
 0x6ce   : > { %v4725_v9 = vpack.i.bf16 %v4018_v51, %v4012_v54  ;;  %v8117_v55 = vadd.f32 %v3988_v47, %v3940_v63  ;;  %v3941_v28 = vmul.f32 %v3924_v32, %v3876_v59  ;;  %v4019_v53 = vmax.f32 %v8115_v5, 0.0  ;;  %4257 = vmatprep.subr.mxu0 %v4846_v37  ;;  %4480 = vmatprep.subr.mxu1 %v4846_v37  ;;  %v4201_v32 = vld [vmem:[%s8379_s8 + $0x18] sm:$0xff] }
 0x6cf   : > { %4258 = vmatpush1.msra.mxu0 %v4208_v30  ;;  %4500 = vmatpush1.msra.mxu1 %v4209_v42 }
 0x6d0   : > { %4060 = vrot.lane.b32.xlu1 %v4017_v14, %s4838_s20  ;;  %4726 = vrot.lane.b32.xlu0 %v4725_v9, %s4838_s20  ;;  %v4020_v1 = vmax.f32 %v8117_v55, 0.0  ;;  %v8132_v26 = vadd.f32 %v3988_v47, %v3941_v28 }
 0x6d1   : > { %4259 = vmatprep.subr.mxu0 %v4846_v37  ;;  %4481 = vmatprep.subr.mxu1 %v4846_v37 }
 0x6d2   : > { %v4730_v6 = vpack.i.bf16 %v4020_v1, %v4014_v25  ;;  %v4021_v18 = vmax.f32 %v8132_v26, 0.0  ;;  %4260 = vmatpush1.msra.mxu0 %v4207_v60  ;;  %4501 = vmatpush1.msra.mxu1 %v4208_v30 }
 0x6d3   : > { %4261 = vmatprep.subr.mxu0 %v4846_v37  ;;  %4482 = vmatprep.subr.mxu1 %v4846_v37 }
 0x6d4   : > { %4064 = vrot.lane.b32.xlu0 %v4019_v53, %s4838_s20  ;;  %4731 = vrot.lane.b32.xlu1 %v4730_v6, %s4838_s20 }
 0x6d5   : > { %4262 = vmatpush1.msra.mxu0 %v4206_v22  ;;  %4502 = vmatpush1.msra.mxu1 %v4207_v60 }
 0x6d6   : > { %4263 = vmatprep.subr.mxu0 %v4846_v37  ;;  %4483 = vmatprep.subr.mxu1 %v4846_v37 }
 0x6d7   : > { %4264 = vmatpush1.msra.mxu0 %v4205_v23  ;;  %4503 = vmatpush1.msra.mxu1 %v4206_v22 }
 0x6d8   : > { %4056 = vrot.lane.b32.xlu0 %v4015_v4, %s4838_s20  ;;  %4068 = vrot.lane.b32.xlu1 %v4021_v18, %s4838_s20 }
 0x6d9   : > { %4265 = vmatprep.subr.mxu0 %v4846_v37  ;;  %4484 = vmatprep.subr.mxu1 %v4846_v37 }
 0x6da   : > { %4266 = vmatpush1.msra.mxu0 %v4204_v10  ;;  %4504 = vmatpush1.msra.mxu1 %v4205_v23 }
 0x6db   : > { %4267 = vmatprep.subr.mxu0 %v4846_v37  ;;  %4485 = vmatprep.subr.mxu1 %v4846_v37 }
 0x6dc   : > { %4268 = vmatpush1.msra.mxu0 %v4203_v12  ;;  %4505 = vmatpush1.msra.mxu1 %v4204_v10 }
 0x6dd   : > { %4269 = vmatprep.subr.mxu0 %v4846_v37  ;;  %4486 = vmatprep.subr.mxu1 %v4846_v37 }
 0x6de   : > { %4506 = vmatpush1.msra.mxu1 %v4203_v12  ;;  %4270 = vmatpush1.msra.mxu0 %v4202_v50 }
 0x6df   : > { %4487 = vmatprep.subr.mxu1 %v4846_v37  ;;  %4271 = vmatprep.subr.mxu0 %v4846_v37 }
 0x6e0   : > { %4507 = vmatpush1.msra.mxu1 %v4202_v50  ;;  %4272 = vmatpush1.msra.mxu0 %v4201_v32 }
 0x6e1   : > { %4488 = vmatprep.subr.mxu1 %v4846_v37  ;;  %4273 = vmatprep.subr.mxu0 %v4846_v37 }
 0x6e2   : > { %4508 = vmatpush1.msra.mxu1 %v4201_v32  ;;  %4274 = vmatpush1.msra.mxu0 %v4200_v17 }
 0x6e3   : > { %4489 = vmatprep.subr.mxu1 %v4846_v37  ;;  %4275 = vmatprep.subr.mxu0 %v4846_v37 }
 0x6e4   : > { %4509 = vmatpush1.msra.mxu1 %v4200_v17  ;;  %4276 = vmatpush1.msra.mxu0 %v4199_v8 }
 0x6e5   : > { %4490 = vmatprep.subr.mxu1 %v4846_v37  ;;  %4277 = vmatprep.subr.mxu0 %v4846_v37 }
 0x6e6   : > { %4510 = vmatpush1.msra.mxu1 %v4199_v8  ;;  %4278 = vmatpush1.msra.mxu0 %v4198_v35 }
 0x6e7   : > { %4491 = vmatprep.subr.mxu1 %v4846_v37  ;;  %4303 = vmatprep.subr.mxu0 %v4846_v37 }
 0x6e8   : > { %4511 = vmatpush1.msra.mxu1 %v4198_v35  ;;  %4464 = vmatpush2.msk.msra.mxu0 %vm4243_vm1, %v4217_v34 }
 0x6e9   : > { %4492 = vmatprep.subr.mxu1 %v4846_v37  ;;  %4305 = vmatprep.subr.mxu0 %v4846_v37 }
 0x6ea   : > { %4512 = vmatpush2.msk.msra.mxu1 %vm4243_vm1, %v4217_v34  ;;  %4306 = vmatpush2.msra.mxu0 %v4216_v21 }
 0x6eb   : > { %4493 = vmatprep.subr.mxu1 %v4846_v37  ;;  %4307 = vmatprep.subr.mxu0 %v4846_v37 }
 0x6ec   : > { %4513 = vmatpush2.msra.mxu1 %v4216_v21  ;;  %4308 = vmatpush2.msra.mxu0 %v4215_v45 }
 0x6ed   : > { %4494 = vmatprep.subr.mxu1 %v4846_v37  ;;  %4309 = vmatprep.subr.mxu0 %v4846_v37 }
 0x6ee   : > { %4514 = vmatpush2.msra.mxu1 %v4215_v45 }
 0x6ef   : > { %4495 = vmatprep.subr.mxu1 %v4846_v37 }
 0x72a   : > { %v4041_v61 = vpop.permute.xlu1 %4040 }
 0x72b   : > { %v8231_v13 = vmax.f32 %v4007_v29, %v4041_v61  ;;  %v4214_v29 = vld [vmem:[%s8379_s8 + $0x80] sm:$0xff] }
 0x72c   : > { %4310 = vmatpush2.msra.mxu0 %v4214_v29  ;;  %4515 = vmatpush2.msra.mxu1 %v4214_v29 }
 0x72d   : > { %4128 = vrot.lane.b32.xlu1 %v8231_v13, %s4847_s22 }
 0x72e   : > { %v4717_v33 = vpop.permute.xlu0 %4716 }
 0x72f   : > { %v4718_v39 = vunpack.i.l.bf16 %v4717_v33  ;;  %v4719_v49 = vunpack.i.h.bf16 %v4717_v33 }
 0x731   : > { %v4070_v27 = vsel %vm626_vm0, %v4718_v39, %v4041_v61 }
 0x732   : > { %v4045_v59 = vpop.permute.xlu0 %4044  ;;  %v8258_v15 = vmax.f32 %v4006_v7, %v4070_v27 }
 0x733   : > { %v4071_v63 = vsel %vm626_vm0, %v4719_v49, %v4045_v59  ;;  %v8254_v47 = vmax.f32 %v4009_v36, %v4045_v59 }
 0x734   : > { %v8262_v9 = vmax.f32 %v4008_v43, %v4071_v63 }
 0x735   : > { %4132 = vrot.lane.b32.xlu0 %v8254_v47, %s4847_s22 }
 0x736   : > { %v4735_v37 = vpack.i.bf16 %v8262_v9, %v8258_v15  ;;  %v4053_v28 = vpop.permute.xlu1 %4052  ;;  %v4049_v36 = vpop.permute.xlu0 %4048 }
 0x737   : > { %v8270_v20 = vmax.f32 %v4013_v31, %v4053_v28  ;;  %v4099_v2 = vmax.f32 %v4011_v0, %v4049_v36 }
 0x739   : > { %4736 = vrot.lane.b32.xlu0 %v4735_v37, %s4847_s22  ;;  %4140 = vrot.lane.b32.xlu1 %v8270_v20, %s4847_s22 }
 0x73d   : > { %4136 = vrot.lane.b32.xlu0 %v4099_v2, %s4847_s22 }
 0x73e   : > { %v4722_v48 = vpop.permute.xlu1 %4721 }
 0x73f   : > { %v4723_v7 = vunpack.i.l.bf16 %v4722_v48  ;;  %v4724_v43 = vunpack.i.h.bf16 %v4722_v48 }
 0x741   : > { %v4072_v6 = vsel %vm626_vm0, %v4723_v7, %v4049_v36 }
 0x742   : > { %v4727_v52 = vpop.permute.xlu0 %4726  ;;  %v4061_v19 = vpop.permute.xlu1 %4060  ;;  %v8284_v41 = vmax.f32 %v4010_v24, %v4072_v6 }
 0x743   : > { %v4728_v31 = vunpack.i.l.bf16 %v4727_v52  ;;  %v4075_v62 = vsel %vm626_vm0, %v4724_v43, %v4061_v19  ;;  %v4105_v11 = vmax.f32 %v4017_v14, %v4061_v19  ;;  %v4729_v0 = vunpack.i.h.bf16 %v4727_v52 }
 0x744   : > { %v8288_v3 = vmax.f32 %v4016_v58, %v4075_v62 }
 0x745   : > { %v4073_v42 = vsel %vm626_vm0, %v4728_v31, %v4053_v28  ;;  %4148 = vrot.lane.b32.xlu1 %v4105_v11, %s4847_s22 }
 0x746   : > { %v4740_v30 = vpack.i.bf16 %v8288_v3, %v8284_v41  ;;  %v4065_v60 = vpop.permute.xlu0 %4064  ;;  %v4732_v24 = vpop.permute.xlu1 %4731  ;;  %v8299_v44 = vmax.f32 %v4012_v54, %v4073_v42 }
 0x747   : > { %v4076_v38 = vsel %vm626_vm0, %v4729_v0, %v4065_v60  ;;  %v4107_v16 = vmax.f32 %v4019_v53, %v4065_v60  ;;  %v4733_v14 = vunpack.i.l.bf16 %v4732_v24  ;;  %v4734_v23 = vunpack.i.h.bf16 %v4732_v24 }
 0x748   : > { %v8303_v58 = vmax.f32 %v4018_v51, %v4076_v38 }
 0x749   : > { %4152 = vrot.lane.b32.xlu0 %v4107_v16, %s4847_s22  ;;  %4741 = vrot.lane.b32.xlu1 %v4740_v30, %s4847_s22 }
 0x74a   : > { %v4745_v22 = vpack.i.bf16 %v8303_v58, %v8299_v44  ;;  %v4057_v5 = vpop.permute.xlu0 %4056  ;;  %v4069_v10 = vpop.permute.xlu1 %4068 }
 0x74b   : > { %v4074_v53 = vsel %vm626_vm0, %v4733_v14, %v4057_v5  ;;  %v4077_v46 = vsel %vm626_vm0, %v4734_v23, %v4069_v10  ;;  %v4103_v51 = vmax.f32 %v4015_v4, %v4057_v5  ;;  %v4109_v56 = vmax.f32 %v4021_v18, %v4069_v10 }
 0x74c   : > { %v8312_v40 = vmax.f32 %v4014_v25, %v4074_v53  ;;  %v8317_v54 = vmax.f32 %v4020_v1, %v4077_v46  ;;  %vm4218_vm0 = vcmask 203776  }
 0x74d   : > { %4746 = vrot.lane.b32.xlu0 %v4745_v22, %s4847_s22 }
 0x74e   : > { %v4750_v12 = vpack.i.bf16 %v8317_v54, %v8312_v40 }
 0x750   : > { %4751 = vrot.lane.b32.xlu1 %v4750_v12, %s4847_s22 }
 0x751   : > { %4144 = vrot.lane.b32.xlu0 %v4103_v51, %s4847_s22 }
 0x754   : > { %4156 = vrot.lane.b32.xlu1 %v4109_v56, %s4847_s22  ;;  %s4475_s22 = sshll.u32 %s9021_s12, 6 }
 0x755   : > { %s359_s17 = scalar_lea.vmem %s8380_s9, %s4475_s22 }
 0x79f   : > { %v4129_v55 = vpop.permute.xlu1 %4128 }
 0x7a0   : > { %v4183_v25 = vmax.f32 %v8231_v13, %v4129_v55 }
 0x7a2   : > { %4465 = vmatprep.mubr.msk.f32.mxu0 %vm4218_vm0, %v4183_v25 }
 0x7a7   : > { %v4133_v1 = vpop.permute.xlu0 %4132 }
 0x7a8   : > { %v4185_v8 = vmax.f32 %v8254_v47, %v4133_v1 }
 0x7ab   : > { %v4737_v57 = vpop.permute.xlu0 %4736  ;;  %v4141_v35 = vpop.permute.xlu1 %4140 }
 0x7ac   : > { %v4739_v4 = vunpack.i.h.bf16 %v4737_v57  ;;  %v4738_v50 = vunpack.i.l.bf16 %v4737_v57 }
 0x7ae   : > { %v4158_v32 = vsel %vm3445_vm10, %v4738_v50, %v4129_v55  ;;  %v4159_v26 = vsel %vm3445_vm10, %v4739_v4, %v4133_v1 }
 0x7af   : > { %v4182_v17 = vmax.f32 %v8258_v15, %v4158_v32  ;;  %v4137_v18 = vpop.permute.xlu0 %4136  ;;  %v4184_v34 = vmax.f32 %v8262_v9, %v4159_v26  ;;  %v4189_v15 = vmax.f32 %v8270_v20, %v4141_v35 }
 0x7b0   : > { %v4187_v61 = vmax.f32 %v4099_v2, %v4137_v18 }
 0x7b1   : > { %4312 = vmatmul.mubr.f32.vlgmr.msra.gmra.mxu0 %v4182_v17 }
 0x7b2   : > { %4466 = vmatprep.mubr.msk.f32.mxu0 %vm4218_vm0, %v4185_v8 }
 0x7b5   : > { %4317 = vmatmul.mubr.f32.gmra.mxu0 %v4184_v34 }
 0x7b6   : > { %4467 = vmatprep.mubr.msk.f32.mxu0 %vm4218_vm0, %v4187_v61 }
 0x7b7   : > { %v4149_v13 = vpop.permute.xlu1 %4148 }
 0x7b8   : > { %v4193_v33 = vmax.f32 %v4105_v11, %v4149_v13 }
 0x7ba   : > { %4470 = vmatprep.mubr.msk.f32.mxu1 %vm4218_vm0, %v4193_v33 }
 0x7bb   : > { %v4153_v21 = vpop.permute.xlu0 %4152  ;;  %v4742_v39 = vpop.permute.xlu1 %4741 }
 0x7bc   : > { %v4744_v45 = vunpack.i.h.bf16 %v4742_v39  ;;  %v4743_v29 = vunpack.i.l.bf16 %v4742_v39  ;;  %v4195_v9 = vmax.f32 %v4107_v16, %v4153_v21 }
 0x7be   : > { %v4163_v49 = vsel %vm3445_vm10, %v4744_v45, %v4149_v13  ;;  %v4160_v27 = vsel %vm3445_vm10, %v4743_v29, %v4137_v18 }
 0x7bf   : > { %v4192_v59 = vmax.f32 %v8288_v3, %v4163_v49  ;;  %v4747_v63 = vpop.permute.xlu0 %4746  ;;  %v4186_v47 = vmax.f32 %v8284_v41, %v4160_v27 }
 0x7c0   : > { %v4749_v37 = vunpack.i.h.bf16 %v4747_v63  ;;  %v4748_v28 = vunpack.i.l.bf16 %v4747_v63 }
 0x7c1   : > { %4322 = vmatmul.mubr.f32.gmra.mxu0 %v4186_v47  ;;  %4337 = vmatmul.mubr.f32.vlgmr.msra.gmra.mxu1 %v4192_v59 }
 0x7c2   : > { %4468 = vmatprep.mubr.msk.f32.mxu0 %vm4218_vm0, %v4189_v15  ;;  %4471 = vmatprep.mubr.msk.f32.mxu1 %vm4218_vm0, %v4195_v9  ;;  %v4161_v36 = vsel %vm3445_vm10, %v4748_v28, %v4141_v35  ;;  %v4164_v2 = vsel %vm3445_vm10, %v4749_v37, %v4153_v21  ;;  %v4752_v48 = vpop.permute.xlu1 %4751 }
 0x7c3   : > { %v4145_v7 = vpop.permute.xlu0 %4144  ;;  %v4188_v43 = vmax.f32 %v8299_v44, %v4161_v36  ;;  %v4194_v6 = vmax.f32 %v8303_v58, %v4164_v2  ;;  %v4753_v20 = vunpack.i.l.bf16 %v4752_v48  ;;  %v4754_v19 = vunpack.i.h.bf16 %v4752_v48 }
 0x7c4   : > { %v4191_v52 = vmax.f32 %v4103_v51, %v4145_v7 }
 0x7c5   : > { %4327 = vmatmul.mubr.f32.gmra.mxu0 %v4188_v43  ;;  %4342 = vmatmul.mubr.f32.gmra.mxu1 %v4194_v6  ;;  %v4162_v31 = vsel %vm3445_vm10, %v4753_v20, %v4145_v7 }
 0x7c6   : > { %4469 = vmatprep.mubr.msk.f32.mxu0 %vm4218_vm0, %v4191_v52  ;;  %v4190_v62 = vmax.f32 %v8312_v40, %v4162_v31  ;;  %v4157_v11 = vpop.permute.xlu1 %4156 }
 0x7c7   : > { %v4165_v41 = vsel %vm3445_vm10, %v4754_v19, %v4157_v11  ;;  %v4197_v3 = vmax.f32 %v4109_v56, %v4157_v11 }
 0x7c8   : > { %v4196_v0 = vmax.f32 %v8317_v54, %v4165_v41 }
 0x7c9   : > { %4332 = vmatmul.mubr.f32.gmra.mxu0 %v4190_v62  ;;  %4472 = vmatprep.mubr.msk.f32.mxu1 %vm4218_vm0, %v4197_v3 }
 0x7ca   : > { %4347 = vmatmul.mubr.f32.gmra.mxu1 %v4196_v0 }
 0x871   : > { %v4313_v42 = vpop.f32.mrf.mxu0 }
 0x872   : > { %4353 = vst.msk [vmem:[%s359_s17] sm:$0xff] %vm4352_vm2, %v4313_v42 }
 0x873   : > { %v4315_v30 = vpop.f32.mrf.mxu0 }
 0x875   : > { %v4318_v60 = vpop.f32.mrf.mxu0 }
 0x876   : > { %4354 = vst.msk [vmem:[%s359_s17 + $0x8] sm:$0xff] %vm4352_vm2, %v4318_v60 }
 0x877   : > { %v4320_v38 = vpop.f32.mrf.mxu0 }
 0x881   : > { %v4323_v16 = vpop.f32.mrf.mxu0  ;;  %v4338_v24 = vpop.f32.mrf.mxu1 }
 0x882   : > { %4355 = vst.msk [vmem:[%s359_s17 + $0x10] sm:$0xff] %vm4352_vm2, %v4323_v16  ;;  %4358 = vst.msk [vmem:[%s359_s17 + $0x28] sm:$0xff] %vm4352_vm2, %v4338_v24 }
 0x883   : > { %v4325_v44 = vpop.f32.mrf.mxu0  ;;  %v4340_v58 = vpop.f32.mrf.mxu1 }
 0x885   : > { %v4328_v14 = vpop.f32.mrf.mxu0  ;;  %v4343_v22 = vpop.f32.mrf.mxu1 }
 0x886   : > { %4356 = vst.msk [vmem:[%s359_s17 + $0x18] sm:$0xff] %vm4352_vm2, %v4328_v14  ;;  %4359 = vst.msk [vmem:[%s359_s17 + $0x30] sm:$0xff] %vm4352_vm2, %v4343_v22 }
 0x887   : > { %v4330_v23 = vpop.f32.mrf.mxu0  ;;  %v4345_v5 = vpop.f32.mrf.mxu1 }
 0x889   : > { %v4333_v53 = vpop.f32.mrf.mxu0 }
 0x88a   : > { %4357 = vst.msk [vmem:[%s359_s17 + $0x20] sm:$0xff] %vm4352_vm2, %v4333_v53  ;;  %v4348_v10 = vpop.f32.mrf.mxu1 }
 0x88b   : > { %v4335_v40 = vpop.f32.mrf.mxu0  ;;  %4360 = vst.msk [vmem:[%s359_s17 + $0x38] sm:$0xff] %vm4352_vm2, %v4348_v10 }
 0x88c   : > { %v4350_v46 = vpop.f32.mrf.mxu1 }
 0x88d PF: > { %s21_s30 = sadd.s32 1, %s4821_s30  }
 0x88e   : > { %p18_p3 = scmp.ge.s32.totalorder %s21_s30, 4  }
 0x890   :  { %20 = sbr.rel (!%p18_p3) target bundleno = 2 (0x2), region = 95 }
 0x895   :  { %4382 = vsyncpa [#allocation3], 1 }
 0x896   :  { %4384 = vsyncpa [#allocation3 + $0x1], 1 }
 0x897   :  { %4385 = vsyncpa [#allocation5], 1 }

</bundles_post_ra>
